<compile_context>
chip_gen: v7x
topology: tpu7x:2x2x1
jax: 0.10.0
libtpu: 0.0.40
codegen_flags: <defaults>
</compile_context>

<pallas_src>
import functools

import numpy as np
import jax
import jax.numpy as jnp
from jax import lax
from jax.experimental import pallas as pl
from jax.experimental.pallas import tpu as pltpu

_EPS = 1e-5      # nn.GroupNorm default eps
_LANES = 128


def _round_up(x, m):
    return ((x + m - 1) // m) * m


def _vmem_limit_bytes():
    """~85% of physical VMEM; the 54 MiB fallback is safe on every generation."""
    cap = 64 << 20
    try:
        info_cap = int(getattr(pltpu.get_tpu_info(), "vmem_capacity_bytes", 0))
        if info_cap > 0:
            cap = info_cap
    except Exception:
        pass
    cap = min(cap, 128 << 20)
    return int(cap * 0.85)


# ----------------------------- in-kernel helpers ----------------------------

def _silu(v):
    # sigmoid lowers to the EUP; keeps VALU slots free for the GN scale/shift.
    return v * jax.nn.sigmoid(v)


def _group_allreduce(v, cpg):
    """v: (1, C) f32. Per-group (cpg consecutive channels) sums broadcast back
    to every channel.  Recursive doubling with *static* jnp.roll (lane slices +
    concat) -> VPU/XLU only, no MXU.  Requires cpg to be a power of two."""
    if cpg == 1:
        return v
    pos = lax.broadcasted_iota(jnp.int32, v.shape, 1) % cpg
    step = 1
    while step < cpg:
        fwd = jnp.roll(v, -step, axis=1)          # v[c + step]         (array-cyclic)
        bwd = jnp.roll(v, cpg - step, axis=1)     # v[c + step - cpg]   (array-cyclic)
        # within-group cyclic partner; array-boundary wraps are never selected.
        v = v + jnp.where(pos < cpg - step, fwd, bwd)
        step *= 2
    return v


def _group_norm(h2d, gamma, beta, cpg):
    """Two-pass GroupNorm on a (HW, C) tile.  Only the (1, C) mean / inv-std
    stay live; the result is one fused x*scale + shift (no (HW, C) x-mean kept)."""
    HW = h2d.shape[0]
    inv_n = 1.0 / float(cpg * HW)
    mean = _group_allreduce(jnp.sum(h2d, axis=0, keepdims=True), cpg) * inv_n
    var = _group_allreduce(
        jnp.sum((h2d - mean) * (h2d - mean), axis=0, keepdims=True), cpg) * inv_n
    scale = lax.rsqrt(var + _EPS) * gamma
    return h2d * scale + (beta - mean * scale)


def _conv3x3(h2d, w_ref, bias, width, left_ok, right_ok):
    """3x3 SAME conv on a flattened (HW, Cin) f32 tile via per-tap MXU accumulation.

    Each tap is a static flat shift (by dy*W + dx) of a zero-padded copy plus a
    column-validity mask; out-of-image rows land in the zero padding.  Every tap
    is cast to bf16 and fed to its own (HW, Cin) @ (Cin, Cout) matmul with f32
    accumulation -- no (HW, 9*Cin) im2col is ever materialized.
    w_ref: (9*Cin, Cout) bf16, tap-major.  bias: (1, Cout) f32.
    """
    # TODO(synk): pltpu.roll-based taps + a single bf16 halo would trade these
    #             unaligned sublane slices / per-tap casts for XLU work.
    HW, Cin = h2d.shape
    W = width
    P = _round_up(W + 1, 8)                               # sublane-aligned halo
    zpad = jnp.zeros((P, Cin), jnp.float32)
    hp = jnp.concatenate([zpad, h2d, zpad], axis=0)       # (HW + 2P, Cin)

    acc = None
    k = 0
    for dy in (-1, 0, 1):
        for dx in (-1, 0, 1):
            start = P + dy * W + dx
            t = hp[start:start + HW, :]                   # flat shift (zero fill)
            if dx == -1:
                t = jnp.where(left_ok, t, 0.0)            # left-edge columns
            elif dx == 1:
                t = jnp.where(right_ok, t, 0.0)           # right-edge columns
            part = jnp.dot(t.astype(jnp.bfloat16),
                           w_ref[pl.ds(k * Cin, Cin), :],
                           preferred_element_type=jnp.float32)
            acc = part if acc is None else acc + part
            k += 1
    return acc + bias                                     # (HW, Cout) f32


# --------------------------------- kernel ----------------------------------

def _resblock_kernel(x_ref, bias1_ref,
                     g1_ref, b1_ref, w1_ref,
                     g2_ref, b2_ref, w2_ref, cb2_ref,
                     wsk_ref, bsk_ref,
                     o_ref,
                     *, width, cpg_in, cpg_out):
    x2 = x_ref[0]                                         # (HW, Cp) f32
    HW = x2.shape[0]
    W = width

    # Edge-validity masks for both 3x3 convs, built once per invocation.
    col = lax.broadcasted_iota(jnp.int32, (HW, 1), 0) % W
    left_ok = col >= 1                                    # dx = -1 reads a valid column
    right_ok = col <= W - 2                               # dx = +1 reads a valid column

    # in_layers: GroupNorm -> SiLU -> Conv3x3(pad=1); emb add folded into the bias.
    h = _group_norm(x2, g1_ref[...], b1_ref[...], cpg_in)
    h = _silu(h)
    h = _conv3x3(h, w1_ref, bias1_ref[0], W, left_ok, right_ok)   # (HW, Cop)

    # out_layers: GroupNorm -> SiLU -> Dropout(eval = identity) -> Conv3x3
    h = _group_norm(h, g2_ref[...], b2_ref[...], cpg_out)
    h = _silu(h)
    h = _conv3x3(h, w2_ref, cb2_ref[...], W, left_ok, right_ok)   # (HW, Cop)

    # skip connection: 1x1 conv (out_channels != channels), kept in f32 since it
    # carries the residual straight into the block output.
    skip = jnp.dot(x2, wsk_ref[...], preferred_element_type=jnp.float32) + bsk_ref[...]

    o_ref[0] = skip + h                                   # lane-dense (Cop % 128 == 0)


# ------------------------------ JAX-side glue -------------------------------

def _pad_last(a, n):
    a = jnp.asarray(a, jnp.float32)
    d = n - a.shape[-1]
    if d == 0:
        return a
    return jnp.pad(a, [(0, 0)] * (a.ndim - 1) + [(0, d)])


def resblock_forward(x_nchw, emb, p, groups=32):
    x = jnp.transpose(x_nchw, (0, 2, 3, 1)).astype(jnp.float32)   # NHWC
    N, H, W, C = x.shape
    Co = p["w1"].shape[-1]
    HW = H * W
    assert C % groups == 0 and Co % groups == 0
    cpg_in, cpg_out = C // groups, Co // groups
    # TODO(synk): the in-kernel group all-reduce assumes power-of-two channels/group.
    assert (cpg_in & (cpg_in - 1)) == 0 and (cpg_out & (cpg_out - 1)) == 0
    assert HW % 8 == 0

    Cp = _round_up(C, _LANES)      # padded channel counts (lane-dense, MXU aligned)
    Cop = _round_up(Co, _LANES)
    # Zero-padded channels must form whole GroupNorm groups of their own
    # (zero data + zero gamma/beta/weights => no effect on real channels).
    assert (Cp - C) % cpg_in == 0 and (Cop - Co) % cpg_out == 0

    # inputs: flatten spatial, zero-pad channels to a multiple of 128.
    x_flat = _pad_last(x.reshape(N, HW, C), Cp)                   # (N, HW, Cp)

    # emb path hoisted out of the kernel: one batched (N,E)@(E,Co) matmul,
    # folded into conv1's bias (removes a whole (HW, Cop) add in the kernel).
    emb_out = jnp.dot(jax.nn.silu(emb.astype(jnp.float32)), p["we"],
                      precision=lax.Precision.HIGHEST) + p["be"]  # (N, Co)
    bias1 = _pad_last(p["cb1"] + emb_out, Cop).reshape(N, 1, Cop)

    # weights: zero-pad channel dims, flatten conv taps to (9*Cin, Cout), bf16.
    # The 1x1 skip weight stays f32 (residual accuracy).
    w1p = jnp.pad(p["w1"], ((0, 0), (0, Cp - C), (0, Cop - Co))
                  ).reshape(9 * Cp, Cop).astype(jnp.bfloat16)
    w2p = jnp.pad(p["w2"], ((0, 0), (0, Cop - Co), (0, Cop - Co))
                  ).reshape(9 * Cop, Cop).astype(jnp.bfloat16)
    wskp = jnp.pad(p["wsk"], ((0, Cp - C), (0, Cop - Co))).astype(jnp.float32)

    g1, b1 = _pad_last(p["gn1_g"], Cp), _pad_last(p["gn1_b"], Cp)
    g2, b2 = _pad_last(p["gn2_g"], Cop), _pad_last(p["gn2_b"], Cop)
    cb2 = _pad_last(p["cb2"], Cop)
    bsk = _pad_last(p["bsk"], Cop)

    kernel = functools.partial(_resblock_kernel, width=W,
                               cpg_in=cpg_in, cpg_out=cpg_out)

    def call(single_buffer_consts):
        def const2d(shape):
            if single_buffer_consts:
                # Grid-invariant parameter blocks: one VMEM buffer is enough.
                return pl.BlockSpec(shape, lambda n: (0, 0),
                                    pipeline_mode=pl.Buffered(1))
            return pl.BlockSpec(shape, lambda n: (0, 0))

        return pl.pallas_call(
            kernel,
            out_shape=jax.ShapeDtypeStruct((N, HW, Cop), jnp.float32),
            grid=(N,),
            in_specs=[
                pl.BlockSpec((1, HW, Cp), lambda n: (n, 0, 0)),   # x (flat NHWC, padded)
                pl.BlockSpec((1, 1, Cop), lambda n: (n, 0, 0)),   # conv1 bias + emb_out[n]
                const2d((1, Cp)), const2d((1, Cp)),               # GN1 gamma / beta
                const2d((9 * Cp, Cop)),                           # conv1 w (bf16)
                const2d((1, Cop)), const2d((1, Cop)),             # GN2 gamma / beta
                const2d((9 * Cop, Cop)), const2d((1, Cop)),       # conv2 w (bf16) / bias
                const2d((Cp, Cop)), const2d((1, Cop)),            # skip 1x1 w (f32) / bias
            ],
            out_specs=pl.BlockSpec((1, HW, Cop), lambda n: (n, 0, 0)),
            compiler_params=pltpu.CompilerParams(
                dimension_semantics=("parallel",),
                vmem_limit_bytes=_vmem_limit_bytes()),
        )(x_flat, bias1, g1, b1, w1p, g2, b2, w2p, cb2, wskp, bsk)

    # TODO(synk): tile the grid over HW (separate GN-stats pass + conv halos)
    #             for very large images; the N-only grid leaves one v7x
    #             TensorCore idle when N == 1.
    try:
        out_flat = call(single_buffer_consts=True)
    except Exception:
        # Some jax versions may reject pipeline_mode on BlockSpec; fall back to
        # default double-buffering of the grid-invariant parameter blocks.
        out_flat = call(single_buffer_consts=False)

    out = out_flat[..., :Co].reshape(N, H, W, Co)                 # drop channel padding
    return jnp.transpose(out, (0, 3, 1, 2))                       # back to NCHW


# --------------------------- pure-JAX reference -----------------------------

def _ref_forward(x_nchw, emb, p, groups=32):
    hp = lax.Precision.HIGHEST
    x = jnp.transpose(x_nchw, (0, 2, 3, 1)).astype(jnp.float32)
    N, H, W, C = x.shape
    Co = p["w1"].shape[-1]

    def gn(h, gamma, beta):
        n, hh, ww, c = h.shape
        g = h.reshape(n, hh, ww, groups, c // groups)
        mu = g.mean(axis=(1, 2, 4), keepdims=True)
        var = jnp.var(g, axis=(1, 2, 4), keepdims=True)
        g = (g - mu) * lax.rsqrt(var + _EPS)
        return g.reshape(n, hh, ww, c) * gamma.reshape(1, 1, 1, c) + beta.reshape(1, 1, 1, c)

    def silu(v):
        return v * jax.nn.sigmoid(v)

    def conv3(h, w, b):
        w_hwio = w.reshape(3, 3, w.shape[-2], w.shape[-1])
        y = lax.conv_general_dilated(h, w_hwio, (1, 1), "SAME",
                                     dimension_numbers=("NHWC", "HWIO", "NHWC"),
                                     precision=hp)
        return y + b.reshape(1, 1, 1, -1)

    h = conv3(silu(gn(x, p["gn1_g"], p["gn1_b"])), p["w1"], p["cb1"])
    eo = jnp.dot(silu(emb), p["we"], precision=hp) + p["be"]        # (N, Co)
    h = h + eo[:, None, None, :]
    h = conv3(silu(gn(h, p["gn2_g"], p["gn2_b"])), p["w2"], p["cb2"])
    skip = jnp.einsum("nhwc,cd->nhwd", x, p["wsk"], precision=hp) + p["bsk"].reshape(1, 1, 1, -1)
    out = skip + h
    return jnp.transpose(out, (0, 3, 1, 2))


# ---------------------------------- main ------------------------------------

if __name__ == "__main__":
    N, C, Co, H, W, E, G = 2, 32, 64, 16, 16, 32, 32   # channels, out_channels, emb_channels
    key = jax.random.PRNGKey(0)
    ks = jax.random.split(key, 16)

    x = jax.random.normal(ks[0], (N, C, H, W), jnp.float32)          # NCHW (PyTorch layout)
    emb = jax.random.normal(ks[1], (N, E), jnp.float32)

    params = dict(
        gn1_g=1.0 + 0.1 * jax.random.normal(ks[2], (1, C), jnp.float32),
        gn1_b=0.1 * jax.random.normal(ks[3], (1, C), jnp.float32),
        w1=0.1 * jax.random.normal(ks[4], (9, C, Co), jnp.float32),   # conv1 3x3, HWIO flattened
        cb1=0.1 * jax.random.normal(ks[5], (1, Co), jnp.float32),
        we=0.1 * jax.random.normal(ks[6], (E, Co), jnp.float32),      # emb Linear
        be=0.1 * jax.random.normal(ks[7], (1, Co), jnp.float32),
        gn2_g=1.0 + 0.1 * jax.random.normal(ks[8], (1, Co), jnp.float32),
        gn2_b=0.1 * jax.random.normal(ks[9], (1, Co), jnp.float32),
        # NOTE: the original __init__ wraps this conv in zero_module(); we use
        # non-zero deterministic weights so the out_layers path is exercised.
        w2=0.1 * jax.random.normal(ks[10], (9, Co, Co), jnp.float32),
        cb2=0.1 * jax.random.normal(ks[11], (1, Co), jnp.float32),
        wsk=0.1 * jax.random.normal(ks[12], (C, Co), jnp.float32),    # skip 1x1 conv
        bsk=0.1 * jax.random.normal(ks[13], (1, Co), jnp.float32),
    )

    out = jax.block_until_ready(resblock_forward(x, emb, params, groups=G))
    assert out.shape == (N, Co, H, W), out.shape

    ref = jax.block_until_ready(_ref_forward(x, emb, params, groups=G))
    # Tolerance accounts for bf16 MXU operands (f32 accumulation) in the 3x3 convs.
    np.testing.assert_allclose(np.asarray(out), np.asarray(ref), rtol=2e-2, atol=2e-2)

    print("KERNEL_OK")
</pallas_src>

<mosaic_0001>
module attributes {stable_mosaic.version = 11 : i64} {
  func.func @_resblock_kernel(%arg0: i32, %arg1: memref<1x256x128xf32, #tpu.memory_space<vmem>>, %arg2: memref<1x1x128xf32, #tpu.memory_space<vmem>>, %arg3: memref<1x128xf32, #tpu.memory_space<vmem>>, %arg4: memref<1x128xf32, #tpu.memory_space<vmem>>, %arg5: memref<1152x128xbf16, #tpu.memory_space<vmem>>, %arg6: memref<1x128xf32, #tpu.memory_space<vmem>>, %arg7: memref<1x128xf32, #tpu.memory_space<vmem>>, %arg8: memref<1152x128xbf16, #tpu.memory_space<vmem>>, %arg9: memref<1x128xf32, #tpu.memory_space<vmem>>, %arg10: memref<128x128xf32, #tpu.memory_space<vmem>>, %arg11: memref<1x128xf32, #tpu.memory_space<vmem>>, %arg12: memref<1x256x128xf32, #tpu.memory_space<vmem>>) attributes {dimension_semantics = [#tpu.dimension_semantics<parallel>], iteration_bounds = array<i64: 2>, scalar_prefetch = 0 : i64, scratch_operands = 0 : i64, tpu.core_type = #tpu.core_type<tc>, window_params = [{transform_indices = @transform_0, window_bounds = array<i64: 1, 256, 128>}, {transform_indices = @transform_1, window_bounds = array<i64: 1, 1, 128>}, {pipeline_mode = #tpu.pipeline_mode<synchronous>, transform_indices = @transform_2, window_bounds = array<i64: 1, 128>}, {pipeline_mode = #tpu.pipeline_mode<synchronous>, transform_indices = @transform_3, window_bounds = array<i64: 1, 128>}, {pipeline_mode = #tpu.pipeline_mode<synchronous>, transform_indices = @transform_4, window_bounds = array<i64: 1152, 128>}, {pipeline_mode = #tpu.pipeline_mode<synchronous>, transform_indices = @transform_5, window_bounds = array<i64: 1, 128>}, {pipeline_mode = #tpu.pipeline_mode<synchronous>, transform_indices = @transform_6, window_bounds = array<i64: 1, 128>}, {pipeline_mode = #tpu.pipeline_mode<synchronous>, transform_indices = @transform_7, window_bounds = array<i64: 1152, 128>}, {pipeline_mode = #tpu.pipeline_mode<synchronous>, transform_indices = @transform_8, window_bounds = array<i64: 1, 128>}, {pipeline_mode = #tpu.pipeline_mode<synchronous>, transform_indices = @transform_9, window_bounds = array<i64: 128, 128>}, {pipeline_mode = #tpu.pipeline_mode<synchronous>, transform_indices = @transform_10, window_bounds = array<i64: 1, 128>}, {transform_indices = @transform_11, window_bounds = array<i64: 1, 256, 128>}]} {
    %c0 = arith.constant 0 : index
    %c0_0 = arith.constant 0 : index
    %c0_1 = arith.constant 0 : index
    %0 = vector.load %arg1[%c0, %c0_0, %c0_1] : memref<1x256x128xf32, #tpu.memory_space<vmem>>, vector<1x256x128xf32>
    %1 = vector.shape_cast %0 : vector<1x256x128xf32> to vector<256x128xf32>
    %2 = tpu.iota {dimensions = array<i32: 0>} : vector<256x1xi32>
    %c16_i32 = arith.constant 16 : i32
    %c0_i32 = arith.constant 0 : i32
    %3 = arith.cmpi eq, %c16_i32, %c0_i32 : i32
    %c1_i32 = arith.constant 1 : i32
    %4 = arith.select %3, %c1_i32, %c16_i32 : i32
    %5 = vector.broadcast %4 : i32 to vector<256x1xi32>
    %6 = arith.remsi %2, %5 : vector<256x1xi32>
    %c0_i32_2 = arith.constant 0 : i32
    %7 = vector.broadcast %c0_i32_2 : i32 to vector<256x1xi32>
    %8 = arith.cmpi ne, %6, %7 : vector<256x1xi32>
    %c0_i32_3 = arith.constant 0 : i32
    %9 = vector.broadcast %c0_i32_3 : i32 to vector<256x1xi32>
    %10 = arith.cmpi slt, %6, %9 : vector<256x1xi32>
    %c0_i32_4 = arith.constant 0 : i32
    %11 = arith.cmpi slt, %4, %c0_i32_4 : i32
    %12 = vector.broadcast %11 : i1 to vector<256x1xi1>
    %13 = vector.broadcast %12 : vector<256x1xi1> to vector<256x1xi1>
    %14 = arith.xori %10, %13 : vector<256x1xi1>
    %15 = arith.andi %14, %8 : vector<256x1xi1>
    %16 = vector.broadcast %4 : i32 to vector<256x1xi32>
    %17 = arith.addi %6, %16 : vector<256x1xi32>
    %18 = arith.select %15, %17, %6 : vector<256x1xi1>, vector<256x1xi32>
    %c1_i32_5 = arith.constant 1 : i32
    %19 = vector.broadcast %c1_i32_5 : i32 to vector<256x1xi32>
    %20 = arith.cmpi sge, %18, %19 : vector<256x1xi32>
    %c14_i32 = arith.constant 14 : i32
    %21 = vector.broadcast %c14_i32 : i32 to vector<256x1xi32>
    %22 = arith.cmpi sle, %18, %21 : vector<256x1xi32>
    %c0_6 = arith.constant 0 : index
    %c0_7 = arith.constant 0 : index
    %23 = vector.load %arg3[%c0_6, %c0_7] : memref<1x128xf32, #tpu.memory_space<vmem>>, vector<1x128xf32>
    %c0_8 = arith.constant 0 : index
    %c0_9 = arith.constant 0 : index
    %24 = vector.load %arg4[%c0_8, %c0_9] : memref<1x128xf32, #tpu.memory_space<vmem>>, vector<1x128xf32>
    %cst = arith.constant dense<0.000000e+00> : vector<128xf32>
    %25 = vector.multi_reduction <add>, %1, %cst [0] : vector<256x128xf32> to vector<128xf32>
    %26 = vector.shape_cast %25 : vector<128xf32> to vector<1x128xf32>
    %cst_10 = arith.constant 3.906250e-03 : f32
    %27 = vector.broadcast %cst_10 : f32 to vector<1x128xf32>
    %28 = arith.mulf %26, %27 : vector<1x128xf32>
    %29 = vector.broadcast %28 : vector<1x128xf32> to vector<256x128xf32>
    %30 = arith.subf %1, %29 : vector<256x128xf32>
    %31 = vector.broadcast %28 : vector<1x128xf32> to vector<256x128xf32>
    %32 = arith.subf %1, %31 : vector<256x128xf32>
    %33 = arith.mulf %30, %32 : vector<256x128xf32>
    %cst_11 = arith.constant dense<0.000000e+00> : vector<128xf32>
    %34 = vector.multi_reduction <add>, %33, %cst_11 [0] : vector<256x128xf32> to vector<128xf32>
    %35 = vector.shape_cast %34 : vector<128xf32> to vector<1x128xf32>
    %cst_12 = arith.constant 3.906250e-03 : f32
    %36 = vector.broadcast %cst_12 : f32 to vector<1x128xf32>
    %37 = arith.mulf %35, %36 : vector<1x128xf32>
    %cst_13 = arith.constant 9.99999974E-6 : f32
    %38 = vector.broadcast %cst_13 : f32 to vector<1x128xf32>
    %39 = arith.addf %37, %38 : vector<1x128xf32>
    %40 = math.rsqrt %39 : vector<1x128xf32>
    %41 = arith.mulf %40, %23 : vector<1x128xf32>
    %42 = vector.broadcast %41 : vector<1x128xf32> to vector<256x128xf32>
    %43 = arith.mulf %1, %42 : vector<256x128xf32>
    %44 = arith.mulf %28, %41 : vector<1x128xf32>
    %45 = arith.subf %24, %44 : vector<1x128xf32>
    %46 = vector.broadcast %45 : vector<1x128xf32> to vector<256x128xf32>
    %47 = arith.addf %43, %46 : vector<256x128xf32>
    %48 = arith.negf %47 : vector<256x128xf32>
    %49 = math.exp %48 : vector<256x128xf32>
    %cst_14 = arith.constant 1.000000e+00 : f32
    %50 = vector.broadcast %cst_14 : f32 to vector<256x128xf32>
    %51 = arith.addf %50, %49 : vector<256x128xf32>
    %52 = arith.divf %50, %51 : vector<256x128xf32>
    %53 = arith.mulf %47, %52 : vector<256x128xf32>
    %c0_15 = arith.constant 0 : index
    %c0_16 = arith.constant 0 : index
    %c0_17 = arith.constant 0 : index
    %54 = vector.load %arg2[%c0_15, %c0_16, %c0_17] : memref<1x1x128xf32, #tpu.memory_space<vmem>>, vector<1x1x128xf32>
    %55 = vector.shape_cast %54 : vector<1x1x128xf32> to vector<1x128xf32>
    %cst_18 = arith.constant 0.000000e+00 : f32
    %56 = vector.broadcast %cst_18 : f32 to vector<24x128xf32>
    %57 = tpu.concatenate %56, %53, %56 in 0 : vector<24x128xf32>, vector<256x128xf32>, vector<24x128xf32> -> vector<304x128xf32>
    %58 = vector.extract_strided_slice %57 {offsets = [7, 0], sizes = [256, 128], strides = [1, 1]} : vector<304x128xf32> to vector<256x128xf32>
    %cst_19 = arith.constant 0.000000e+00 : f32
    %59 = vector.shape_cast %20 : vector<256x1xi1> to vector<256x1xi1>
    %60 = vector.broadcast %59 : vector<256x1xi1> to vector<256x128xi1>
    %61 = vector.broadcast %cst_19 : f32 to vector<256x128xf32>
    %62 = arith.select %60, %58, %61 : vector<256x128xi1>, vector<256x128xf32>
    %63 = arith.truncf %62 : vector<256x128xf32> to vector<256x128xbf16>
    %c0_20 = arith.constant 0 : index
    %c0_21 = arith.constant 0 : index
    %64 = vector.load %arg5[%c0_20, %c0_21] : memref<1152x128xbf16, #tpu.memory_space<vmem>>, vector<128x128xbf16>
    %cst_22 = arith.constant dense<0.000000e+00> : vector<256x128xf32>
    %65 = tpu.matmul %63, %64, %cst_22 {dimension_numbers = #tpu.dot_dimension_numbers<[1], [0], [0], [1], [0, 0, 1, 1], [], []>} : vector<256x128xbf16>, vector<128x128xbf16>, vector<256x128xf32> -> vector<256x128xf32>
    %66 = vector.extract_strided_slice %57 {offsets = [8, 0], sizes = [256, 128], strides = [1, 1]} : vector<304x128xf32> to vector<256x128xf32>
    %67 = arith.truncf %66 : vector<256x128xf32> to vector<256x128xbf16>
    %c128 = arith.constant 128 : index
    %c0_23 = arith.constant 0 : index
    %68 = vector.load %arg5[%c128, %c0_23] : memref<1152x128xbf16, #tpu.memory_space<vmem>>, vector<128x128xbf16>
    %cst_24 = arith.constant dense<0.000000e+00> : vector<256x128xf32>
    %69 = tpu.matmul %67, %68, %cst_24 {dimension_numbers = #tpu.dot_dimension_numbers<[1], [0], [0], [1], [0, 0, 1, 1], [], []>} : vector<256x128xbf16>, vector<128x128xbf16>, vector<256x128xf32> -> vector<256x128xf32>
    %70 = arith.addf %65, %69 : vector<256x128xf32>
    %71 = vector.extract_strided_slice %57 {offsets = [9, 0], sizes = [256, 128], strides = [1, 1]} : vector<304x128xf32> to vector<256x128xf32>
    %cst_25 = arith.constant 0.000000e+00 : f32
    %72 = vector.shape_cast %22 : vector<256x1xi1> to vector<256x1xi1>
    %73 = vector.broadcast %72 : vector<256x1xi1> to vector<256x128xi1>
    %74 = vector.broadcast %cst_25 : f32 to vector<256x128xf32>
    %75 = arith.select %73, %71, %74 : vector<256x128xi1>, vector<256x128xf32>
    %76 = arith.truncf %75 : vector<256x128xf32> to vector<256x128xbf16>
    %c256 = arith.constant 256 : index
    %c0_26 = arith.constant 0 : index
    %77 = vector.load %arg5[%c256, %c0_26] : memref<1152x128xbf16, #tpu.memory_space<vmem>>, vector<128x128xbf16>
    %cst_27 = arith.constant dense<0.000000e+00> : vector<256x128xf32>
    %78 = tpu.matmul %76, %77, %cst_27 {dimension_numbers = #tpu.dot_dimension_numbers<[1], [0], [0], [1], [0, 0, 1, 1], [], []>} : vector<256x128xbf16>, vector<128x128xbf16>, vector<256x128xf32> -> vector<256x128xf32>
    %79 = arith.addf %70, %78 : vector<256x128xf32>
    %80 = vector.extract_strided_slice %57 {offsets = [23, 0], sizes = [256, 128], strides = [1, 1]} : vector<304x128xf32> to vector<256x128xf32>
    %cst_28 = arith.constant 0.000000e+00 : f32
    %81 = vector.shape_cast %20 : vector<256x1xi1> to vector<256x1xi1>
    %82 = vector.broadcast %81 : vector<256x1xi1> to vector<256x128xi1>
    %83 = vector.broadcast %cst_28 : f32 to vector<256x128xf32>
    %84 = arith.select %82, %80, %83 : vector<256x128xi1>, vector<256x128xf32>
    %85 = arith.truncf %84 : vector<256x128xf32> to vector<256x128xbf16>
    %c384 = arith.constant 384 : index
    %c0_29 = arith.constant 0 : index
    %86 = vector.load %arg5[%c384, %c0_29] : memref<1152x128xbf16, #tpu.memory_space<vmem>>, vector<128x128xbf16>
    %cst_30 = arith.constant dense<0.000000e+00> : vector<256x128xf32>
    %87 = tpu.matmul %85, %86, %cst_30 {dimension_numbers = #tpu.dot_dimension_numbers<[1], [0], [0], [1], [0, 0, 1, 1], [], []>} : vector<256x128xbf16>, vector<128x128xbf16>, vector<256x128xf32> -> vector<256x128xf32>
    %88 = arith.addf %79, %87 : vector<256x128xf32>
    %89 = vector.extract_strided_slice %57 {offsets = [24, 0], sizes = [256, 128], strides = [1, 1]} : vector<304x128xf32> to vector<256x128xf32>
    %90 = arith.truncf %89 : vector<256x128xf32> to vector<256x128xbf16>
    %c512 = arith.constant 512 : index
    %c0_31 = arith.constant 0 : index
    %91 = vector.load %arg5[%c512, %c0_31] : memref<1152x128xbf16, #tpu.memory_space<vmem>>, vector<128x128xbf16>
    %cst_32 = arith.constant dense<0.000000e+00> : vector<256x128xf32>
    %92 = tpu.matmul %90, %91, %cst_32 {dimension_numbers = #tpu.dot_dimension_numbers<[1], [0], [0], [1], [0, 0, 1, 1], [], []>} : vector<256x128xbf16>, vector<128x128xbf16>, vector<256x128xf32> -> vector<256x128xf32>
    %93 = arith.addf %88, %92 : vector<256x128xf32>
    %94 = vector.extract_strided_slice %57 {offsets = [25, 0], sizes = [256, 128], strides = [1, 1]} : vector<304x128xf32> to vector<256x128xf32>
    %cst_33 = arith.constant 0.000000e+00 : f32
    %95 = vector.shape_cast %22 : vector<256x1xi1> to vector<256x1xi1>
    %96 = vector.broadcast %95 : vector<256x1xi1> to vector<256x128xi1>
    %97 = vector.broadcast %cst_33 : f32 to vector<256x128xf32>
    %98 = arith.select %96, %94, %97 : vector<256x128xi1>, vector<256x128xf32>
    %99 = arith.truncf %98 : vector<256x128xf32> to vector<256x128xbf16>
    %c640 = arith.constant 640 : index
    %c0_34 = arith.constant 0 : index
    %100 = vector.load %arg5[%c640, %c0_34] : memref<1152x128xbf16, #tpu.memory_space<vmem>>, vector<128x128xbf16>
    %cst_35 = arith.constant dense<0.000000e+00> : vector<256x128xf32>
    %101 = tpu.matmul %99, %100, %cst_35 {dimension_numbers = #tpu.dot_dimension_numbers<[1], [0], [0], [1], [0, 0, 1, 1], [], []>} : vector<256x128xbf16>, vector<128x128xbf16>, vector<256x128xf32> -> vector<256x128xf32>
    %102 = arith.addf %93, %101 : vector<256x128xf32>
    %103 = vector.extract_strided_slice %57 {offsets = [39, 0], sizes = [256, 128], strides = [1, 1]} : vector<304x128xf32> to vector<256x128xf32>
    %cst_36 = arith.constant 0.000000e+00 : f32
    %104 = vector.shape_cast %20 : vector<256x1xi1> to vector<256x1xi1>
    %105 = vector.broadcast %104 : vector<256x1xi1> to vector<256x128xi1>
    %106 = vector.broadcast %cst_36 : f32 to vector<256x128xf32>
    %107 = arith.select %105, %103, %106 : vector<256x128xi1>, vector<256x128xf32>
    %108 = arith.truncf %107 : vector<256x128xf32> to vector<256x128xbf16>
    %c768 = arith.constant 768 : index
    %c0_37 = arith.constant 0 : index
    %109 = vector.load %arg5[%c768, %c0_37] : memref<1152x128xbf16, #tpu.memory_space<vmem>>, vector<128x128xbf16>
    %cst_38 = arith.constant dense<0.000000e+00> : vector<256x128xf32>
    %110 = tpu.matmul %108, %109, %cst_38 {dimension_numbers = #tpu.dot_dimension_numbers<[1], [0], [0], [1], [0, 0, 1, 1], [], []>} : vector<256x128xbf16>, vector<128x128xbf16>, vector<256x128xf32> -> vector<256x128xf32>
    %111 = arith.addf %102, %110 : vector<256x128xf32>
    %112 = vector.extract_strided_slice %57 {offsets = [40, 0], sizes = [256, 128], strides = [1, 1]} : vector<304x128xf32> to vector<256x128xf32>
    %113 = arith.truncf %112 : vector<256x128xf32> to vector<256x128xbf16>
    %c896 = arith.constant 896 : index
    %c0_39 = arith.constant 0 : index
    %114 = vector.load %arg5[%c896, %c0_39] : memref<1152x128xbf16, #tpu.memory_space<vmem>>, vector<128x128xbf16>
    %cst_40 = arith.constant dense<0.000000e+00> : vector<256x128xf32>
    %115 = tpu.matmul %113, %114, %cst_40 {dimension_numbers = #tpu.dot_dimension_numbers<[1], [0], [0], [1], [0, 0, 1, 1], [], []>} : vector<256x128xbf16>, vector<128x128xbf16>, vector<256x128xf32> -> vector<256x128xf32>
    %116 = arith.addf %111, %115 : vector<256x128xf32>
    %117 = vector.extract_strided_slice %57 {offsets = [41, 0], sizes = [256, 128], strides = [1, 1]} : vector<304x128xf32> to vector<256x128xf32>
    %cst_41 = arith.constant 0.000000e+00 : f32
    %118 = vector.shape_cast %22 : vector<256x1xi1> to vector<256x1xi1>
    %119 = vector.broadcast %118 : vector<256x1xi1> to vector<256x128xi1>
    %120 = vector.broadcast %cst_41 : f32 to vector<256x128xf32>
    %121 = arith.select %119, %117, %120 : vector<256x128xi1>, vector<256x128xf32>
    %122 = arith.truncf %121 : vector<256x128xf32> to vector<256x128xbf16>
    %c1024 = arith.constant 1024 : index
    %c0_42 = arith.constant 0 : index
    %123 = vector.load %arg5[%c1024, %c0_42] : memref<1152x128xbf16, #tpu.memory_space<vmem>>, vector<128x128xbf16>
    %cst_43 = arith.constant dense<0.000000e+00> : vector<256x128xf32>
    %124 = tpu.matmul %122, %123, %cst_43 {dimension_numbers = #tpu.dot_dimension_numbers<[1], [0], [0], [1], [0, 0, 1, 1], [], []>} : vector<256x128xbf16>, vector<128x128xbf16>, vector<256x128xf32> -> vector<256x128xf32>
    %125 = arith.addf %116, %124 : vector<256x128xf32>
    %126 = vector.broadcast %55 : vector<1x128xf32> to vector<256x128xf32>
    %127 = arith.addf %125, %126 : vector<256x128xf32>
    %c0_44 = arith.constant 0 : index
    %c0_45 = arith.constant 0 : index
    %128 = vector.load %arg6[%c0_44, %c0_45] : memref<1x128xf32, #tpu.memory_space<vmem>>, vector<1x128xf32>
    %c0_46 = arith.constant 0 : index
    %c0_47 = arith.constant 0 : index
    %129 = vector.load %arg7[%c0_46, %c0_47] : memref<1x128xf32, #tpu.memory_space<vmem>>, vector<1x128xf32>
    %cst_48 = arith.constant dense<0.000000e+00> : vector<128xf32>
    %130 = vector.multi_reduction <add>, %127, %cst_48 [0] : vector<256x128xf32> to vector<128xf32>
    %131 = vector.shape_cast %130 : vector<128xf32> to vector<1x128xf32>
    %132 = tpu.iota {dimensions = array<i32: 1>} : vector<1x128xi32>
    %c2_i32 = arith.constant 2 : i32
    %c0_i32_49 = arith.constant 0 : i32
    %133 = arith.cmpi eq, %c2_i32, %c0_i32_49 : i32
    %c1_i32_50 = arith.constant 1 : i32
    %134 = arith.select %133, %c1_i32_50, %c2_i32 : i32
    %135 = vector.broadcast %134 : i32 to vector<1x128xi32>
    %136 = arith.remsi %132, %135 : vector<1x128xi32>
    %c0_i32_51 = arith.constant 0 : i32
    %137 = vector.broadcast %c0_i32_51 : i32 to vector<1x128xi32>
    %138 = arith.cmpi ne, %136, %137 : vector<1x128xi32>
    %c0_i32_52 = arith.constant 0 : i32
    %139 = vector.broadcast %c0_i32_52 : i32 to vector<1x128xi32>
    %140 = arith.cmpi slt, %136, %139 : vector<1x128xi32>
    %c0_i32_53 = arith.constant 0 : i32
    %141 = arith.cmpi slt, %134, %c0_i32_53 : i32
    %142 = vector.broadcast %141 : i1 to vector<1x128xi1>
    %143 = vector.broadcast %142 : vector<1x128xi1> to vector<1x128xi1>
    %144 = arith.xori %140, %143 : vector<1x128xi1>
    %145 = arith.andi %144, %138 : vector<1x128xi1>
    %146 = vector.broadcast %134 : i32 to vector<1x128xi32>
    %147 = arith.addi %136, %146 : vector<1x128xi32>
    %148 = arith.select %145, %147, %136 : vector<1x128xi1>, vector<1x128xi32>
    %149 = vector.extract_strided_slice %131 {offsets = [0, 1], sizes = [1, 127], strides = [1, 1]} : vector<1x128xf32> to vector<1x127xf32>
    %150 = vector.extract_strided_slice %131 {offsets = [0, 0], sizes = [1, 1], strides = [1, 1]} : vector<1x128xf32> to vector<1x1xf32>
    %151 = tpu.concatenate %149, %150 in 1 : vector<1x127xf32>, vector<1x1xf32> -> vector<1x128xf32>
    %152 = vector.extract_strided_slice %131 {offsets = [0, 127], sizes = [1, 1], strides = [1, 1]} : vector<1x128xf32> to vector<1x1xf32>
    %153 = vector.extract_strided_slice %131 {offsets = [0, 0], sizes = [1, 127], strides = [1, 1]} : vector<1x128xf32> to vector<1x127xf32>
    %154 = tpu.concatenate %152, %153 in 1 : vector<1x1xf32>, vector<1x127xf32> -> vector<1x128xf32>
    %c1_i32_54 = arith.constant 1 : i32
    %155 = vector.broadcast %c1_i32_54 : i32 to vector<1x128xi32>
    %156 = arith.cmpi slt, %148, %155 : vector<1x128xi32>
    %157 = arith.select %156, %151, %154 : vector<1x128xi1>, vector<1x128xf32>
    %158 = arith.addf %131, %157 : vector<1x128xf32>
    %cst_55 = arith.constant 0.001953125 : f32
    %159 = vector.broadcast %cst_55 : f32 to vector<1x128xf32>
    %160 = arith.mulf %158, %159 : vector<1x128xf32>
    %161 = vector.broadcast %160 : vector<1x128xf32> to vector<256x128xf32>
    %162 = arith.subf %127, %161 : vector<256x128xf32>
    %163 = vector.broadcast %160 : vector<1x128xf32> to vector<256x128xf32>
    %164 = arith.subf %127, %163 : vector<256x128xf32>
    %165 = arith.mulf %162, %164 : vector<256x128xf32>
    %cst_56 = arith.constant dense<0.000000e+00> : vector<128xf32>
    %166 = vector.multi_reduction <add>, %165, %cst_56 [0] : vector<256x128xf32> to vector<128xf32>
    %167 = vector.shape_cast %166 : vector<128xf32> to vector<1x128xf32>
    %168 = tpu.iota {dimensions = array<i32: 1>} : vector<1x128xi32>
    %c2_i32_57 = arith.constant 2 : i32
    %c0_i32_58 = arith.constant 0 : i32
    %169 = arith.cmpi eq, %c2_i32_57, %c0_i32_58 : i32
    %c1_i32_59 = arith.constant 1 : i32
    %170 = arith.select %169, %c1_i32_59, %c2_i32_57 : i32
    %171 = vector.broadcast %170 : i32 to vector<1x128xi32>
    %172 = arith.remsi %168, %171 : vector<1x128xi32>
    %c0_i32_60 = arith.constant 0 : i32
    %173 = vector.broadcast %c0_i32_60 : i32 to vector<1x128xi32>
    %174 = arith.cmpi ne, %172, %173 : vector<1x128xi32>
    %c0_i32_61 = arith.constant 0 : i32
    %175 = vector.broadcast %c0_i32_61 : i32 to vector<1x128xi32>
    %176 = arith.cmpi slt, %172, %175 : vector<1x128xi32>
    %c0_i32_62 = arith.constant 0 : i32
    %177 = arith.cmpi slt, %170, %c0_i32_62 : i32
    %178 = vector.broadcast %177 : i1 to vector<1x128xi1>
    %179 = vector.broadcast %178 : vector<1x128xi1> to vector<1x128xi1>
    %180 = arith.xori %176, %179 : vector<1x128xi1>
    %181 = arith.andi %180, %174 : vector<1x128xi1>
    %182 = vector.broadcast %170 : i32 to vector<1x128xi32>
    %183 = arith.addi %172, %182 : vector<1x128xi32>
    %184 = arith.select %181, %183, %172 : vector<1x128xi1>, vector<1x128xi32>
    %185 = vector.extract_strided_slice %167 {offsets = [0, 1], sizes = [1, 127], strides = [1, 1]} : vector<1x128xf32> to vector<1x127xf32>
    %186 = vector.extract_strided_slice %167 {offsets = [0, 0], sizes = [1, 1], strides = [1, 1]} : vector<1x128xf32> to vector<1x1xf32>
    %187 = tpu.concatenate %185, %186 in 1 : vector<1x127xf32>, vector<1x1xf32> -> vector<1x128xf32>
    %188 = vector.extract_strided_slice %167 {offsets = [0, 127], sizes = [1, 1], strides = [1, 1]} : vector<1x128xf32> to vector<1x1xf32>
    %189 = vector.extract_strided_slice %167 {offsets = [0, 0], sizes = [1, 127], strides = [1, 1]} : vector<1x128xf32> to vector<1x127xf32>
    %190 = tpu.concatenate %188, %189 in 1 : vector<1x1xf32>, vector<1x127xf32> -> vector<1x128xf32>
    %c1_i32_63 = arith.constant 1 : i32
    %191 = vector.broadcast %c1_i32_63 : i32 to vector<1x128xi32>
    %192 = arith.cmpi slt, %184, %191 : vector<1x128xi32>
    %193 = arith.select %192, %187, %190 : vector<1x128xi1>, vector<1x128xf32>
    %194 = arith.addf %167, %193 : vector<1x128xf32>
    %cst_64 = arith.constant 0.001953125 : f32
    %195 = vector.broadcast %cst_64 : f32 to vector<1x128xf32>
    %196 = arith.mulf %194, %195 : vector<1x128xf32>
    %cst_65 = arith.constant 9.99999974E-6 : f32
    %197 = vector.broadcast %cst_65 : f32 to vector<1x128xf32>
    %198 = arith.addf %196, %197 : vector<1x128xf32>
    %199 = math.rsqrt %198 : vector<1x128xf32>
    %200 = arith.mulf %199, %128 : vector<1x128xf32>
    %201 = vector.broadcast %200 : vector<1x128xf32> to vector<256x128xf32>
    %202 = arith.mulf %127, %201 : vector<256x128xf32>
    %203 = arith.mulf %160, %200 : vector<1x128xf32>
    %204 = arith.subf %129, %203 : vector<1x128xf32>
    %205 = vector.broadcast %204 : vector<1x128xf32> to vector<256x128xf32>
    %206 = arith.addf %202, %205 : vector<256x128xf32>
    %207 = arith.negf %206 : vector<256x128xf32>
    %208 = math.exp %207 : vector<256x128xf32>
    %cst_66 = arith.constant 1.000000e+00 : f32
    %209 = vector.broadcast %cst_66 : f32 to vector<256x128xf32>
    %210 = arith.addf %209, %208 : vector<256x128xf32>
    %211 = arith.divf %209, %210 : vector<256x128xf32>
    %212 = arith.mulf %206, %211 : vector<256x128xf32>
    %c0_67 = arith.constant 0 : index
    %c0_68 = arith.constant 0 : index
    %213 = vector.load %arg9[%c0_67, %c0_68] : memref<1x128xf32, #tpu.memory_space<vmem>>, vector<1x128xf32>
    %cst_69 = arith.constant 0.000000e+00 : f32
    %214 = vector.broadcast %cst_69 : f32 to vector<24x128xf32>
    %215 = tpu.concatenate %214, %212, %214 in 0 : vector<24x128xf32>, vector<256x128xf32>, vector<24x128xf32> -> vector<304x128xf32>
    %216 = vector.extract_strided_slice %215 {offsets = [7, 0], sizes = [256, 128], strides = [1, 1]} : vector<304x128xf32> to vector<256x128xf32>
    %cst_70 = arith.constant 0.000000e+00 : f32
    %217 = vector.shape_cast %20 : vector<256x1xi1> to vector<256x1xi1>
    %218 = vector.broadcast %217 : vector<256x1xi1> to vector<256x128xi1>
    %219 = vector.broadcast %cst_70 : f32 to vector<256x128xf32>
    %220 = arith.select %218, %216, %219 : vector<256x128xi1>, vector<256x128xf32>
    %221 = arith.truncf %220 : vector<256x128xf32> to vector<256x128xbf16>
    %c0_71 = arith.constant 0 : index
    %c0_72 = arith.constant 0 : index
    %222 = vector.load %arg8[%c0_71, %c0_72] : memref<1152x128xbf16, #tpu.memory_space<vmem>>, vector<128x128xbf16>
    %cst_73 = arith.constant dense<0.000000e+00> : vector<256x128xf32>
    %223 = tpu.matmul %221, %222, %cst_73 {dimension_numbers = #tpu.dot_dimension_numbers<[1], [0], [0], [1], [0, 0, 1, 1], [], []>} : vector<256x128xbf16>, vector<128x128xbf16>, vector<256x128xf32> -> vector<256x128xf32>
    %224 = vector.extract_strided_slice %215 {offsets = [8, 0], sizes = [256, 128], strides = [1, 1]} : vector<304x128xf32> to vector<256x128xf32>
    %225 = arith.truncf %224 : vector<256x128xf32> to vector<256x128xbf16>
    %c128_74 = arith.constant 128 : index
    %c0_75 = arith.constant 0 : index
    %226 = vector.load %arg8[%c128_74, %c0_75] : memref<1152x128xbf16, #tpu.memory_space<vmem>>, vector<128x128xbf16>
    %cst_76 = arith.constant dense<0.000000e+00> : vector<256x128xf32>
    %227 = tpu.matmul %225, %226, %cst_76 {dimension_numbers = #tpu.dot_dimension_numbers<[1], [0], [0], [1], [0, 0, 1, 1], [], []>} : vector<256x128xbf16>, vector<128x128xbf16>, vector<256x128xf32> -> vector<256x128xf32>
    %228 = arith.addf %223, %227 : vector<256x128xf32>
    %229 = vector.extract_strided_slice %215 {offsets = [9, 0], sizes = [256, 128], strides = [1, 1]} : vector<304x128xf32> to vector<256x128xf32>
    %cst_77 = arith.constant 0.000000e+00 : f32
    %230 = vector.shape_cast %22 : vector<256x1xi1> to vector<256x1xi1>
    %231 = vector.broadcast %230 : vector<256x1xi1> to vector<256x128xi1>
    %232 = vector.broadcast %cst_77 : f32 to vector<256x128xf32>
    %233 = arith.select %231, %229, %232 : vector<256x128xi1>, vector<256x128xf32>
    %234 = arith.truncf %233 : vector<256x128xf32> to vector<256x128xbf16>
    %c256_78 = arith.constant 256 : index
    %c0_79 = arith.constant 0 : index
    %235 = vector.load %arg8[%c256_78, %c0_79] : memref<1152x128xbf16, #tpu.memory_space<vmem>>, vector<128x128xbf16>
    %cst_80 = arith.constant dense<0.000000e+00> : vector<256x128xf32>
    %236 = tpu.matmul %234, %235, %cst_80 {dimension_numbers = #tpu.dot_dimension_numbers<[1], [0], [0], [1], [0, 0, 1, 1], [], []>} : vector<256x128xbf16>, vector<128x128xbf16>, vector<256x128xf32> -> vector<256x128xf32>
    %237 = arith.addf %228, %236 : vector<256x128xf32>
    %238 = vector.extract_strided_slice %215 {offsets = [23, 0], sizes = [256, 128], strides = [1, 1]} : vector<304x128xf32> to vector<256x128xf32>
    %cst_81 = arith.constant 0.000000e+00 : f32
    %239 = vector.shape_cast %20 : vector<256x1xi1> to vector<256x1xi1>
    %240 = vector.broadcast %239 : vector<256x1xi1> to vector<256x128xi1>
    %241 = vector.broadcast %cst_81 : f32 to vector<256x128xf32>
    %242 = arith.select %240, %238, %241 : vector<256x128xi1>, vector<256x128xf32>
    %243 = arith.truncf %242 : vector<256x128xf32> to vector<256x128xbf16>
    %c384_82 = arith.constant 384 : index
    %c0_83 = arith.constant 0 : index
    %244 = vector.load %arg8[%c384_82, %c0_83] : memref<1152x128xbf16, #tpu.memory_space<vmem>>, vector<128x128xbf16>
    %cst_84 = arith.constant dense<0.000000e+00> : vector<256x128xf32>
    %245 = tpu.matmul %243, %244, %cst_84 {dimension_numbers = #tpu.dot_dimension_numbers<[1], [0], [0], [1], [0, 0, 1, 1], [], []>} : vector<256x128xbf16>, vector<128x128xbf16>, vector<256x128xf32> -> vector<256x128xf32>
    %246 = arith.addf %237, %245 : vector<256x128xf32>
    %247 = vector.extract_strided_slice %215 {offsets = [24, 0], sizes = [256, 128], strides = [1, 1]} : vector<304x128xf32> to vector<256x128xf32>
    %248 = arith.truncf %247 : vector<256x128xf32> to vector<256x128xbf16>
    %c512_85 = arith.constant 512 : index
    %c0_86 = arith.constant 0 : index
    %249 = vector.load %arg8[%c512_85, %c0_86] : memref<1152x128xbf16, #tpu.memory_space<vmem>>, vector<128x128xbf16>
    %cst_87 = arith.constant dense<0.000000e+00> : vector<256x128xf32>
    %250 = tpu.matmul %248, %249, %cst_87 {dimension_numbers = #tpu.dot_dimension_numbers<[1], [0], [0], [1], [0, 0, 1, 1], [], []>} : vector<256x128xbf16>, vector<128x128xbf16>, vector<256x128xf32> -> vector<256x128xf32>
    %251 = arith.addf %246, %250 : vector<256x128xf32>
    %252 = vector.extract_strided_slice %215 {offsets = [25, 0], sizes = [256, 128], strides = [1, 1]} : vector<304x128xf32> to vector<256x128xf32>
    %cst_88 = arith.constant 0.000000e+00 : f32
    %253 = vector.shape_cast %22 : vector<256x1xi1> to vector<256x1xi1>
    %254 = vector.broadcast %253 : vector<256x1xi1> to vector<256x128xi1>
    %255 = vector.broadcast %cst_88 : f32 to vector<256x128xf32>
    %256 = arith.select %254, %252, %255 : vector<256x128xi1>, vector<256x128xf32>
    %257 = arith.truncf %256 : vector<256x128xf32> to vector<256x128xbf16>
    %c640_89 = arith.constant 640 : index
    %c0_90 = arith.constant 0 : index
    %258 = vector.load %arg8[%c640_89, %c0_90] : memref<1152x128xbf16, #tpu.memory_space<vmem>>, vector<128x128xbf16>
    %cst_91 = arith.constant dense<0.000000e+00> : vector<256x128xf32>
    %259 = tpu.matmul %257, %258, %cst_91 {dimension_numbers = #tpu.dot_dimension_numbers<[1], [0], [0], [1], [0, 0, 1, 1], [], []>} : vector<256x128xbf16>, vector<128x128xbf16>, vector<256x128xf32> -> vector<256x128xf32>
    %260 = arith.addf %251, %259 : vector<256x128xf32>
    %261 = vector.extract_strided_slice %215 {offsets = [39, 0], sizes = [256, 128], strides = [1, 1]} : vector<304x128xf32> to vector<256x128xf32>
    %cst_92 = arith.constant 0.000000e+00 : f32
    %262 = vector.shape_cast %20 : vector<256x1xi1> to vector<256x1xi1>
    %263 = vector.broadcast %262 : vector<256x1xi1> to vector<256x128xi1>
    %264 = vector.broadcast %cst_92 : f32 to vector<256x128xf32>
    %265 = arith.select %263, %261, %264 : vector<256x128xi1>, vector<256x128xf32>
    %266 = arith.truncf %265 : vector<256x128xf32> to vector<256x128xbf16>
    %c768_93 = arith.constant 768 : index
    %c0_94 = arith.constant 0 : index
    %267 = vector.load %arg8[%c768_93, %c0_94] : memref<1152x128xbf16, #tpu.memory_space<vmem>>, vector<128x128xbf16>
    %cst_95 = arith.constant dense<0.000000e+00> : vector<256x128xf32>
    %268 = tpu.matmul %266, %267, %cst_95 {dimension_numbers = #tpu.dot_dimension_numbers<[1], [0], [0], [1], [0, 0, 1, 1], [], []>} : vector<256x128xbf16>, vector<128x128xbf16>, vector<256x128xf32> -> vector<256x128xf32>
    %269 = arith.addf %260, %268 : vector<256x128xf32>
    %270 = vector.extract_strided_slice %215 {offsets = [40, 0], sizes = [256, 128], strides = [1, 1]} : vector<304x128xf32> to vector<256x128xf32>
    %271 = arith.truncf %270 : vector<256x128xf32> to vector<256x128xbf16>
    %c896_96 = arith.constant 896 : index
    %c0_97 = arith.constant 0 : index
    %272 = vector.load %arg8[%c896_96, %c0_97] : memref<1152x128xbf16, #tpu.memory_space<vmem>>, vector<128x128xbf16>
    %cst_98 = arith.constant dense<0.000000e+00> : vector<256x128xf32>
    %273 = tpu.matmul %271, %272, %cst_98 {dimension_numbers = #tpu.dot_dimension_numbers<[1], [0], [0], [1], [0, 0, 1, 1], [], []>} : vector<256x128xbf16>, vector<128x128xbf16>, vector<256x128xf32> -> vector<256x128xf32>
    %274 = arith.addf %269, %273 : vector<256x128xf32>
    %275 = vector.extract_strided_slice %215 {offsets = [41, 0], sizes = [256, 128], strides = [1, 1]} : vector<304x128xf32> to vector<256x128xf32>
    %cst_99 = arith.constant 0.000000e+00 : f32
    %276 = vector.shape_cast %22 : vector<256x1xi1> to vector<256x1xi1>
    %277 = vector.broadcast %276 : vector<256x1xi1> to vector<256x128xi1>
    %278 = vector.broadcast %cst_99 : f32 to vector<256x128xf32>
    %279 = arith.select %277, %275, %278 : vector<256x128xi1>, vector<256x128xf32>
    %280 = arith.truncf %279 : vector<256x128xf32> to vector<256x128xbf16>
    %c1024_100 = arith.constant 1024 : index
    %c0_101 = arith.constant 0 : index
    %281 = vector.load %arg8[%c1024_100, %c0_101] : memref<1152x128xbf16, #tpu.memory_space<vmem>>, vector<128x128xbf16>
    %cst_102 = arith.constant dense<0.000000e+00> : vector<256x128xf32>
    %282 = tpu.matmul %280, %281, %cst_102 {dimension_numbers = #tpu.dot_dimension_numbers<[1], [0], [0], [1], [0, 0, 1, 1], [], []>} : vector<256x128xbf16>, vector<128x128xbf16>, vector<256x128xf32> -> vector<256x128xf32>
    %283 = arith.addf %274, %282 : vector<256x128xf32>
    %284 = vector.broadcast %213 : vector<1x128xf32> to vector<256x128xf32>
    %285 = arith.addf %283, %284 : vector<256x128xf32>
    %c0_103 = arith.constant 0 : index
    %c0_104 = arith.constant 0 : index
    %286 = vector.load %arg10[%c0_103, %c0_104] : memref<128x128xf32, #tpu.memory_space<vmem>>, vector<128x128xf32>
    %cst_105 = arith.constant dense<0.000000e+00> : vector<256x128xf32>
    %287 = tpu.matmul %1, %286, %cst_105 {dimension_numbers = #tpu.dot_dimension_numbers<[1], [0], [0], [1], [0, 0, 1, 1], [], []>} : vector<256x128xf32>, vector<128x128xf32>, vector<256x128xf32> -> vector<256x128xf32>
    %c0_106 = arith.constant 0 : index
    %c0_107 = arith.constant 0 : index
    %288 = vector.load %arg11[%c0_106, %c0_107] : memref<1x128xf32, #tpu.memory_space<vmem>>, vector<1x128xf32>
    %289 = vector.broadcast %288 : vector<1x128xf32> to vector<256x128xf32>
    %290 = arith.addf %287, %289 : vector<256x128xf32>
    %291 = arith.addf %290, %285 : vector<256x128xf32>
    %c0_108 = arith.constant 0 : index
    %c0_109 = arith.constant 0 : index
    %c0_110 = arith.constant 0 : index
    %292 = vector.load %arg12[%c0_108, %c0_109, %c0_110] : memref<1x256x128xf32, #tpu.memory_space<vmem>>, vector<1x256x128xf32>
    %293 = vector.shape_cast %292 : vector<1x256x128xf32> to vector<256x128xf32>
    %294 = vector.shape_cast %291 : vector<256x128xf32> to vector<1x256x128xf32>
    tpu.vector_store %arg12[%c0_108, %c0_109, %c0_110], %294 {strides = array<i32>} : memref<1x256x128xf32, #tpu.memory_space<vmem>>, vector<1x256x128xf32>,
    return
  }
  func.func @transform_0(%arg0: i32) -> (i32, i32, i32) {
    %c0_i32 = arith.constant 0 : i32
    %c0_i32_0 = arith.constant 0 : i32
    %c0_i32_1 = arith.constant 0 : i32
    return %arg0, %c0_i32, %c0_i32_0 : i32, i32, i32
  }
  func.func @transform_1(%arg0: i32) -> (i32, i32, i32) {
    %c0_i32 = arith.constant 0 : i32
    %c0_i32_0 = arith.constant 0 : i32
    %c0_i32_1 = arith.constant 0 : i32
    return %arg0, %c0_i32, %c0_i32_0 : i32, i32, i32
  }
  func.func @transform_2(%arg0: i32) -> (i32, i32) {
    %c0_i32 = arith.constant 0 : i32
    %c0_i32_0 = arith.constant 0 : i32
    %c0_i32_1 = arith.constant 0 : i32
    return %c0_i32, %c0_i32_0 : i32, i32
  }
  func.func @transform_3(%arg0: i32) -> (i32, i32) {
    %c0_i32 = arith.constant 0 : i32
    %c0_i32_0 = arith.constant 0 : i32
    %c0_i32_1 = arith.constant 0 : i32
    return %c0_i32, %c0_i32_0 : i32, i32
  }
  func.func @transform_4(%arg0: i32) -> (i32, i32) {
    %c0_i32 = arith.constant 0 : i32
    %c0_i32_0 = arith.constant 0 : i32
    %c0_i32_1 = arith.constant 0 : i32
    return %c0_i32, %c0_i32_0 : i32, i32
  }
  func.func @transform_5(%arg0: i32) -> (i32, i32) {
    %c0_i32 = arith.constant 0 : i32
    %c0_i32_0 = arith.constant 0 : i32
    %c0_i32_1 = arith.constant 0 : i32
    return %c0_i32, %c0_i32_0 : i32, i32
  }
  func.func @transform_6(%arg0: i32) -> (i32, i32) {
    %c0_i32 = arith.constant 0 : i32
    %c0_i32_0 = arith.constant 0 : i32
    %c0_i32_1 = arith.constant 0 : i32
    return %c0_i32, %c0_i32_0 : i32, i32
  }
  func.func @transform_7(%arg0: i32) -> (i32, i32) {
    %c0_i32 = arith.constant 0 : i32
    %c0_i32_0 = arith.constant 0 : i32
    %c0_i32_1 = arith.constant 0 : i32
    return %c0_i32, %c0_i32_0 : i32, i32
  }
  func.func @transform_8(%arg0: i32) -> (i32, i32) {
    %c0_i32 = arith.constant 0 : i32
    %c0_i32_0 = arith.constant 0 : i32
    %c0_i32_1 = arith.constant 0 : i32
    return %c0_i32, %c0_i32_0 : i32, i32
  }
  func.func @transform_9(%arg0: i32) -> (i32, i32) {
    %c0_i32 = arith.constant 0 : i32
    %c0_i32_0 = arith.constant 0 : i32
    %c0_i32_1 = arith.constant 0 : i32
    return %c0_i32, %c0_i32_0 : i32, i32
  }
  func.func @transform_10(%arg0: i32) -> (i32, i32) {
    %c0_i32 = arith.constant 0 : i32
    %c0_i32_0 = arith.constant 0 : i32
    %c0_i32_1 = arith.constant 0 : i32
    return %c0_i32, %c0_i32_0 : i32, i32
  }
  func.func @transform_11(%arg0: i32) -> (i32, i32, i32) {
    %c0_i32 = arith.constant 0 : i32
    %c0_i32_0 = arith.constant 0 : i32
    %c0_i32_1 = arith.constant 0 : i32
    return %arg0, %c0_i32, %c0_i32_0 : i32, i32, i32
  }
}

module attributes {stable_mosaic.version = 11 : i64} {
  func.func @_resblock_kernel(%arg0: i32, %arg1: memref<1x256x128xf32, #tpu.memory_space<vmem>>, %arg2: memref<1x1x128xf32, #tpu.memory_space<vmem>>, %arg3: memref<1x128xf32, #tpu.memory_space<vmem>>, %arg4: memref<1x128xf32, #tpu.memory_space<vmem>>, %arg5: memref<1152x128xbf16, #tpu.memory_space<vmem>>, %arg6: memref<1x128xf32, #tpu.memory_space<vmem>>, %arg7: memref<1x128xf32, #tpu.memory_space<vmem>>, %arg8: memref<1152x128xbf16, #tpu.memory_space<vmem>>, %arg9: memref<1x128xf32, #tpu.memory_space<vmem>>, %arg10: memref<128x128xf32, #tpu.memory_space<vmem>>, %arg11: memref<1x128xf32, #tpu.memory_space<vmem>>, %arg12: memref<1x256x128xf32, #tpu.memory_space<vmem>>) attributes {dimension_semantics = [#tpu.dimension_semantics<parallel>], iteration_bounds = array<i64: 2>, scalar_prefetch = 0 : i64, scratch_operands = 0 : i64, tpu.core_type = #tpu.core_type<tc>, window_params = [{transform_indices = @transform_0, window_bounds = array<i64: 1, 256, 128>}, {transform_indices = @transform_1, window_bounds = array<i64: 1, 1, 128>}, {pipeline_mode = #tpu.pipeline_mode<synchronous>, transform_indices = @transform_2, window_bounds = array<i64: 1, 128>}, {pipeline_mode = #tpu.pipeline_mode<synchronous>, transform_indices = @transform_3, window_bounds = array<i64: 1, 128>}, {pipeline_mode = #tpu.pipeline_mode<synchronous>, transform_indices = @transform_4, window_bounds = array<i64: 1152, 128>}, {pipeline_mode = #tpu.pipeline_mode<synchronous>, transform_indices = @transform_5, window_bounds = array<i64: 1, 128>}, {pipeline_mode = #tpu.pipeline_mode<synchronous>, transform_indices = @transform_6, window_bounds = array<i64: 1, 128>}, {pipeline_mode = #tpu.pipeline_mode<synchronous>, transform_indices = @transform_7, window_bounds = array<i64: 1152, 128>}, {pipeline_mode = #tpu.pipeline_mode<synchronous>, transform_indices = @transform_8, window_bounds = array<i64: 1, 128>}, {pipeline_mode = #tpu.pipeline_mode<synchronous>, transform_indices = @transform_9, window_bounds = array<i64: 128, 128>}, {pipeline_mode = #tpu.pipeline_mode<synchronous>, transform_indices = @transform_10, window_bounds = array<i64: 1, 128>}, {transform_indices = @transform_11, window_bounds = array<i64: 1, 256, 128>}]} {
    %c0 = arith.constant 0 : index
    %c0_0 = arith.constant 0 : index
    %c0_1 = arith.constant 0 : index
    %0 = vector.load %arg1[%c0, %c0_0, %c0_1] : memref<1x256x128xf32, #tpu.memory_space<vmem>>, vector<1x256x128xf32>
    %1 = vector.shape_cast %0 : vector<1x256x128xf32> to vector<256x128xf32>
    %2 = tpu.iota {dimensions = array<i32: 0>} : vector<256x1xi32>
    %c16_i32 = arith.constant 16 : i32
    %c0_i32 = arith.constant 0 : i32
    %3 = arith.cmpi eq, %c16_i32, %c0_i32 : i32
    %c1_i32 = arith.constant 1 : i32
    %4 = arith.select %3, %c1_i32, %c16_i32 : i32
    %5 = vector.broadcast %4 : i32 to vector<256x1xi32>
    %6 = arith.remsi %2, %5 : vector<256x1xi32>
    %c0_i32_2 = arith.constant 0 : i32
    %7 = vector.broadcast %c0_i32_2 : i32 to vector<256x1xi32>
    %8 = arith.cmpi ne, %6, %7 : vector<256x1xi32>
    %c0_i32_3 = arith.constant 0 : i32
    %9 = vector.broadcast %c0_i32_3 : i32 to vector<256x1xi32>
    %10 = arith.cmpi slt, %6, %9 : vector<256x1xi32>
    %c0_i32_4 = arith.constant 0 : i32
    %11 = arith.cmpi slt, %4, %c0_i32_4 : i32
    %12 = vector.broadcast %11 : i1 to vector<256x1xi1>
    %13 = vector.broadcast %12 : vector<256x1xi1> to vector<256x1xi1>
    %14 = arith.xori %10, %13 : vector<256x1xi1>
    %15 = arith.andi %14, %8 : vector<256x1xi1>
    %16 = vector.broadcast %4 : i32 to vector<256x1xi32>
    %17 = arith.addi %6, %16 : vector<256x1xi32>
    %18 = arith.select %15, %17, %6 : vector<256x1xi1>, vector<256x1xi32>
    %c1_i32_5 = arith.constant 1 : i32
    %19 = vector.broadcast %c1_i32_5 : i32 to vector<256x1xi32>
    %20 = arith.cmpi sge, %18, %19 : vector<256x1xi32>
    %c14_i32 = arith.constant 14 : i32
    %21 = vector.broadcast %c14_i32 : i32 to vector<256x1xi32>
    %22 = arith.cmpi sle, %18, %21 : vector<256x1xi32>
    %c0_6 = arith.constant 0 : index
    %c0_7 = arith.constant 0 : index
    %23 = vector.load %arg3[%c0_6, %c0_7] : memref<1x128xf32, #tpu.memory_space<vmem>>, vector<1x128xf32>
    %c0_8 = arith.constant 0 : index
    %c0_9 = arith.constant 0 : index
    %24 = vector.load %arg4[%c0_8, %c0_9] : memref<1x128xf32, #tpu.memory_space<vmem>>, vector<1x128xf32>
    %cst = arith.constant dense<0.000000e+00> : vector<128xf32>
    %25 = vector.multi_reduction <add>, %1, %cst [0] : vector<256x128xf32> to vector<128xf32>
    %26 = vector.shape_cast %25 : vector<128xf32> to vector<1x128xf32>
    %cst_10 = arith.constant 3.906250e-03 : f32
    %27 = vector.broadcast %cst_10 : f32 to vector<1x128xf32>
    %28 = arith.mulf %26, %27 : vector<1x128xf32>
    %29 = vector.broadcast %28 : vector<1x128xf32> to vector<256x128xf32>
    %30 = arith.subf %1, %29 : vector<256x128xf32>
    %31 = vector.broadcast %28 : vector<1x128xf32> to vector<256x128xf32>
    %32 = arith.subf %1, %31 : vector<256x128xf32>
    %33 = arith.mulf %30, %32 : vector<256x128xf32>
    %cst_11 = arith.constant dense<0.000000e+00> : vector<128xf32>
    %34 = vector.multi_reduction <add>, %33, %cst_11 [0] : vector<256x128xf32> to vector<128xf32>
    %35 = vector.shape_cast %34 : vector<128xf32> to vector<1x128xf32>
    %cst_12 = arith.constant 3.906250e-03 : f32
    %36 = vector.broadcast %cst_12 : f32 to vector<1x128xf32>
    %37 = arith.mulf %35, %36 : vector<1x128xf32>
    %cst_13 = arith.constant 9.99999974E-6 : f32
    %38 = vector.broadcast %cst_13 : f32 to vector<1x128xf32>
    %39 = arith.addf %37, %38 : vector<1x128xf32>
    %40 = math.rsqrt %39 : vector<1x128xf32>
    %41 = arith.mulf %40, %23 : vector<1x128xf32>
    %42 = vector.broadcast %41 : vector<1x128xf32> to vector<256x128xf32>
    %43 = arith.mulf %1, %42 : vector<256x128xf32>
    %44 = arith.mulf %28, %41 : vector<1x128xf32>
    %45 = arith.subf %24, %44 : vector<1x128xf32>
    %46 = vector.broadcast %45 : vector<1x128xf32> to vector<256x128xf32>
    %47 = arith.addf %43, %46 : vector<256x128xf32>
    %48 = arith.negf %47 : vector<256x128xf32>
    %49 = math.exp %48 : vector<256x128xf32>
    %cst_14 = arith.constant 1.000000e+00 : f32
    %50 = vector.broadcast %cst_14 : f32 to vector<256x128xf32>
    %51 = arith.addf %50, %49 : vector<256x128xf32>
    %52 = arith.divf %50, %51 : vector<256x128xf32>
    %53 = arith.mulf %47, %52 : vector<256x128xf32>
    %c0_15 = arith.constant 0 : index
    %c0_16 = arith.constant 0 : index
    %c0_17 = arith.constant 0 : index
    %54 = vector.load %arg2[%c0_15, %c0_16, %c0_17] : memref<1x1x128xf32, #tpu.memory_space<vmem>>, vector<1x1x128xf32>
    %55 = vector.shape_cast %54 : vector<1x1x128xf32> to vector<1x128xf32>
    %cst_18 = arith.constant 0.000000e+00 : f32
    %56 = vector.broadcast %cst_18 : f32 to vector<24x128xf32>
    %57 = tpu.concatenate %56, %53, %56 in 0 : vector<24x128xf32>, vector<256x128xf32>, vector<24x128xf32> -> vector<304x128xf32>
    %58 = vector.extract_strided_slice %57 {offsets = [7, 0], sizes = [256, 128], strides = [1, 1]} : vector<304x128xf32> to vector<256x128xf32>
    %cst_19 = arith.constant 0.000000e+00 : f32
    %59 = vector.shape_cast %20 : vector<256x1xi1> to vector<256x1xi1>
    %60 = vector.broadcast %59 : vector<256x1xi1> to vector<256x128xi1>
    %61 = vector.broadcast %cst_19 : f32 to vector<256x128xf32>
    %62 = arith.select %60, %58, %61 : vector<256x128xi1>, vector<256x128xf32>
    %63 = arith.truncf %62 : vector<256x128xf32> to vector<256x128xbf16>
    %c0_20 = arith.constant 0 : index
    %c0_21 = arith.constant 0 : index
    %64 = vector.load %arg5[%c0_20, %c0_21] : memref<1152x128xbf16, #tpu.memory_space<vmem>>, vector<128x128xbf16>
    %cst_22 = arith.constant dense<0.000000e+00> : vector<256x128xf32>
    %65 = tpu.matmul %63, %64, %cst_22 {dimension_numbers = #tpu.dot_dimension_numbers<[1], [0], [0], [1], [0, 0, 1, 1], [], []>} : vector<256x128xbf16>, vector<128x128xbf16>, vector<256x128xf32> -> vector<256x128xf32>
    %66 = vector.extract_strided_slice %57 {offsets = [8, 0], sizes = [256, 128], strides = [1, 1]} : vector<304x128xf32> to vector<256x128xf32>
    %67 = arith.truncf %66 : vector<256x128xf32> to vector<256x128xbf16>
    %c128 = arith.constant 128 : index
    %c0_23 = arith.constant 0 : index
    %68 = vector.load %arg5[%c128, %c0_23] : memref<1152x128xbf16, #tpu.memory_space<vmem>>, vector<128x128xbf16>
    %cst_24 = arith.constant dense<0.000000e+00> : vector<256x128xf32>
    %69 = tpu.matmul %67, %68, %cst_24 {dimension_numbers = #tpu.dot_dimension_numbers<[1], [0], [0], [1], [0, 0, 1, 1], [], []>} : vector<256x128xbf16>, vector<128x128xbf16>, vector<256x128xf32> -> vector<256x128xf32>
    %70 = arith.addf %65, %69 : vector<256x128xf32>
    %71 = vector.extract_strided_slice %57 {offsets = [9, 0], sizes = [256, 128], strides = [1, 1]} : vector<304x128xf32> to vector<256x128xf32>
    %cst_25 = arith.constant 0.000000e+00 : f32
    %72 = vector.shape_cast %22 : vector<256x1xi1> to vector<256x1xi1>
    %73 = vector.broadcast %72 : vector<256x1xi1> to vector<256x128xi1>
    %74 = vector.broadcast %cst_25 : f32 to vector<256x128xf32>
    %75 = arith.select %73, %71, %74 : vector<256x128xi1>, vector<256x128xf32>
    %76 = arith.truncf %75 : vector<256x128xf32> to vector<256x128xbf16>
    %c256 = arith.constant 256 : index
    %c0_26 = arith.constant 0 : index
    %77 = vector.load %arg5[%c256, %c0_26] : memref<1152x128xbf16, #tpu.memory_space<vmem>>, vector<128x128xbf16>
    %cst_27 = arith.constant dense<0.000000e+00> : vector<256x128xf32>
    %78 = tpu.matmul %76, %77, %cst_27 {dimension_numbers = #tpu.dot_dimension_numbers<[1], [0], [0], [1], [0, 0, 1, 1], [], []>} : vector<256x128xbf16>, vector<128x128xbf16>, vector<256x128xf32> -> vector<256x128xf32>
    %79 = arith.addf %70, %78 : vector<256x128xf32>
    %80 = vector.extract_strided_slice %57 {offsets = [23, 0], sizes = [256, 128], strides = [1, 1]} : vector<304x128xf32> to vector<256x128xf32>
    %cst_28 = arith.constant 0.000000e+00 : f32
    %81 = vector.shape_cast %20 : vector<256x1xi1> to vector<256x1xi1>
    %82 = vector.broadcast %81 : vector<256x1xi1> to vector<256x128xi1>
    %83 = vector.broadcast %cst_28 : f32 to vector<256x128xf32>
    %84 = arith.select %82, %80, %83 : vector<256x128xi1>, vector<256x128xf32>
    %85 = arith.truncf %84 : vector<256x128xf32> to vector<256x128xbf16>
    %c384 = arith.constant 384 : index
    %c0_29 = arith.constant 0 : index
    %86 = vector.load %arg5[%c384, %c0_29] : memref<1152x128xbf16, #tpu.memory_space<vmem>>, vector<128x128xbf16>
    %cst_30 = arith.constant dense<0.000000e+00> : vector<256x128xf32>
    %87 = tpu.matmul %85, %86, %cst_30 {dimension_numbers = #tpu.dot_dimension_numbers<[1], [0], [0], [1], [0, 0, 1, 1], [], []>} : vector<256x128xbf16>, vector<128x128xbf16>, vector<256x128xf32> -> vector<256x128xf32>
    %88 = arith.addf %79, %87 : vector<256x128xf32>
    %89 = vector.extract_strided_slice %57 {offsets = [24, 0], sizes = [256, 128], strides = [1, 1]} : vector<304x128xf32> to vector<256x128xf32>
    %90 = arith.truncf %89 : vector<256x128xf32> to vector<256x128xbf16>
    %c512 = arith.constant 512 : index
    %c0_31 = arith.constant 0 : index
    %91 = vector.load %arg5[%c512, %c0_31] : memref<1152x128xbf16, #tpu.memory_space<vmem>>, vector<128x128xbf16>
    %cst_32 = arith.constant dense<0.000000e+00> : vector<256x128xf32>
    %92 = tpu.matmul %90, %91, %cst_32 {dimension_numbers = #tpu.dot_dimension_numbers<[1], [0], [0], [1], [0, 0, 1, 1], [], []>} : vector<256x128xbf16>, vector<128x128xbf16>, vector<256x128xf32> -> vector<256x128xf32>
    %93 = arith.addf %88, %92 : vector<256x128xf32>
    %94 = vector.extract_strided_slice %57 {offsets = [25, 0], sizes = [256, 128], strides = [1, 1]} : vector<304x128xf32> to vector<256x128xf32>
    %cst_33 = arith.constant 0.000000e+00 : f32
    %95 = vector.shape_cast %22 : vector<256x1xi1> to vector<256x1xi1>
    %96 = vector.broadcast %95 : vector<256x1xi1> to vector<256x128xi1>
    %97 = vector.broadcast %cst_33 : f32 to vector<256x128xf32>
    %98 = arith.select %96, %94, %97 : vector<256x128xi1>, vector<256x128xf32>
    %99 = arith.truncf %98 : vector<256x128xf32> to vector<256x128xbf16>
    %c640 = arith.constant 640 : index
    %c0_34 = arith.constant 0 : index
    %100 = vector.load %arg5[%c640, %c0_34] : memref<1152x128xbf16, #tpu.memory_space<vmem>>, vector<128x128xbf16>
    %cst_35 = arith.constant dense<0.000000e+00> : vector<256x128xf32>
    %101 = tpu.matmul %99, %100, %cst_35 {dimension_numbers = #tpu.dot_dimension_numbers<[1], [0], [0], [1], [0, 0, 1, 1], [], []>} : vector<256x128xbf16>, vector<128x128xbf16>, vector<256x128xf32> -> vector<256x128xf32>
    %102 = arith.addf %93, %101 : vector<256x128xf32>
    %103 = vector.extract_strided_slice %57 {offsets = [39, 0], sizes = [256, 128], strides = [1, 1]} : vector<304x128xf32> to vector<256x128xf32>
    %cst_36 = arith.constant 0.000000e+00 : f32
    %104 = vector.shape_cast %20 : vector<256x1xi1> to vector<256x1xi1>
    %105 = vector.broadcast %104 : vector<256x1xi1> to vector<256x128xi1>
    %106 = vector.broadcast %cst_36 : f32 to vector<256x128xf32>
    %107 = arith.select %105, %103, %106 : vector<256x128xi1>, vector<256x128xf32>
    %108 = arith.truncf %107 : vector<256x128xf32> to vector<256x128xbf16>
    %c768 = arith.constant 768 : index
    %c0_37 = arith.constant 0 : index
    %109 = vector.load %arg5[%c768, %c0_37] : memref<1152x128xbf16, #tpu.memory_space<vmem>>, vector<128x128xbf16>
    %cst_38 = arith.constant dense<0.000000e+00> : vector<256x128xf32>
    %110 = tpu.matmul %108, %109, %cst_38 {dimension_numbers = #tpu.dot_dimension_numbers<[1], [0], [0], [1], [0, 0, 1, 1], [], []>} : vector<256x128xbf16>, vector<128x128xbf16>, vector<256x128xf32> -> vector<256x128xf32>
    %111 = arith.addf %102, %110 : vector<256x128xf32>
    %112 = vector.extract_strided_slice %57 {offsets = [40, 0], sizes = [256, 128], strides = [1, 1]} : vector<304x128xf32> to vector<256x128xf32>
    %113 = arith.truncf %112 : vector<256x128xf32> to vector<256x128xbf16>
    %c896 = arith.constant 896 : index
    %c0_39 = arith.constant 0 : index
    %114 = vector.load %arg5[%c896, %c0_39] : memref<1152x128xbf16, #tpu.memory_space<vmem>>, vector<128x128xbf16>
    %cst_40 = arith.constant dense<0.000000e+00> : vector<256x128xf32>
    %115 = tpu.matmul %113, %114, %cst_40 {dimension_numbers = #tpu.dot_dimension_numbers<[1], [0], [0], [1], [0, 0, 1, 1], [], []>} : vector<256x128xbf16>, vector<128x128xbf16>, vector<256x128xf32> -> vector<256x128xf32>
    %116 = arith.addf %111, %115 : vector<256x128xf32>
    %117 = vector.extract_strided_slice %57 {offsets = [41, 0], sizes = [256, 128], strides = [1, 1]} : vector<304x128xf32> to vector<256x128xf32>
    %cst_41 = arith.constant 0.000000e+00 : f32
    %118 = vector.shape_cast %22 : vector<256x1xi1> to vector<256x1xi1>
    %119 = vector.broadcast %118 : vector<256x1xi1> to vector<256x128xi1>
    %120 = vector.broadcast %cst_41 : f32 to vector<256x128xf32>
    %121 = arith.select %119, %117, %120 : vector<256x128xi1>, vector<256x128xf32>
    %122 = arith.truncf %121 : vector<256x128xf32> to vector<256x128xbf16>
    %c1024 = arith.constant 1024 : index
    %c0_42 = arith.constant 0 : index
    %123 = vector.load %arg5[%c1024, %c0_42] : memref<1152x128xbf16, #tpu.memory_space<vmem>>, vector<128x128xbf16>
    %cst_43 = arith.constant dense<0.000000e+00> : vector<256x128xf32>
    %124 = tpu.matmul %122, %123, %cst_43 {dimension_numbers = #tpu.dot_dimension_numbers<[1], [0], [0], [1], [0, 0, 1, 1], [], []>} : vector<256x128xbf16>, vector<128x128xbf16>, vector<256x128xf32> -> vector<256x128xf32>
    %125 = arith.addf %116, %124 : vector<256x128xf32>
    %126 = vector.broadcast %55 : vector<1x128xf32> to vector<256x128xf32>
    %127 = arith.addf %125, %126 : vector<256x128xf32>
    %c0_44 = arith.constant 0 : index
    %c0_45 = arith.constant 0 : index
    %128 = vector.load %arg6[%c0_44, %c0_45] : memref<1x128xf32, #tpu.memory_space<vmem>>, vector<1x128xf32>
    %c0_46 = arith.constant 0 : index
    %c0_47 = arith.constant 0 : index
    %129 = vector.load %arg7[%c0_46, %c0_47] : memref<1x128xf32, #tpu.memory_space<vmem>>, vector<1x128xf32>
    %cst_48 = arith.constant dense<0.000000e+00> : vector<128xf32>
    %130 = vector.multi_reduction <add>, %127, %cst_48 [0] : vector<256x128xf32> to vector<128xf32>
    %131 = vector.shape_cast %130 : vector<128xf32> to vector<1x128xf32>
    %132 = tpu.iota {dimensions = array<i32: 1>} : vector<1x128xi32>
    %c2_i32 = arith.constant 2 : i32
    %c0_i32_49 = arith.constant 0 : i32
    %133 = arith.cmpi eq, %c2_i32, %c0_i32_49 : i32
    %c1_i32_50 = arith.constant 1 : i32
    %134 = arith.select %133, %c1_i32_50, %c2_i32 : i32
    %135 = vector.broadcast %134 : i32 to vector<1x128xi32>
    %136 = arith.remsi %132, %135 : vector<1x128xi32>
    %c0_i32_51 = arith.constant 0 : i32
    %137 = vector.broadcast %c0_i32_51 : i32 to vector<1x128xi32>
    %138 = arith.cmpi ne, %136, %137 : vector<1x128xi32>
    %c0_i32_52 = arith.constant 0 : i32
    %139 = vector.broadcast %c0_i32_52 : i32 to vector<1x128xi32>
    %140 = arith.cmpi slt, %136, %139 : vector<1x128xi32>
    %c0_i32_53 = arith.constant 0 : i32
    %141 = arith.cmpi slt, %134, %c0_i32_53 : i32
    %142 = vector.broadcast %141 : i1 to vector<1x128xi1>
    %143 = vector.broadcast %142 : vector<1x128xi1> to vector<1x128xi1>
    %144 = arith.xori %140, %143 : vector<1x128xi1>
    %145 = arith.andi %144, %138 : vector<1x128xi1>
    %146 = vector.broadcast %134 : i32 to vector<1x128xi32>
    %147 = arith.addi %136, %146 : vector<1x128xi32>
    %148 = arith.select %145, %147, %136 : vector<1x128xi1>, vector<1x128xi32>
    %149 = vector.extract_strided_slice %131 {offsets = [0, 1], sizes = [1, 127], strides = [1, 1]} : vector<1x128xf32> to vector<1x127xf32>
    %150 = vector.extract_strided_slice %131 {offsets = [0, 0], sizes = [1, 1], strides = [1, 1]} : vector<1x128xf32> to vector<1x1xf32>
    %151 = tpu.concatenate %149, %150 in 1 : vector<1x127xf32>, vector<1x1xf32> -> vector<1x128xf32>
    %152 = vector.extract_strided_slice %131 {offsets = [0, 127], sizes = [1, 1], strides = [1, 1]} : vector<1x128xf32> to vector<1x1xf32>
    %153 = vector.extract_strided_slice %131 {offsets = [0, 0], sizes = [1, 127], strides = [1, 1]} : vector<1x128xf32> to vector<1x127xf32>
    %154 = tpu.concatenate %152, %153 in 1 : vector<1x1xf32>, vector<1x127xf32> -> vector<1x128xf32>
    %c1_i32_54 = arith.constant 1 : i32
    %155 = vector.broadcast %c1_i32_54 : i32 to vector<1x128xi32>
    %156 = arith.cmpi slt, %148, %155 : vector<1x128xi32>
    %157 = arith.select %156, %151, %154 : vector<1x128xi1>, vector<1x128xf32>
    %158 = arith.addf %131, %157 : vector<1x128xf32>
    %cst_55 = arith.constant 0.001953125 : f32
    %159 = vector.broadcast %cst_55 : f32 to vector<1x128xf32>
    %160 = arith.mulf %158, %159 : vector<1x128xf32>
    %161 = vector.broadcast %160 : vector<1x128xf32> to vector<256x128xf32>
    %162 = arith.subf %127, %161 : vector<256x128xf32>
    %163 = vector.broadcast %160 : vector<1x128xf32> to vector<256x128xf32>
    %164 = arith.subf %127, %163 : vector<256x128xf32>
    %165 = arith.mulf %162, %164 : vector<256x128xf32>
    %cst_56 = arith.constant dense<0.000000e+00> : vector<128xf32>
    %166 = vector.multi_reduction <add>, %165, %cst_56 [0] : vector<256x128xf32> to vector<128xf32>
    %167 = vector.shape_cast %166 : vector<128xf32> to vector<1x128xf32>
    %168 = tpu.iota {dimensions = array<i32: 1>} : vector<1x128xi32>
    %c2_i32_57 = arith.constant 2 : i32
    %c0_i32_58 = arith.constant 0 : i32
    %169 = arith.cmpi eq, %c2_i32_57, %c0_i32_58 : i32
    %c1_i32_59 = arith.constant 1 : i32
    %170 = arith.select %169, %c1_i32_59, %c2_i32_57 : i32
    %171 = vector.broadcast %170 : i32 to vector<1x128xi32>
    %172 = arith.remsi %168, %171 : vector<1x128xi32>
    %c0_i32_60 = arith.constant 0 : i32
    %173 = vector.broadcast %c0_i32_60 : i32 to vector<1x128xi32>
    %174 = arith.cmpi ne, %172, %173 : vector<1x128xi32>
    %c0_i32_61 = arith.constant 0 : i32
    %175 = vector.broadcast %c0_i32_61 : i32 to vector<1x128xi32>
    %176 = arith.cmpi slt, %172, %175 : vector<1x128xi32>
    %c0_i32_62 = arith.constant 0 : i32
    %177 = arith.cmpi slt, %170, %c0_i32_62 : i32
    %178 = vector.broadcast %177 : i1 to vector<1x128xi1>
    %179 = vector.broadcast %178 : vector<1x128xi1> to vector<1x128xi1>
    %180 = arith.xori %176, %179 : vector<1x128xi1>
    %181 = arith.andi %180, %174 : vector<1x128xi1>
    %182 = vector.broadcast %170 : i32 to vector<1x128xi32>
    %183 = arith.addi %172, %182 : vector<1x128xi32>
    %184 = arith.select %181, %183, %172 : vector<1x128xi1>, vector<1x128xi32>
    %185 = vector.extract_strided_slice %167 {offsets = [0, 1], sizes = [1, 127], strides = [1, 1]} : vector<1x128xf32> to vector<1x127xf32>
    %186 = vector.extract_strided_slice %167 {offsets = [0, 0], sizes = [1, 1], strides = [1, 1]} : vector<1x128xf32> to vector<1x1xf32>
    %187 = tpu.concatenate %185, %186 in 1 : vector<1x127xf32>, vector<1x1xf32> -> vector<1x128xf32>
    %188 = vector.extract_strided_slice %167 {offsets = [0, 127], sizes = [1, 1], strides = [1, 1]} : vector<1x128xf32> to vector<1x1xf32>
    %189 = vector.extract_strided_slice %167 {offsets = [0, 0], sizes = [1, 127], strides = [1, 1]} : vector<1x128xf32> to vector<1x127xf32>
    %190 = tpu.concatenate %188, %189 in 1 : vector<1x1xf32>, vector<1x127xf32> -> vector<1x128xf32>
    %c1_i32_63 = arith.constant 1 : i32
    %191 = vector.broadcast %c1_i32_63 : i32 to vector<1x128xi32>
    %192 = arith.cmpi slt, %184, %191 : vector<1x128xi32>
    %193 = arith.select %192, %187, %190 : vector<1x128xi1>, vector<1x128xf32>
    %194 = arith.addf %167, %193 : vector<1x128xf32>
    %cst_64 = arith.constant 0.001953125 : f32
    %195 = vector.broadcast %cst_64 : f32 to vector<1x128xf32>
    %196 = arith.mulf %194, %195 : vector<1x128xf32>
    %cst_65 = arith.constant 9.99999974E-6 : f32
    %197 = vector.broadcast %cst_65 : f32 to vector<1x128xf32>
    %198 = arith.addf %196, %197 : vector<1x128xf32>
    %199 = math.rsqrt %198 : vector<1x128xf32>
    %200 = arith.mulf %199, %128 : vector<1x128xf32>
    %201 = vector.broadcast %200 : vector<1x128xf32> to vector<256x128xf32>
    %202 = arith.mulf %127, %201 : vector<256x128xf32>
    %203 = arith.mulf %160, %200 : vector<1x128xf32>
    %204 = arith.subf %129, %203 : vector<1x128xf32>
    %205 = vector.broadcast %204 : vector<1x128xf32> to vector<256x128xf32>
    %206 = arith.addf %202, %205 : vector<256x128xf32>
    %207 = arith.negf %206 : vector<256x128xf32>
    %208 = math.exp %207 : vector<256x128xf32>
    %cst_66 = arith.constant 1.000000e+00 : f32
    %209 = vector.broadcast %cst_66 : f32 to vector<256x128xf32>
    %210 = arith.addf %209, %208 : vector<256x128xf32>
    %211 = arith.divf %209, %210 : vector<256x128xf32>
    %212 = arith.mulf %206, %211 : vector<256x128xf32>
    %c0_67 = arith.constant 0 : index
    %c0_68 = arith.constant 0 : index
    %213 = vector.load %arg9[%c0_67, %c0_68] : memref<1x128xf32, #tpu.memory_space<vmem>>, vector<1x128xf32>
    %cst_69 = arith.constant 0.000000e+00 : f32
    %214 = vector.broadcast %cst_69 : f32 to vector<24x128xf32>
    %215 = tpu.concatenate %214, %212, %214 in 0 : vector<24x128xf32>, vector<256x128xf32>, vector<24x128xf32> -> vector<304x128xf32>
    %216 = vector.extract_strided_slice %215 {offsets = [7, 0], sizes = [256, 128], strides = [1, 1]} : vector<304x128xf32> to vector<256x128xf32>
    %cst_70 = arith.constant 0.000000e+00 : f32
    %217 = vector.shape_cast %20 : vector<256x1xi1> to vector<256x1xi1>
    %218 = vector.broadcast %217 : vector<256x1xi1> to vector<256x128xi1>
    %219 = vector.broadcast %cst_70 : f32 to vector<256x128xf32>
    %220 = arith.select %218, %216, %219 : vector<256x128xi1>, vector<256x128xf32>
    %221 = arith.truncf %220 : vector<256x128xf32> to vector<256x128xbf16>
    %c0_71 = arith.constant 0 : index
    %c0_72 = arith.constant 0 : index
    %222 = vector.load %arg8[%c0_71, %c0_72] : memref<1152x128xbf16, #tpu.memory_space<vmem>>, vector<128x128xbf16>
    %cst_73 = arith.constant dense<0.000000e+00> : vector<256x128xf32>
    %223 = tpu.matmul %221, %222, %cst_73 {dimension_numbers = #tpu.dot_dimension_numbers<[1], [0], [0], [1], [0, 0, 1, 1], [], []>} : vector<256x128xbf16>, vector<128x128xbf16>, vector<256x128xf32> -> vector<256x128xf32>
    %224 = vector.extract_strided_slice %215 {offsets = [8, 0], sizes = [256, 128], strides = [1, 1]} : vector<304x128xf32> to vector<256x128xf32>
    %225 = arith.truncf %224 : vector<256x128xf32> to vector<256x128xbf16>
    %c128_74 = arith.constant 128 : index
    %c0_75 = arith.constant 0 : index
    %226 = vector.load %arg8[%c128_74, %c0_75] : memref<1152x128xbf16, #tpu.memory_space<vmem>>, vector<128x128xbf16>
    %cst_76 = arith.constant dense<0.000000e+00> : vector<256x128xf32>
    %227 = tpu.matmul %225, %226, %cst_76 {dimension_numbers = #tpu.dot_dimension_numbers<[1], [0], [0], [1], [0, 0, 1, 1], [], []>} : vector<256x128xbf16>, vector<128x128xbf16>, vector<256x128xf32> -> vector<256x128xf32>
    %228 = arith.addf %223, %227 : vector<256x128xf32>
    %229 = vector.extract_strided_slice %215 {offsets = [9, 0], sizes = [256, 128], strides = [1, 1]} : vector<304x128xf32> to vector<256x128xf32>
    %cst_77 = arith.constant 0.000000e+00 : f32
    %230 = vector.shape_cast %22 : vector<256x1xi1> to vector<256x1xi1>
    %231 = vector.broadcast %230 : vector<256x1xi1> to vector<256x128xi1>
    %232 = vector.broadcast %cst_77 : f32 to vector<256x128xf32>
    %233 = arith.select %231, %229, %232 : vector<256x128xi1>, vector<256x128xf32>
    %234 = arith.truncf %233 : vector<256x128xf32> to vector<256x128xbf16>
    %c256_78 = arith.constant 256 : index
    %c0_79 = arith.constant 0 : index
    %235 = vector.load %arg8[%c256_78, %c0_79] : memref<1152x128xbf16, #tpu.memory_space<vmem>>, vector<128x128xbf16>
    %cst_80 = arith.constant dense<0.000000e+00> : vector<256x128xf32>
    %236 = tpu.matmul %234, %235, %cst_80 {dimension_numbers = #tpu.dot_dimension_numbers<[1], [0], [0], [1], [0, 0, 1, 1], [], []>} : vector<256x128xbf16>, vector<128x128xbf16>, vector<256x128xf32> -> vector<256x128xf32>
    %237 = arith.addf %228, %236 : vector<256x128xf32>
    %238 = vector.extract_strided_slice %215 {offsets = [23, 0], sizes = [256, 128], strides = [1, 1]} : vector<304x128xf32> to vector<256x128xf32>
    %cst_81 = arith.constant 0.000000e+00 : f32
    %239 = vector.shape_cast %20 : vector<256x1xi1> to vector<256x1xi1>
    %240 = vector.broadcast %239 : vector<256x1xi1> to vector<256x128xi1>
    %241 = vector.broadcast %cst_81 : f32 to vector<256x128xf32>
    %242 = arith.select %240, %238, %241 : vector<256x128xi1>, vector<256x128xf32>
    %243 = arith.truncf %242 : vector<256x128xf32> to vector<256x128xbf16>
    %c384_82 = arith.constant 384 : index
    %c0_83 = arith.constant 0 : index
    %244 = vector.load %arg8[%c384_82, %c0_83] : memref<1152x128xbf16, #tpu.memory_space<vmem>>, vector<128x128xbf16>
    %cst_84 = arith.constant dense<0.000000e+00> : vector<256x128xf32>
    %245 = tpu.matmul %243, %244, %cst_84 {dimension_numbers = #tpu.dot_dimension_numbers<[1], [0], [0], [1], [0, 0, 1, 1], [], []>} : vector<256x128xbf16>, vector<128x128xbf16>, vector<256x128xf32> -> vector<256x128xf32>
    %246 = arith.addf %237, %245 : vector<256x128xf32>
    %247 = vector.extract_strided_slice %215 {offsets = [24, 0], sizes = [256, 128], strides = [1, 1]} : vector<304x128xf32> to vector<256x128xf32>
    %248 = arith.truncf %247 : vector<256x128xf32> to vector<256x128xbf16>
    %c512_85 = arith.constant 512 : index
    %c0_86 = arith.constant 0 : index
    %249 = vector.load %arg8[%c512_85, %c0_86] : memref<1152x128xbf16, #tpu.memory_space<vmem>>, vector<128x128xbf16>
    %cst_87 = arith.constant dense<0.000000e+00> : vector<256x128xf32>
    %250 = tpu.matmul %248, %249, %cst_87 {dimension_numbers = #tpu.dot_dimension_numbers<[1], [0], [0], [1], [0, 0, 1, 1], [], []>} : vector<256x128xbf16>, vector<128x128xbf16>, vector<256x128xf32> -> vector<256x128xf32>
    %251 = arith.addf %246, %250 : vector<256x128xf32>
    %252 = vector.extract_strided_slice %215 {offsets = [25, 0], sizes = [256, 128], strides = [1, 1]} : vector<304x128xf32> to vector<256x128xf32>
    %cst_88 = arith.constant 0.000000e+00 : f32
    %253 = vector.shape_cast %22 : vector<256x1xi1> to vector<256x1xi1>
    %254 = vector.broadcast %253 : vector<256x1xi1> to vector<256x128xi1>
    %255 = vector.broadcast %cst_88 : f32 to vector<256x128xf32>
    %256 = arith.select %254, %252, %255 : vector<256x128xi1>, vector<256x128xf32>
    %257 = arith.truncf %256 : vector<256x128xf32> to vector<256x128xbf16>
    %c640_89 = arith.constant 640 : index
    %c0_90 = arith.constant 0 : index
    %258 = vector.load %arg8[%c640_89, %c0_90] : memref<1152x128xbf16, #tpu.memory_space<vmem>>, vector<128x128xbf16>
    %cst_91 = arith.constant dense<0.000000e+00> : vector<256x128xf32>
    %259 = tpu.matmul %257, %258, %cst_91 {dimension_numbers = #tpu.dot_dimension_numbers<[1], [0], [0], [1], [0, 0, 1, 1], [], []>} : vector<256x128xbf16>, vector<128x128xbf16>, vector<256x128xf32> -> vector<256x128xf32>
    %260 = arith.addf %251, %259 : vector<256x128xf32>
    %261 = vector.extract_strided_slice %215 {offsets = [39, 0], sizes = [256, 128], strides = [1, 1]} : vector<304x128xf32> to vector<256x128xf32>
    %cst_92 = arith.constant 0.000000e+00 : f32
    %262 = vector.shape_cast %20 : vector<256x1xi1> to vector<256x1xi1>
    %263 = vector.broadcast %262 : vector<256x1xi1> to vector<256x128xi1>
    %264 = vector.broadcast %cst_92 : f32 to vector<256x128xf32>
    %265 = arith.select %263, %261, %264 : vector<256x128xi1>, vector<256x128xf32>
    %266 = arith.truncf %265 : vector<256x128xf32> to vector<256x128xbf16>
    %c768_93 = arith.constant 768 : index
    %c0_94 = arith.constant 0 : index
    %267 = vector.load %arg8[%c768_93, %c0_94] : memref<1152x128xbf16, #tpu.memory_space<vmem>>, vector<128x128xbf16>
    %cst_95 = arith.constant dense<0.000000e+00> : vector<256x128xf32>
    %268 = tpu.matmul %266, %267, %cst_95 {dimension_numbers = #tpu.dot_dimension_numbers<[1], [0], [0], [1], [0, 0, 1, 1], [], []>} : vector<256x128xbf16>, vector<128x128xbf16>, vector<256x128xf32> -> vector<256x128xf32>
    %269 = arith.addf %260, %268 : vector<256x128xf32>
    %270 = vector.extract_strided_slice %215 {offsets = [40, 0], sizes = [256, 128], strides = [1, 1]} : vector<304x128xf32> to vector<256x128xf32>
    %271 = arith.truncf %270 : vector<256x128xf32> to vector<256x128xbf16>
    %c896_96 = arith.constant 896 : index
    %c0_97 = arith.constant 0 : index
    %272 = vector.load %arg8[%c896_96, %c0_97] : memref<1152x128xbf16, #tpu.memory_space<vmem>>, vector<128x128xbf16>
    %cst_98 = arith.constant dense<0.000000e+00> : vector<256x128xf32>
    %273 = tpu.matmul %271, %272, %cst_98 {dimension_numbers = #tpu.dot_dimension_numbers<[1], [0], [0], [1], [0, 0, 1, 1], [], []>} : vector<256x128xbf16>, vector<128x128xbf16>, vector<256x128xf32> -> vector<256x128xf32>
    %274 = arith.addf %269, %273 : vector<256x128xf32>
    %275 = vector.extract_strided_slice %215 {offsets = [41, 0], sizes = [256, 128], strides = [1, 1]} : vector<304x128xf32> to vector<256x128xf32>
    %cst_99 = arith.constant 0.000000e+00 : f32
    %276 = vector.shape_cast %22 : vector<256x1xi1> to vector<256x1xi1>
    %277 = vector.broadcast %276 : vector<256x1xi1> to vector<256x128xi1>
    %278 = vector.broadcast %cst_99 : f32 to vector<256x128xf32>
    %279 = arith.select %277, %275, %278 : vector<256x128xi1>, vector<256x128xf32>
    %280 = arith.truncf %279 : vector<256x128xf32> to vector<256x128xbf16>
    %c1024_100 = arith.constant 1024 : index
    %c0_101 = arith.constant 0 : index
    %281 = vector.load %arg8[%c1024_100, %c0_101] : memref<1152x128xbf16, #tpu.memory_space<vmem>>, vector<128x128xbf16>
    %cst_102 = arith.constant dense<0.000000e+00> : vector<256x128xf32>
    %282 = tpu.matmul %280, %281, %cst_102 {dimension_numbers = #tpu.dot_dimension_numbers<[1], [0], [0], [1], [0, 0, 1, 1], [], []>} : vector<256x128xbf16>, vector<128x128xbf16>, vector<256x128xf32> -> vector<256x128xf32>
    %283 = arith.addf %274, %282 : vector<256x128xf32>
    %284 = vector.broadcast %213 : vector<1x128xf32> to vector<256x128xf32>
    %285 = arith.addf %283, %284 : vector<256x128xf32>
    %c0_103 = arith.constant 0 : index
    %c0_104 = arith.constant 0 : index
    %286 = vector.load %arg10[%c0_103, %c0_104] : memref<128x128xf32, #tpu.memory_space<vmem>>, vector<128x128xf32>
    %cst_105 = arith.constant dense<0.000000e+00> : vector<256x128xf32>
    %287 = tpu.matmul %1, %286, %cst_105 {dimension_numbers = #tpu.dot_dimension_numbers<[1], [0], [0], [1], [0, 0, 1, 1], [], []>} : vector<256x128xf32>, vector<128x128xf32>, vector<256x128xf32> -> vector<256x128xf32>
    %c0_106 = arith.constant 0 : index
    %c0_107 = arith.constant 0 : index
    %288 = vector.load %arg11[%c0_106, %c0_107] : memref<1x128xf32, #tpu.memory_space<vmem>>, vector<1x128xf32>
    %289 = vector.broadcast %288 : vector<1x128xf32> to vector<256x128xf32>
    %290 = arith.addf %287, %289 : vector<256x128xf32>
    %291 = arith.addf %290, %285 : vector<256x128xf32>
    %c0_108 = arith.constant 0 : index
    %c0_109 = arith.constant 0 : index
    %c0_110 = arith.constant 0 : index
    %292 = vector.load %arg12[%c0_108, %c0_109, %c0_110] : memref<1x256x128xf32, #tpu.memory_space<vmem>>, vector<1x256x128xf32>
    %293 = vector.shape_cast %292 : vector<1x256x128xf32> to vector<256x128xf32>
    %294 = vector.shape_cast %291 : vector<256x128xf32> to vector<1x256x128xf32>
    tpu.vector_store %arg12[%c0_108, %c0_109, %c0_110], %294 {strides = array<i32>} : memref<1x256x128xf32, #tpu.memory_space<vmem>>, vector<1x256x128xf32>,
    return
  }
  func.func @transform_0(%arg0: i32) -> (i32, i32, i32) {
    %c0_i32 = arith.constant 0 : i32
    %c0_i32_0 = arith.constant 0 : i32
    %c0_i32_1 = arith.constant 0 : i32
    return %arg0, %c0_i32, %c0_i32_0 : i32, i32, i32
  }
  func.func @transform_1(%arg0: i32) -> (i32, i32, i32) {
    %c0_i32 = arith.constant 0 : i32
    %c0_i32_0 = arith.constant 0 : i32
    %c0_i32_1 = arith.constant 0 : i32
    return %arg0, %c0_i32, %c0_i32_0 : i32, i32, i32
  }
  func.func @transform_2(%arg0: i32) -> (i32, i32) {
    %c0_i32 = arith.constant 0 : i32
    %c0_i32_0 = arith.constant 0 : i32
    %c0_i32_1 = arith.constant 0 : i32
    return %c0_i32, %c0_i32_0 : i32, i32
  }
  func.func @transform_3(%arg0: i32) -> (i32, i32) {
    %c0_i32 = arith.constant 0 : i32
    %c0_i32_0 = arith.constant 0 : i32
    %c0_i32_1 = arith.constant 0 : i32
    return %c0_i32, %c0_i32_0 : i32, i32
  }
  func.func @transform_4(%arg0: i32) -> (i32, i32) {
    %c0_i32 = arith.constant 0 : i32
    %c0_i32_0 = arith.constant 0 : i32
    %c0_i32_1 = arith.constant 0 : i32
    return %c0_i32, %c0_i32_0 : i32, i32
  }
  func.func @transform_5(%arg0: i32) -> (i32, i32) {
    %c0_i32 = arith.constant 0 : i32
    %c0_i32_0 = arith.constant 0 : i32
    %c0_i32_1 = arith.constant 0 : i32
    return %c0_i32, %c0_i32_0 : i32, i32
  }
  func.func @transform_6(%arg0: i32) -> (i32, i32) {
    %c0_i32 = arith.constant 0 : i32
    %c0_i32_0 = arith.constant 0 : i32
    %c0_i32_1 = arith.constant 0 : i32
    return %c0_i32, %c0_i32_0 : i32, i32
  }
  func.func @transform_7(%arg0: i32) -> (i32, i32) {
    %c0_i32 = arith.constant 0 : i32
    %c0_i32_0 = arith.constant 0 : i32
    %c0_i32_1 = arith.constant 0 : i32
    return %c0_i32, %c0_i32_0 : i32, i32
  }
  func.func @transform_8(%arg0: i32) -> (i32, i32) {
    %c0_i32 = arith.constant 0 : i32
    %c0_i32_0 = arith.constant 0 : i32
    %c0_i32_1 = arith.constant 0 : i32
    return %c0_i32, %c0_i32_0 : i32, i32
  }
  func.func @transform_9(%arg0: i32) -> (i32, i32) {
    %c0_i32 = arith.constant 0 : i32
    %c0_i32_0 = arith.constant 0 : i32
    %c0_i32_1 = arith.constant 0 : i32
    return %c0_i32, %c0_i32_0 : i32, i32
  }
  func.func @transform_10(%arg0: i32) -> (i32, i32) {
    %c0_i32 = arith.constant 0 : i32
    %c0_i32_0 = arith.constant 0 : i32
    %c0_i32_1 = arith.constant 0 : i32
    return %c0_i32, %c0_i32_0 : i32, i32
  }
  func.func @transform_11(%arg0: i32) -> (i32, i32, i32) {
    %c0_i32 = arith.constant 0 : i32
    %c0_i32_0 = arith.constant 0 : i32
    %c0_i32_1 = arith.constant 0 : i32
    return %arg0, %c0_i32, %c0_i32_0 : i32, i32, i32
  }
}

</mosaic_0001>

<bundles_post_ra>
// kernel: tpu_custom_call.1
= control target key start
LH: loop header
LB: loop body
LE: loop exit
PB: predicated region body
PF: predicated region fallthrough
CT: control target
= control target key end

     0   :  { %s14889_s0 = inlined_call_operand.hbm [shape: f32[2,256,128], index: 0, kind: input, shape index: {}]   ;;  %s14890_s1 = inlined_call_operand.vmem [shape: f32[2,1,128], index: 1, kind: input, shape index: {}]   ;;  %s14891_s2 = inlined_call_operand.vmem [shape: f32[1,128], index: 2, kind: input, shape index: {}]   ;;  %s14892_s3 = inlined_call_operand.vmem [shape: f32[1,128], index: 3, kind: input, shape index: {}]   ;;  %s14893_s4 = inlined_call_operand.hbm [shape: bf16[1152,128], index: 4, kind: input, shape index: {}]   ;;  %s14894_s5 = inlined_call_operand.vmem [shape: f32[1,128], index: 5, kind: input, shape index: {}]   ;;  %s14895_s6 = inlined_call_operand.vmem [shape: f32[1,128], index: 6, kind: input, shape index: {}]   ;;  %s14896_s7 = inlined_call_operand.hbm [shape: bf16[1152,128], index: 7, kind: input, shape index: {}]   ;;  %s14897_s8 = inlined_call_operand.vmem [shape: f32[1,128], index: 8, kind: input, shape index: {}]   ;;  %s14898_s9 = inlined_call_operand.hbm [shape: f32[128,128], index: 9, kind: input, shape index: {}]   ;;  %s14899_s10 = inlined_call_operand.vmem [shape: f32[1,128], index: 10, kind: input, shape index: {}]   ;;  %s14900_s11 = inlined_call_operand.hbm [shape: f32[2,256,128], index: 11, kind: output, shape index: {}]  }
   0x1   :  { %15145 = sst [smem:[#allocation70_spill]] %s14897_s8 }
   0x2   :  { %15146 = sst [smem:[#allocation71_spill]] %s14899_s10 }
   0x3   :  { %15147 = sst [smem:[#allocation72_spill]] %s14900_s11 }
   0x4   :  { %16 = vsyncpa [#allocation3], 0 }
   0x5   :  { %18 = vsyncpa [#allocation3 + $0x1], 0 }
   0x6   :  { %19 = vsyncpa [#allocation6], 0 }
   0x7   :  { %20 = vsyncpa [#allocation9], 0 }
   0x8   :  { %21 = vsyncpa [#allocation4], 0 }
   0x9   :  { %23 = vsyncpa [#allocation4 + $0x1], 0  ;;  %s11699_s17 = smov 0   ;;  %s11701_s18 = smov 0  }
   0xa   :  { %s11703_s19 = smov 0   ;;  %s11705_s20 = smov 0  }
   0xb LB: > { %15148 = sst [smem:[#allocation15_spill]] %s11609_s17  ;;  %s11720_s21 = sadd.s32 4294967295, %s11621_s20   ;;  %s11621_s20 = sphi %s11705_s20, %s15672_s20   ;;  %s11617_s19 = sphi %s11703_s19, %s15671_s19   ;;  %s11613_s18 = sphi %s11701_s18, %s15670_s18   ;;  %s11609_s17 = sphi %s11699_s17, %s15669_s17  }
   0xc   : > { %s8111_s22 = sadd.s32 4294967294, %s11621_s20   ;;  %p49_p0 = scmp.ne.s32.totalorder %s11613_s18, %s11609_s17 }
   0xd   : > { %p14902_p1 = scmp.eq.s32.totalorder %s11720_s21, 0  ;;  %p294_p3 = scmp.eq.s32.totalorder %s8111_s22, 1 }
   0xe   : > { %p8112_p5 = scmp.ge.s32.totalorder %s11621_s20, 1  ;;  %p301_p7 = scmp.lt.s32.totalorder %s11621_s20, 3 }
   0xf   : > { %p11729_p4 = por %p14902_p1, %p49_p0  ;;  %p11734_p6 = por %p294_p3, %p49_p0 }
  0x10   : > { %p11739_p8 = pnand %p8112_p5, %p301_p7  ;;  %s11623_s26 = smov [#allocation5]  }
  0x11   : > { %s15149_s23 = scalar_select %p11729_p4, 1, 0 }
  0x12   : > { %s15150_s24 = scalar_select %p11734_p6, 1, 0 }
  0x13   : > { %s15152_s25 = scalar_select %p11739_p8, 1, 0 }
  0x14   : > { %15151 = sst [smem:[#allocation16_spill]] %s15150_s24  ;;  %s319_s27 = sshll.u32 %s11623_s26, 4  ;;  %s11743_s27 = int_to_ptr.vmem [resolvable:$true] %s319_s27 }
  0x15   : > { %p10920_p9 = pneg %p11739_p8  ;;  %s11624_s29 = smov [#allocation7]  }
  0x16   : > { %s338_s30 = sshll.u32 %s11624_s29, 4  ;;  %s11625_s12 = smov [#allocation8]   ;;  %s11754_s30 = int_to_ptr.vmem [resolvable:$true] %s338_s30 }
  0x17   : > { %p11750_p11 = pnand %p10920_p9, %p14902_p1  ;;  %s11756_s13 = sshll.u32 %s11625_s12, 4  ;;  %s355_s13 = int_to_ptr.vmem [resolvable:$true] %s11756_s13 }
  0x18   : > { %s11433_s16 = scalar_lea.hbm %s14893_s4, 9216 }
  0x19   : > { %p11434_p12 = scmp.ne.s32.totalorder %s14893_s4, %s11433_s16  ;;  %p11766_p13 = pneg %p11750_p11 }
  0x1a   : > { %p11440_p5 = scmp.lt.u32.totalorder %s11433_s16, %s14893_s4 }
  0x1b   : > { %p11436_p0 = pnand %p11766_p13, %p11434_p12 }
  0x1d   : > { %p11437_p3 = pneg %p11436_p0 }
  0x1f   : > { %p11442_p7 = pnand %p11440_p5, %p11437_p3 }
  0x21   : > { %11445 = shalt.err (!%p11442_p7)
}
  0x22   : > { %s11446_s14 = scalar_lea.vmem %s11743_s27, 9216  ;;  %p11454_p2 = scmp.lt.s32.totalorder %s11743_s27, %s11743_s27 }
  0x23   : > { %p11447_p9 = scmp.ne.s32.totalorder %s11743_s27, %s11446_s14  ;;  %p11455_p6 = scmp.lt.s32.totalorder %s11446_s14, %s11446_s14 }
  0x25   : > { %p11449_p10 = pnand %p11447_p9, %p11766_p13  ;;  %p11456_p12 = por %p11455_p6, %p11454_p2 }
  0x27   : > { %p11450_p1 = pneg %p11449_p10 }
  0x29   : > { %p11457_p0 = pnand %p11456_p12, %p11450_p1 }
  0x2b   : > { %11460 = shalt.err (!%p11457_p0)
}
  0x2c   : > { %s11626_s15 = smov 64   ;;  %s11627_s16 = smov 4  }
  0x2d   : > { %10923 = dma.hbm_to_vmem [thread:$0]  (!%p11750_p11), %s14893_s4, 9216, %s11743_s27, [#allocation6], %s11626_s15, %s11626_s15, %s11627_s16  }
  0x2e   : > { %s11461_s17 = scalar_lea.hbm %s14896_s7, 9216 }
  0x2f   : > { %p11462_p2 = scmp.ne.s32.totalorder %s14896_s7, %s11461_s17  ;;  %p11468_p10 = scmp.lt.u32.totalorder %s11461_s17, %s14896_s7 }
  0x31   : > { %p11464_p1 = pnand %p11462_p2, %p11766_p13 }
  0x33   : > { %p11465_p6 = pneg %p11464_p1 }
  0x35   : > { %p11470_p3 = pnand %p11468_p10, %p11465_p6 }
  0x37   : > { %11473 = shalt.err (!%p11470_p3)
}
  0x38   : > { %s11474_s27 = scalar_lea.vmem %s11754_s30, 9216  ;;  %p11482_p12 = scmp.lt.s32.totalorder %s11754_s30, %s11754_s30 }
  0x39   : > { %p11475_p5 = scmp.ne.s32.totalorder %s11754_s30, %s11474_s27  ;;  %p11483_p0 = scmp.lt.s32.totalorder %s11474_s27, %s11474_s27 }
  0x3b   : > { %p11477_p7 = pnand %p11475_p5, %p11766_p13  ;;  %p11484_p2 = por %p11483_p0, %p11482_p12 }
  0x3d   : > { %p11478_p9 = pneg %p11477_p7 }
  0x3f   : > { %p11485_p1 = pnand %p11484_p2, %p11478_p9 }
  0x41   : > { %11488 = shalt.err (!%p11485_p1)
}
  0x42   : > { %10926 = dma.hbm_to_vmem [thread:$0]  (!%p11750_p11), %s14896_s7, 9216, %s11754_s30, [#allocation6], %s11626_s15, %s11626_s15, %s11627_s16  }
  0x43   : > { %s11489_s22 = scalar_lea.hbm %s14898_s9, 2048 }
  0x44   : > { %p11490_p6 = scmp.ne.s32.totalorder %s14898_s9, %s11489_s22  ;;  %p11496_p5 = scmp.lt.u32.totalorder %s11489_s22, %s14898_s9 }
  0x46   : > { %p11492_p10 = pnand %p11490_p6, %p11766_p13 }
  0x48   : > { %p11493_p3 = pneg %p11492_p10 }
  0x4a   : > { %p11498_p7 = pnand %p11496_p5, %p11493_p3 }
  0x4c   : > { %11501 = shalt.err (!%p11498_p7)
}
  0x4d   : > { %s11502_s27 = scalar_lea.vmem %s355_s13, 2048  ;;  %p11510_p2 = scmp.lt.s32.totalorder %s355_s13, %s355_s13 }
  0x4e   : > { %p11503_p9 = scmp.ne.s32.totalorder %s355_s13, %s11502_s27  ;;  %p11511_p1 = scmp.lt.s32.totalorder %s11502_s27, %s11502_s27 }
  0x50   : > { %p11505_p12 = pnand %p11503_p9, %p11766_p13  ;;  %p11512_p4 = por %p11511_p1, %p11510_p2 }
  0x52   : > { %p11506_p0 = pneg %p11505_p12 }
  0x54   : > { %p11513_p8 = pnand %p11512_p4, %p11506_p0 }
  0x56   : > { %11516 = shalt.err (!%p11513_p8)
}
  0x57   : > { %s11628_s30 = smov 128   ;;  %s11629_s24 = smov 8  }
  0x58   : > { %10929 = dma.hbm_to_vmem [thread:$0]  (!%p11750_p11), %s14898_s9, 2048, %s355_s13, [#allocation9], %s11628_s30, %s11628_s30, %s11629_s24  }
  0x59   : > { %s11833_s8 = sadd.s32 1, %s11621_s20   ;;  %s36_s11 = sadd.s32 1, %s11617_s19 }
  0x5a   : > { %s33_s10 = ssub.s32 %s11621_s20, %s11833_s8  ;;  %p43_p8 = scmp.ne.s32.totalorder %s11617_s19, %s11613_s18 }
  0x5b   : > { %p34_p4 = scmp.eq.s32.totalorder %s33_s10, 0  ;;  %p44_p13 = scmp.eq.s32.totalorder %s11621_s20, 0 }
  0x5c   : > { %p10941_p6 = scmp.lt.s32.totalorder %s11621_s20, 2  ;;  %p15155_p3 = scmp.eq.s32.totalorder %s11720_s21, 1 }
  0x5d   : > { %s11843_s17 = scalar_select %p34_p4, %s11617_s19, %s36_s11  }
  0x5e   : > { %p45_p10 = por %p44_p13, %p43_p8  ;;  %p11847_p5 = por %p15155_p3, %p43_p8 }
  0x5f   : > { %s371_s22 = sand.u32 1, %s11617_s19   ;;  %s8918_s26 = sshll.u32 %s11621_s20, 12 }
  0x60   : > { %s8117_s13 = sshll.u32 %s371_s22, 8  ;;  %s11856_s14 = scalar_lea.hbm %s14889_s0, %s8918_s26 }
  0x61   : > { %s375_s27 = scalar_lea.vmem [#allocation2], %s8117_s13  ;;  %p11858_p11 = pnand %p10941_p6, %p45_p10 }
  0x62   : > { %s382_s15 = sshll.u32 %s375_s27, 4  ;;  %s11864_s10 = scalar_lea.sflag [#allocation3], %s371_s22  ;;  %s11862_s15 = int_to_ptr.vmem [resolvable:$true] %s382_s15 }
  0x63   : > { %s11517_s11 = scalar_lea.hbm %s11856_s14, 4096  ;;  %p11519_p9 = pneg %p11858_p11 }
  0x64   : > { %p11518_p7 = scmp.ne.s32.totalorder %s11856_s14, %s11517_s11  ;;  %s11522_s29 = scalar_lea.hbm %s14889_s0, 8192 }
  0x65   : > { %p11523_p2 = scmp.lt.u32.totalorder %s11856_s14, %s14889_s0  ;;  %p11524_p1 = scmp.lt.u32.totalorder %s11522_s29, %s11517_s11 }
  0x66   : > { %p11520_p12 = pnand %p11519_p9, %p11518_p7  ;;  %p11526_p8 = scmp.lt.u32.totalorder %s11517_s11, %s11856_s14 }
  0x67   : > { %p11525_p4 = por %p11524_p1, %p11523_p2 }
  0x68   : > { %p11521_p0 = pneg %p11520_p12 }
  0x69   : > { %p11527_p13 = por %p11526_p8, %p11525_p4 }
  0x6b   : > { %p11528_p6 = pnand %p11527_p13, %p11521_p0 }
  0x6d   : > { %11531 = shalt.err (!%p11528_p6)
}
  0x6e   : > { %s11532_s22 = scalar_lea.vmem %s11862_s15, 4096  ;;  %s11630_s26 = smov [#allocation2]  }
  0x6f   : > { %p11533_p10 = scmp.ne.s32.totalorder %s11862_s15, %s11532_s22  ;;  %s11537_s13 = sshll.u32 %s11630_s26, 4  ;;  %s11538_s13 = int_to_ptr.vmem [resolvable:$false] %s11537_s13 }
  0x70   : > { %s11539_s12 = scalar_lea.vmem %s11538_s13, 8192  ;;  %p11540_p12 = scmp.lt.s32.totalorder %s11862_s15, %s11538_s13 }
  0x71   : > { %p11535_p3 = pnand %p11533_p10, %p11519_p9  ;;  %p11541_p2 = scmp.lt.s32.totalorder %s11539_s12, %s11532_s22 }
  0x73   : > { %p11536_p7 = pneg %p11535_p3  ;;  %p11542_p1 = por %p11541_p2, %p11540_p12 }
  0x75   : > { %p11543_p4 = pnand %p11542_p1, %p11536_p7 }
  0x77   : > { %11546 = shalt.err (!%p11543_p4)
}
  0x78   : > { %10933 = dma.hbm_to_vmem [thread:$0]  (!%p11858_p11), %s11856_s14, 4096, %s11862_s15, %s11864_s10, %s11628_s30, %s11628_s30, %s11629_s24  }
  0x79   : > { %p15158_p9 = scmp.ne.s32.totalorder %s15152_s25, 0 }
  0x7b   : > { %400 = sbr.rel (%p15158_p9) target bundleno = 2331 (0x91b), region = 64 }
  0x82   : > { %s11898_s11 = sand.u32 1, %s11613_s18   ;;  %p15159_p0 = scmp.ne.s32.totalorder %s15149_s23, 0 }
  0x83   : > { %s8121_s29 = sshll.u32 %s11898_s11, 8  ;;  %s403_s27 = scalar_lea.sflag [#allocation3], %s11898_s11 }
  0x84   : > { %s11904_s16 = scalar_lea.vmem [#allocation2], %s8121_s29 }
  0x85   : > { %11592 = dma.done.wait (%p15159_p0), %s403_s27, 4096  }
  0x86   : > { %11594 = vsyncadd (%p15159_p0), %s403_s27, 4294963200  ;;  %p15160_p11 = scmp.eq.s32.totalorder %s11720_s21, 0 }
  0x88   : > { %11596 = dma.done.wait (%p15160_p11), [#allocation6], 18432   ;;  %p15161_p8 = pmov %p15160_p11 }
  0x8a   : > { %11598 = vsyncadd (%p15161_p8), [#allocation6], 4294948864  ;;  %p15162_p13 = pmov %p15161_p8 }
  0x8b   : > { %p15163_p6 = pmov %p15161_p8 }
  0x8c   : > { %11600 = dma.done.wait (%p15162_p13), [#allocation9], 2048  }
  0x8d   : > { %11602 = vsyncadd (%p15163_p6), [#allocation9], 4294965248  ;;  %v14908_v0 = vmov 0.0|0.0   ;;  %v10992_v1 = vld [vmem:[#allocation5 + $0x40] sm:$0xff]   ;;  %v10993_v2 = vld [vmem:[#allocation5 + $0x48] sm:$0xff]   ;;  %vm14959_vm0 = vcmask 1046528  }
  0x8e   : > { %9416 = vmatprep.mubr.bf16.mxu0 %v14908_v0  ;;  %9400 = vmatprep.subr.bf16.mxu0 %v10992_v1  ;;  %v10994_v3 = vld [vmem:[#allocation5 + $0x50] sm:$0xff]   ;;  %v10995_v4 = vld [vmem:[#allocation5 + $0x58] sm:$0xff]   ;;  %v11920_v5 = vld [vmem:[%s11904_s16] sm:$0xff]  ;;  %vm14958_vm1 = vcmask 1040384   ;;  %vm14960_vm5 = vmmov 1   ;;  %p460_p10 = scmp.lt.s32.totalorder %s11720_s21, 1 }
  0x8f   : > { %10376 = vmatprep.subr.bf16.mxu1 %v10992_v1  ;;  %9401 = vmatpush3.bf16.msra.mxu0 %v10992_v1  ;;  %v11923_v6 = vld [vmem:[%s11904_s16 + $0x8] sm:$0xff]  ;;  %v11926_v7 = vld [vmem:[%s11904_s16 + $0x10] sm:$0xff]  ;;  %v11931_v9 = vld [vmem:[%s11904_s16 + $0x18] sm:$0xff]  ;;  %s11634_s26 = smov 127   ;;  %s11635_s13 = smov 1  }
  0x90   : > { %10384 = vmatpush3.bf16.msra.mxu1 %v10992_v1  ;;  %9402 = vmatprep.subr.bf16.mxu0 %v10993_v2  ;;  %v979_v8 = vadd.f32 %v11923_v6, %v11920_v5  ;;  %v10996_v10 = vld [vmem:[#allocation5 + $0x60] sm:$0xff]   ;;  %v11939_v14 = vld [vmem:[%s11904_s16 + $0x28] sm:$0xff]  ;;  %v11943_v17 = vld [vmem:[%s11904_s16 + $0x30] sm:$0xff]  ;;  %s461_s14 = scalar_select %p460_p10, %s11720_s21, 1 }
  0x91   : > { %10377 = vmatprep.subr.bf16.mxu1 %v10993_v2  ;;  %v11935_v12 = vld [vmem:[%s11904_s16 + $0x20] sm:$0xff]  ;;  %v10997_v15 = vld [vmem:[#allocation5 + $0x68] sm:$0xff]   ;;  %v10998_v19 = vld [vmem:[#allocation5 + $0x70] sm:$0xff]   ;;  %s15661_s24 = sld [smem:[#allocation71_spill]]  ;;  %s15662_s10 = sld [smem:[#allocation70_spill]] }
  0x92   : > { %v980_v11 = vadd.f32 %v979_v8, %v11926_v7  ;;  %v11947_v20 = vld [vmem:[%s11904_s16 + $0x38] sm:$0xff]  ;;  %v11950_v21 = vld [vmem:[%s11904_s16 + $0x40] sm:$0xff]  ;;  %v11954_v23 = vld [vmem:[%s11904_s16 + $0x48] sm:$0xff]  ;;  %s462_s22 = scalar_lea.vmem %s14890_s1, %s461_s14  ;;  %s15663_s27 = sld [smem:[#allocation72_spill]] }
  0x93   : > { %9403 = vmatpush3.bf16.msra.mxu0 %v10993_v2  ;;  %v10999_v24 = vld [vmem:[#allocation5 + $0x78] sm:$0xff]   ;;  %v11958_v26 = vld [vmem:[%s11904_s16 + $0x50] sm:$0xff]  ;;  %v11000_v29 = vld [vmem:[#allocation5] sm:$0xff]  }
  0x94   : > { %10385 = vmatpush3.bf16.msra.mxu1 %v10993_v2  ;;  %9404 = vmatprep.subr.bf16.mxu0 %v10994_v3  ;;  %v981_v13 = vadd.f32 %v980_v11, %v11931_v9  ;;  %v11962_v28 = vld [vmem:[%s11904_s16 + $0x58] sm:$0xff]  ;;  %v11966_v31 = vld [vmem:[%s11904_s16 + $0x60] sm:$0xff]  ;;  %v11970_v33 = vld [vmem:[%s11904_s16 + $0x68] sm:$0xff] }
  0x95   : > { %10378 = vmatprep.subr.bf16.mxu1 %v10994_v3  ;;  %v11974_v35 = vld [vmem:[%s11904_s16 + $0x70] sm:$0xff]  ;;  %v11978_v37 = vld [vmem:[%s11904_s16 + $0x78] sm:$0xff]  ;;  %v11982_v39 = vld [vmem:[%s11904_s16 + $0x80] sm:$0xff] }
  0x96   : > { %v982_v16 = vadd.f32 %v981_v13, %v11935_v12  ;;  %v11986_v41 = vld [vmem:[%s11904_s16 + $0x88] sm:$0xff]  ;;  %v11990_v43 = vld [vmem:[%s11904_s16 + $0x90] sm:$0xff]  ;;  %v11994_v45 = vld [vmem:[%s11904_s16 + $0x98] sm:$0xff] }
  0x97   : > { %9405 = vmatpush3.bf16.msra.mxu0 %v10994_v3  ;;  %v11998_v47 = vld [vmem:[%s11904_s16 + $0xa0] sm:$0xff]  ;;  %v12002_v49 = vld [vmem:[%s11904_s16 + $0xa8] sm:$0xff]  ;;  %v12006_v51 = vld [vmem:[%s11904_s16 + $0xb0] sm:$0xff] }
  0x98   : > { %10386 = vmatpush3.bf16.msra.mxu1 %v10994_v3  ;;  %9406 = vmatprep.subr.bf16.mxu0 %v10995_v4  ;;  %v983_v18 = vadd.f32 %v982_v16, %v11939_v14  ;;  %v12010_v53 = vld [vmem:[%s11904_s16 + $0xb8] sm:$0xff]  ;;  %v12014_v55 = vld [vmem:[%s11904_s16 + $0xc0] sm:$0xff]  ;;  %v12018_v57 = vld [vmem:[%s11904_s16 + $0xc8] sm:$0xff] }
  0x99   : > { %10379 = vmatprep.subr.bf16.mxu1 %v10995_v4  ;;  %v12022_v59 = vld [vmem:[%s11904_s16 + $0xd0] sm:$0xff]  ;;  %v12026_v61 = vld [vmem:[%s11904_s16 + $0xd8] sm:$0xff]  ;;  %v12030_v63 = vld [vmem:[%s11904_s16 + $0xe0] sm:$0xff] }
  0x9a   : > { %v984_v22 = vadd.f32 %v983_v18, %v11943_v17  ;;  %v12034_v2 = vld [vmem:[%s11904_s16 + $0xe8] sm:$0xff] }
  0x9b   : > { %9407 = vmatpush3.bf16.msra.mxu0 %v10995_v4 }
  0x9c   : > { %10387 = vmatpush3.bf16.msra.mxu1 %v10995_v4  ;;  %9408 = vmatprep.subr.bf16.mxu0 %v10996_v10  ;;  %v985_v25 = vadd.f32 %v984_v22, %v11947_v20  ;;  %v12038_v4 = vld [vmem:[%s11904_s16 + $0xf0] sm:$0xff] }
  0x9d   : > { %10380 = vmatprep.subr.bf16.mxu1 %v10996_v10 }
  0x9e   : > { %v986_v27 = vadd.f32 %v985_v25, %v11950_v21 }
  0x9f   : > { %9409 = vmatpush3.bf16.msra.mxu0 %v10996_v10 }
  0xa0   : > { %10388 = vmatpush3.bf16.msra.mxu1 %v10996_v10  ;;  %9410 = vmatprep.subr.bf16.mxu0 %v10997_v15  ;;  %v987_v30 = vadd.f32 %v986_v27, %v11954_v23  ;;  %v12042_v10 = vld [vmem:[%s11904_s16 + $0xf8] sm:$0xff] }
  0xa1   : > { %10381 = vmatprep.subr.bf16.mxu1 %v10997_v15 }
  0xa2   : > { %v988_v32 = vadd.f32 %v987_v30, %v11958_v26 }
  0xa3   : > { %9411 = vmatpush3.bf16.msra.mxu0 %v10997_v15 }
  0xa4   : > { %10389 = vmatpush3.bf16.msra.mxu1 %v10997_v15  ;;  %9412 = vmatprep.subr.bf16.mxu0 %v10998_v19  ;;  %v989_v34 = vadd.f32 %v988_v32, %v11962_v28 }
  0xa5   : > { %10382 = vmatprep.subr.bf16.mxu1 %v10998_v19 }
  0xa6   : > { %v990_v36 = vadd.f32 %v989_v34, %v11966_v31 }
  0xa7   : > { %9413 = vmatpush3.bf16.msra.mxu0 %v10998_v19 }
  0xa8   : > { %10390 = vmatpush3.bf16.msra.mxu1 %v10998_v19  ;;  %9414 = vmatprep.subr.bf16.mxu0 %v10999_v24  ;;  %v991_v38 = vadd.f32 %v990_v36, %v11970_v33 }
  0xa9   : > { %10383 = vmatprep.subr.bf16.mxu1 %v10999_v24 }
  0xaa   : > { %v992_v40 = vadd.f32 %v991_v38, %v11974_v35 }
  0xab   : > { %9415 = vmatpush3.bf16.msra.mxu0 %v10999_v24 }
  0xac   : > { %10391 = vmatpush3.bf16.msra.mxu1 %v10999_v24  ;;  %9448 = vmatprep.subr.bf16.mxu0 %v11000_v29  ;;  %v993_v42 = vadd.f32 %v992_v40, %v11978_v37 }
  0xae   : > { %v994_v44 = vadd.f32 %v993_v42, %v11982_v39 }
  0xb0   : > { %v995_v46 = vadd.f32 %v994_v44, %v11986_v41 }
  0xb2   : > { %v996_v48 = vadd.f32 %v995_v46, %v11990_v43 }
  0xb4   : > { %v997_v50 = vadd.f32 %v996_v48, %v11994_v45 }
  0xb6   : > { %v998_v52 = vadd.f32 %v997_v50, %v11998_v47 }
  0xb8   : > { %v999_v54 = vadd.f32 %v998_v52, %v12002_v49 }
  0xba   : > { %v1000_v56 = vadd.f32 %v999_v54, %v12006_v51 }
  0xbc   : > { %v1001_v58 = vadd.f32 %v1000_v56, %v12010_v53 }
  0xbe   : > { %v1002_v60 = vadd.f32 %v1001_v58, %v12014_v55 }
  0xc0   : > { %v1003_v62 = vadd.f32 %v1002_v60, %v12018_v57 }
  0xc2   : > { %v1004_v1 = vadd.f32 %v1003_v62, %v12022_v59 }
  0xc4   : > { %v1005_v3 = vadd.f32 %v1004_v1, %v12026_v61 }
  0xc6   : > { %v1006_v8 = vadd.f32 %v1005_v3, %v12030_v63 }
  0xc8   : > { %v1007_v11 = vadd.f32 %v1006_v8, %v12034_v2 }
  0xca   : > { %v1008_v13 = vadd.f32 %v1007_v11, %v12038_v4 }
  0xcc   : > { %v1009_v15 = vadd.f32 %v1008_v13, %v12042_v10 }
  0xce   : > { %v1010_v16 = vrot.slane %v1009_v15, 4 }
  0xd0   : > { %v1011_v18 = vadd.f32 %v1010_v16, %v1009_v15 }
  0xd2   : > { %v1012_v19 = vrot.slane %v1011_v18, 2 }
  0xd4   : > { %v1013_v22 = vadd.f32 %v1012_v19, %v1011_v18 }
  0xd6   : > { %v1014_v24 = vrot.slane %v1013_v22, 1 }
  0xd8   : > { %v1015_v25 = vadd.f32 %v1014_v24, %v1013_v22 }
  0xda   : > { %v12047_v27 = vmul.f32 0.00390625, %v1015_v25 }
  0xdc   : > { %v1017_v29 = vsub.f32 %v11920_v5, %v12047_v27  ;;  %v1018_v30 = vsub.f32 %v11923_v6, %v12047_v27  ;;  %v1019_v32 = vsub.f32 %v11926_v7, %v12047_v27  ;;  %v1020_v34 = vsub.f32 %v11931_v9, %v12047_v27 }
  0xdd   : > { %v1021_v40 = vsub.f32 %v11935_v12, %v12047_v27  ;;  %v1022_v44 = vsub.f32 %v11939_v14, %v12047_v27  ;;  %v1023_v50 = vsub.f32 %v11943_v17, %v12047_v27  ;;  %v1024_v56 = vsub.f32 %v11947_v20, %v12047_v27 }
  0xde   : > { %v1049_v36 = vmul.f32 %v1017_v29, %v1017_v29  ;;  %v1050_v38 = vmul.f32 %v1018_v30, %v1018_v30  ;;  %v1051_v42 = vmul.f32 %v1019_v32, %v1019_v32  ;;  %v1052_v46 = vmul.f32 %v1020_v34, %v1020_v34 }
  0xdf   : > { %v1053_v52 = vmul.f32 %v1021_v40, %v1021_v40  ;;  %v1054_v58 = vmul.f32 %v1022_v44, %v1022_v44  ;;  %v1025_v62 = vsub.f32 %v11950_v21, %v12047_v27  ;;  %v1055_v1 = vmul.f32 %v1023_v50, %v1023_v50 }
  0xe0   : > { %v1081_v48 = vadd.f32 %v1050_v38, %v1049_v36  ;;  %v1026_v8 = vsub.f32 %v11954_v23, %v12047_v27  ;;  %v1056_v11 = vmul.f32 %v1024_v56, %v1024_v56  ;;  %v1027_v15 = vsub.f32 %v11958_v26, %v12047_v27 }
  0xe1   : > { %v1057_v16 = vmul.f32 %v1025_v62, %v1025_v62  ;;  %v1028_v19 = vsub.f32 %v11962_v28, %v12047_v27  ;;  %v1029_v25 = vsub.f32 %v11966_v31, %v12047_v27  ;;  %v1030_v32 = vsub.f32 %v11970_v33, %v12047_v27 }
  0xe2   : > { %v1082_v54 = vadd.f32 %v1081_v48, %v1051_v42  ;;  %v1058_v22 = vmul.f32 %v1026_v8, %v1026_v8  ;;  %v1059_v29 = vmul.f32 %v1027_v15, %v1027_v15  ;;  %v1031_v38 = vsub.f32 %v11974_v35, %v12047_v27 }
  0xe3   : > { %v1060_v34 = vmul.f32 %v1028_v19, %v1028_v19  ;;  %v1061_v40 = vmul.f32 %v1029_v25, %v1029_v25  ;;  %v1032_v44 = vsub.f32 %v11978_v37, %v12047_v27  ;;  %v1033_v50 = vsub.f32 %v11982_v39, %v12047_v27 }
  0xe4   : > { %v1083_v60 = vadd.f32 %v1082_v54, %v1052_v46  ;;  %v1062_v46 = vmul.f32 %v1030_v32, %v1030_v32  ;;  %v1034_v56 = vsub.f32 %v11986_v41, %v12047_v27  ;;  %v1035_v62 = vsub.f32 %v11990_v43, %v12047_v27 }
  0xe5   : > { %v1036_v8 = vsub.f32 %v11994_v45, %v12047_v27  ;;  %v1037_v15 = vsub.f32 %v11998_v47, %v12047_v27  ;;  %v1038_v19 = vsub.f32 %v12002_v49, %v12047_v27  ;;  %v1039_v25 = vsub.f32 %v12006_v51, %v12047_v27 }
  0xe6   : > { %v1084_v3 = vadd.f32 %v1083_v60, %v1053_v52  ;;  %v1063_v52 = vmul.f32 %v1031_v38, %v1031_v38  ;;  %v1040_v32 = vsub.f32 %v12010_v53, %v12047_v27  ;;  %v1041_v38 = vsub.f32 %v12014_v55, %v12047_v27 }
  0xe8   : > { %v1085_v13 = vadd.f32 %v1084_v3, %v1054_v58  ;;  %v1064_v58 = vmul.f32 %v1032_v44, %v1032_v44  ;;  %v1042_v44 = vsub.f32 %v12018_v57, %v12047_v27 }
  0xea   : > { %v1086_v18 = vadd.f32 %v1085_v13, %v1055_v1  ;;  %v1065_v1 = vmul.f32 %v1033_v50, %v1033_v50  ;;  %v1043_v50 = vsub.f32 %v12022_v59, %v12047_v27 }
  0xec   : > { %v1087_v24 = vadd.f32 %v1086_v18, %v1056_v11  ;;  %v1066_v11 = vmul.f32 %v1034_v56, %v1034_v56  ;;  %v1044_v56 = vsub.f32 %v12026_v61, %v12047_v27 }
  0xee   : > { %v1088_v30 = vadd.f32 %v1087_v24, %v1057_v16  ;;  %v1067_v16 = vmul.f32 %v1035_v62, %v1035_v62  ;;  %v1045_v62 = vsub.f32 %v12030_v63, %v12047_v27 }
  0xf0   : > { %v1089_v36 = vadd.f32 %v1088_v30, %v1058_v22  ;;  %v1068_v22 = vmul.f32 %v1036_v8, %v1036_v8  ;;  %v1046_v8 = vsub.f32 %v12034_v2, %v12047_v27 }
  0xf2   : > { %v1090_v42 = vadd.f32 %v1089_v36, %v1059_v29  ;;  %v1069_v29 = vmul.f32 %v1037_v15, %v1037_v15  ;;  %v1047_v15 = vsub.f32 %v12038_v4, %v12047_v27 }
  0xf4   : > { %v1091_v48 = vadd.f32 %v1090_v42, %v1060_v34  ;;  %v1070_v34 = vmul.f32 %v1038_v19, %v1038_v19  ;;  %v1048_v19 = vsub.f32 %v12042_v10, %v12047_v27 }
  0xf6   : > { %v1092_v54 = vadd.f32 %v1091_v48, %v1061_v40  ;;  %v1071_v40 = vmul.f32 %v1039_v25, %v1039_v25  ;;  %v1079_v25 = vmul.f32 %v1047_v15, %v1047_v15  ;;  %v1080_v63 = vmul.f32 %v1048_v19, %v1048_v19 }
  0xf8   : > { %v1093_v60 = vadd.f32 %v1092_v54, %v1062_v46  ;;  %v1072_v46 = vmul.f32 %v1040_v32, %v1040_v32 }
  0xfa   : > { %v1094_v3 = vadd.f32 %v1093_v60, %v1063_v52  ;;  %v1073_v52 = vmul.f32 %v1041_v38, %v1041_v38 }
  0xfc   : > { %v1095_v13 = vadd.f32 %v1094_v3, %v1064_v58  ;;  %v1074_v58 = vmul.f32 %v1042_v44, %v1042_v44 }
  0xfe   : > { %v1096_v18 = vadd.f32 %v1095_v13, %v1065_v1  ;;  %v1075_v1 = vmul.f32 %v1043_v50, %v1043_v50  ;;  %v977_v50 = vld [vmem:[%s14891_s2] sm:$0x1] }
 0x100   : > { %v1097_v24 = vadd.f32 %v1096_v18, %v1066_v11  ;;  %v1076_v11 = vmul.f32 %v1044_v56, %v1044_v56 }
 0x102   : > { %v1098_v30 = vadd.f32 %v1097_v24, %v1067_v16  ;;  %v1077_v16 = vmul.f32 %v1045_v62, %v1045_v62 }
 0x104   : > { %v1099_v36 = vadd.f32 %v1098_v30, %v1068_v22  ;;  %v1078_v22 = vmul.f32 %v1046_v8, %v1046_v8 }
 0x106   : > { %v1100_v42 = vadd.f32 %v1099_v36, %v1069_v29 }
 0x108   : > { %v1101_v48 = vadd.f32 %v1100_v42, %v1070_v34 }
 0x10a   : > { %v1102_v54 = vadd.f32 %v1101_v48, %v1071_v40  ;;  %v14907_v48 = vlaneseq }
 0x10c   : > { %v1103_v60 = vadd.f32 %v1102_v54, %v1072_v46  ;;  %v12114_v10 = vshrl.u32 %v14907_v48, 7 }
 0x10e   : > { %v1104_v3 = vadd.f32 %v1103_v60, %v1073_v52  ;;  %v12120_v52 = vsub.s32 0, %v12114_v10 }
 0x110   : > { %v1105_v13 = vadd.f32 %v1104_v3, %v1074_v58  ;;  %15164 = vst [vmem:[#allocation17_spill] sm:$0xff] %v12120_v52  ;;  %v978_v58 = vld [vmem:[%s14892_s3] sm:$0x1] }
 0x112   : > { %v1106_v18 = vadd.f32 %v1105_v13, %v1075_v1 }
 0x114   : > { %v1107_v24 = vadd.f32 %v1106_v18, %v1076_v11 }
 0x116   : > { %v1108_v29 = vadd.f32 %v1107_v24, %v1077_v16 }
 0x118   : > { %v1109_v30 = vadd.f32 %v1108_v29, %v1078_v22 }
 0x11a   : > { %v1110_v32 = vadd.f32 %v1109_v30, %v1079_v25 }
 0x11c   : > { %v1111_v34 = vadd.f32 %v1110_v32, %v1080_v63 }
 0x11e   : > { %v1112_v36 = vrot.slane %v1111_v34, 4 }
 0x120   : > { %v1113_v2 = vadd.f32 %v1112_v36, %v1111_v34 }
 0x122   : > { %v1114_v38 = vrot.slane %v1113_v2, 2 }
 0x124   : > { %v1115_v40 = vadd.f32 %v1114_v38, %v1113_v2 }
 0x126   : > { %v1116_v42 = vrot.slane %v1115_v40, 1 }
 0x128   : > { %v1117_v44 = vadd.f32 %v1116_v42, %v1115_v40 }
 0x12a   : > { %v1118_v4 = vmul.f32 0.00390625, %v1117_v44 }
 0x12c   : > { %v1119_v46 = vadd.f32 1e-05, %v1118_v4 }
 0x12e   : > { %11136 = vrsqrt.f32 %v1119_v46 }
 0x138   : > { %v11137_v54 = vpop.eup %11136 }
 0x139   : > { %v1121_v56 = vmul.f32 %v11137_v54, %v977_v50 }
 0x13b   : > { %v12126_v60 = vrot.slane %v1121_v56, %v12120_v52  ;;  %v1158_v62 = vmul.f32 %v1121_v56, %v12047_v27 }
 0x13d   : > { %v1126_v1 = vmul.f32 %v12126_v60, %v11920_v5  ;;  %v1127_v3 = vmul.f32 %v12126_v60, %v11923_v6  ;;  %v1159_v8 = vsub.f32 %v978_v58, %v1158_v62  ;;  %v1128_v11 = vmul.f32 %v12126_v60, %v11926_v7 }
 0x13e   : > { %v1129_v13 = vmul.f32 %v12126_v60, %v11931_v9  ;;  %v1130_v15 = vmul.f32 %v12126_v60, %v11935_v12  ;;  %v1131_v16 = vmul.f32 %v12126_v60, %v11939_v14  ;;  %v1132_v5 = vmul.f32 %v12126_v60, %v11943_v17 }
 0x13f   : > { %v12142_v27 = vrot.slane %v1159_v8, %v12120_v52  ;;  %v1133_v6 = vmul.f32 %v12126_v60, %v11947_v20  ;;  %v1134_v7 = vmul.f32 %v12126_v60, %v11950_v21  ;;  %v1135_v21 = vmul.f32 %v12126_v60, %v11954_v23 }
 0x140   : > { %v1136_v19 = vmul.f32 %v12126_v60, %v11958_v26  ;;  %v1137_v23 = vmul.f32 %v12126_v60, %v11962_v28  ;;  %v1138_v34 = vmul.f32 %v12126_v60, %v11966_v31  ;;  %v1145_v0 = vmul.f32 %v12126_v60, %v11994_v45 }
 0x141   : > { %v12151_v9 = vadd.f32 %v12142_v27, %v1126_v1  ;;  %v12154_v12 = vadd.f32 %v12142_v27, %v1127_v3  ;;  %v12157_v14 = vadd.f32 %v12142_v27, %v1128_v11  ;;  %v12160_v18 = vadd.f32 %v12142_v27, %v1129_v13 }
 0x142   : > { %v12163_v17 = vadd.f32 %v12142_v27, %v1130_v15  ;;  %v12166_v20 = vadd.f32 %v12142_v27, %v1131_v16  ;;  %v12176_v29 = vadd.f32 %v12142_v27, %v1132_v5  ;;  %v12180_v30 = vadd.f32 %v12142_v27, %v1133_v6 }
 0x143   : > { %v8126_v22 = vmul.f32 -1.442695, %v12151_v9  ;;  %v8127_v24 = vmul.f32 -1.442695, %v12154_v12  ;;  %v8128_v25 = vmul.f32 -1.442695, %v12157_v14  ;;  %v12186_v32 = vadd.f32 %v12142_v27, %v1134_v7 }
 0x144   : > { %v8129_v63 = vmul.f32 -1.442695, %v12160_v18  ;;  %v8130_v26 = vmul.f32 -1.442695, %v12163_v17  ;;  %v8131_v36 = vmul.f32 -1.442695, %v12166_v20  ;;  %v12192_v2 = vadd.f32 %v12142_v27, %v1135_v21 }
 0x145   : > { %11138 = vpow2.f32 %v8126_v22  ;;  %v8132_v38 = vmul.f32 -1.442695, %v12176_v29  ;;  %v12196_v28 = vadd.f32 %v12142_v27, %v1136_v19  ;;  %v8133_v40 = vmul.f32 -1.442695, %v12180_v30 }
 0x146   : > { %11140 = vpow2.f32 %v8127_v24  ;;  %v12200_v42 = vadd.f32 %v12142_v27, %v1137_v23  ;;  %v8134_v31 = vmul.f32 -1.442695, %v12186_v32  ;;  %v12204_v44 = vadd.f32 %v12142_v27, %v1138_v34  ;;  %v11003_v34 = vld [vmem:[#allocation5 + $0x18] sm:$0xff]  }
 0x147   : > { %11142 = vpow2.f32 %v8128_v25  ;;  %v8135_v4 = vmul.f32 -1.442695, %v12192_v2  ;;  %v8136_v46 = vmul.f32 -1.442695, %v12196_v28  ;;  %v1139_v13 = vmul.f32 %v12126_v60, %v11970_v33 }
 0x148   : > { %11144 = vpow2.f32 %v8129_v63  ;;  %v8137_v50 = vmul.f32 -1.442695, %v12200_v42  ;;  %v8138_v54 = vmul.f32 -1.442695, %v12204_v44  ;;  %v14910_v16 = vmov 0.0  }
 0x149   : > { %11146 = vpow2.f32 %v8130_v26  ;;  %v12213_v5 = vrot.slane %v14910_v16, 7  ;;  %v12216_v7 = vadd.s32 16, %v12114_v10  ;;  %v12219_v25 = vadd.s32 32, %v12114_v10 }
 0x14a   : > { %11148 = vpow2.f32 %v8131_v36  ;;  %v12222_v33 = vadd.s32 48, %v12114_v10  ;;  %v12225_v26 = vadd.f32 %v12142_v27, %v1139_v13  ;;  %v12243_v13 = vadd.s32 96, %v12114_v10 }
 0x14b   : > { %11150 = vpow2.f32 %v8132_v38  ;;  %15165 = vst [vmem:[#allocation18_spill] sm:$0xff] %v12213_v5  ;;  %v1152_v52 = vmul.f32 %v12126_v60, %v12022_v59 }
 0x14c   : > { %11152 = vpow2.f32 %v8133_v40  ;;  %v12230_v40 = vpack.c.bf16 %v12213_v5, %v12213_v5 }
 0x14d   : > { %11154 = vpow2.f32 %v8134_v31 }
 0x14e   : > { %11156 = vpow2.f32 %v8135_v4  ;;  %15166 = vst [vmem:[#allocation19_spill] sm:$0xff] %v12230_v40 }
 0x14f   : > { %v11139_v56 = vpop.eup %11138  ;;  %11158 = vpow2.f32 %v8136_v46 }
 0x150   : > { %v11141_v58 = vpop.eup %11140  ;;  %v1294_v62 = vadd.f32 1.0, %v11139_v56  ;;  %11160 = vpow2.f32 %v8137_v50  ;;  %v12234_v50 = vadd.s32 64, %v12114_v10 }
 0x151   : > { %v11143_v1 = vpop.eup %11142  ;;  %v1295_v3 = vadd.f32 1.0, %v11141_v58  ;;  %11162 = vpow2.f32 %v8138_v54  ;;  %v12237_v54 = vadd.s32 80, %v12114_v10 }
 0x152   : > { %v11145_v8 = vpop.eup %11144  ;;  %11164 = vrcp.f32 %v1294_v62  ;;  %v1296_v11 = vadd.f32 1.0, %v11143_v1  ;;  %v12346_v62 = vadd.f32 %v12142_v27, %v1145_v0 }
 0x153   : > { %v11147_v15 = vpop.eup %11146  ;;  %11166 = vrcp.f32 %v1295_v3  ;;  %v1297_v6 = vadd.f32 1.0, %v11145_v8 }
 0x154   : > { %v11149_v21 = vpop.eup %11148  ;;  %11168 = vrcp.f32 %v1296_v11  ;;  %v1298_v19 = vadd.f32 1.0, %v11147_v15  ;;  %v8139_v11 = vmul.f32 -1.442695, %v12225_v26  ;;  %v8145_v59 = vmul.f32 -1.442695, %v12346_v62 }
 0x155   : > { %v11151_v22 = vpop.eup %11150  ;;  %11170 = vrcp.f32 %v1297_v6  ;;  %v1299_v24 = vadd.f32 1.0, %v11149_v21  ;;  %v12246_v21 = vadd.s32 112, %v12114_v10 }
 0x156   : > { %v11153_v63 = vpop.eup %11152  ;;  %11172 = vrcp.f32 %v1298_v19  ;;  %v1300_v23 = vadd.f32 1.0, %v11151_v22  ;;  %v1140_v19 = vmul.f32 %v12126_v60, %v11974_v35  ;;  %v1143_v35 = vmul.f32 %v12126_v60, %v11986_v41 }
 0x157   : > { %v11155_v36 = vpop.eup %11154  ;;  %11174 = vrcp.f32 %v1299_v24  ;;  %v1301_v38 = vadd.f32 1.0, %v11153_v63  ;;  %v1147_v63 = vmul.f32 %v12126_v60, %v12002_v49  ;;  %v1150_v24 = vmul.f32 %v12126_v60, %v12014_v55 }
 0x158   : > { %v11157_v4 = vpop.eup %11156  ;;  %11176 = vrcp.f32 %v1300_v23  ;;  %v1302_v46 = vadd.f32 1.0, %v11155_v36  ;;  %v1141_v23 = vmul.f32 %v12126_v60, %v11978_v37  ;;  %v1144_v37 = vmul.f32 %v12126_v60, %v11990_v43  ;;  %v11001_v43 = vld [vmem:[#allocation5 + $0x8] sm:$0xff]  }
 0x159   : > { %v11159_v56 = vpop.eup %11158  ;;  %11178 = vrcp.f32 %v1301_v38  ;;  %v1303_v58 = vadd.f32 1.0, %v11157_v4  ;;  %v1142_v4 = vmul.f32 %v12126_v60, %v11982_v39  ;;  %v12272_v39 = vadd.s32 128, %v12114_v10 }
 0x15a   : > { %v11161_v3 = vpop.eup %11160  ;;  %11180 = vrcp.f32 %v1302_v46  ;;  %v1304_v8 = vadd.f32 1.0, %v11159_v56  ;;  %v12275_v41 = vadd.f32 %v12142_v27, %v1140_v19  ;;  %v12293_v48 = vadd.f32 %v12142_v27, %v1143_v35 }
 0x15b   : > { %v11163_v15 = vpop.eup %11162  ;;  %11182 = vrcp.f32 %v1303_v58  ;;  %v1305_v6 = vadd.f32 1.0, %v11161_v3  ;;  %v12290_v19 = vadd.f32 %v12142_v27, %v1142_v4  ;;  %v12309_v4 = vadd.f32 %v12142_v27, %v1144_v37  ;;  %v11002_v37 = vld [vmem:[#allocation5 + $0x10] sm:$0xff]  }
 0x15c   : > { %v11165_v22 = vpop.eup %11164  ;;  %11184 = vrcp.f32 %v1304_v8  ;;  %v11396_v8 = vld [vmem:[#allocation5] sm:$0xff]   ;;  %v12358_v0 = vadd.f32 %v12142_v27, %v1147_v63 }
 0x15d   : > { %v11167_v36 = vpop.eup %11166  ;;  %v12255_v38 = vmul.f32 %v11165_v22, %v12151_v9  ;;  %11186 = vrcp.f32 %v1305_v6  ;;  %v8142_v49 = vmul.f32 -1.442695, %v12290_v19  ;;  %v8144_v55 = vmul.f32 -1.442695, %v12309_v4 }
 0x15e   : > { %v11169_v46 = vpop.eup %11168  ;;  %v12262_v56 = vmul.f32 %v11167_v36, %v12154_v12  ;;  %11188 = vpow2.f32 %v8139_v11 }
 0x15f   : > { %v11171_v3 = vpop.eup %11170  ;;  %v12268_v9 = vmul.f32 %v11169_v46, %v12157_v14  ;;  %v12286_v14 = vadd.f32 %v12142_v27, %v1141_v23 }
 0x160   : > { %v11173_v12 = vpop.eup %11172  ;;  %v12279_v11 = vpack.c.bf16 %v12262_v56, %v12255_v38  ;;  %v14912_v6 = vrot.slane %v12262_v56, 1  ;;  %v12283_v22 = vmul.f32 %v11171_v3, %v12160_v18 }
 0x161   : > { %v11175_v36 = vpop.eup %11174  ;;  %v14911_v46 = vrot.slane %v12268_v9, 1  ;;  %v12303_v23 = vmul.f32 %v11173_v12, %v12163_v17  ;;  %v1306_v17 = vadd.f32 1.0, %v11163_v15  ;;  %v8141_v15 = vmul.f32 -1.442695, %v12286_v14 }
 0x162   : > { %15167 = vst [vmem:[#allocation20_spill] sm:$0xff] %v12279_v11  ;;  %v11177_v16 = vpop.eup %11176  ;;  %9417 = vmatmul.mubr.bf16.vlgmr.msra.gmra.mrb[0].mxu0 %v12279_v11  ;;  %v12300_v18 = vpack.c.bf16 %v12283_v22, %v12268_v9  ;;  %v12306_v3 = vmul.f32 %v11175_v36, %v12166_v20  ;;  %v1146_v20 = vmul.f32 %v12126_v60, %v11998_v47  ;;  %v8140_v36 = vmul.f32 -1.442695, %v12275_v41 }
 0x163   : > { %v11179_v35 = vpop.eup %11178  ;;  %9449 = vmatpush3.bf16.msra.mxu0 %v11396_v8  ;;  %v12316_v45 = vsel %vm14959_vm0, %v14912_v6, %v14911_v46  ;;  %v12319_v58 = vmul.f32 %v11177_v16, %v12176_v29  ;;  %v1148_v29 = vmul.f32 %v12126_v60, %v12006_v51  ;;  %v1149_v47 = vmul.f32 %v12126_v60, %v12010_v53 }
 0x164   : > { %15168 = vst [vmem:[#allocation21_spill] sm:$0xff] %v12300_v18  ;;  %v11181_v12 = vpop.eup %11180  ;;  %9450 = vmatprep.subr.bf16.mxu0 %v11001_v43  ;;  %9420 = vmatprep.mubr.bf16.mxu0 %v12300_v18  ;;  %v12325_v8 = vmul.f32 %v11179_v35, %v12180_v30  ;;  %v1151_v30 = vmul.f32 %v12126_v60, %v12018_v57  ;;  %v8143_v51 = vmul.f32 -1.442695, %v12293_v48  ;;  %11190 = vrcp.f32 %v1306_v17 }
 0x165   : > { %v11183_v16 = vpop.eup %11182  ;;  %v12341_v1 = vpack.c.bf16 %v12306_v3, %v12303_v23  ;;  %v12355_v6 = vadd.f32 %v12142_v27, %v1146_v20  ;;  %v12366_v18 = vadd.f32 %v12142_v27, %v1149_v47  ;;  %v12369_v57 = vadd.f32 %v12142_v27, %v1150_v24  ;;  %v11004_v24 = vld [vmem:[#allocation5 + $0x20] sm:$0xff]  }
 0x166   : > { %v11185_v35 = vpop.eup %11184  ;;  %v12350_v53 = vpack.c.bf16 %v12325_v8, %v12319_v58  ;;  %v12372_v11 = vadd.f32 %v12142_v27, %v1151_v30  ;;  %v12376_v63 = vmul.f32 %v11181_v12, %v12186_v32  ;;  %v12379_v20 = vmul.f32 %v11183_v16, %v12192_v2 }
 0x167   : > { %15169 = vst [vmem:[#allocation22_spill] sm:$0xff] %v12341_v1  ;;  %v11187_v31 = vpop.eup %11186  ;;  %9451 = vmatpush3.bf16.msra.mxu0 %v11001_v43  ;;  %v12361_v43 = vadd.f32 %v12142_v27, %v1148_v29  ;;  %15171 = vst [vmem:[#allocation24_spill] sm:$0xff] %v12366_v18  ;;  %v12386_v29 = vmul.f32 %v11185_v35, %v12196_v28  ;;  %v15174_v32 = vrot.slane %v12262_v56, 1  ;;  %v15175_v2 = vrot.slane %v12255_v38, 1 }
 0x168   : > { %15170 = vst [vmem:[#allocation23_spill] sm:$0xff] %v12350_v53  ;;  %v11189_v46 = vpop.eup %11188  ;;  %9452 = vmatprep.subr.bf16.mxu0 %v11002_v37  ;;  %15172 = vst [vmem:[#allocation25_spill] sm:$0xff] %v12369_v57  ;;  %v12389_v47 = vmul.f32 %v11187_v31, %v12200_v42  ;;  %v12400_v28 = vadd.f32 %v12142_v27, %v1152_v52  ;;  %v15177_v42 = vand.u32 15, %v12114_v10  ;;  %v8149_v30 = vmul.f32 -1.442695, %v12366_v18 }
 0x169   : > { %v1307_v17 = vadd.f32 1.0, %v11189_v46  ;;  %15173 = vst [vmem:[#allocation26_spill] sm:$0xff] %v12372_v11  ;;  %v1153_v46 = vmul.f32 %v12126_v60, %v12026_v61  ;;  %v2197_v12 = vsel %vm14959_vm0, %v15175_v2, %v15174_v32  ;;  %v8146_v61 = vmul.f32 -1.442695, %v12355_v6 }
 0x16a   : > { %9421 = vmatmul.mubr.bf16.gmra.mrb[4].mxu0 %v12341_v1  ;;  %v8148_v16 = vmul.f32 -1.442695, %v12361_v43  ;;  %15176 = vst [vmem:[#allocation27_spill] sm:$0xff] %v12400_v28  ;;  %vm12404_vm2 = vcmp.ge.s32.totalorder %v15177_v42, 1  ;;  %v8150_v35 = vmul.f32 -1.442695, %v12369_v57  ;;  %v12415_v32 = vpack.c.bf16 %v12379_v20, %v12376_v63 }
 0x16b   : > { %9453 = vmatpush3.bf16.msra.mxu0 %v11002_v37  ;;  %9424 = vmatprep.mubr.bf16.mxu0 %v12350_v53  ;;  %11192 = vrcp.f32 %v1307_v17  ;;  %v8147_v37 = vmul.f32 -1.442695, %v12358_v0  ;;  %v12411_v17 = vmul.f32 -1.442695, %v12372_v11  ;;  %v12418_v52 = vadd.f32 %v12142_v27, %v1153_v46  ;;  %v11005_v1 = vld [vmem:[#allocation5 + $0x28] sm:$0xff]   ;;  %vm12486_vm6 = vmpackc.low %vm14960_vm5, %vm12404_vm2 }
 0x16c   : > { %9454 = vmatprep.subr.bf16.mxu0 %v11003_v34  ;;  %11194 = vpow2.f32 %v8140_v36  ;;  %15180 = vst [vmem:[#allocation28_spill] sm:$0xff] %v12415_v32  ;;  %v12421_v2 = vpack.c.bf16 %v12316_v45, %v2197_v12  ;;  %v12425_v36 = vpack.c.bf16 %v12389_v47, %v12386_v29  ;;  %v2200_v42 = vrot.slane %v12283_v22, 1 }
 0x16d   : > { %11196 = vpow2.f32 %v8141_v15  ;;  %v2202_v53 = vrot.slane %v12303_v23, 1  ;;  %v8152_v15 = vmul.f32 -1.442695, %v12400_v28  ;;  %v2204_v46 = vrot.slane %v12306_v3, 1 }
 0x16e   : > { %15181 = vst [vmem:[#allocation29_spill] sm:$0xff] %v12421_v2  ;;  %15182 = vst [vmem:[#allocation30_spill] sm:$0xff] %v12425_v36  ;;  %11198 = vpow2.f32 %v8142_v49  ;;  %v2206_v45 = vrot.slane %v12319_v58, 1  ;;  %v11191_v12 = vpop.eup %11190  ;;  %v15183_v2 = vrot.slane %v12268_v9, 1  ;;  %v1523_v18 = vrot.slane %v12262_v56, 7 }
 0x16f   : > { %9455 = vmatpush3.bf16.msra.mxu0 %v11003_v34  ;;  %11200 = vpow2.f32 %v8143_v51  ;;  %v1521_v34 = vrot.slane %v12255_v38, 7  ;;  %v2203_v11 = vsel %vm14959_vm0, %v2200_v42, %v2202_v53  ;;  %v2205_v28 = vsel %vm14959_vm0, %v2202_v53, %v2204_v46  ;;  %v11009_v53 = vld [vmem:[#allocation5 + $0x88] sm:$0xff]  }
 0x170   : > { %9456 = vmatprep.subr.bf16.mxu0 %v11004_v24  ;;  %11202 = vpow2.f32 %v8144_v55  ;;  %v2201_v49 = vsel %vm14959_vm0, %v15183_v2, %v2200_v42  ;;  %v2207_v57 = vsel %vm14959_vm0, %v2204_v46, %v2206_v45  ;;  %v1525_v55 = vrot.slane %v12268_v9, 7  ;;  %v11006_v42 = vld [vmem:[#allocation5 + $0x30] sm:$0xff]  }
 0x171   : > { %11204 = vpow2.f32 %v8145_v59  ;;  %v12438_v51 = vpack.c.bf16 %v2203_v11, %v2201_v49  ;;  %v12445_v2 = vpack.c.bf16 %v2207_v57, %v2205_v28  ;;  %v12448_v59 = vmul.f32 %v11191_v12, %v12204_v44 }
 0x172   : > { %9425 = vmatmul.mubr.bf16.gmra.mrb[8].mxu0 %v12415_v32  ;;  %11206 = vpow2.f32 %v8146_v61  ;;  %v15184_v11 = vand.u32 15, %v12216_v7  ;;  %v2208_v56 = vrot.slane %v12325_v8, 1  ;;  %v2210_v9 = vrot.slane %v12376_v63, 1 }
 0x173   : > { %9457 = vmatpush3.bf16.msra.mxu0 %v11004_v24  ;;  %9428 = vmatprep.mubr.bf16.mxu0 %v12425_v36  ;;  %11208 = vpow2.f32 %v8147_v37  ;;  %v15187_v57 = vand.u32 15, %v12219_v25  ;;  %v2212_v7 = vrot.slane %v12379_v20, 1  ;;  %v2214_v28 = vrot.slane %v12386_v29, 1 }
 0x174   : > { %9458 = vmatprep.subr.bf16.mxu0 %v11005_v1  ;;  %vm12452_vm3 = vcmp.ge.s32.totalorder %v15184_v11, 1  ;;  %11210 = vpow2.f32 %v8148_v16  ;;  %v2209_v46 = vsel %vm14959_vm0, %v2206_v45, %v2208_v56  ;;  %v2211_v12 = vsel %vm14959_vm0, %v2208_v56, %v2210_v9  ;;  %v11397_v11 = vld [vmem:[%s11904_s16 + $0xe0] sm:$0xff]  ;;  %v11007_v45 = vld [vmem:[#allocation5 + $0x38] sm:$0xff]  }
 0x175   : > { %v11193_v24 = vpop.eup %11192  ;;  %vm12460_vm4 = vcmp.ge.s32.totalorder %v15187_v57, 1  ;;  %11212 = vpow2.f32 %v8149_v30  ;;  %v1522_v49 = vsel %vm14958_vm1, %v12213_v5, %v1521_v34  ;;  %v1154_v16 = vmul.f32 %v11397_v11, %v12126_v60  ;;  %vm12533_vm9 = vmpackc.low %vm14960_vm5, %vm12452_vm3 }
 0x176   : > { %v12468_v37 = vmul.f32 %v11193_v24, %v12225_v26  ;;  %v11195_v25 = vpop.eup %11194  ;;  %11214 = vpow2.f32 %v8150_v35  ;;  %v12476_v57 = vpack.c.bf16 %v2211_v12, %v2209_v46  ;;  %v1524_v26 = vsel %vm14958_vm1, %v1521_v34, %v1523_v18  ;;  %vm12542_vm10 = vmpackc.low %vm14960_vm5, %vm12460_vm4 }
 0x177   : > { %9459 = vmatpush3.bf16.msra.mxu0 %v11005_v1  ;;  %v11197_v44 = vpop.eup %11196  ;;  %v15191_v1 = vmov 0  ;;  %v1308_v35 = vadd.f32 1.0, %v11195_v25  ;;  %11216 = vpow2.f32 %v12411_v17  ;;  %v1526_v34 = vsel %vm14958_vm1, %v1523_v18, %v1525_v55 }
 0x178   : > { %9460 = vmatprep.subr.bf16.mxu0 %v11006_v42  ;;  %v12481_v30 = vpack.c.bf16 %v12468_v37, %v12448_v59  ;;  %v15192_v1 = vsel %vm12486_vm6, 4294967295, %v15191_v1  ;;  %v11199_v56 = vpop.eup %11198  ;;  %v1309_v24 = vadd.f32 1.0, %v11197_v44  ;;  %11218 = vpow2.f32 %v8152_v15  ;;  %v11398_v15 = vld [vmem:[%s11904_s16 + $0xe8] sm:$0xff] }
 0x179   : > { %15193 = vst [vmem:[#allocation32_spill] sm:$0xff] %v15192_v1  ;;  %v2213_v46 = vsel %vm14959_vm0, %v2210_v9, %v2212_v7  ;;  %v11201_v12 = vpop.eup %11200  ;;  %v15194_v31 = vrot.slane %v12283_v22, 7  ;;  %11220 = vrcp.f32 %v1308_v35  ;;  %v1310_v5 = vadd.f32 1.0, %v11199_v56 }
 0x17a   : > { %15190 = vst [vmem:[#allocation31_spill] sm:$0xff] %v12481_v30  ;;  %9429 = vmatmul.mubr.bf16.gmra.mrb[12].mxu0 %v12481_v30  ;;  %v2215_v25 = vsel %vm14959_vm0, %v2212_v7, %v2214_v28  ;;  %v11203_v17 = vpop.eup %11202  ;;  %11222 = vrcp.f32 %v1309_v24  ;;  %v1311_v18 = vadd.f32 1.0, %v11201_v12  ;;  %v1155_v9 = vmul.f32 %v11398_v15, %v12126_v60 }
 0x17b   : > { %v1528_v11 = vsel %vm14958_vm1, %v1525_v55, %v15194_v31  ;;  %9461 = vmatpush3.bf16.msra.mxu0 %v11006_v42  ;;  %9464 = vmatprep.mubr.msk.bf16.mxu0 %vm12486_vm6, %v12230_v40  ;;  %v12503_v44 = vpack.c.bf16 %v2215_v25, %v2213_v46  ;;  %v11205_v30 = vpop.eup %11204  ;;  %v11008_v55 = vld [vmem:[#allocation5 + $0x80] sm:$0xff]   ;;  %v12505_v35 = vpack.c.bf16 %v1524_v26, %v1522_v49  ;;  %v15195_v7 = vand.u32 15, %v12222_v33 }
 0x17c   : > { %9462 = vmatprep.subr.bf16.mxu0 %v11007_v45  ;;  %v1529_v56 = vrot.slane %v12303_v23, 7  ;;  %v12515_v24 = vadd.f32 %v12142_v27, %v1154_v16  ;;  %v2216_v12 = vrot.slane %v12389_v47, 1  ;;  %v11207_v46 = vpop.eup %11206  ;;  %v12518_v31 = vpack.c.bf16 %v1528_v11, %v1526_v34 }
 0x17d   : > { %vm12509_vm7 = vcmp.ge.s32.totalorder %v15195_v7, 1  ;;  %v1531_v25 = vrot.slane %v12306_v3, 7  ;;  %v15198_v49 = vand.u32 15, %v12234_v50  ;;  %v1312_v26 = vadd.f32 1.0, %v11203_v17  ;;  %v11209_v23 = vpop.eup %11208 }
 0x17e   : > { %v2218_v15 = vrot.slane %v12448_v59, 1  ;;  %v1533_v16 = vrot.slane %v12319_v58, 7  ;;  %11224 = vrcp.f32 %v1310_v5  ;;  %v1313_v7 = vadd.f32 1.0, %v11205_v30  ;;  %v11211_v34 = vpop.eup %11210  ;;  %vm12593_vm13 = vmpackc.low %vm14960_vm5, %vm12509_vm7 }
 0x17f   : > { %vm12523_vm8 = vcmp.ge.s32.totalorder %v15198_v49, 1  ;;  %v2217_v40 = vsel %vm14959_vm0, %v2214_v28, %v2216_v12  ;;  %9463 = vmatpush3.bf16.msra.mxu0 %v11007_v45  ;;  %v15201_v50 = vmov 0  ;;  %v1535_v3 = vrot.slane %v12325_v8, 7  ;;  %v11213_v58 = vpop.eup %11212 }
 0x180   : > { %v15202_v50 = vsel %vm12533_vm9, 4294967295, %v15201_v50  ;;  %11226 = vrcp.f32 %v1311_v18  ;;  %v1314_v11 = vadd.f32 1.0, %v11207_v46  ;;  %v2219_v17 = vsel %vm14959_vm0, %v2216_v12, %v2218_v15  ;;  %9496 = vmatprep.subr.bf16.mxu0 %v11008_v55  ;;  %v11215_v18 = vpop.eup %11214  ;;  %vm12604_vm14 = vmpackc.low %vm14960_vm5, %vm12523_vm8 }
 0x181   : > { %15203 = vst [vmem:[#allocation33_spill] sm:$0xff] %v15202_v50  ;;  %v15204_v5 = vmov 0  ;;  %v1315_v28 = vadd.f32 1.0, %v11209_v23  ;;  %v8153_v30 = vmul.f32 -1.442695, %v12418_v52  ;;  %v12548_v45 = vadd.f32 %v12142_v27, %v1155_v9  ;;  %v11217_v49 = vpop.eup %11216 }
 0x182   : > { %v15205_v5 = vsel %vm12542_vm10, 4294967295, %v15204_v5  ;;  %v12550_v8 = vpack.c.bf16 %v2219_v17, %v2217_v40  ;;  %11228 = vrcp.f32 %v1312_v26  ;;  %v1316_v12 = vadd.f32 1.0, %v11211_v34  ;;  %9465 = vmatmul.mubr.msk.bf16.vlgmr.msra.gmra.mrb[0].mxu0 %vm12533_vm9, %v12505_v35  ;;  %v11219_v26 = vpop.eup %11218 }
 0x183   : > { %15206 = vst [vmem:[#allocation34_spill] sm:$0xff] %v15205_v5  ;;  %v8154_v46 = vmul.f32 -1.442695, %v12515_v24  ;;  %v2220_v61 = vrot.slane %v12468_v37, 1  ;;  %v15207_v23 = vrot.slane %v12283_v22, 7  ;;  %v1532_v9 = vsel %vm14958_vm1, %v1529_v56, %v1531_v25  ;;  %9497 = vmatpush3.bf16.msra.mxu0 %v11008_v55  ;;  %9468 = vmatprep.mubr.msk.bf16.mxu0 %vm12542_vm10, %v12518_v31  ;;  %v11221_v22 = vpop.eup %11220 }
 0x184   : > { %v1534_v40 = vsel %vm14958_vm1, %v1531_v25, %v1533_v16  ;;  %11230 = vrcp.f32 %v1313_v7  ;;  %v1536_v34 = vsel %vm14958_vm1, %v1533_v16, %v1535_v3  ;;  %v1317_v17 = vadd.f32 1.0, %v11213_v58  ;;  %9498 = vmatprep.subr.bf16.mxu0 %v11009_v53  ;;  %v11223_v16 = vpop.eup %11222 }
 0x185   : > { %v1530_v36 = vsel %vm14958_vm1, %v15207_v23, %v1529_v56  ;;  %11232 = vrcp.f32 %v1314_v11  ;;  %v2221_v32 = vsel %vm14959_vm0, %v2218_v15, %v2220_v61  ;;  %v11010_v23 = vld [vmem:[#allocation5 + $0x90] sm:$0xff]   ;;  %v15208_v56 = vand.u32 15, %v12237_v54 }
 0x186   : > { %v1537_v55 = vrot.slane %v12376_v63, 7  ;;  %v1539_v7 = vrot.slane %v12379_v20, 7  ;;  %v1541_v5 = vrot.slane %v12386_v29, 7  ;;  %11234 = vrcp.f32 %v1315_v28 }
 0x187   : > { %vm12569_vm11 = vcmp.ge.s32.totalorder %v15208_v56, 1  ;;  %v15211_v11 = vand.u32 15, %v12243_v13  ;;  %v1543_v54 = vrot.slane %v12389_v47, 7  ;;  %v12584_v58 = vmul.f32 %v11221_v22, %v12275_v41  ;;  %9499 = vmatpush3.bf16.msra.mxu0 %v11009_v53 }
 0x188   : > { %11236 = vrcp.f32 %v1316_v12  ;;  %v1318_v56 = vadd.f32 1.0, %v11215_v18  ;;  %v12586_v63 = vpack.c.bf16 %v1532_v9, %v1530_v36  ;;  %v12588_v20 = vpack.c.bf16 %v1536_v34, %v1534_v40  ;;  %v11225_v28 = vpop.eup %11224  ;;  %9500 = vmatprep.subr.bf16.mxu0 %v11010_v23  ;;  %v11011_v18 = vld [vmem:[#allocation5 + $0x98] sm:$0xff]   ;;  %vm12651_vm15 = vmpackc.low %vm14960_vm5, %vm12569_vm11 }
 0x189   : > { %vm12578_vm12 = vcmp.ge.s32.totalorder %v15211_v11, 1  ;;  %v1319_v29 = vadd.f32 1.0, %v11217_v49  ;;  %11238 = vpow2.f32 %v8153_v30  ;;  %v15214_v13 = vmov 0 }
 0x18a   : > { %v15215_v13 = vsel %vm12593_vm13, 4294967295, %v15214_v13  ;;  %v12598_v47 = vmul.f32 %v11223_v16, %v12286_v14  ;;  %11240 = vrcp.f32 %v1317_v17  ;;  %v1320_v41 = vadd.f32 1.0, %v11219_v26  ;;  %v11227_v12 = vpop.eup %11226  ;;  %9469 = vmatmul.mubr.msk.bf16.gmra.mrb[4].mxu0 %vm12593_vm13, %v12586_v63  ;;  %v11012_v17 = vld [vmem:[#allocation5 + $0xa0] sm:$0xff]   ;;  %vm12664_vm2 = vmpackc.low %vm14960_vm5, %vm12578_vm12 }
 0x18b   : > { %15216 = vst [vmem:[#allocation35_spill] sm:$0xff] %v15215_v13  ;;  %v2222_v36 = vrot.slane %v12584_v58, 1  ;;  %v15217_v30 = vmov 0  ;;  %v1538_v42 = vsel %vm14958_vm1, %v1535_v3, %v1537_v55  ;;  %v1540_v53 = vsel %vm14958_vm1, %v1537_v55, %v1539_v7  ;;  %9472 = vmatprep.mubr.msk.bf16.mxu0 %vm12604_vm14, %v12588_v20  ;;  %9501 = vmatpush3.bf16.msra.mxu0 %v11010_v23 }
 0x18c   : > { %v15218_v30 = vsel %vm12604_vm14, 4294967295, %v15217_v30  ;;  %11242 = vpow2.f32 %v8154_v46  ;;  %v8155_v14 = vmul.f32 -1.442695, %v12548_v45  ;;  %v1542_v49 = vsel %vm14958_vm1, %v1539_v7, %v1541_v5  ;;  %v11229_v26 = vpop.eup %11228  ;;  %9502 = vmatprep.subr.bf16.mxu0 %v11011_v18 }
 0x18d   : > { %15219 = vst [vmem:[#allocation36_spill] sm:$0xff] %v15218_v30  ;;  %v1544_v9 = vsel %vm14958_vm1, %v1541_v5, %v1543_v54  ;;  %v1545_v33 = vrot.slane %v12448_v59, 7  ;;  %11244 = vrcp.f32 %v1318_v56  ;;  %v1547_v3 = vrot.slane %v12468_v37, 7 }
 0x18e   : > { %11246 = vrcp.f32 %v1319_v29  ;;  %v2223_v40 = vsel %vm14959_vm0, %v2220_v61, %v2222_v36  ;;  %v2224_v46 = vrot.slane %v12598_v47, 1  ;;  %v1549_v59 = vrot.slane %v12584_v58, 7  ;;  %v11231_v37 = vpop.eup %11230 }
 0x18f   : > { %v1551_v5 = vrot.slane %v12598_v47, 7  ;;  %v12626_v34 = vmul.f32 %v11225_v28, %v12290_v19  ;;  %11248 = vrcp.f32 %v1320_v41  ;;  %v515_v61 = vadd.s32 144, %v12114_v10  ;;  %v11233_v23 = vpop.eup %11232  ;;  %9503 = vmatpush3.bf16.msra.mxu0 %v11011_v18 }
 0x190   : > { %v12630_v22 = vmul.f32 %v11227_v12, %v12293_v48  ;;  %11250 = vpow2.f32 %v8155_v14  ;;  %v12632_v55 = vpack.c.bf16 %v2223_v40, %v2221_v32  ;;  %v12634_v7 = vpack.c.bf16 %v1540_v53, %v1538_v42  ;;  %v11235_v56 = vpop.eup %11234  ;;  %9504 = vmatprep.subr.bf16.mxu0 %v11012_v17 }
 0x191   : > { %v645_v16 = vand.u32 15, %v12272_v39  ;;  %v12638_v19 = vadd.s32 160, %v12114_v10  ;;  %v12641_v11 = vadd.s32 176, %v12114_v10  ;;  %v12643_v29 = vpack.c.bf16 %v1544_v9, %v1542_v49  ;;  %v11013_v9 = vld [vmem:[#allocation5 + $0xa8] sm:$0xff]  }
 0x192   : > { %v1546_v48 = vsel %vm14958_vm1, %v1543_v54, %v1545_v33  ;;  %v1548_v41 = vsel %vm14958_vm1, %v1545_v33, %v1547_v3  ;;  %v2225_v32 = vsel %vm14959_vm0, %v2222_v36, %v2224_v46  ;;  %v11237_v28 = vpop.eup %11236  ;;  %v15221_v39 = vmov 0  ;;  %9473 = vmatmul.mubr.msk.bf16.gmra.mrb[8].mxu0 %vm12651_vm15, %v12634_v7 }
 0x193   : > { %15220 = vst [vmem:[#allocation37_spill] sm:$0xff] %v12643_v29  ;;  %v15222_v39 = vsel %vm12651_vm15, 4294967295, %v15221_v39  ;;  %v1550_v42 = vsel %vm14958_vm1, %v1547_v3, %v1549_v59  ;;  %v1552_v53 = vsel %vm14958_vm1, %v1549_v59, %v1551_v5  ;;  %v1553_v14 = vrot.slane %v12626_v34, 7  ;;  %v11239_v12 = vpop.eup %11238  ;;  %9476 = vmatprep.mubr.msk.bf16.mxu0 %vm12664_vm2, %v12643_v29  ;;  %9505 = vmatpush3.bf16.msra.mxu0 %v11012_v17 }
 0x194   : > { %15223 = vst [vmem:[#allocation38_spill] sm:$0xff] %v15222_v39  ;;  %v12659_v54 = vmul.f32 %v11229_v26, %v12309_v4  ;;  %v15224_v25 = vmov 0  ;;  %v659_v36 = vand.u32 15, %v515_v61  ;;  %v12670_v49 = vmul.f32 %v11231_v37, %v12346_v62  ;;  %v11241_v4 = vpop.eup %11240  ;;  %9506 = vmatprep.subr.bf16.mxu0 %v11013_v9 }
 0x195   : > { %v15225_v25 = vsel %vm12664_vm2, 4294967295, %v15224_v25  ;;  %v2226_v33 = vrot.slane %v12626_v34, 1  ;;  %v15227_v3 = vand.u32 15, %v12246_v21  ;;  %vm12679_vm4 = vcmp.ge.s32.totalorder %v645_v16, 1 }
 0x196   : > { %15226 = vst [vmem:[#allocation39_spill] sm:$0xff] %v15225_v25  ;;  %v673_v26 = vand.u32 15, %v12638_v19  ;;  %v1321_v59 = vadd.f32 1.0, %v11239_v12  ;;  %v11243_v61 = vpop.eup %11242  ;;  %v12687_v62 = vpack.c.bf16 %v1548_v41, %v1546_v48  ;;  %v12689_v37 = vpack.c.bf16 %v1552_v53, %v1550_v42  ;;  %vm12742_vm11 = vmpackc.low %vm14960_vm5, %vm12679_vm4 }
 0x197   : > { %vm12675_vm3 = vcmp.ge.s32.totalorder %v15227_v3, 1  ;;  %v2227_v3 = vsel %vm14959_vm0, %v2224_v46, %v2226_v33  ;;  %v11245_v16 = vpop.eup %11244  ;;  %v1554_v19 = vsel %vm14958_vm1, %v1551_v5, %v1553_v14  ;;  %v1557_v12 = vrot.slane %v12659_v54, 7  ;;  %v11014_v5 = vld [vmem:[#allocation5 + $0xb0] sm:$0xff]   ;;  %9507 = vmatpush3.bf16.msra.mxu0 %v11013_v9 }
 0x198   : > { %15232 = vst [vmem:[#allocation40_spill] sm:$0xff] %v12689_v37  ;;  %11252 = vrcp.f32 %v1321_v59  ;;  %v1322_v18 = vadd.f32 1.0, %v11243_v61  ;;  %v11247_v48 = vpop.eup %11246  ;;  %vm12698_vm7 = vcmp.ge.s32.totalorder %v659_v36, 1  ;;  %v15235_v42 = vrot.slane %v12630_v22, 7  ;;  %vm12729_vm8 = vmpackc.low %vm14960_vm5, %vm12675_vm3  ;;  %9508 = vmatprep.subr.bf16.mxu0 %v11014_v5 }
 0x199   : > { %v12707_v21 = vmul.f32 %v11233_v23, %v12355_v6  ;;  %v12709_v17 = vpack.c.bf16 %v2227_v3, %v2225_v32  ;;  %v11249_v59 = vpop.eup %11248  ;;  %v12712_v61 = vmul.f32 %v11235_v56, %v12358_v0  ;;  %v2228_v36 = vrot.slane %v12630_v22, 1  ;;  %v15237_v6 = vld [vmem:[#allocation25_spill] sm:$0xff]  ;;  %v15241_v56 = vld [vmem:[#allocation26_spill] sm:$0xff]  ;;  %v11015_v3 = vld [vmem:[#allocation5 + $0xb8] sm:$0xff]  }
 0x19a   : > { %v1556_v46 = vsel %vm14958_vm1, %v1553_v14, %v15235_v42  ;;  %11254 = vrcp.f32 %v1322_v18  ;;  %v2230_v25 = vrot.slane %v12659_v54, 1  ;;  %v11251_v39 = vpop.eup %11250  ;;  %v12717_v14 = vmul.f32 %v11237_v28, %v12361_v43  ;;  %v15236_v42 = vld [vmem:[#allocation24_spill] sm:$0xff]  ;;  %9477 = vmatmul.mubr.msk.bf16.gmra.mrb[12].mxu0 %vm12729_vm8, %v12687_v62  ;;  %vm12799_vm3 = vmpackc.low %vm14960_vm5, %vm12698_vm7 }
 0x19b   : > { %v12720_v53 = vmul.f32 %v11241_v4, %v15236_v42  ;;  %v12723_v23 = vmul.f32 %v11245_v16, %v15237_v6  ;;  %v2232_v32 = vrot.slane %v12670_v49, 1  ;;  %v15238_v0 = vmov 0  ;;  %9480 = vmatprep.mubr.msk.bf16.mxu0 %vm12742_vm11, %v12689_v37  ;;  %9509 = vmatpush3.bf16.msra.mxu0 %v11014_v5 }
 0x19c   : > { %v15239_v0 = vsel %vm12729_vm8, 4294967295, %v15238_v0  ;;  %v12734_v18 = vmul.f32 %v11247_v48, %v15241_v56  ;;  %v2229_v43 = vsel %vm14959_vm0, %v2226_v33, %v2228_v36  ;;  %v2231_v28 = vsel %vm14959_vm0, %v2228_v36, %v2230_v25  ;;  %v15245_v36 = vld [vmem:[#allocation27_spill] sm:$0xff]  ;;  %9510 = vmatprep.subr.bf16.mxu0 %v11015_v3 }
 0x19d   : > { %15240 = vst [vmem:[#allocation24_spill] sm:$0xff] %v15239_v0  ;;  %v2234_v4 = vrot.slane %v12707_v21, 1  ;;  %v15242_v15 = vmov 0  ;;  %v12746_v16 = vpack.c.bf16 %v2231_v28, %v2229_v43  ;;  %v2233_v9 = vsel %vm14959_vm0, %v2230_v25, %v2232_v32 }
 0x19e   : > { %v15243_v15 = vsel %vm12742_vm11, 4294967295, %v15242_v15  ;;  %v2236_v48 = vrot.slane %v12712_v61, 1  ;;  %v2238_v33 = vrot.slane %v12717_v14, 1  ;;  %v12752_v42 = vmul.f32 %v11249_v59, %v15245_v36 }
 0x19f   : > { %15244 = vst [vmem:[#allocation25_spill] sm:$0xff] %v15243_v15  ;;  %v1323_v6 = vadd.f32 1.0, %v11251_v39  ;;  %v2235_v40 = vsel %vm14959_vm0, %v2232_v32, %v2234_v4  ;;  %v2240_v56 = vrot.slane %v12720_v53, 1  ;;  %v2242_v29 = vrot.slane %v12723_v23, 1  ;;  %9511 = vmatpush3.bf16.msra.mxu0 %v11015_v3  ;;  %v11400_v39 = vld [vmem:[%s11904_s16 + $0xf8] sm:$0xff] }
 0x1a0   : > { %v12759_v43 = vpack.c.bf16 %v2235_v40, %v2233_v9  ;;  %v2237_v25 = vsel %vm14959_vm0, %v2234_v4, %v2236_v48  ;;  %v2239_v28 = vsel %vm14959_vm0, %v2236_v48, %v2238_v33  ;;  %vm12767_vm12 = vcmp.ge.s32.totalorder %v673_v26, 1  ;;  %v12780_v40 = vld [vmem:[#allocation5 + $0xc0] sm:$0xff]  }
 0x1a1   : > { %v15248_v59 = vrot.slane %v12630_v22, 7  ;;  %v12774_v9 = vpack.c.bf16 %v2239_v28, %v2237_v25  ;;  %v2241_v4 = vsel %vm14959_vm0, %v2238_v33, %v2240_v56  ;;  %v15249_v48 = vrot.slane %v12670_v49, 7  ;;  %vm12813_vm4 = vmpackc.low %vm14960_vm5, %vm12767_vm12  ;;  %9544 = vmatprep.subr.bf16.mxu0 %v12780_v40 }
 0x1a2   : > { %v2243_v26 = vsel %vm14959_vm0, %v2240_v56, %v2242_v29  ;;  %v2244_v15 = vrot.slane %v12734_v18, 1  ;;  %v2246_v0 = vrot.slane %v12752_v42, 1  ;;  %v12785_v5 = vpack.c.bf16 %v1556_v46, %v1554_v19 }
 0x1a3   : > { %v1558_v32 = vsel %vm14958_vm1, %v15248_v59, %v1557_v12  ;;  %v1560_v36 = vsel %vm14958_vm1, %v1557_v12, %v15249_v48  ;;  %v11253_v59 = vpop.eup %11252  ;;  %v1561_v25 = vrot.slane %v12707_v21, 7  ;;  %v521_v33 = vadd.s32 192, %v12114_v10 }
 0x1a4   : > { %15250 = vst [vmem:[#allocation26_spill] sm:$0xff] %v12785_v5  ;;  %v12789_v28 = vpack.c.bf16 %v2243_v26, %v2241_v4  ;;  %v12792_v12 = vmul.f32 %v11253_v59, %v12418_v52  ;;  %11256 = vrcp.f32 %v1323_v6  ;;  %v2245_v56 = vsel %vm14959_vm0, %v2242_v29, %v2244_v15  ;;  %v11255_v37 = vpop.eup %11254  ;;  %v11399_v6 = vld [vmem:[%s11904_s16 + $0xf0] sm:$0xff]  ;;  %9481 = vmatmul.mubr.msk.bf16.gmra.mrb[16].mxu0 %vm12799_vm3, %v12785_v5 }
 0x1a5   : > { %v2247_v48 = vsel %vm14959_vm0, %v2244_v15, %v2246_v0  ;;  %v15251_v19 = vmov 0  ;;  %v12803_v46 = vpack.c.bf16 %v1560_v36, %v1558_v32  ;;  %v1563_v4 = vrot.slane %v12712_v61, 7 }
 0x1a6   : > { %v15252_v19 = vsel %vm12799_vm3, 4294967295, %v15251_v19  ;;  %v12806_v52 = vpack.c.bf16 %v2247_v48, %v2245_v56  ;;  %v1156_v29 = vmul.f32 %v11399_v6, %v12126_v60  ;;  %v15255_v41 = vmov 0  ;;  %v15354_v13 = vld [vmem:[#allocation25_spill] sm:$0xff] }
 0x1a7   : > { %15253 = vst [vmem:[#allocation27_spill] sm:$0xff] %v15252_v19  ;;  %15254 = vst [vmem:[#allocation41_spill] sm:$0xff] %v12803_v46  ;;  %v15256_v41 = vsel %vm12813_vm4, 4294967295, %v15255_v41  ;;  %v1565_v15 = vrot.slane %v12717_v14, 7  ;;  %v1567_v32 = vrot.slane %v12720_v53, 7  ;;  %v12820_v36 = vmul.f32 %v11255_v37, %v12515_v24  ;;  %9484 = vmatprep.mubr.msk.bf16.mxu0 %vm12813_vm4, %v12803_v46 }
 0x1a8   : > { %15257 = vst [vmem:[#allocation42_spill] sm:$0xff] %v15256_v41  ;;  %v2248_v3 = vrot.slane %v12792_v12, 1  ;;  %v701_v26 = vand.u32 15, %v521_v33  ;;  %v12825_v59 = vadd.f32 %v12142_v27, %v1156_v29  ;;  %v1157_v56 = vmul.f32 %v11400_v39, %v12126_v60 }
 0x1a9   : > { %v15258_v48 = vand.u32 15, %v12641_v11  ;;  %v14968_v33 = vrot.slane %v12820_v36, 1  ;;  %v15261_v60 = vrot.slane %v12670_v49, 7  ;;  %v1564_v29 = vsel %vm14958_vm1, %v1561_v25, %v1563_v4 }
 0x1aa   : > { %v2249_v37 = vsel %vm14959_vm0, %v2246_v0, %v2248_v3  ;;  %v523_v11 = vadd.s32 208, %v12114_v10  ;;  %v8156_v39 = vmul.f32 -1.442695, %v12825_v59  ;;  %v1568_v0 = vsel %vm14958_vm1, %v1565_v15, %v1567_v32 }
 0x1ab   : > { %vm12834_vm7 = vcmp.ge.s32.totalorder %v15258_v48, 1  ;;  %v1562_v6 = vsel %vm14958_vm1, %v15261_v60, %v1561_v25  ;;  %v1566_v48 = vsel %vm14958_vm1, %v1563_v4, %v1565_v15  ;;  %v2251_v19 = vsel %vm14959_vm0, %v2248_v3, %v14968_v33 }
 0x1ac   : > { %v12855_v41 = vadd.f32 %v12142_v27, %v1157_v56  ;;  %vm937_vm12 = vcmp.ge.s32.totalorder %v701_v26, 1  ;;  %v525_v60 = vadd.s32 224, %v12114_v10  ;;  %v12858_v46 = vpack.c.bf16 %v2251_v19, %v2249_v37  ;;  %vm12866_vm1 = vmpackc.low %vm14960_vm5, %vm12834_vm7 }
 0x1ad   : > { %11258 = vpow2.f32 %v8156_v39  ;;  %v12860_v25 = vpack.c.bf16 %v1564_v29, %v1562_v6  ;;  %v15262_v4 = vmov 0  ;;  %v12870_v15 = vpack.c.bf16 %v1568_v0, %v1566_v48  ;;  %vm12875_vm0 = vmpackc.low %vm14960_vm5, %vm937_vm12 }
 0x1ae   : > { %v8157_v5 = vmul.f32 -1.442695, %v12855_v41  ;;  %v15263_v4 = vsel %vm12866_vm1, 4294967295, %v15262_v4  ;;  %v1569_v27 = vrot.slane %v12723_v23, 7  ;;  %v1571_v3 = vrot.slane %v12734_v18, 7  ;;  %v11257_v19 = vpop.eup %11256 }
 0x1af   : > { %15264 = vst [vmem:[#allocation43_spill] sm:$0xff] %v15263_v4  ;;  %v15265_v26 = vmov 0  ;;  %v715_v56 = vand.u32 15, %v523_v11  ;;  %v1573_v24 = vrot.slane %v12752_v42, 7  ;;  %v1575_v37 = vrot.slane %v12792_v12, 7  ;;  %9485 = vmatmul.mubr.msk.bf16.gmra.mrb[20].mxu0 %vm12866_vm1, %v12860_v25 }
 0x1b0   : > { %v15266_v26 = vsel %vm12875_vm0, 4294967295, %v15265_v26  ;;  %11260 = vpow2.f32 %v8157_v5  ;;  %v729_v6 = vand.u32 15, %v525_v60  ;;  %9488 = vmatprep.mubr.msk.bf16.mxu0 %vm12875_vm0, %v12870_v15  ;;  %vm15268_vm7 = vcmask 1040384  }
 0x1b1   : > { %15267 = vst [vmem:[#allocation44_spill] sm:$0xff] %v15266_v26  ;;  %v1570_v29 = vsel %vm15268_vm7, %v1567_v32, %v1569_v27  ;;  %vm15269_vm12 = vmmov %vm15268_vm7  ;;  %v12890_v11 = vmul.f32 %v11257_v19, %v12548_v45  ;;  %vm939_vm5 = vcmp.ge.s32.totalorder %v715_v56, 1  ;;  %v527_v0 = vadd.s32 240, %v12114_v10 }
 0x1b2   : > { %v1572_v39 = vsel %vm15269_vm12, %v1569_v27, %v1571_v3  ;;  %vm15270_vm4 = vmmov %vm15268_vm7  ;;  %vm941_vm11 = vcmp.ge.s32.totalorder %v729_v6, 1  ;;  %v498_v60 = vadd.s32 8, %v12114_v10  ;;  %vm15273_vm0 = vmmov 1  }
 0x1b3   : > { %v1574_v48 = vsel %vm15270_vm4, %v1571_v3, %v1573_v24  ;;  %vm15271_vm3 = vmmov %vm15270_vm4  ;;  %v12896_v33 = vpack.c.bf16 %v1572_v39, %v1570_v29  ;;  %v15274_v32 = vmov 0  ;;  %v1577_v27 = vrot.slane %v12820_v36, 7 }
 0x1b4   : > { %v1576_v5 = vsel %vm15271_vm3, %v1573_v24, %v1575_v37  ;;  %vm12899_vm7 = vmpackc.low %vm15273_vm0, %vm939_vm5  ;;  %v1579_v3 = vrot.slane %v12890_v11, 7  ;;  %v15278_v19 = vmov 0  ;;  %v743_v56 = vand.u32 15, %v527_v0 }
 0x1b5   : > { %15272 = vst [vmem:[#allocation45_spill] sm:$0xff] %v12896_v33  ;;  %v15275_v32 = vsel %vm12899_vm7, 4294967295, %v15274_v32  ;;  %v12903_v45 = vpack.c.bf16 %v1576_v5, %v1574_v48  ;;  %vm12908_vm3 = vmpackc.low %vm15273_vm0, %vm941_vm11  ;;  %v15281_v24 = vmov 0.0   ;;  %v540_v39 = vand.u32 15, %v498_v60 }
 0x1b6   : > { %15276 = vst [vmem:[#allocation46_spill] sm:$0xff] %v15275_v32  ;;  %v15279_v19 = vsel %vm12908_vm3, 4294967295, %v15278_v19  ;;  %v12913_v6 = vrot.slane %v15281_v24, 1  ;;  %vm15283_vm5 = vmmov %vm15270_vm4  ;;  %v15285_v24 = vrot.slane %v12255_v38, 1  ;;  %vm15286_vm12 = vcmask 1046528   ;;  %v15361_v30 = vld [vmem:[#allocation43_spill] sm:$0xff] }
 0x1b7   : > { %v11259_v26 = vpop.eup %11258  ;;  %15277 = vst [vmem:[#allocation47_spill] sm:$0xff] %v12903_v45  ;;  %15280 = vst [vmem:[#allocation48_spill] sm:$0xff] %v15279_v19  ;;  %9489 = vmatmul.mubr.msk.bf16.gmra.mrb[24].mxu0 %vm12899_vm7, %v12896_v33  ;;  %v1578_v48 = vsel %vm15283_vm5, %v1575_v37, %v1577_v27  ;;  %v500_v60 = vadd.s32 24, %v12114_v10  ;;  %vm946_vm1 = vcmp.le.s32.totalorder %v540_v39, 14  ;;  %v15287_v37 = vmov 0 }
 0x1b8   : > { %15282 = vst [vmem:[#allocation49_spill] sm:$0xff] %v12913_v6  ;;  %v1324_v29 = vadd.f32 1.0, %v11259_v26  ;;  %9492 = vmatprep.mubr.msk.bf16.mxu0 %vm12908_vm3, %v12903_v45  ;;  %vm15284_vm11 = vmmov %vm15270_vm4  ;;  %vm943_vm4 = vcmp.ge.s32.totalorder %v743_v56, 1  ;;  %v2195_v26 = vsel %vm15286_vm12, %v12913_v6, %v15285_v24  ;;  %v15290_v38 = vmov 0 }
 0x1b9   : > { %v1580_v5 = vsel %vm15284_vm11, %v1577_v27, %v1579_v3  ;;  %vm12932_vm3 = vmpackc.low %vm15273_vm0, %vm943_vm4  ;;  %v554_v27 = vand.u32 15, %v500_v60 }
 0x1ba   : > { %v11261_v4 = vpop.eup %11260  ;;  %11262 = vrcp.f32 %v1324_v29  ;;  %v502_v29 = vadd.s32 40, %v12114_v10  ;;  %v12929_v32 = vpack.c.bf16 %v1580_v5, %v1578_v48  ;;  %v15288_v37 = vsel %vm12932_vm3, 4294967295, %v15287_v37  ;;  %vm12938_vm5 = vmpackc.low %vm946_vm1, %vm15273_vm0 }
 0x1bb   : > { %v1325_v0 = vadd.f32 1.0, %v11261_v4  ;;  %15289 = vst [vmem:[#allocation50_spill] sm:$0xff] %v15288_v37  ;;  %v8231_v4 = vpack.c.bf16 %v2195_v26, %v12913_v6  ;;  %v15291_v38 = vsel %vm12938_vm5, 4294967295, %v15290_v38  ;;  %vm948_vm11 = vcmp.le.s32.totalorder %v554_v27, 14  ;;  %v15300_v6 = vld [vmem:[#allocation29_spill] sm:$0xff] }
 0x1bc   : > { %15292 = vst [vmem:[#allocation51_spill] sm:$0xff] %v15291_v38  ;;  %v568_v56 = vand.u32 15, %v502_v29  ;;  %v504_v48 = vadd.s32 56, %v12114_v10  ;;  %v506_v5 = vadd.s32 72, %v12114_v10  ;;  %vm12953_vm1 = vmpackc.low %vm948_vm11, %vm15273_vm0  ;;  %v15293_v26 = vmov 0  ;;  %v11036_v37 = vld [vmem:[#allocation5 + $0x160] sm:$0xff]  }
 0x1bd   : > { %11264 = vrcp.f32 %v1325_v0  ;;  %v15294_v26 = vsel %vm12953_vm1, 4294967295, %v15293_v26  ;;  %v15296_v29 = vmov 0 }
 0x1be   : > { %vm950_vm4 = vcmp.le.s32.totalorder %v568_v56, 14  ;;  %15295 = vst [vmem:[#allocation52_spill] sm:$0xff] %v15294_v26  ;;  %v582_v27 = vand.u32 15, %v504_v48  ;;  %v11018_v48 = vld [vmem:[#allocation5 + $0xd0] sm:$0xff]   ;;  %v11019_v26 = vld [vmem:[#allocation5 + $0xd8] sm:$0xff]  }
 0x1bf   : > { %9493 = vmatmul.mubr.msk.bf16.gmra.mrb[28].mxu0 %vm12932_vm3, %v12929_v32  ;;  %vm12959_vm12 = vmpackc.low %vm950_vm4, %vm15273_vm0 }
 0x1c0   : > { %9512 = vmatprep.mubr.msk.bf16.mxu0 %vm12938_vm5, %v8231_v4  ;;  %v15297_v29 = vsel %vm12959_vm12, 4294967295, %v15296_v29  ;;  %v11017_v4 = vld [vmem:[#allocation5 + $0xc8] sm:$0xff]   ;;  %vm15299_vm5 = vcmask 1040384   ;;  %vm952_vm11 = vcmp.le.s32.totalorder %v582_v27, 14  ;;  %v15305_v27 = vmov 0 }
 0x1c1   : > { %15298 = vst [vmem:[#allocation53_spill] sm:$0xff] %v15297_v29 }
 0x1c4   : > { %v11263_v39 = vpop.eup %11262 }
 0x1c5   : > { %v12950_v0 = vmul.f32 %v11263_v39, %v12825_v59  ;;  %v596_v59 = vand.u32 15, %v506_v5  ;;  %v510_v5 = vadd.s32 104, %v12114_v10 }
 0x1c7   : > { %v11265_v24 = vpop.eup %11264  ;;  %v2594_v60 = vrot.slane %v12950_v0, 7  ;;  %9513 = vmatmul.mubr.msk.bf16.vlgmr.msra.gmra.mrb[0].mxu0 %vm12953_vm1, %v15300_v6  ;;  %vm954_vm4 = vcmp.le.s32.totalorder %v596_v59, 14  ;;  %vm12983_vm1 = vmpackc.low %vm952_vm11, %vm15273_vm0  ;;  %v11020_v59 = vld [vmem:[#allocation5 + $0xe0] sm:$0xff]  }
 0x1c8   : > { %v12964_v56 = vmul.f32 %v11265_v24, %v12855_v41  ;;  %9545 = vmatpush3.bf16.msra.mxu0 %v12780_v40  ;;  %9516 = vmatprep.mubr.msk.bf16.mxu0 %vm12959_vm12, %v12438_v51  ;;  %v508_v41 = vadd.s32 88, %v12114_v10  ;;  %v15302_v40 = vmov 0  ;;  %vm12988_vm12 = vmpackc.low %vm954_vm4, %vm15273_vm0 }
 0x1c9   : > { %v2595_v39 = vsel %vm15299_vm5, %v1579_v3, %v2594_v60  ;;  %9546 = vmatprep.subr.bf16.mxu0 %v11017_v4  ;;  %v15303_v40 = vsel %vm12983_vm1, 4294967295, %v15302_v40  ;;  %v15306_v27 = vsel %vm12988_vm12, 4294967295, %v15305_v27 }
 0x1ca   : > { %v14999_v38 = vrot.slane %v12964_v56, 7  ;;  %15304 = vst [vmem:[#allocation54_spill] sm:$0xff] %v15303_v40  ;;  %15307 = vst [vmem:[#allocation55_spill] sm:$0xff] %v15306_v27  ;;  %v610_v29 = vand.u32 15, %v508_v41  ;;  %v15308_v41 = vmov 0 }
 0x1cc   : > { %v2597_v3 = vsel %vm15299_vm5, %v2594_v60, %v14999_v38  ;;  %9547 = vmatpush3.bf16.msra.mxu0 %v11017_v4  ;;  %v624_v60 = vand.u32 15, %v510_v5  ;;  %vm956_vm11 = vcmp.le.s32.totalorder %v610_v29, 14  ;;  %v512_v4 = vadd.s32 120, %v12114_v10  ;;  %v11021_v29 = vld [vmem:[#allocation5 + $0xe8] sm:$0xff]  }
 0x1cd   : > { %v12980_v24 = vpack.c.bf16 %v2597_v3, %v2595_v39  ;;  %9548 = vmatprep.subr.bf16.mxu0 %v11018_v48  ;;  %v514_v39 = vadd.s32 136, %v12114_v10  ;;  %vm13001_vm4 = vmpackc.low %vm956_vm11, %vm15273_vm0  ;;  %v15311_v3 = vmov 0  ;;  %v15314_v38 = vmov 0 }
 0x1ce   : > { %vm958_vm5 = vcmp.le.s32.totalorder %v624_v60, 14  ;;  %v15309_v41 = vsel %vm13001_vm4, 4294967295, %v15308_v41  ;;  %v516_v60 = vadd.s32 152, %v12114_v10 }
 0x1cf   : > { %15301 = vst [vmem:[#allocation29_spill] sm:$0xff] %v12980_v24  ;;  %9517 = vmatmul.mubr.msk.bf16.gmra.mrb[4].mxu0 %vm12983_vm1, %v12445_v2  ;;  %15310 = vst [vmem:[#allocation56_spill] sm:$0xff] %v15309_v41  ;;  %v652_v5 = vand.u32 15, %v514_v39  ;;  %v518_v39 = vadd.s32 168, %v12114_v10 }
 0x1d0   : > { %9520 = vmatprep.mubr.msk.bf16.mxu0 %vm12988_vm12, %v12476_v57  ;;  %9549 = vmatpush3.bf16.msra.mxu0 %v11018_v48  ;;  %vm13006_vm1 = vmpackc.low %vm958_vm5, %vm15273_vm0  ;;  %v638_v48 = vand.u32 15, %v512_v4  ;;  %v11022_v4 = vld [vmem:[#allocation5 + $0xf0] sm:$0xff]  }
 0x1d1   : > { %9550 = vmatprep.subr.bf16.mxu0 %v11019_v26  ;;  %v15312_v3 = vsel %vm13006_vm1, 4294967295, %v15311_v3  ;;  %vm962_vm5 = vcmp.le.s32.totalorder %v652_v5, 14  ;;  %v13038_v5 = vpack.c.bf16 %v12630_v22, %v12626_v34  ;;  %v522_v34 = vadd.s32 200, %v12114_v10 }
 0x1d2   : > { %15313 = vst [vmem:[#allocation57_spill] sm:$0xff] %v15312_v3  ;;  %vm960_vm11 = vcmp.le.s32.totalorder %v638_v48, 14  ;;  %v680_v48 = vand.u32 15, %v518_v39  ;;  %v11024_v39 = vld [vmem:[#allocation5 + $0x100] sm:$0xff]   ;;  %v15320_v22 = vmov 0 }
 0x1d4   : > { %9551 = vmatpush3.bf16.msra.mxu0 %v11019_v26  ;;  %v13018_v26 = vpack.c.bf16 %v12598_v47, %v12584_v58  ;;  %v15317_v58 = vmov 0  ;;  %v666_v47 = vand.u32 15, %v516_v60  ;;  %v520_v60 = vadd.s32 184, %v12114_v10 }
 0x1d5   : > { %9552 = vmatprep.subr.bf16.mxu0 %v11020_v59 }
 0x1d6   : > { %9432 = vmatprep.mubr.bf16.mxu1 %v13018_v26 }
 0x1d7   : > { %9521 = vmatmul.mubr.msk.bf16.gmra.mrb[8].mxu0 %vm13001_vm4, %v12503_v44  ;;  %vm13024_vm4 = vmpackc.low %vm960_vm11, %vm15273_vm0  ;;  %vm964_vm11 = vcmp.le.s32.totalorder %v666_v47, 14  ;;  %9433 = vmatmul.mubr.bf16.vlgmr.msra.gmra.mrb[0].mxu1 %v13038_v5  ;;  %v13066_v47 = vpack.c.bf16 %v12712_v61, %v12707_v21  ;;  %v15326_v21 = vmov 0  ;;  %v15329_v61 = vmov 0 }
 0x1d8   : > { %9524 = vmatprep.mubr.msk.bf16.mxu0 %vm13006_vm1, %v12550_v8  ;;  %9553 = vmatpush3.bf16.msra.mxu0 %v11020_v59  ;;  %v15315_v38 = vsel %vm13024_vm4, 4294967295, %v15314_v38  ;;  %vm13029_vm1 = vmpackc.low %vm962_vm5, %vm15273_vm0  ;;  %v11023_v59 = vld [vmem:[#allocation5 + $0xf8] sm:$0xff]   ;;  %vm966_vm5 = vcmp.le.s32.totalorder %v680_v48, 14  ;;  %v524_v48 = vadd.s32 216, %v12114_v10 }
 0x1d9   : > { %9554 = vmatprep.subr.bf16.mxu0 %v11021_v29  ;;  %15316 = vst [vmem:[#allocation58_spill] sm:$0xff] %v15315_v38  ;;  %v15318_v58 = vsel %vm13029_vm1, 4294967295, %v15317_v58 }
 0x1da   : > { %15319 = vst [vmem:[#allocation59_spill] sm:$0xff] %v15318_v58 }
 0x1dc   : > { %9555 = vmatpush3.bf16.msra.mxu0 %v11021_v29  ;;  %v13045_v29 = vpack.c.bf16 %v12670_v49, %v12659_v54  ;;  %v15323_v54 = vmov 0  ;;  %v694_v49 = vand.u32 15, %v520_v60  ;;  %v526_v60 = vadd.s32 232, %v12114_v10 }
 0x1dd   : > { %9556 = vmatprep.subr.bf16.mxu0 %v11022_v4 }
 0x1de   : > { %9436 = vmatprep.mubr.bf16.mxu1 %v13045_v29 }
 0x1df   : > { %9525 = vmatmul.mubr.msk.bf16.gmra.mrb[12].mxu0 %vm13024_vm4, %v12632_v55  ;;  %vm13052_vm4 = vmpackc.low %vm964_vm11, %vm15273_vm0  ;;  %vm968_vm11 = vcmp.le.s32.totalorder %v694_v49, 14  ;;  %9437 = vmatmul.mubr.bf16.gmra.mrb[4].mxu1 %v13066_v47  ;;  %v13101_v49 = vpack.c.bf16 %v12792_v12, %v12752_v42  ;;  %v15336_v42 = vmov 0  ;;  %v13123_v12 = vpack.c.bf16 %v12890_v11, %v12820_v36 }
 0x1e0   : > { %9528 = vmatprep.mubr.msk.bf16.mxu0 %vm13029_vm1, %v12709_v17  ;;  %9557 = vmatpush3.bf16.msra.mxu0 %v11022_v4  ;;  %v15321_v22 = vsel %vm13052_vm4, 4294967295, %v15320_v22  ;;  %vm13057_vm1 = vmpackc.low %vm966_vm5, %vm15273_vm0  ;;  %v708_v4 = vand.u32 15, %v522_v34  ;;  %v13094_v34 = vpack.c.bf16 %v12734_v18, %v12723_v23  ;;  %v15333_v23 = vmov 0 }
 0x1e1   : > { %9558 = vmatprep.subr.bf16.mxu0 %v11023_v59  ;;  %15322 = vst [vmem:[#allocation60_spill] sm:$0xff] %v15321_v22  ;;  %v15324_v54 = vsel %vm13057_vm1, 4294967295, %v15323_v54  ;;  %15332 = vst [vmem:[#allocation64_spill] sm:$0xff] %v13101_v49  ;;  %v2252_v18 = vrot.slane %v12890_v11, 1  ;;  %v15344_v11 = vmov 0 }
 0x1e2   : > { %15325 = vst [vmem:[#allocation61_spill] sm:$0xff] %v15324_v54  ;;  %vm970_vm5 = vcmp.le.s32.totalorder %v708_v4, 14  ;;  %v528_v4 = vadd.s32 248, %v12114_v10  ;;  %15339 = vst [vmem:[#allocation67_spill] sm:$0xff] %v13123_v12 }
 0x1e4   : > { %9559 = vmatpush3.bf16.msra.mxu0 %v11023_v59  ;;  %v13073_v59 = vpack.c.bf16 %v12720_v53, %v12717_v14  ;;  %v722_v53 = vand.u32 15, %v524_v48  ;;  %v736_v14 = vand.u32 15, %v526_v60  ;;  %v15020_v48 = vrot.slane %v12950_v0, 1 }
 0x1e5   : > { %9592 = vmatprep.subr.bf16.mxu0 %v11024_v39  ;;  %v750_v10 = vand.u32 15, %v528_v4  ;;  %v15340_v60 = vrot.slane %v12820_v36, 1  ;;  %v15343_v4 = vmov 0.0|0.0   ;;  %v11025_v36 = vld [vmem:[#allocation5 + $0x108] sm:$0xff]  }
 0x1e6   : > { %9440 = vmatprep.mubr.bf16.mxu1 %v13073_v59 }
 0x1e7   : > { %9529 = vmatmul.mubr.msk.bf16.gmra.mrb[16].mxu0 %vm13052_vm4, %v12746_v16  ;;  %vm13080_vm4 = vmpackc.low %vm968_vm11, %vm15273_vm0  ;;  %vm972_vm11 = vcmp.le.s32.totalorder %v722_v53, 14  ;;  %9441 = vmatmul.mubr.bf16.gmra.mrb[8].mxu1 %v13094_v34  ;;  %vm976_vm12 = vcmp.le.s32.totalorder %v750_v10, 14  ;;  %v11026_v10 = vld [vmem:[#allocation5 + $0x110] sm:$0xff]  }
 0x1e8   : > { %9532 = vmatprep.mubr.msk.bf16.mxu0 %vm13057_vm1, %v12759_v43  ;;  %v15327_v21 = vsel %vm13080_vm4, 4294967295, %v15326_v21  ;;  %vm13085_vm1 = vmpackc.low %vm970_vm5, %vm15273_vm0  ;;  %vm974_vm5 = vcmp.le.s32.totalorder %v736_v14, 14  ;;  %9444 = vmatprep.mubr.bf16.mxu1 %v13101_v49 }
 0x1e9   : > { %15328 = vst [vmem:[#allocation62_spill] sm:$0xff] %v15327_v21  ;;  %v15330_v61 = vsel %vm13085_vm1, 4294967295, %v15329_v61 }
 0x1ea   : > { %15331 = vst [vmem:[#allocation63_spill] sm:$0xff] %v15330_v61 }
 0x1ef   : > { %9533 = vmatmul.mubr.msk.bf16.gmra.mrb[20].mxu0 %vm13080_vm4, %v12774_v9  ;;  %vm13107_vm4 = vmpackc.low %vm972_vm11, %vm15273_vm0  ;;  %vm15341_vm11 = vcmask 1046528   ;;  %9445 = vmatmul.mubr.bf16.gmra.mrb[12].mxu1 %v13123_v12 }
 0x1f0   : > { %9536 = vmatprep.mubr.msk.bf16.mxu0 %vm13085_vm1, %v12789_v28  ;;  %v15334_v23 = vsel %vm13107_vm4, 4294967295, %v15333_v23  ;;  %vm13114_vm1 = vmpackc.low %vm974_vm5, %vm15273_vm0  ;;  %v2253_v53 = vsel %vm15341_vm11, %v15340_v60, %v2252_v18  ;;  %9848 = vmatprep.mubr.bf16.mxu1 %v15343_v4  ;;  %v11027_v60 = vld [vmem:[#allocation5 + $0x118] sm:$0xff]  }
 0x1f1   : > { %15335 = vst [vmem:[#allocation65_spill] sm:$0xff] %v15334_v23  ;;  %v15337_v42 = vsel %vm13114_vm1, 4294967295, %v15336_v42  ;;  %vm15342_vm5 = vmmov %vm15341_vm11  ;;  %v11031_v4 = vld [vmem:[#allocation5 + $0x138] sm:$0xff]  }
 0x1f2   : > { %15338 = vst [vmem:[#allocation66_spill] sm:$0xff] %v15337_v42  ;;  %v2255_v14 = vsel %vm15342_vm5, %v2252_v18, %v15020_v48  ;;  %v11030_v48 = vld [vmem:[#allocation5 + $0x130] sm:$0xff]   ;;  %vm15362_vm5 = vnez %v15361_v30  ;;  %v11033_v30 = vld [vmem:[#allocation5 + $0x148] sm:$0xff]  }
 0x1f3   : > { %v13136_v23 = vpack.c.bf16 %v2255_v14, %v2253_v53  ;;  %v15348_v53 = vld [vmem:[#allocation37_spill] sm:$0xff] }
 0x1f4   : > { %v11032_v14 = vld [vmem:[#allocation5 + $0x140] sm:$0xff]  }
 0x1f7   : > { %9537 = vmatmul.mubr.msk.bf16.gmra.mrb[24].mxu0 %vm13107_vm4, %v12806_v52  ;;  %vm13139_vm4 = vmpackc.low %vm976_vm12, %vm15273_vm0  ;;  %vm15355_vm0 = vnez %v15354_v13  ;;  %v15363_v13 = vld [vmem:[#allocation44_spill] sm:$0xff] }
 0x1f8   : > { %9540 = vmatprep.mubr.msk.bf16.mxu0 %vm13114_vm1, %v12858_v46  ;;  %v15345_v11 = vsel %vm13139_vm4, 4294967295, %v15344_v11 }
 0x1f9   : > { %15346 = vst [vmem:[#allocation68_spill] sm:$0xff] %v15345_v11 }
 0x1ff   : > { %9541 = vmatmul.mubr.msk.bf16.gmra.mrb[28].mxu0 %vm13139_vm4, %v13136_v23 }
 0x200   : > { %9560 = vmatprep.mubr.msk.bf16.mxu0 %vm12486_vm6, %v12505_v35  ;;  %v11028_v35 = vld [vmem:[#allocation5 + $0x120] sm:$0xff]  }
 0x207   : > { %9561 = vmatmul.mubr.msk.bf16.vlgmr.msra.gmra.mrb[0].mxu0 %vm12533_vm9, %v12518_v31 }
 0x208   : > { %9593 = vmatpush3.bf16.msra.mxu0 %v11024_v39  ;;  %9564 = vmatprep.mubr.msk.bf16.mxu0 %vm12542_vm10, %v12586_v63  ;;  %v11029_v39 = vld [vmem:[#allocation5 + $0x128] sm:$0xff]  }
 0x209   : > { %9594 = vmatprep.subr.bf16.mxu0 %v11025_v36 }
 0x20c   : > { %9595 = vmatpush3.bf16.msra.mxu0 %v11025_v36  ;;  %v15356_v36 = vld [vmem:[#allocation41_spill] sm:$0xff] }
 0x20d   : > { %9596 = vmatprep.subr.bf16.mxu0 %v11026_v10 }
 0x20f   : > { %9565 = vmatmul.mubr.msk.bf16.gmra.mrb[4].mxu0 %vm12593_vm13, %v12588_v20 }
 0x210   : > { %9568 = vmatprep.mubr.msk.bf16.mxu0 %vm12604_vm14, %v12634_v7  ;;  %9597 = vmatpush3.bf16.msra.mxu0 %v11026_v10  ;;  %v15351_v10 = vld [vmem:[#allocation40_spill] sm:$0xff] }
 0x211   : > { %9598 = vmatprep.subr.bf16.mxu0 %v11027_v60 }
 0x214   : > { %9599 = vmatpush3.bf16.msra.mxu0 %v11027_v60  ;;  %v15353_v60 = vld [vmem:[#allocation26_spill] sm:$0xff] }
 0x215   : > { %9600 = vmatprep.subr.bf16.mxu0 %v11028_v35 }
 0x217   : > { %9569 = vmatmul.mubr.msk.bf16.gmra.mrb[8].mxu0 %vm12651_vm15, %v15348_v53 }
 0x218   : > { %9572 = vmatprep.mubr.msk.bf16.mxu0 %vm12664_vm2, %v12687_v62  ;;  %9601 = vmatpush3.bf16.msra.mxu0 %v11028_v35  ;;  %v15357_v35 = vld [vmem:[#allocation27_spill] sm:$0xff] }
 0x219   : > { %9602 = vmatprep.subr.bf16.mxu0 %v11029_v39  ;;  %vm15358_vm12 = vnez %v15357_v35 }
 0x21c   : > { %9603 = vmatpush3.bf16.msra.mxu0 %v11029_v39  ;;  %v15359_v39 = vld [vmem:[#allocation42_spill] sm:$0xff] }
 0x21d   : > { %9604 = vmatprep.subr.bf16.mxu0 %v11030_v48  ;;  %vm15360_vm11 = vnez %v15359_v39  ;;  %v15368_v39 = vld [vmem:[#allocation21_spill] sm:$0xff] }
 0x21f   : > { %9573 = vmatmul.mubr.msk.bf16.gmra.mrb[12].mxu0 %vm12729_vm8, %v15351_v10  ;;  %vm15366_vm8 = vnez %v15279_v19  ;;  %v15371_v19 = vld [vmem:[#allocation28_spill] sm:$0xff] }
 0x220   : > { %9576 = vmatprep.mubr.msk.bf16.mxu0 %vm15355_vm0, %v15353_v60  ;;  %9605 = vmatpush3.bf16.msra.mxu0 %v11030_v48  ;;  %vm15364_vm0 = vnez %v15363_v13  ;;  %v15369_v13 = vld [vmem:[#allocation22_spill] sm:$0xff]  ;;  %v11035_v48 = vld [vmem:[#allocation5 + $0x158] sm:$0xff]  }
 0x221   : > { %9606 = vmatprep.subr.bf16.mxu0 %v11031_v4 }
 0x224   : > { %9607 = vmatpush3.bf16.msra.mxu0 %v11031_v4  ;;  %v15367_v4 = vld [vmem:[#allocation20_spill] sm:$0xff] }
 0x225   : > { %9640 = vmatprep.subr.bf16.mxu0 %v11032_v14 }
 0x227   : > { %9577 = vmatmul.mubr.msk.bf16.gmra.mrb[16].mxu0 %vm15358_vm12, %v15356_v36 }
 0x228   : > { %9580 = vmatprep.mubr.msk.bf16.mxu0 %vm15360_vm11, %v12860_v25 }
 0x22f   : > { %9581 = vmatmul.mubr.msk.bf16.gmra.mrb[20].mxu0 %vm15362_vm5, %v12870_v15 }
 0x230   : > { %9584 = vmatprep.mubr.msk.bf16.mxu0 %vm15364_vm0, %v12896_v33  ;;  %v11034_v33 = vld [vmem:[#allocation5 + $0x150] sm:$0xff]   ;;  %vm15380_vm0 = vnez %v15303_v40 }
 0x237   : > { %9585 = vmatmul.mubr.msk.bf16.gmra.mrb[24].mxu0 %vm12899_vm7, %v12903_v45  ;;  %v15370_v45 = vld [vmem:[#allocation23_spill] sm:$0xff] }
 0x238   : > { %9588 = vmatprep.mubr.msk.bf16.mxu0 %vm15366_vm8, %v12929_v32 }
 0x23f   : > { %9589 = vmatmul.mubr.msk.bf16.gmra.mrb[28].mxu0 %vm12932_vm3, %v12980_v24  ;;  %v15372_v24 = vld [vmem:[#allocation30_spill] sm:$0xff] }
 0x240   : > { %9608 = vmatprep.mubr.bf16.mxu0 %v15367_v4  ;;  %v11037_v4 = vld [vmem:[#allocation5 + $0x168] sm:$0xff]  }
 0x247   : > { %9609 = vmatmul.mubr.bf16.vlgmr.msra.gmra.mrb[0].mxu0 %v15368_v39 }
 0x248   : > { %9641 = vmatpush3.bf16.msra.mxu0 %v11032_v14  ;;  %9612 = vmatprep.mubr.bf16.mxu0 %v15369_v13  ;;  %v15373_v14 = vld [vmem:[#allocation31_spill] sm:$0xff] }
 0x249   : > { %9642 = vmatprep.subr.bf16.mxu0 %v11033_v30  ;;  %v11038_v13 = vld [vmem:[#allocation5 + $0x170] sm:$0xff]  }
 0x24c   : > { %9643 = vmatpush3.bf16.msra.mxu0 %v11033_v30  ;;  %v11039_v30 = vld [vmem:[#allocation5 + $0x178] sm:$0xff]  }
 0x24d   : > { %9644 = vmatprep.subr.bf16.mxu0 %v11034_v33 }
 0x24f   : > { %9613 = vmatmul.mubr.bf16.gmra.mrb[4].mxu0 %v15370_v45 }
 0x250   : > { %9616 = vmatprep.mubr.bf16.mxu0 %v15371_v19  ;;  %9645 = vmatpush3.bf16.msra.mxu0 %v11034_v33  ;;  %v11040_v33 = vld [vmem:[#allocation5 + $0x180] sm:$0xff]  }
 0x251   : > { %9646 = vmatprep.subr.bf16.mxu0 %v11035_v48 }
 0x254   : > { %9647 = vmatpush3.bf16.msra.mxu0 %v11035_v48  ;;  %v11041_v48 = vld [vmem:[#allocation5 + $0x188] sm:$0xff]  }
 0x255   : > { %9648 = vmatprep.subr.bf16.mxu0 %v11036_v37 }
 0x257   : > { %9617 = vmatmul.mubr.bf16.gmra.mrb[8].mxu0 %v15372_v24 }
 0x258   : > { %9620 = vmatprep.mubr.bf16.mxu0 %v15373_v14  ;;  %9649 = vmatpush3.bf16.msra.mxu0 %v11036_v37  ;;  %v13211_v37 = vpack.c.bf16 %v12964_v56, %v12950_v0 }
 0x259   : > { %9650 = vmatprep.subr.bf16.mxu0 %v11037_v4 }
 0x25c   : > { %9651 = vmatpush3.bf16.msra.mxu0 %v11037_v4  ;;  %v15376_v4 = vld [vmem:[#allocation52_spill] sm:$0xff] }
 0x25d   : > { %9652 = vmatprep.subr.bf16.mxu0 %v11038_v13  ;;  %vm15377_vm8 = vnez %v15376_v4 }
 0x25f   : > { %9621 = vmatmul.mubr.bf16.gmra.mrb[12].mxu0 %v13018_v26 }
 0x260   : > { %9624 = vmatprep.mubr.bf16.mxu0 %v13038_v5  ;;  %9653 = vmatpush3.bf16.msra.mxu0 %v11038_v13  ;;  %v15374_v13 = vld [vmem:[#allocation51_spill] sm:$0xff] }
 0x261   : > { %9654 = vmatprep.subr.bf16.mxu0 %v11039_v30  ;;  %vm15375_vm3 = vnez %v15374_v13 }
 0x264   : > { %9655 = vmatpush3.bf16.msra.mxu0 %v11039_v30  ;;  %v15378_v30 = vld [vmem:[#allocation53_spill] sm:$0xff] }
 0x265   : > { %9688 = vmatprep.subr.bf16.mxu0 %v11040_v33  ;;  %vm15379_vm7 = vnez %v15378_v30 }
 0x267   : > { %9625 = vmatmul.mubr.bf16.gmra.mrb[16].mxu0 %v13045_v29 }
 0x268   : > { %9628 = vmatprep.mubr.bf16.mxu0 %v13066_v47 }
 0x26f   : > { %9629 = vmatmul.mubr.bf16.gmra.mrb[20].mxu0 %v13073_v59 }
 0x270   : > { %9632 = vmatprep.mubr.bf16.mxu0 %v13094_v34 }
 0x277   : > { %9633 = vmatmul.mubr.bf16.gmra.mrb[24].mxu0 %v13101_v49  ;;  %v11043_v49 = vld [vmem:[#allocation5 + $0x198] sm:$0xff]  }
 0x278   : > { %9636 = vmatprep.mubr.bf16.mxu0 %v13123_v12  ;;  %v11042_v12 = vld [vmem:[#allocation5 + $0x190] sm:$0xff]  }
 0x27f   : > { %9637 = vmatmul.mubr.bf16.gmra.mrb[28].mxu0 %v13211_v37 }
 0x280   : > { %9656 = vmatprep.mubr.msk.bf16.mxu0 %vm15375_vm3, %v15300_v6  ;;  %vm15381_vm3 = vnez %v15306_v27  ;;  %v11044_v6 = vld [vmem:[#allocation5 + $0x1a0] sm:$0xff]   ;;  %v11047_v27 = vld [vmem:[#allocation5 + $0x1b8] sm:$0xff]  }
 0x287   : > { %9657 = vmatmul.mubr.msk.bf16.vlgmr.msra.gmra.mrb[0].mxu0 %vm15377_vm8, %v12438_v51  ;;  %vm15383_vm8 = vnez %v15312_v3 }
 0x288   : > { %9689 = vmatpush3.bf16.msra.mxu0 %v11040_v33  ;;  %9660 = vmatprep.mubr.msk.bf16.mxu0 %vm15379_vm7, %v12445_v2  ;;  %v11045_v33 = vld [vmem:[#allocation5 + $0x1a8] sm:$0xff]   ;;  %vm15382_vm7 = vnez %v15309_v41 }
 0x289   : > { %9690 = vmatprep.subr.bf16.mxu0 %v11041_v48 }
 0x28c   : > { %9691 = vmatpush3.bf16.msra.mxu0 %v11041_v48  ;;  %v11046_v48 = vld [vmem:[#allocation5 + $0x1b0] sm:$0xff]  }
 0x28d   : > { %9692 = vmatprep.subr.bf16.mxu0 %v11042_v12 }
 0x28f   : > { %9661 = vmatmul.mubr.msk.bf16.gmra.mrb[4].mxu0 %vm15380_vm0, %v12476_v57  ;;  %vm15385_vm0 = vnez %v15318_v58 }
 0x290   : > { %9664 = vmatprep.mubr.msk.bf16.mxu0 %vm15381_vm3, %v12503_v44  ;;  %9693 = vmatpush3.bf16.msra.mxu0 %v11042_v12  ;;  %vm15384_vm3 = vnez %v15315_v38  ;;  %v3163_v12 = vrot.slane %v12964_v56, 1 }
 0x291   : > { %9694 = vmatprep.subr.bf16.mxu0 %v11043_v49 }
 0x294   : > { %9695 = vmatpush3.bf16.msra.mxu0 %v11043_v49  ;;  %v11048_v49 = vld [vmem:[#allocation5 + $0x1c0] sm:$0xff]  }
 0x295   : > { %9696 = vmatprep.subr.bf16.mxu0 %v11044_v6 }
 0x297   : > { %9665 = vmatmul.mubr.msk.bf16.gmra.mrb[8].mxu0 %vm15382_vm7, %v12550_v8  ;;  %vm15387_vm7 = vnez %v15324_v54 }
 0x298   : > { %9668 = vmatprep.mubr.msk.bf16.mxu0 %vm15383_vm8, %v12632_v55  ;;  %9697 = vmatpush3.bf16.msra.mxu0 %v11044_v6  ;;  %vm15386_vm8 = vnez %v15321_v22  ;;  %v15392_v6 = vrot.slane %v12950_v0, 1  ;;  %v11050_v0 = vld [vmem:[#allocation5 + $0x1d0] sm:$0xff]  }
 0x299   : > { %9698 = vmatprep.subr.bf16.mxu0 %v11045_v33 }
 0x29c   : > { %9699 = vmatpush3.bf16.msra.mxu0 %v11045_v33 }
 0x29d   : > { %9700 = vmatprep.subr.bf16.mxu0 %v11046_v48 }
 0x29f   : > { %9669 = vmatmul.mubr.msk.bf16.gmra.mrb[12].mxu0 %vm15384_vm3, %v12709_v17  ;;  %vm15388_vm3 = vnez %v15327_v21 }
 0x2a0   : > { %9672 = vmatprep.mubr.msk.bf16.mxu0 %vm15385_vm0, %v12746_v16  ;;  %9701 = vmatpush3.bf16.msra.mxu0 %v11046_v48  ;;  %vm15389_vm0 = vnez %v15330_v61  ;;  %v15394_v48 = vld [vmem:[#allocation49_spill] sm:$0xff] }
 0x2a1   : > { %9702 = vmatprep.subr.bf16.mxu0 %v11047_v27 }
 0x2a4   : > { %9703 = vmatpush3.bf16.msra.mxu0 %v11047_v27  ;;  %v15390_v27 = vld [vmem:[#allocation65_spill] sm:$0xff] }
 0x2a5   : > { %9736 = vmatprep.subr.bf16.mxu0 %v11048_v49  ;;  %vm15391_vm5 = vnez %v15390_v27  ;;  %v11049_v27 = vld [vmem:[#allocation5 + $0x1c8] sm:$0xff]  }
 0x2a7   : > { %9673 = vmatmul.mubr.msk.bf16.gmra.mrb[16].mxu0 %vm15386_vm8, %v12759_v43 }
 0x2a8   : > { %9676 = vmatprep.mubr.msk.bf16.mxu0 %vm15387_vm7, %v12774_v9  ;;  %vm15393_vm7 = vcmask 1046528  }
 0x2a9   : > { %v3164_v33 = vsel %vm15393_vm7, %v15392_v6, %v3163_v12  ;;  %v15400_v6 = vld [vmem:[#allocation24_spill] sm:$0xff] }
 0x2af   : > { %9677 = vmatmul.mubr.msk.bf16.gmra.mrb[20].mxu0 %vm15388_vm3, %v12789_v28  ;;  %vm15395_vm3 = vmmov %vm15393_vm7  ;;  %vm15401_vm7 = vnez %v15400_v6 }
 0x2b0   : > { %9680 = vmatprep.mubr.msk.bf16.mxu0 %vm15389_vm0, %v12806_v52  ;;  %v3165_v21 = vsel %vm15395_vm3, %v3163_v12, %v15394_v48 }
 0x2b1   : > { %v13265_v54 = vpack.c.bf16 %v3165_v21, %v3164_v33  ;;  %v11051_v21 = vld [vmem:[#allocation5 + $0x1d8] sm:$0xff]   ;;  %v15402_v33 = vld [vmem:[#allocation25_spill] sm:$0xff] }
 0x2b2   : > { %vm15403_vm3 = vnez %v15402_v33 }
 0x2b7   : > { %9681 = vmatmul.mubr.msk.bf16.gmra.mrb[24].mxu0 %vm15391_vm5, %v12858_v46 }
 0x2b8   : > { %9684 = vmatprep.mubr.msk.bf16.mxu0 %vm13114_vm1, %v13136_v23 }
 0x2bf   : > { %9685 = vmatmul.mubr.msk.bf16.gmra.mrb[28].mxu0 %vm13139_vm4, %v13265_v54 }
 0x2c0   : > { %9704 = vmatprep.mubr.msk.bf16.mxu0 %vm12486_vm6, %v12518_v31 }
 0x2c7   : > { %9705 = vmatmul.mubr.msk.bf16.vlgmr.msra.gmra.mrb[0].mxu0 %vm12533_vm9, %v12586_v63  ;;  %v11052_v63 = vld [vmem:[#allocation5 + $0x1e0] sm:$0xff]  }
 0x2c8   : > { %9737 = vmatpush3.bf16.msra.mxu0 %v11048_v49  ;;  %9708 = vmatprep.mubr.msk.bf16.mxu0 %vm12542_vm10, %v12588_v20  ;;  %v11053_v49 = vld [vmem:[#allocation5 + $0x1e8] sm:$0xff]  }
 0x2c9   : > { %9738 = vmatprep.subr.bf16.mxu0 %v11049_v27 }
 0x2cc   : > { %9739 = vmatpush3.bf16.msra.mxu0 %v11049_v27 }
 0x2cd   : > { %9740 = vmatprep.subr.bf16.mxu0 %v11050_v0 }
 0x2cf   : > { %9709 = vmatmul.mubr.msk.bf16.gmra.mrb[4].mxu0 %vm12593_vm13, %v12634_v7  ;;  %v11054_v7 = vld [vmem:[#allocation5 + $0x1f0] sm:$0xff]  }
 0x2d0   : > { %9712 = vmatprep.mubr.msk.bf16.mxu0 %vm12604_vm14, %v15348_v53  ;;  %9741 = vmatpush3.bf16.msra.mxu0 %v11050_v0  ;;  %v11055_v53 = vld [vmem:[#allocation5 + $0x1f8] sm:$0xff]   ;;  %v15405_v0 = vld [vmem:[#allocation45_spill] sm:$0xff] }
 0x2d1   : > { %9742 = vmatprep.subr.bf16.mxu0 %v11051_v21 }
 0x2d4   : > { %9743 = vmatpush3.bf16.msra.mxu0 %v11051_v21  ;;  %v15406_v21 = vld [vmem:[#allocation43_spill] sm:$0xff] }
 0x2d5   : > { %9744 = vmatprep.subr.bf16.mxu0 %v11052_v63 }
 0x2d7   : > { %9713 = vmatmul.mubr.msk.bf16.gmra.mrb[8].mxu0 %vm12651_vm15, %v12687_v62  ;;  %v11056_v62 = vld [vmem:[#allocation5 + $0x200] sm:$0xff]  }
 0x2d8   : > { %9716 = vmatprep.mubr.msk.bf16.mxu0 %vm12664_vm2, %v15351_v10  ;;  %9745 = vmatpush3.bf16.msra.mxu0 %v11052_v63  ;;  %v15409_v63 = vld [vmem:[#allocation44_spill] sm:$0xff] }
 0x2d9   : > { %9746 = vmatprep.subr.bf16.mxu0 %v11053_v49 }
 0x2dc   : > { %9747 = vmatpush3.bf16.msra.mxu0 %v11053_v49  ;;  %v15413_v49 = vld [vmem:[#allocation29_spill] sm:$0xff] }
 0x2dd   : > { %9748 = vmatprep.subr.bf16.mxu0 %v11054_v7 }
 0x2df   : > { %9717 = vmatmul.mubr.msk.bf16.gmra.mrb[12].mxu0 %vm15401_vm7, %v15353_v60  ;;  %vm15407_vm7 = vnez %v15406_v21  ;;  %v15408_v60 = vld [vmem:[#allocation47_spill] sm:$0xff] }
 0x2e0   : > { %9720 = vmatprep.mubr.msk.bf16.mxu0 %vm15403_vm3, %v15356_v36  ;;  %9749 = vmatpush3.bf16.msra.mxu0 %v11054_v7  ;;  %vm15410_vm3 = vnez %v15409_v63  ;;  %v15411_v36 = vld [vmem:[#allocation46_spill] sm:$0xff]  ;;  %v15414_v7 = vld [vmem:[#allocation48_spill] sm:$0xff] }
 0x2e1   : > { %9750 = vmatprep.subr.bf16.mxu0 %v11055_v53  ;;  %vm15412_vm2 = vnez %v15411_v36  ;;  %vm15415_vm15 = vnez %v15414_v7  ;;  %v15421_v63 = vld [vmem:[#allocation22_spill] sm:$0xff] }
 0x2e4   : > { %9751 = vmatpush3.bf16.msra.mxu0 %v11055_v53  ;;  %v15417_v53 = vrot.slane %v12964_v56, 7  ;;  %v11059_v56 = vld [vmem:[#allocation5 + $0x218] sm:$0xff]  }
 0x2e5   : > { %9784 = vmatprep.subr.bf16.mxu0 %v11056_v62 }
 0x2e7   : > { %9721 = vmatmul.mubr.msk.bf16.gmra.mrb[16].mxu0 %vm15358_vm12, %v12860_v25  ;;  %v15416_v25 = vld [vmem:[#allocation18_spill] sm:$0xff]  ;;  %vm15433_vm12 = vnez %v15315_v38 }
 0x2e8   : > { %9724 = vmatprep.mubr.msk.bf16.mxu0 %vm15360_vm11, %v12870_v15  ;;  %vm15418_vm11 = vcmask 1040384  }
 0x2e9   : > { %v3473_v15 = vsel %vm15418_vm11, %v15417_v53, %v15416_v25  ;;  %vm15425_vm11 = vnez %v15374_v13 }
 0x2ea   : > { %v8452_v21 = vpack.c.bf16 %v15416_v25, %v3473_v15 }
 0x2ef   : > { %9725 = vmatmul.mubr.msk.bf16.gmra.mrb[20].mxu0 %vm15407_vm7, %v15405_v0  ;;  %v15419_v0 = vld [vmem:[#allocation50_spill] sm:$0xff] }
 0x2f0   : > { %9728 = vmatprep.mubr.msk.bf16.mxu0 %vm15410_vm3, %v15408_v60  ;;  %vm15420_vm7 = vnez %v15419_v0  ;;  %v11057_v60 = vld [vmem:[#allocation5 + $0x208] sm:$0xff]  }
 0x2f7   : > { %9729 = vmatmul.mubr.msk.bf16.gmra.mrb[24].mxu0 %vm15412_vm2, %v12929_v32  ;;  %v11058_v32 = vld [vmem:[#allocation5 + $0x210] sm:$0xff]   ;;  %vm15428_vm2 = vnez %v15303_v40 }
 0x2f8   : > { %9732 = vmatprep.mubr.msk.bf16.mxu0 %vm15415_vm15, %v15413_v49  ;;  %vm15427_vm15 = vnez %v15378_v30  ;;  %v13428_v49 = vld [vmem:[%s462_s22] ss:$0 sm:$0xff]  ;;  %s14724_s22 = scalar_lea.vmem [#allocation10], %s8121_s29  ;;  %s8919_s29 = sshll.u32 %s11720_s21, 12 }
 0x2f9   : > { %s14840_s23 = scalar_lea.hbm %s15663_s27, %s8919_s29  ;;  %s7987_s21 = scalar_lea.sflag [#allocation4], %s11898_s11 }
 0x2ff   : > { %9733 = vmatmul.mubr.msk.bf16.gmra.mrb[28].mxu0 %vm15420_vm7, %v8452_v21  ;;  %v11060_v21 = vld [vmem:[#allocation5 + $0x220] sm:$0xff]   ;;  %vm15426_vm7 = vnez %v15376_v4 }
 0x300   : > { %9752 = vmatprep.mubr.bf16.mxu0 %v15368_v39  ;;  %v11061_v39 = vld [vmem:[#allocation5 + $0x228] sm:$0xff]  }
 0x307   : > { %9753 = vmatmul.mubr.bf16.vlgmr.msra.gmra.mrb[0].mxu0 %v15421_v63 }
 0x308   : > { %9785 = vmatpush3.bf16.msra.mxu0 %v11056_v62  ;;  %9756 = vmatprep.mubr.bf16.mxu0 %v15370_v45  ;;  %v11062_v45 = vld [vmem:[#allocation5 + $0x230] sm:$0xff]   ;;  %v11063_v62 = vld [vmem:[#allocation5 + $0x238] sm:$0xff]  }
 0x309   : > { %9786 = vmatprep.subr.bf16.mxu0 %v11057_v60 }
 0x30c   : > { %9787 = vmatpush3.bf16.msra.mxu0 %v11057_v60 }
 0x30d   : > { %9788 = vmatprep.subr.bf16.mxu0 %v11058_v32 }
 0x30f   : > { %9757 = vmatmul.mubr.bf16.gmra.mrb[4].mxu0 %v15371_v19  ;;  %v15422_v19 = vld [vmem:[#allocation64_spill] sm:$0xff] }
 0x310   : > { %9760 = vmatprep.mubr.bf16.mxu0 %v15372_v24  ;;  %9789 = vmatpush3.bf16.msra.mxu0 %v11058_v32  ;;  %v15423_v24 = vld [vmem:[#allocation67_spill] sm:$0xff] }
 0x311   : > { %9790 = vmatprep.subr.bf16.mxu0 %v11059_v56 }
 0x314   : > { %9791 = vmatpush3.bf16.msra.mxu0 %v11059_v56 }
 0x315   : > { %9792 = vmatprep.subr.bf16.mxu0 %v11060_v21 }
 0x317   : > { %9761 = vmatmul.mubr.bf16.gmra.mrb[8].mxu0 %v15373_v14 }
 0x318   : > { %9764 = vmatprep.mubr.bf16.mxu0 %v13018_v26  ;;  %9793 = vmatpush3.bf16.msra.mxu0 %v11060_v21  ;;  %v15424_v26 = vmov 0.0|0.0  }
 0x319   : > { %9794 = vmatprep.subr.bf16.mxu0 %v11061_v39 }
 0x31c   : > { %9795 = vmatpush3.bf16.msra.mxu0 %v11061_v39 }
 0x31d   : > { %9796 = vmatprep.subr.bf16.mxu0 %v11062_v45 }
 0x31f   : > { %9765 = vmatmul.mubr.bf16.gmra.mrb[12].mxu0 %v13038_v5  ;;  %v15429_v5 = vld [vmem:[#allocation55_spill] sm:$0xff] }
 0x320   : > { %9768 = vmatprep.mubr.bf16.mxu0 %v13045_v29  ;;  %9797 = vmatpush3.bf16.msra.mxu0 %v11062_v45  ;;  %vm15430_vm3 = vnez %v15429_v5 }
 0x321   : > { %9798 = vmatprep.subr.bf16.mxu0 %v11063_v62 }
 0x324   : > { %9799 = vmatpush3.bf16.msra.mxu0 %v11063_v62 }
 0x327   : > { %9769 = vmatmul.mubr.bf16.gmra.mrb[16].mxu0 %v13066_v47 }
 0x328   : > { %9772 = vmatprep.mubr.bf16.mxu0 %v13073_v59 }
 0x32f   : > { %9773 = vmatmul.mubr.bf16.gmra.mrb[20].mxu0 %v13094_v34 }
 0x330   : > { %9776 = vmatprep.mubr.bf16.mxu0 %v15422_v19 }
 0x337   : > { %9777 = vmatmul.mubr.bf16.gmra.mrb[24].mxu0 %v15423_v24 }
 0x338   : > { %9780 = vmatprep.mubr.bf16.mxu0 %v13211_v37 }
 0x33f   : > { %9781 = vmatmul.mubr.bf16.gmra.mrb[28].mxu0 %v15424_v26 }
 0x340   : > { %9800 = vmatprep.mubr.msk.bf16.mxu0 %vm15425_vm11, %v12438_v51  ;;  %vm15431_vm11 = vnez %v15309_v41  ;;  %v15435_v51 = vld [vmem:[#allocation61_spill] sm:$0xff] }
 0x347   : > { %9801 = vmatmul.mubr.msk.bf16.vlgmr.msra.gmra.mrb[0].mxu0 %vm15426_vm7, %v12445_v2  ;;  %vm15432_vm7 = vnez %v15312_v3  ;;  %v15437_v2 = vld [vmem:[#allocation62_spill] sm:$0xff] }
 0x348   : > { %9804 = vmatprep.mubr.msk.bf16.mxu0 %vm15427_vm15, %v12476_v57  ;;  %vm15434_vm15 = vnez %v15318_v58 }
 0x34f   : > { %9805 = vmatmul.mubr.msk.bf16.gmra.mrb[4].mxu0 %vm15428_vm2, %v12503_v44  ;;  %v13385_v44 = vpack.c.bf16 %v15394_v48, %v15394_v48 }
 0x350   : > { %9808 = vmatprep.mubr.msk.bf16.mxu0 %vm15430_vm3, %v12550_v8  ;;  %vm15436_vm3 = vnez %v15435_v51  ;;  %v11401_v8 = vld [vmem:[%s11904_s16] sm:$0xff] }
 0x351   : > { %15440 = vst [vmem:[#allocation37_spill] sm:$0xff] %v13385_v44 }
 0x357   : > { %9809 = vmatmul.mubr.msk.bf16.gmra.mrb[8].mxu0 %vm15431_vm11, %v12632_v55  ;;  %vm15438_vm11 = vnez %v15437_v2  ;;  %v13391_v55 = vpop.f32.mrb[0].mxu1 }
 0x358   : > { %9812 = vmatprep.mubr.msk.bf16.mxu0 %vm15432_vm7, %v12709_v17  ;;  %v13393_v17 = vpop.f32.mrb[1].mxu1 }
 0x35f   : > { %9813 = vmatmul.mubr.msk.bf16.gmra.mrb[12].mxu0 %vm15433_vm12, %v12746_v16  ;;  %v13395_v16 = vpop.f32.mrb[2].mxu1 }
 0x360   : > { %9816 = vmatprep.mubr.msk.bf16.mxu0 %vm15434_vm15, %v12759_v43  ;;  %v13397_v43 = vpop.f32.mrb[3].mxu1 }
 0x367   : > { %9817 = vmatmul.mubr.msk.bf16.gmra.mrb[16].mxu0 %vm15386_vm8, %v12774_v9  ;;  %v13399_v9 = vpop.f32.mrb[4].mxu1 }
 0x368   : > { %9820 = vmatprep.mubr.msk.bf16.mxu0 %vm15436_vm3, %v12789_v28  ;;  %v13401_v28 = vpop.f32.mrb[5].mxu1 }
 0x36f   : > { %9821 = vmatmul.mubr.msk.bf16.gmra.mrb[20].mxu0 %vm15438_vm11, %v12806_v52 }
 0x370   : > { %9824 = vmatprep.mubr.msk.bf16.mxu0 %vm15389_vm0, %v12858_v46  ;;  %v13403_v46 = vpop.f32.mrb[6].mxu1 }
 0x371   : > { %v13405_v52 = vpop.f32.mrb[7].mxu1 }
 0x372   : > { %v13407_v29 = vpop.f32.mrb[8].mxu1 }
 0x377   : > { %9825 = vmatmul.mubr.msk.bf16.gmra.mrb[24].mxu0 %vm15391_vm5, %v13136_v23 }
 0x378   : > { %9828 = vmatprep.mubr.msk.bf16.mxu0 %vm13114_vm1, %v13265_v54  ;;  %v13409_v54 = vpop.f32.mrb[9].mxu1 }
 0x379   : > { %v13411_v47 = vpop.f32.mrb[10].mxu1 }
 0x37a   : > { %v13413_v59 = vpop.f32.mrb[11].mxu1 }
 0x37b   : > { %v13415_v34 = vpop.f32.mrb[12].mxu1 }
 0x37c   : > { %v13417_v23 = vpop.f32.mrb[13].mxu1 }
 0x37d   : > { %v13419_v14 = vpop.f32.mrb[14].mxu1 }
 0x37e   : > { %v13421_v37 = vpop.f32.mrb[15].mxu1 }
 0x37f   : > { %9829 = vmatmul.mubr.msk.bf16.gmra.mrb[28].mxu0 %vm13139_vm4, %v13385_v44 }
 0x380   : > { %10296 = vmatprep.mubr.f32.mxu0 %v11401_v8 }
 0x41a   : > { %v9802_v63 = vpop.f32.mrb[0].mxu0 }
 0x41b   : > { %v4183_v53 = vpop.f32.mrb[1].mxu0  ;;  %v13437_v21 = vadd.f32 %v9802_v63, %v13428_v49 }
 0x41c   : > { %v9803_v15 = vpop.f32.mrb[2].mxu0  ;;  %v13431_v32 = vadd.f32 %v13428_v49, %v4183_v53 }
 0x41d   : > { %v4186_v60 = vpop.f32.mrb[3].mxu0  ;;  %v13442_v45 = vadd.f32 %v9803_v15, %v13428_v49 }
 0x41e   : > { %v13434_v56 = vadd.f32 %v13428_v49, %v4186_v60 }
 0x420   : > { %v4382_v39 = vadd.f32 %v13434_v56, %v13431_v32 }
 0x422   : > { %v4383_v62 = vadd.f32 %v4382_v39, %v13437_v21  ;;  %v9806_v19 = vpop.f32.mrb[4].mxu0 }
 0x423   : > { %v4199_v24 = vpop.f32.mrb[5].mxu0  ;;  %v13454_v11 = vadd.f32 %v9806_v19, %v13428_v49 }
 0x424   : > { %v13446_v8 = vadd.f32 %v13428_v49, %v4199_v24  ;;  %v4384_v53 = vadd.f32 %v4383_v62, %v13442_v45  ;;  %v9807_v60 = vpop.f32.mrb[6].mxu0 }
 0x425   : > { %v4202_v44 = vpop.f32.mrb[7].mxu0  ;;  %v13458_v39 = vadd.f32 %v9807_v60, %v13428_v49 }
 0x426   : > { %v4385_v63 = vadd.f32 %v4384_v53, %v13446_v8  ;;  %v13451_v26 = vadd.f32 %v13428_v49, %v4202_v44 }
 0x428   : > { %v4386_v15 = vadd.f32 %v4385_v63, %v13451_v26 }
 0x42a   : > { %v4387_v24 = vadd.f32 %v4386_v15, %v13454_v11  ;;  %v9810_v42 = vpop.f32.mrb[8].mxu0 }
 0x42b   : > { %v4215_v57 = vpop.f32.mrb[9].mxu0  ;;  %v13470_v63 = vadd.f32 %v9810_v42, %v13428_v49 }
 0x42c   : > { %v13462_v62 = vadd.f32 %v13428_v49, %v4215_v57  ;;  %v4388_v53 = vadd.f32 %v4387_v24, %v13458_v39  ;;  %v9811_v61 = vpop.f32.mrb[10].mxu0 }
 0x42d   : > { %v4218_v44 = vpop.f32.mrb[11].mxu0  ;;  %v13474_v15 = vadd.f32 %v9811_v61, %v13428_v49 }
 0x42e   : > { %v4389_v2 = vadd.f32 %v4388_v53, %v13462_v62  ;;  %v13467_v19 = vadd.f32 %v13428_v49, %v4218_v44 }
 0x430   : > { %v4390_v60 = vadd.f32 %v4389_v2, %v13467_v19 }
 0x432   : > { %v4391_v57 = vadd.f32 %v4390_v60, %v13470_v63  ;;  %v9814_v51 = vpop.f32.mrb[12].mxu0 }
 0x433   : > { %v4231_v22 = vpop.f32.mrb[13].mxu0  ;;  %v13486_v2 = vadd.f32 %v9814_v51, %v13428_v49 }
 0x434   : > { %v13478_v24 = vadd.f32 %v13428_v49, %v4231_v22  ;;  %v4392_v53 = vadd.f32 %v4391_v57, %v13474_v15  ;;  %v9815_v58 = vpop.f32.mrb[14].mxu0 }
 0x435   : > { %v4234_v44 = vpop.f32.mrb[15].mxu0  ;;  %v13492_v57 = vadd.f32 %v9815_v58, %v13428_v49 }
 0x436   : > { %v4393_v38 = vadd.f32 %v4392_v53, %v13478_v24  ;;  %v13483_v42 = vadd.f32 %v13428_v49, %v4234_v44 }
 0x438   : > { %v4394_v61 = vadd.f32 %v4393_v38, %v13483_v42 }
 0x43a   : > { %v4395_v60 = vadd.f32 %v4394_v61, %v13486_v2  ;;  %v9818_v3 = vpop.f32.mrb[16].mxu0 }
 0x43b   : > { %v10392_v22 = vadd.f32 %v9818_v3, %v13391_v55  ;;  %v4247_v41 = vpop.f32.mrb[17].mxu0 }
 0x43c   : > { %v10393_v5 = vadd.f32 %v4247_v41, %v13393_v17  ;;  %v9819_v53 = vpop.f32.mrb[18].mxu0  ;;  %v4396_v38 = vadd.f32 %v4395_v60, %v13492_v57 }
 0x43d   : > { %v10394_v44 = vadd.f32 %v9819_v53, %v13395_v16  ;;  %v4250_v40 = vpop.f32.mrb[19].mxu0  ;;  %v13506_v58 = vadd.f32 %v10392_v22, %v13428_v49 }
 0x43e   : > { %v13497_v51 = vadd.f32 %v10393_v5, %v13428_v49  ;;  %v10395_v61 = vadd.f32 %v4250_v40, %v13397_v43 }
 0x43f   : > { %v13511_v5 = vadd.f32 %v10394_v44, %v13428_v49 }
 0x440   : > { %v4397_v30 = vadd.f32 %v4396_v38, %v13497_v51  ;;  %v13503_v3 = vadd.f32 %v10395_v61, %v13428_v49 }
 0x442   : > { %v4398_v41 = vadd.f32 %v4397_v30, %v13503_v3  ;;  %v9822_v55 = vpop.f32.mrb[20].mxu0 }
 0x443   : > { %v10396_v17 = vadd.f32 %v9822_v55, %v13399_v9  ;;  %v4263_v16 = vpop.f32.mrb[21].mxu0 }
 0x444   : > { %v4399_v60 = vadd.f32 %v4398_v41, %v13506_v58  ;;  %v10397_v40 = vadd.f32 %v4263_v16, %v13401_v28  ;;  %v9823_v43 = vpop.f32.mrb[22].mxu0 }
 0x445   : > { %v10398_v53 = vadd.f32 %v9823_v43, %v13403_v46  ;;  %v4266_v38 = vpop.f32.mrb[23].mxu0  ;;  %v13526_v41 = vadd.f32 %v10396_v17, %v13428_v49 }
 0x446   : > { %v13517_v22 = vadd.f32 %v10397_v40, %v13428_v49  ;;  %v4400_v30 = vadd.f32 %v4399_v60, %v13511_v5  ;;  %v10399_v61 = vadd.f32 %v4266_v38, %v13405_v52 }
 0x447   : > { %v13531_v40 = vadd.f32 %v10398_v53, %v13428_v49 }
 0x448   : > { %v4401_v9 = vadd.f32 %v4400_v30, %v13517_v22  ;;  %v13523_v44 = vadd.f32 %v10399_v61, %v13428_v49 }
 0x44a   : > { %v4402_v28 = vadd.f32 %v4401_v9, %v13523_v44  ;;  %v9826_v55 = vpop.f32.mrb[24].mxu0 }
 0x44b   : > { %v10400_v46 = vadd.f32 %v9826_v55, %v13407_v29  ;;  %v4279_v16 = vpop.f32.mrb[25].mxu0 }
 0x44c   : > { %v4403_v60 = vadd.f32 %v4402_v28, %v13526_v41  ;;  %v10401_v52 = vadd.f32 %v4279_v16, %v13409_v54  ;;  %v9827_v43 = vpop.f32.mrb[26].mxu0 }
 0x44d   : > { %v10402_v38 = vadd.f32 %v9827_v43, %v13411_v47  ;;  %v4282_v30 = vpop.f32.mrb[27].mxu0  ;;  %v13546_v28 = vadd.f32 %v10400_v46, %v13428_v49 }
 0x44e   : > { %v13537_v17 = vadd.f32 %v10401_v52, %v13428_v49  ;;  %v4404_v61 = vadd.f32 %v4403_v60, %v13531_v40  ;;  %v10403_v9 = vadd.f32 %v4282_v30, %v13413_v59 }
 0x44f   : > { %v13551_v52 = vadd.f32 %v10402_v38, %v13428_v49 }
 0x450   : > { %v4405_v29 = vadd.f32 %v4404_v61, %v13537_v17  ;;  %v13543_v53 = vadd.f32 %v10403_v9, %v13428_v49 }
 0x452   : > { %v4406_v54 = vadd.f32 %v4405_v29, %v13543_v53  ;;  %v9830_v55 = vpop.f32.mrb[28].mxu0 }
 0x453   : > { %v10404_v47 = vadd.f32 %v9830_v55, %v13415_v34  ;;  %v4295_v16 = vpop.f32.mrb[29].mxu0 }
 0x454   : > { %v4407_v60 = vadd.f32 %v4406_v54, %v13546_v28  ;;  %v10405_v59 = vadd.f32 %v4295_v16, %v13417_v23  ;;  %v9831_v43 = vpop.f32.mrb[30].mxu0 }
 0x455   : > { %v10406_v30 = vadd.f32 %v9831_v43, %v13419_v14  ;;  %v4298_v61 = vpop.f32.mrb[31].mxu0  ;;  %v13566_v54 = vadd.f32 %v10404_v47, %v13428_v49  ;;  %v15441_v47 = vlaneseq }
 0x456   : > { %v13557_v46 = vadd.f32 %v10405_v59, %v13428_v49  ;;  %v4408_v9 = vadd.f32 %v4407_v60, %v13551_v52  ;;  %v10407_v29 = vadd.f32 %v4298_v61, %v13421_v37 }
 0x457   : > { %v13570_v14 = vadd.f32 %v10406_v30, %v13428_v49 }
 0x458   : > { %v4409_v34 = vadd.f32 %v4408_v9, %v13557_v46  ;;  %v13563_v38 = vadd.f32 %v10407_v29, %v13428_v49  ;;  %v4420_v29 = vand.u32 127, %v15441_v47 }
 0x45a   : > { %v4410_v23 = vadd.f32 %v4409_v34, %v13563_v38  ;;  %v4425_v49 = vand.u32 1, %v4420_v29 }
 0x45c   : > { %v4411_v55 = vadd.f32 %v4410_v23, %v13566_v54  ;;  %vm13577_vm4 = vcmp.lt.s32.totalorder %v4425_v49, 1 }
 0x45e   : > { %v4412_v16 = vadd.f32 %v4411_v55, %v13570_v14 }
 0x460   : > { %v4413_v60 = vrot.slane %v4412_v16, 4 }
 0x462   : > { %v4414_v59 = vadd.f32 %v4413_v60, %v4412_v16 }
 0x464   : > { %v4415_v37 = vrot.slane %v4414_v59, 2 }
 0x466   : > { %v4416_v43 = vadd.f32 %v4415_v37, %v4414_v59  ;;  %v15444_v59 = vld [vmem:[#allocation17_spill] sm:$0xff] }
 0x468   : > { %v4417_v61 = vrot.slane %v4416_v43, 1 }
 0x46a   : > { %v4418_v9 = vadd.f32 %v4417_v61, %v4416_v43 }
 0x46c   : > { %4434 = vrot.lane.b32.xlu0 %v4418_v9, %s11634_s26 }
 0x470   : > { %4437 = vrot.lane.b32.xlu0 %v4418_v9, %s11635_s13 }
 0x4de   : > { %v4435_v30 = vpop.permute.xlu0 %4434 }
 0x4e2   : > { %v4438_v23 = vpop.permute.xlu0 %4437 }
 0x4e3   : > { %v4441_v55 = vsel %vm13577_vm4, %v4435_v30, %v4438_v23 }
 0x4e4   : > { %v4442_v16 = vadd.f32 %v4441_v55, %v4418_v9 }
 0x4e6   : > { %v13583_v60 = vmul.f32 0.001953125, %v4442_v16 }
 0x4e8   : > { %v13587_v37 = vrot.slane %v13583_v60, %v15444_v59 }
 0x4ea   : > { %v4448_v43 = vsub.f32 %v13431_v32, %v13587_v37  ;;  %v4449_v61 = vsub.f32 %v13434_v56, %v13587_v37  ;;  %v4450_v47 = vsub.f32 %v13437_v21, %v13587_v37  ;;  %v4451_v9 = vsub.f32 %v13442_v45, %v13587_v37 }
 0x4eb   : > { %v4452_v30 = vsub.f32 %v13446_v8, %v13587_v37  ;;  %v4453_v16 = vsub.f32 %v13451_v26, %v13587_v37  ;;  %v4454_v0 = vsub.f32 %v13454_v11, %v13587_v37  ;;  %v4456_v35 = vsub.f32 %v13462_v62, %v13587_v37 }
 0x4ec   : > { %v4480_v29 = vmul.f32 %v4448_v43, %v4448_v43  ;;  %v4481_v49 = vmul.f32 %v4449_v61, %v4449_v61  ;;  %v4482_v23 = vmul.f32 %v4450_v47, %v4450_v47  ;;  %v4483_v4 = vmul.f32 %v4451_v9, %v4451_v9 }
 0x4ed   : > { %v4484_v7 = vmul.f32 %v4452_v30, %v4452_v30  ;;  %v4455_v43 = vsub.f32 %v13458_v39, %v13587_v37  ;;  %v4485_v61 = vmul.f32 %v4453_v16, %v4453_v16  ;;  %v4486_v47 = vmul.f32 %v4454_v0, %v4454_v0 }
 0x4ee   : > { %v4512_v55 = vadd.f32 %v4481_v49, %v4480_v29  ;;  %v4457_v49 = vsub.f32 %v13467_v19, %v13587_v37  ;;  %v4488_v30 = vmul.f32 %v4456_v35, %v4456_v35 }
 0x4ef   : > { %v4487_v9 = vmul.f32 %v4455_v43, %v4455_v43 }
 0x4f0   : > { %v4513_v13 = vadd.f32 %v4512_v55, %v4482_v23  ;;  %v4458_v55 = vsub.f32 %v13470_v63, %v13587_v37  ;;  %v4489_v16 = vmul.f32 %v4457_v49, %v4457_v49 }
 0x4f2   : > { %v4514_v36 = vadd.f32 %v4513_v13, %v4483_v4  ;;  %v4459_v4 = vsub.f32 %v13474_v15, %v13587_v37  ;;  %v4490_v0 = vmul.f32 %v4458_v55, %v4458_v55 }
 0x4f4   : > { %v4515_v10 = vadd.f32 %v4514_v36, %v4484_v7  ;;  %v4460_v7 = vsub.f32 %v13478_v24, %v13587_v37  ;;  %v4491_v43 = vmul.f32 %v4459_v4, %v4459_v4 }
 0x4f6   : > { %v4516_v29 = vadd.f32 %v4515_v10, %v4485_v61  ;;  %v4461_v61 = vsub.f32 %v13483_v42, %v13587_v37  ;;  %v4492_v35 = vmul.f32 %v4460_v7, %v4460_v7 }
 0x4f8   : > { %v4517_v23 = vadd.f32 %v4516_v29, %v4486_v47  ;;  %v4462_v29 = vsub.f32 %v13486_v2, %v13587_v37  ;;  %v4493_v49 = vmul.f32 %v4461_v61, %v4461_v61 }
 0x4fa   : > { %v4518_v13 = vadd.f32 %v4517_v23, %v4487_v9  ;;  %v4463_v23 = vsub.f32 %v13492_v57, %v13587_v37  ;;  %v4494_v55 = vmul.f32 %v4462_v29, %v4462_v29 }
 0x4fc   : > { %v4519_v36 = vadd.f32 %v4518_v13, %v4488_v30  ;;  %v4464_v13 = vsub.f32 %v13497_v51, %v13587_v37  ;;  %v4495_v4 = vmul.f32 %v4463_v23, %v4463_v23 }
 0x4fe   : > { %v4520_v10 = vadd.f32 %v4519_v36, %v4489_v16  ;;  %v4465_v36 = vsub.f32 %v13503_v3, %v13587_v37  ;;  %v4496_v7 = vmul.f32 %v4464_v13, %v4464_v13 }
 0x500   : > { %v4521_v47 = vadd.f32 %v4520_v10, %v4490_v0  ;;  %v4466_v10 = vsub.f32 %v13506_v58, %v13587_v37  ;;  %v4497_v61 = vmul.f32 %v4465_v36, %v4465_v36 }
 0x502   : > { %v4522_v9 = vadd.f32 %v4521_v47, %v4491_v43  ;;  %v4467_v47 = vsub.f32 %v13511_v5, %v13587_v37  ;;  %v4498_v29 = vmul.f32 %v4466_v10, %v4466_v10 }
 0x504   : > { %v4523_v30 = vadd.f32 %v4522_v9, %v4492_v35  ;;  %v4468_v9 = vsub.f32 %v13517_v22, %v13587_v37  ;;  %v4499_v23 = vmul.f32 %v4467_v47, %v4467_v47 }
 0x506   : > { %v4524_v16 = vadd.f32 %v4523_v30, %v4493_v49  ;;  %v4469_v30 = vsub.f32 %v13523_v44, %v13587_v37  ;;  %v4500_v13 = vmul.f32 %v4468_v9, %v4468_v9 }
 0x508   : > { %v4525_v0 = vadd.f32 %v4524_v16, %v4494_v55  ;;  %v4470_v16 = vsub.f32 %v13526_v41, %v13587_v37  ;;  %v4501_v36 = vmul.f32 %v4469_v30, %v4469_v30 }
 0x50a   : > { %v4526_v43 = vadd.f32 %v4525_v0, %v4495_v4  ;;  %v4471_v0 = vsub.f32 %v13531_v40, %v13587_v37  ;;  %v4502_v10 = vmul.f32 %v4470_v16, %v4470_v16 }
 0x50c   : > { %v4527_v35 = vadd.f32 %v4526_v43, %v4496_v7  ;;  %v4472_v43 = vsub.f32 %v13537_v17, %v13587_v37  ;;  %v4503_v47 = vmul.f32 %v4471_v0, %v4471_v0 }
 0x50e   : > { %v4528_v49 = vadd.f32 %v4527_v35, %v4497_v61  ;;  %v4473_v35 = vsub.f32 %v13543_v53, %v13587_v37  ;;  %v4504_v9 = vmul.f32 %v4472_v43, %v4472_v43 }
 0x510   : > { %v4529_v55 = vadd.f32 %v4528_v49, %v4498_v29  ;;  %v4474_v49 = vsub.f32 %v13546_v28, %v13587_v37  ;;  %v4505_v30 = vmul.f32 %v4473_v35, %v4473_v35 }
 0x512   : > { %v4530_v4 = vadd.f32 %v4529_v55, %v4499_v23  ;;  %v4475_v55 = vsub.f32 %v13551_v52, %v13587_v37  ;;  %v4506_v16 = vmul.f32 %v4474_v49, %v4474_v49 }
 0x514   : > { %v4531_v7 = vadd.f32 %v4530_v4, %v4500_v13  ;;  %v4476_v4 = vsub.f32 %v13557_v46, %v13587_v37  ;;  %v4507_v0 = vmul.f32 %v4475_v55, %v4475_v55 }
 0x516   : > { %v4532_v61 = vadd.f32 %v4531_v7, %v4501_v36  ;;  %v4477_v7 = vsub.f32 %v13563_v38, %v13587_v37  ;;  %v4508_v43 = vmul.f32 %v4476_v4, %v4476_v4  ;;  %v11064_v4 = vld [vmem:[#allocation7 + $0x40] sm:$0xff]  }
 0x517   : > { %9832 = vmatprep.subr.bf16.mxu1 %v11064_v4 }
 0x518   : > { %v4533_v29 = vadd.f32 %v4532_v61, %v4502_v10  ;;  %v4478_v61 = vsub.f32 %v13566_v54, %v13587_v37  ;;  %v4509_v35 = vmul.f32 %v4477_v7, %v4477_v7  ;;  %9833 = vmatpush3.bf16.msra.mxu1 %v11064_v4  ;;  %v11066_v7 = vld [vmem:[#allocation7 + $0x50] sm:$0xff]  }
 0x51a   : > { %v4534_v23 = vadd.f32 %v4533_v29, %v4503_v47  ;;  %v4479_v29 = vsub.f32 %v13570_v14, %v13587_v37  ;;  %v11065_v37 = vld [vmem:[#allocation7 + $0x48] sm:$0xff]  }
 0x51b   : > { %9834 = vmatprep.subr.bf16.mxu1 %v11065_v37 }
 0x51c   : > { %v4535_v13 = vadd.f32 %v4534_v23, %v4504_v9  ;;  %v4510_v23 = vmul.f32 %v4478_v61, %v4478_v61  ;;  %v4511_v6 = vmul.f32 %v4479_v29, %v4479_v29  ;;  %9835 = vmatpush3.bf16.msra.mxu1 %v11065_v37 }
 0x51d   : > { %9836 = vmatprep.subr.bf16.mxu1 %v11066_v7 }
 0x51e   : > { %v4536_v36 = vadd.f32 %v4535_v13, %v4505_v30 }
 0x520   : > { %v4537_v10 = vadd.f32 %v4536_v36, %v4506_v16  ;;  %9837 = vmatpush3.bf16.msra.mxu1 %v11066_v7 }
 0x522   : > { %v4538_v47 = vadd.f32 %v4537_v10, %v4507_v0  ;;  %v11071_v0 = vld [vmem:[#allocation7 + $0x78] sm:$0xff]   ;;  %v13655_v10 = vld [vmem:[#allocation7] sm:$0xff]  }
 0x524   : > { %v4539_v9 = vadd.f32 %v4538_v47, %v4508_v43 }
 0x526   : > { %v4540_v33 = vadd.f32 %v4539_v9, %v4509_v35 }
 0x528   : > { %v4541_v49 = vadd.f32 %v4540_v33, %v4510_v23  ;;  %v11068_v33 = vld [vmem:[#allocation7 + $0x60] sm:$0xff]  }
 0x52a   : > { %v4542_v30 = vadd.f32 %v4541_v49, %v4511_v6  ;;  %v11067_v6 = vld [vmem:[#allocation7 + $0x58] sm:$0xff]   ;;  %v4380_v49 = vld [vmem:[%s14894_s5] sm:$0x1] }
 0x52b   : > { %9838 = vmatprep.subr.bf16.mxu1 %v11067_v6 }
 0x52c   : > { %v4543_v13 = vrot.slane %v4542_v30, 4  ;;  %9839 = vmatpush3.bf16.msra.mxu1 %v11067_v6 }
 0x52d   : > { %9840 = vmatprep.subr.bf16.mxu1 %v11068_v33 }
 0x52e   : > { %v4544_v27 = vadd.f32 %v4543_v13, %v4542_v30 }
 0x530   : > { %v4545_v20 = vrot.slane %v4544_v27, 2  ;;  %9841 = vmatpush3.bf16.msra.mxu1 %v11068_v33 }
 0x532   : > { %v4546_v55 = vadd.f32 %v4545_v20, %v4544_v27  ;;  %v11069_v20 = vld [vmem:[#allocation7 + $0x68] sm:$0xff]   ;;  %v11070_v27 = vld [vmem:[#allocation7 + $0x70] sm:$0xff]  }
 0x533   : > { %9842 = vmatprep.subr.bf16.mxu1 %v11069_v20 }
 0x534   : > { %v4547_v16 = vrot.slane %v4546_v55, 1  ;;  %9843 = vmatpush3.bf16.msra.mxu1 %v11069_v20 }
 0x535   : > { %9844 = vmatprep.subr.bf16.mxu1 %v11070_v27 }
 0x536   : > { %v4548_v36 = vadd.f32 %v4547_v16, %v4546_v55  ;;  %v4381_v55 = vld [vmem:[%s14895_s6] sm:$0x1] }
 0x538   : > { %4550 = vrot.lane.b32.xlu1 %v4548_v36, %s11634_s26  ;;  %9845 = vmatpush3.bf16.msra.mxu1 %v11070_v27  ;;  %s8000_s26 = sshll.u32 %s14724_s22, 4  ;;  %s14842_s26 = int_to_ptr.vmem [resolvable:$true] %s8000_s26 }
 0x539   : > { %9846 = vmatprep.subr.bf16.mxu1 %v11071_v0  ;;  %s11547_s25 = scalar_lea.vmem %s14842_s26, 4096 }
 0x53a   : > { %p11548_p3 = scmp.ne.s32.totalorder %s14842_s26, %s11547_s25 }
 0x53c   : > { %4553 = vrot.lane.b32.xlu1 %v4548_v36, %s11635_s13  ;;  %9847 = vmatpush3.bf16.msra.mxu1 %v11071_v0  ;;  %p11549_p7 = pnand %p11548_p3, %p11847_p5 }
 0x53d   : > { %9880 = vmatprep.subr.bf16.mxu1 %v13655_v10 }
 0x53e   : > { %p11550_p12 = pneg %p11549_p7 }
 0x5aa   : > { %v4551_v61 = vpop.permute.xlu1 %4550 }
 0x5ae   : > { %v4554_v43 = vpop.permute.xlu1 %4553 }
 0x5af   : > { %v4556_v47 = vsel %vm13577_vm4, %v4551_v61, %v4554_v43  ;;  %vm15448_vm4 = vcmask 1046528  }
 0x5b0   : > { %v4557_v29 = vadd.f32 %v4556_v47, %v4548_v36  ;;  %vm15464_vm1 = vmmov %vm15448_vm4 }
 0x5b1   : > { %vm15465_vm5 = vmmov %vm15464_vm1 }
 0x5b2   : > { %v4558_v35 = vmul.f32 0.001953125, %v4557_v29  ;;  %vm15466_vm0 = vmmov %vm15464_vm1 }
 0x5b3   : > { %vm15468_vm11 = vmmov %vm15466_vm0 }
 0x5b4   : > { %v4559_v9 = vadd.f32 1e-05, %v4558_v35  ;;  %vm15470_vm3 = vmmov %vm15466_vm0 }
 0x5b6   : > { %11266 = vrsqrt.f32 %v4559_v9 }
 0x5c0   : > { %v11267_v23 = vpop.eup %11266 }
 0x5c1   : > { %v4561_v30 = vmul.f32 %v11267_v23, %v4380_v49 }
 0x5c3   : > { %v4598_v13 = vmul.f32 %v4561_v30, %v13583_v60  ;;  %v13668_v34 = vrot.slane %v4561_v30, %v15444_v59 }
 0x5c5   : > { %v4599_v16 = vsub.f32 %v4381_v55, %v4598_v13  ;;  %v4566_v4 = vmul.f32 %v13668_v34, %v13431_v32  ;;  %v4567_v37 = vmul.f32 %v13668_v34, %v13434_v56  ;;  %v4568_v60 = vmul.f32 %v13668_v34, %v13437_v21 }
 0x5c6   : > { %v4596_v7 = vmul.f32 %v13668_v34, %v13566_v54  ;;  %v4597_v6 = vmul.f32 %v13668_v34, %v13570_v14  ;;  %v4570_v56 = vmul.f32 %v13668_v34, %v13446_v8  ;;  %v4571_v20 = vmul.f32 %v13668_v34, %v13451_v26 }
 0x5c7   : > { %v13671_v36 = vrot.slane %v4599_v16, %v15444_v59  ;;  %v4569_v59 = vmul.f32 %v13668_v34, %v13442_v45  ;;  %v4572_v27 = vmul.f32 %v13668_v34, %v13454_v11  ;;  %v4573_v61 = vmul.f32 %v13668_v34, %v13458_v39 }
 0x5c8   : > { %v4574_v26 = vmul.f32 %v13668_v34, %v13462_v62  ;;  %v4575_v35 = vmul.f32 %v13668_v34, %v13467_v19  ;;  %v4576_v23 = vmul.f32 %v13668_v34, %v13470_v63  ;;  %v4577_v30 = vmul.f32 %v13668_v34, %v13474_v15 }
 0x5c9   : > { %v13684_v33 = vadd.f32 %v13671_v36, %v4566_v4  ;;  %v13689_v32 = vadd.f32 %v13671_v36, %v4567_v37  ;;  %v13694_v21 = vadd.f32 %v13671_v36, %v4568_v60  ;;  %v13697_v54 = vadd.f32 %v13671_v36, %v4596_v7 }
 0x5ca   : > { %v13700_v14 = vadd.f32 %v13671_v36, %v4597_v6  ;;  %v13705_v45 = vadd.f32 %v13671_v36, %v4569_v59  ;;  %v13710_v8 = vadd.f32 %v13671_v36, %v4570_v56  ;;  %v13716_v43 = vadd.f32 %v13671_v36, %v4571_v20 }
 0x5cb   : > { %15445 = vst [vmem:[#allocation40_spill] sm:$0xff] %v13697_v54  ;;  %v8519_v0 = vmul.f32 -1.442695, %v13684_v33  ;;  %v8520_v47 = vmul.f32 -1.442695, %v13689_v32  ;;  %v13722_v29 = vadd.f32 %v13671_v36, %v4572_v27  ;;  %v13728_v9 = vadd.f32 %v13671_v36, %v4573_v61 }
 0x5cc   : > { %v8521_v11 = vmul.f32 -1.442695, %v13694_v21  ;;  %v8522_v39 = vmul.f32 -1.442695, %v13705_v45  ;;  %v13734_v49 = vadd.f32 %v13671_v36, %v4574_v26  ;;  %v8523_v62 = vmul.f32 -1.442695, %v13710_v8 }
 0x5cd   : > { %11268 = vpow2.f32 %v8519_v0  ;;  %v13740_v13 = vadd.f32 %v13671_v36, %v4575_v35  ;;  %v8524_v19 = vmul.f32 -1.442695, %v13716_v43  ;;  %v4578_v55 = vmul.f32 %v13668_v34, %v13478_v24 }
 0x5ce   : > { %11270 = vpow2.f32 %v8520_v47  ;;  %v13746_v63 = vadd.f32 %v13671_v36, %v4576_v23  ;;  %v8525_v16 = vmul.f32 -1.442695, %v13722_v29  ;;  %v4579_v4 = vmul.f32 %v13668_v34, %v13483_v42 }
 0x5cf   : > { %11272 = vpow2.f32 %v8521_v11  ;;  %v13752_v15 = vadd.f32 %v13671_v36, %v4577_v30  ;;  %v8526_v37 = vmul.f32 -1.442695, %v13728_v9  ;;  %v4580_v60 = vmul.f32 %v13668_v34, %v13486_v2 }
 0x5d0   : > { %11274 = vpow2.f32 %v8522_v39  ;;  %v13758_v24 = vadd.f32 %v13671_v36, %v4578_v55  ;;  %v8527_v7 = vmul.f32 -1.442695, %v13734_v49  ;;  %v4581_v6 = vmul.f32 %v13668_v34, %v13492_v57 }
 0x5d1   : > { %11276 = vpow2.f32 %v8523_v62  ;;  %v13764_v42 = vadd.f32 %v13671_v36, %v4579_v4  ;;  %v8528_v59 = vmul.f32 -1.442695, %v13740_v13  ;;  %v4582_v56 = vmul.f32 %v13668_v34, %v13497_v51 }
 0x5d2   : > { %11278 = vpow2.f32 %v8524_v19  ;;  %v13770_v2 = vadd.f32 %v13671_v36, %v4580_v60  ;;  %v8529_v20 = vmul.f32 -1.442695, %v13746_v63  ;;  %v4583_v27 = vmul.f32 %v13668_v34, %v13503_v3 }
 0x5d3   : > { %11280 = vpow2.f32 %v8525_v16  ;;  %v13776_v57 = vadd.f32 %v13671_v36, %v4581_v6  ;;  %v8530_v0 = vmul.f32 -1.442695, %v13752_v15  ;;  %v4584_v61 = vmul.f32 %v13668_v34, %v13506_v58 }
 0x5d4   : > { %11282 = vpow2.f32 %v8526_v37  ;;  %v13782_v51 = vadd.f32 %v13671_v36, %v4582_v56  ;;  %v8531_v47 = vmul.f32 -1.442695, %v13758_v24  ;;  %v4585_v26 = vmul.f32 %v13668_v34, %v13511_v5 }
 0x5d5   : > { %11284 = vpow2.f32 %v8527_v7  ;;  %v13788_v3 = vadd.f32 %v13671_v36, %v4583_v27  ;;  %v8532_v11 = vmul.f32 -1.442695, %v13764_v42  ;;  %v4586_v39 = vmul.f32 %v13668_v34, %v13517_v22 }
 0x5d6   : > { %11286 = vpow2.f32 %v8528_v59  ;;  %v13794_v58 = vadd.f32 %v13671_v36, %v4584_v61  ;;  %v8533_v23 = vmul.f32 -1.442695, %v13770_v2  ;;  %v4587_v5 = vmul.f32 %v13668_v34, %v13523_v44 }
 0x5d7   : > { %v11269_v35 = vpop.eup %11268  ;;  %11288 = vpow2.f32 %v8529_v20  ;;  %v13800_v30 = vadd.f32 %v13671_v36, %v4585_v26  ;;  %v8534_v19 = vmul.f32 -1.442695, %v13776_v57  ;;  %v4588_v22 = vmul.f32 %v13668_v34, %v13526_v41 }
 0x5d8   : > { %v11271_v62 = vpop.eup %11270  ;;  %11290 = vpow2.f32 %v8530_v0  ;;  %v13806_v16 = vadd.f32 %v13671_v36, %v4586_v39  ;;  %v8535_v4 = vmul.f32 -1.442695, %v13782_v51  ;;  %v4589_v44 = vmul.f32 %v13668_v34, %v13531_v40 }
 0x5d9   : > { %v11273_v55 = vpop.eup %11272  ;;  %11292 = vpow2.f32 %v8531_v47  ;;  %v13812_v60 = vadd.f32 %v13671_v36, %v4587_v5  ;;  %v8536_v7 = vmul.f32 -1.442695, %v13788_v3  ;;  %v4590_v41 = vmul.f32 %v13668_v34, %v13537_v17 }
 0x5da   : > { %v11275_v37 = vpop.eup %11274  ;;  %11294 = vpow2.f32 %v8532_v11  ;;  %v13818_v59 = vadd.f32 %v13671_v36, %v4588_v22  ;;  %v8537_v56 = vmul.f32 -1.442695, %v13794_v58  ;;  %v4591_v40 = vmul.f32 %v13668_v34, %v13543_v53 }
 0x5db   : > { %v11277_v6 = vpop.eup %11276  ;;  %11296 = vpow2.f32 %v8533_v23  ;;  %v13824_v27 = vadd.f32 %v13671_v36, %v4589_v44  ;;  %v8538_v0 = vmul.f32 -1.442695, %v13800_v30  ;;  %v4592_v17 = vmul.f32 %v13668_v34, %v13546_v28 }
 0x5dc   : > { %v11279_v20 = vpop.eup %11278  ;;  %11298 = vpow2.f32 %v8534_v19  ;;  %v13830_v47 = vadd.f32 %v13671_v36, %v4590_v41  ;;  %v8539_v26 = vmul.f32 -1.442695, %v13806_v16  ;;  %v4593_v53 = vmul.f32 %v13668_v34, %v13551_v52 }
 0x5dd   : > { %v11281_v61 = vpop.eup %11280  ;;  %11300 = vpow2.f32 %v8535_v4  ;;  %v13836_v39 = vadd.f32 %v13671_v36, %v4591_v40  ;;  %v8540_v23 = vmul.f32 -1.442695, %v13812_v60  ;;  %v13840_v19 = vadd.f32 %v13671_v36, %v4592_v17 }
 0x5de   : > { %v11283_v11 = vpop.eup %11282  ;;  %11302 = vpow2.f32 %v8536_v7  ;;  %v8541_v28 = vmul.f32 -1.442695, %v13818_v59  ;;  %v13844_v4 = vadd.f32 %v13671_v36, %v4593_v53  ;;  %v8542_v52 = vmul.f32 -1.442695, %v13824_v27 }
 0x5df   : > { %v11285_v5 = vpop.eup %11284  ;;  %11304 = vpow2.f32 %v8537_v56  ;;  %v8543_v7 = vmul.f32 -1.442695, %v13830_v47  ;;  %v8544_v40 = vmul.f32 -1.442695, %v13836_v39  ;;  %v8545_v56 = vmul.f32 -1.442695, %v13840_v19 }
 0x5e0   : > { %v11287_v22 = vpop.eup %11286  ;;  %11306 = vpow2.f32 %v8538_v0  ;;  %v8546_v53 = vmul.f32 -1.442695, %v13844_v4  ;;  %v4734_v0 = vadd.f32 1.0, %v11269_v35  ;;  %v4737_v1 = vadd.f32 1.0, %v11275_v37 }
 0x5e1   : > { %v11289_v44 = vpop.eup %11288  ;;  %11308 = vpow2.f32 %v8539_v26  ;;  %v4735_v26 = vadd.f32 1.0, %v11271_v62  ;;  %v4738_v62 = vadd.f32 1.0, %v11277_v6  ;;  %v4740_v48 = vadd.f32 1.0, %v11281_v61 }
 0x5e2   : > { %v11291_v41 = vpop.eup %11290  ;;  %11310 = vpow2.f32 %v8540_v23  ;;  %v4594_v23 = vmul.f32 %v13668_v34, %v13557_v46 }
 0x5e3   : > { %v11293_v17 = vpop.eup %11292  ;;  %11312 = vpow2.f32 %v8541_v28  ;;  %v4736_v28 = vadd.f32 1.0, %v11273_v55  ;;  %v4739_v55 = vadd.f32 1.0, %v11279_v20 }
 0x5e4   : > { %v11295_v31 = vpop.eup %11294  ;;  %11314 = vpow2.f32 %v8542_v52  ;;  %v4595_v52 = vmul.f32 %v13668_v34, %v13563_v38  ;;  %v13864_v35 = vadd.f32 %v13671_v36, %v4594_v23  ;;  %v4741_v34 = vadd.f32 1.0, %v11283_v11 }
 0x5e5   : > { %v11297_v12 = vpop.eup %11296  ;;  %11316 = vpow2.f32 %v8543_v7  ;;  %v4743_v11 = vadd.f32 1.0, %v11287_v22 }
 0x5e6   : > { %v13851_v18 = vpop.eup %11298  ;;  %11318 = vpow2.f32 %v8544_v40  ;;  %15446 = vst [vmem:[#allocation26_spill] sm:$0xff] %v13864_v35  ;;  %v13869_v46 = vadd.f32 %v13671_v36, %v4595_v52  ;;  %v8547_v6 = vmul.f32 -1.442695, %v13864_v35  ;;  %v8550_v35 = vmul.f32 -1.442695, %v13700_v14 }
 0x5e7   : > { %v13853_v50 = vpop.eup %11300  ;;  %11320 = vpow2.f32 %v8545_v56 }
 0x5e8   : > { %v13857_v25 = vpop.eup %11302  ;;  %11322 = vpow2.f32 %v8546_v53  ;;  %v8548_v36 = vmul.f32 -1.442695, %v13869_v46 }
 0x5e9   : > { %v13861_v7 = vpop.eup %11304  ;;  %11324 = vrcp.f32 %v4734_v0  ;;  %v8549_v0 = vmul.f32 -1.442695, %v13697_v54  ;;  %v4747_v54 = vadd.f32 1.0, %v11295_v31 }
 0x5ea   : > { %v13866_v40 = vpop.eup %11306  ;;  %11326 = vrcp.f32 %v4735_v26  ;;  %v4742_v26 = vadd.f32 1.0, %v11285_v5 }
 0x5eb   : > { %v13871_v56 = vpop.eup %11308  ;;  %11328 = vrcp.f32 %v4736_v28  ;;  %v4744_v28 = vadd.f32 1.0, %v11289_v44 }
 0x5ec   : > { %v13873_v38 = vpop.eup %11310  ;;  %11330 = vrcp.f32 %v4737_v1 }
 0x5ed   : > { %v13875_v37 = vpop.eup %11312  ;;  %11332 = vrcp.f32 %v4738_v62  ;;  %v4745_v62 = vadd.f32 1.0, %v11291_v41 }
 0x5ee   : > { %v13878_v53 = vpop.eup %11314  ;;  %11334 = vrcp.f32 %v4739_v55 }
 0x5ef   : > { %v13881_v20 = vpop.eup %11316  ;;  %11336 = vrcp.f32 %v4740_v48 }
 0x5f0   : > { %v13884_v61 = vpop.eup %11318  ;;  %11338 = vrcp.f32 %v4741_v34  ;;  %v4746_v34 = vadd.f32 1.0, %v11293_v17  ;;  %v11073_v17 = vld [vmem:[#allocation7 + $0x8] sm:$0xff]  }
 0x5f1   : > { %v13886_v1 = vpop.eup %11320  ;;  %11340 = vpow2.f32 %v8547_v6 }
 0x5f2   : > { %v13888_v23 = vpop.eup %11322  ;;  %11342 = vpow2.f32 %v8548_v36  ;;  %v4748_v36 = vadd.f32 1.0, %v11297_v12  ;;  %v4750_v12 = vadd.f32 1.0, %v13853_v50 }
 0x5f3   : > { %v11325_v52 = vpop.eup %11324  ;;  %11344 = vpow2.f32 %v8549_v0 }
 0x5f4   : > { %v11327_v55 = vpop.eup %11326  ;;  %11346 = vrcp.f32 %v4742_v26  ;;  %v13892_v48 = vmul.f32 %v11325_v52, %v13684_v33  ;;  %v4751_v52 = vadd.f32 1.0, %v13857_v25 }
 0x5f5   : > { %v11329_v5 = vpop.eup %11328  ;;  %11348 = vrcp.f32 %v4743_v11  ;;  %v13895_v6 = vmul.f32 %v11327_v55, %v13689_v32  ;;  %v4749_v32 = vadd.f32 1.0, %v13851_v18  ;;  %v4753_v55 = vadd.f32 1.0, %v13866_v40 }
 0x5f6   : > { %v11331_v22 = vpop.eup %11330  ;;  %11350 = vrcp.f32 %v4744_v28  ;;  %v13898_v44 = vmul.f32 %v11329_v5, %v13694_v21  ;;  %v4756_v40 = vadd.f32 1.0, %v13875_v37 }
 0x5f7   : > { %v11333_v41 = vpop.eup %11332  ;;  %11352 = vrcp.f32 %v4745_v62  ;;  %v5496_v0 = vrot.slane %v13895_v6, 1  ;;  %v13903_v33 = vpack.c.bf16 %v13895_v6, %v13892_v48  ;;  %v13907_v31 = vmul.f32 %v11331_v22, %v13705_v45 }
 0x5f8   : > { %v11335_v26 = vpop.eup %11334  ;;  %11354 = vpow2.f32 %v8550_v35  ;;  %v5498_v21 = vrot.slane %v13898_v44, 1  ;;  %v4752_v35 = vadd.f32 1.0, %v13861_v7  ;;  %v13927_v25 = vmul.f32 %v11333_v41, %v13710_v8 }
 0x5f9   : > { %v11337_v11 = vpop.eup %11336  ;;  %11356 = vrcp.f32 %v4746_v34  ;;  %9849 = vmatmul.mubr.bf16.vlgmr.msra.gmra.mrb[16].mxu1 %v13903_v33  ;;  %v13916_v18 = vpack.c.bf16 %v13907_v31, %v13898_v44  ;;  %v4754_v8 = vadd.f32 1.0, %v13871_v56 }
 0x5fa   : > { %v11339_v28 = vpop.eup %11338  ;;  %11358 = vrcp.f32 %v4747_v54  ;;  %9881 = vmatpush3.bf16.msra.mxu1 %v13655_v10  ;;  %v13923_v45 = vsel %vm15448_vm4, %v5496_v0, %v5498_v21  ;;  %v13930_v10 = vmul.f32 %v11335_v26, %v13716_v43  ;;  %v11074_v54 = vld [vmem:[#allocation7 + $0x10] sm:$0xff]   ;;  %v13935_v5 = vmul.f32 %v11337_v11, %v13722_v29 }
 0x5fb   : > { %15447 = vst [vmem:[#allocation41_spill] sm:$0xff] %v13916_v18  ;;  %v11341_v50 = vpop.eup %11340  ;;  %11360 = vrcp.f32 %v4748_v36  ;;  %9882 = vmatprep.subr.bf16.mxu1 %v11073_v17  ;;  %9852 = vmatprep.mubr.bf16.mxu1 %v13916_v18  ;;  %v13938_v7 = vmul.f32 %v11339_v28, %v13728_v9  ;;  %v4755_v43 = vadd.f32 1.0, %v13873_v38  ;;  %v11075_v9 = vld [vmem:[#allocation7 + $0x18] sm:$0xff]   ;;  %v4757_v26 = vadd.f32 1.0, %v13878_v53 }
 0x5fc   : > { %v11343_v62 = vpop.eup %11342  ;;  %11362 = vrcp.f32 %v4749_v32  ;;  %v13945_v29 = vpack.c.bf16 %v13930_v10, %v13927_v25  ;;  %v4759_v32 = vadd.f32 1.0, %v13884_v61  ;;  %v4760_v53 = vadd.f32 1.0, %v13886_v1 }
 0x5fd   : > { %v11345_v34 = vpop.eup %11344  ;;  %11364 = vrcp.f32 %v4750_v12  ;;  %v13950_v56 = vpack.c.bf16 %v13938_v7, %v13935_v5 }
 0x5fe   : > { %v11347_v22 = vpop.eup %11346  ;;  %11366 = vrcp.f32 %v4751_v52  ;;  %9883 = vmatpush3.bf16.msra.mxu1 %v11073_v17  ;;  %15449 = vst [vmem:[#allocation20_spill] sm:$0xff] %v13945_v29  ;;  %v4758_v17 = vadd.f32 1.0, %v13881_v20  ;;  %v11076_v20 = vld [vmem:[#allocation7 + $0x20] sm:$0xff]  }
 0x5ff   : > { %v11349_v41 = vpop.eup %11348  ;;  %11368 = vrcp.f32 %v4752_v35  ;;  %9884 = vmatprep.subr.bf16.mxu1 %v11074_v54  ;;  %15450 = vst [vmem:[#allocation21_spill] sm:$0xff] %v13950_v56  ;;  %v13958_v12 = vmul.f32 %v11347_v22, %v13734_v49  ;;  %v4761_v35 = vadd.f32 1.0, %v13888_v23  ;;  %v4763_v49 = vadd.f32 1.0, %v11343_v62  ;;  %v11077_v23 = vld [vmem:[#allocation7 + $0x28] sm:$0xff]  }
 0x600   : > { %v11351_v36 = vpop.eup %11350  ;;  %11370 = vrcp.f32 %v4753_v55  ;;  %v13961_v28 = vmul.f32 %v11349_v41, %v13740_v13 }
 0x601   : > { %v11353_v38 = vpop.eup %11352  ;;  %11372 = vrcp.f32 %v4754_v8  ;;  %9853 = vmatmul.mubr.bf16.gmra.mrb[20].mxu1 %v13945_v29  ;;  %v13965_v61 = vmul.f32 %v11351_v36, %v13746_v63  ;;  %v4762_v8 = vadd.f32 1.0, %v11341_v50  ;;  %v11078_v36 = vld [vmem:[#allocation7 + $0x30] sm:$0xff]  }
 0x602   : > { %v11355_v37 = vpop.eup %11354  ;;  %11374 = vrcp.f32 %v4755_v43  ;;  %9856 = vmatprep.mubr.bf16.mxu1 %v13950_v56  ;;  %9885 = vmatpush3.bf16.msra.mxu1 %v11074_v54  ;;  %v13968_v54 = vmul.f32 %v11353_v38, %v13752_v15  ;;  %v13972_v22 = vpack.c.bf16 %v13961_v28, %v13958_v12  ;;  %v4764_v43 = vadd.f32 1.0, %v11345_v34 }
 0x603   : > { %v11357_v11 = vpop.eup %11356  ;;  %11376 = vrcp.f32 %v4756_v40  ;;  %9886 = vmatprep.subr.bf16.mxu1 %v11075_v9  ;;  %v4765_v62 = vadd.f32 1.0, %v11355_v37 }
 0x604   : > { %v11359_v52 = vpop.eup %11358  ;;  %11378 = vrcp.f32 %v4757_v26  ;;  %15451 = vst [vmem:[#allocation23_spill] sm:$0xff] %v13972_v22  ;;  %v13976_v15 = vpack.c.bf16 %v13968_v54, %v13965_v61 }
 0x605   : > { %v11361_v1 = vpop.eup %11360  ;;  %11380 = vrcp.f32 %v4758_v17  ;;  %v13984_v34 = vmul.f32 %v11359_v52, %v13764_v42  ;;  %v11079_v42 = vld [vmem:[#allocation7 + $0x38] sm:$0xff]  }
 0x606   : > { %v11363_v55 = vpop.eup %11362  ;;  %11382 = vrcp.f32 %v4759_v32  ;;  %9887 = vmatpush3.bf16.msra.mxu1 %v11075_v9  ;;  %15452 = vst [vmem:[#allocation28_spill] sm:$0xff] %v13976_v15  ;;  %v13981_v9 = vmul.f32 %v11357_v11, %v13758_v24  ;;  %v13987_v38 = vmul.f32 %v11361_v1, %v13770_v2 }
 0x607   : > { %v11365_v13 = vpop.eup %11364  ;;  %11384 = vrcp.f32 %v4760_v53  ;;  %9888 = vmatprep.subr.bf16.mxu1 %v11076_v20  ;;  %v13990_v17 = vmul.f32 %v11363_v55, %v13776_v57 }
 0x608   : > { %v11367_v63 = vpop.eup %11366  ;;  %11386 = vrcp.f32 %v4761_v35  ;;  %v13994_v24 = vpack.c.bf16 %v13984_v34, %v13981_v9  ;;  %v14003_v52 = vmul.f32 %v11365_v13, %v13782_v51 }
 0x609   : > { %v11369_v41 = vpop.eup %11368  ;;  %9857 = vmatmul.mubr.bf16.gmra.mrb[24].mxu1 %v13972_v22  ;;  %11388 = vrcp.f32 %v4763_v49  ;;  %v14006_v35 = vmul.f32 %v11367_v63, %v13788_v3 }
 0x60a   : > { %v11371_v40 = vpop.eup %11370  ;;  %9860 = vmatprep.mubr.bf16.mxu1 %v13976_v15  ;;  %9889 = vmatpush3.bf16.msra.mxu1 %v11076_v20  ;;  %11390 = vrcp.f32 %v4762_v8  ;;  %15453 = vst [vmem:[#allocation30_spill] sm:$0xff] %v13994_v24  ;;  %v13998_v20 = vpack.c.bf16 %v13990_v17, %v13987_v38  ;;  %v14009_v1 = vmul.f32 %v11369_v41, %v13794_v58 }
 0x60b   : > { %v11373_v50 = vpop.eup %11372  ;;  %9890 = vmatprep.subr.bf16.mxu1 %v11077_v23  ;;  %11392 = vrcp.f32 %v4764_v43  ;;  %v14012_v55 = vmul.f32 %v11371_v40, %v13800_v30  ;;  %v15090_v43 = vrot.slane %v13892_v48, 1  ;;  %v15461_v40 = vld [vmem:[#allocation26_spill] sm:$0xff] }
 0x60c   : > { %v11375_v26 = vpop.eup %11374  ;;  %11394 = vrcp.f32 %v4765_v62  ;;  %15454 = vst [vmem:[#allocation31_spill] sm:$0xff] %v13998_v20  ;;  %v14015_v49 = vmul.f32 %v11373_v50, %v13806_v16 }
 0x60d   : > { %v11377_v37 = vpop.eup %11376  ;;  %v14018_v8 = vmul.f32 %v11375_v26, %v13812_v60  ;;  %v5500_v26 = vrot.slane %v13907_v31, 1 }
 0x60e   : > { %v11379_v32 = vpop.eup %11378  ;;  %9891 = vmatpush3.bf16.msra.mxu1 %v11077_v23  ;;  %v14020_v23 = vld [vmem:[#allocation7 + $0x80] sm:$0xff]   ;;  %v14023_v3 = vmul.f32 %v11377_v37, %v13818_v59  ;;  %v15462_v37 = vld [vmem:[#allocation40_spill] sm:$0xff] }
 0x60f   : > { %v11381_v53 = vpop.eup %11380  ;;  %9892 = vmatprep.subr.bf16.mxu1 %v11078_v36  ;;  %v14026_v13 = vmul.f32 %v11379_v32, %v13824_v27  ;;  %v14043_v27 = vpack.c.bf16 %v14006_v35, %v14003_v52 }
 0x610   : > { %v11383_v11 = vpop.eup %11382  ;;  %v14029_v58 = vmul.f32 %v11381_v53, %v13830_v47 }
 0x611   : > { %v11385_v2 = vpop.eup %11384  ;;  %9861 = vmatmul.mubr.bf16.gmra.mrb[28].mxu1 %v13994_v24  ;;  %v14032_v30 = vmul.f32 %v11383_v11, %v13836_v39  ;;  %15455 = vst [vmem:[#allocation45_spill] sm:$0xff] %v14043_v27  ;;  %v14051_v39 = vpack.c.bf16 %v14012_v55, %v14009_v1  ;;  %v5502_v11 = vrot.slane %v13927_v25, 1 }
 0x612   : > { %v11387_v57 = vpop.eup %11386  ;;  %9864 = vmatprep.mubr.bf16.mxu1 %v13998_v20  ;;  %9893 = vmatpush3.bf16.msra.mxu1 %v11078_v36  ;;  %v14035_v60 = vmul.f32 %v11385_v2, %v13840_v19  ;;  %v14055_v19 = vpack.c.bf16 %v14018_v8, %v14015_v49  ;;  %v5497_v36 = vsel %vm15448_vm4, %v15090_v43, %v5496_v0 }
 0x613   : > { %9894 = vmatprep.subr.bf16.mxu1 %v11079_v42  ;;  %v11389_v51 = vpop.eup %11388  ;;  %v14038_v63 = vmul.f32 %v11387_v57, %v13844_v4  ;;  %15456 = vst [vmem:[#allocation47_spill] sm:$0xff] %v14051_v39  ;;  %v14059_v4 = vpack.c.bf16 %v14026_v13, %v14023_v3  ;;  %v14063_v62 = vpack.c.bf16 %v14032_v30, %v14029_v58  ;;  %v5504_v57 = vrot.slane %v13930_v10, 1 }
 0x614   : > { %v11391_v16 = vpop.eup %11390  ;;  %v14046_v47 = vmul.f32 %v11389_v51, %v13869_v46  ;;  %15457 = vst [vmem:[#allocation29_spill] sm:$0xff] %v14055_v19  ;;  %v5501_v0 = vsel %vm15448_vm4, %v5498_v21, %v5500_v26  ;;  %v5506_v51 = vrot.slane %v13935_v5, 1  ;;  %v5514_v21 = vrot.slane %v13965_v61, 1  ;;  %vm15467_vm4 = vmmov %vm15466_vm0 }
 0x615   : > { %v11393_v59 = vpop.eup %11392  ;;  %15458 = vst [vmem:[#allocation22_spill] sm:$0xff] %v14059_v4  ;;  %15459 = vst [vmem:[#allocation64_spill] sm:$0xff] %v14063_v62  ;;  %v14068_v46 = vpack.c.bf16 %v14038_v63, %v14035_v60  ;;  %v14071_v50 = vmul.f32 %v11391_v16, %v15461_v40  ;;  %v5508_v16 = vrot.slane %v13938_v7, 1  ;;  %v5505_v40 = vsel %vm15465_vm5, %v5502_v11, %v5504_v57 }
 0x616   : > { %9895 = vmatpush3.bf16.msra.mxu1 %v11079_v42  ;;  %v11395_v41 = vpop.eup %11394  ;;  %v14080_v32 = vmul.f32 %v11393_v59, %v15462_v37  ;;  %v14087_v42 = vpack.c.bf16 %v13923_v45, %v5497_v36  ;;  %v5510_v59 = vrot.slane %v13958_v12, 1  ;;  %v5512_v45 = vrot.slane %v13961_v28, 1  ;;  %vm15471_vm5 = vmmov %vm15466_vm0 }
 0x617   : > { %9928 = vmatprep.subr.bf16.mxu1 %v14020_v23  ;;  %15460 = vst [vmem:[#allocation67_spill] sm:$0xff] %v14068_v46  ;;  %v14083_v53 = vmul.f32 %v11395_v41, %v13700_v14  ;;  %v5503_v14 = vsel %vm15464_vm1, %v5500_v26, %v5502_v11  ;;  %v5507_v36 = vsel %vm15466_vm0, %v5504_v57, %v5506_v51  ;;  %vm15469_vm1 = vmmov %vm15466_vm0  ;;  %v5518_v11 = vrot.slane %v13981_v9, 1 }
 0x618   : > { %v14100_v41 = vpack.c.bf16 %v5503_v14, %v5501_v0  ;;  %v14105_v37 = vpack.c.bf16 %v5507_v36, %v5505_v40  ;;  %v5509_v43 = vsel %vm15467_vm4, %v5506_v51, %v5508_v16  ;;  %v5511_v26 = vsel %vm15468_vm11, %v5508_v16, %v5510_v59  ;;  %vm15473_vm11 = vmmov %vm15466_vm0 }
 0x619   : > { %9865 = vmatmul.mubr.bf16.gmra.mrb[32].mxu1 %v14043_v27  ;;  %15463 = vst [vmem:[#allocation17_spill] sm:$0xff] %v14083_v53  ;;  %v5513_v2 = vsel %vm15469_vm1, %v5510_v59, %v5512_v45  ;;  %v5515_v27 = vsel %vm15470_vm3, %v5512_v45, %v5514_v21  ;;  %v5516_v0 = vrot.slane %v13968_v54, 1  ;;  %v5520_v57 = vrot.slane %v13984_v34, 1  ;;  %vm15472_vm3 = vmmov %vm15466_vm0 }
 0x61a   : > { %9868 = vmatprep.mubr.bf16.mxu1 %v14051_v39  ;;  %v14110_v39 = vpack.c.bf16 %v5511_v26, %v5509_v43  ;;  %v14115_v14 = vpack.c.bf16 %v5515_v27, %v5513_v2  ;;  %v5522_v40 = vrot.slane %v13987_v38, 1  ;;  %v5524_v51 = vrot.slane %v13990_v17, 1  ;;  %vm15474_vm4 = vmmov %vm15466_vm0 }
 0x61b   : > { %v5517_v16 = vsel %vm15466_vm0, %v5514_v21, %v5516_v0  ;;  %v5519_v43 = vsel %vm15471_vm5, %v5516_v0, %v5518_v11  ;;  %v5526_v59 = vrot.slane %v14003_v52, 1  ;;  %v5528_v45 = vrot.slane %v14006_v35, 1  ;;  %vm15475_vm1 = vmmov %vm15466_vm0 }
 0x61c   : > { %v14126_v27 = vpack.c.bf16 %v5519_v43, %v5517_v16  ;;  %v5521_v2 = vsel %vm15472_vm3, %v5518_v11, %v5520_v57  ;;  %v5523_v36 = vsel %vm15473_vm11, %v5520_v57, %v5522_v40  ;;  %v5525_v26 = vsel %vm15474_vm4, %v5522_v40, %v5524_v51  ;;  %vm15476_vm5 = vmmov %vm15466_vm0 }
 0x61d   : > { %v14131_v20 = vpack.c.bf16 %v5523_v36, %v5521_v2  ;;  %v5527_v21 = vsel %vm15475_vm1, %v5524_v51, %v5526_v59  ;;  %v5529_v0 = vsel %vm15466_vm0, %v5526_v59, %v5528_v45  ;;  %v5534_v16 = vrot.slane %v14015_v49, 1  ;;  %vm15477_vm3 = vmmov %vm15466_vm0 }
 0x61e   : > { %v14136_v24 = vpack.c.bf16 %v5527_v21, %v5525_v26  ;;  %v5536_v11 = vrot.slane %v14018_v8, 1  ;;  %v5538_v40 = vrot.slane %v14023_v3, 1  ;;  %v5540_v43 = vrot.slane %v14026_v13, 1  ;;  %vm15478_vm11 = vmmov %vm15466_vm0 }
 0x61f   : > { %v5542_v51 = vrot.slane %v14029_v58, 1  ;;  %vm15479_vm4 = vmmov %vm15466_vm0 }
 0x620   : > { %v5537_v26 = vsel %vm15479_vm4, %v5534_v16, %v5536_v11  ;;  %vm15480_vm1 = vmmov %vm15466_vm0 }
 0x621   : > { %9869 = vmatmul.mubr.bf16.gmra.mrb[36].mxu1 %v14055_v19  ;;  %v5530_v19 = vrot.slane %v14009_v1, 1  ;;  %v5539_v15 = vsel %vm15480_vm1, %v5536_v11, %v5538_v40  ;;  %v5552_v11 = vrot.slane %v14046_v47, 1  ;;  %vm15484_vm4 = vmmov %vm15466_vm0 }
 0x622   : > { %9872 = vmatprep.mubr.bf16.mxu1 %v14059_v4  ;;  %v5532_v4 = vrot.slane %v14012_v55, 1  ;;  %v14155_v56 = vpack.c.bf16 %v5539_v15, %v5537_v26  ;;  %vm15485_vm1 = vmmov %vm15466_vm0 }
 0x623   : > { %v5531_v57 = vsel %vm15476_vm5, %v5528_v45, %v5530_v19  ;;  %v5541_v45 = vsel %vm15466_vm0, %v5538_v40, %v5540_v43  ;;  %vm15481_vm5 = vmmov %vm15466_vm0  ;;  %v5892_v40 = vrot.slane %v14080_v32, 7 }
 0x624   : > { %v14145_v2 = vpack.c.bf16 %v5531_v57, %v5529_v0  ;;  %v5533_v59 = vsel %vm15477_vm3, %v5530_v19, %v5532_v4  ;;  %v5535_v36 = vsel %vm15478_vm11, %v5532_v4, %v5534_v16  ;;  %v5543_v22 = vsel %vm15481_vm5, %v5540_v43, %v5542_v51  ;;  %vm15482_vm3 = vmmov %vm15466_vm0 }
 0x625   : > { %v14150_v21 = vpack.c.bf16 %v5535_v36, %v5533_v59  ;;  %v14157_v29 = vpack.c.bf16 %v5543_v22, %v5541_v45  ;;  %v5544_v0 = vrot.slane %v14032_v30, 1  ;;  %v5546_v19 = vrot.slane %v14035_v60, 1  ;;  %vm15483_vm11 = vmmov %vm15466_vm0 }
 0x626   : > { %v5548_v4 = vrot.slane %v14038_v63, 1  ;;  %v5550_v16 = vrot.slane %v14071_v50, 1  ;;  %v5554_v57 = vrot.slane %v14080_v32, 1  ;;  %v15117_v43 = vrot.slane %v14083_v53, 7  ;;  %vm15486_vm5 = vmmov %vm15466_vm0 }
 0x627   : > { %v5545_v15 = vsel %vm15482_vm3, %v5542_v51, %v5544_v0  ;;  %v5547_v22 = vsel %vm15483_vm11, %v5544_v0, %v5546_v19  ;;  %v15487_v51 = vrot.slane %v14046_v47, 7  ;;  %vm15488_vm3 = vcmask 1040384  }
 0x628   : > { %v14171_v59 = vpack.c.bf16 %v5547_v22, %v5545_v15  ;;  %v5549_v36 = vsel %vm15484_vm4, %v5546_v19, %v5548_v4  ;;  %v5551_v26 = vsel %vm15485_vm1, %v5548_v4, %v5550_v16  ;;  %v5553_v45 = vsel %vm15466_vm0, %v5550_v16, %v5552_v11  ;;  %vm15489_vm11 = vmmov %vm15488_vm3 }
 0x629   : > { %9873 = vmatmul.mubr.bf16.gmra.mrb[40].mxu1 %v14063_v62  ;;  %v14176_v62 = vpack.c.bf16 %v5551_v26, %v5549_v36  ;;  %v5893_v0 = vsel %vm15488_vm3, %v15487_v51, %v5892_v40  ;;  %v5895_v18 = vsel %vm15489_vm11, %v5892_v40, %v15117_v43  ;;  %v14191_v19 = vpack.c.bf16 %v14083_v53, %v14080_v32  ;;  %vm15493_vm4 = vmmov %vm15466_vm0  ;;  %v15494_v36 = vld [vmem:[#allocation49_spill] sm:$0xff]  ;;  %v15497_v51 = vld [vmem:[#allocation19_spill] sm:$0xff] }
 0x62a   : > { %9876 = vmatprep.mubr.bf16.mxu1 %v14068_v46  ;;  %v5555_v46 = vsel %vm15486_vm5, %v5552_v11, %v5554_v57  ;;  %v14187_v22 = vpack.c.bf16 %v5895_v18, %v5893_v0  ;;  %v6461_v4 = vrot.slane %v14083_v53, 1  ;;  %v14196_v16 = vpack.c.bf16 %v14046_v47, %v14071_v50  ;;  %vm15495_vm1 = vmmov %vm15466_vm0  ;;  %v15498_v0 = vld [vmem:[#allocation32_spill] sm:$0xff] }
 0x62b   : > { %v14185_v15 = vpack.c.bf16 %v5555_v46, %v5553_v45  ;;  %15491 = vst [vmem:[#allocation40_spill] sm:$0xff] %v14191_v19  ;;  %v4893_v46 = vrot.slane %v13892_v48, 7  ;;  %v4895_v18 = vrot.slane %v13895_v6, 7  ;;  %v4897_v32 = vrot.slane %v13898_v44, 7  ;;  %vm15500_vm0 = vmmov %vm15488_vm3  ;;  %v15509_v19 = vld [vmem:[#allocation35_spill] sm:$0xff] }
 0x62c   : > { %15490 = vst [vmem:[#allocation26_spill] sm:$0xff] %v14187_v22  ;;  %15492 = vst [vmem:[#allocation69_spill] sm:$0xff] %v14196_v16  ;;  %v6462_v11 = vsel %vm15493_vm4, %v5554_v57, %v6461_v4  ;;  %v6463_v26 = vsel %vm15495_vm1, %v6461_v4, %v15494_v36  ;;  %v4899_v45 = vrot.slane %v13907_v31, 7  ;;  %v15499_v57 = vld [vmem:[#allocation18_spill] sm:$0xff]  ;;  %v4901_v44 = vrot.slane %v13927_v25, 7 }
 0x62d   : > { %v14203_v40 = vpack.c.bf16 %v6463_v26, %v6462_v11  ;;  %v4894_v43 = vsel %vm15500_vm0, %v15499_v57, %v4893_v46  ;;  %vm15501_vm5 = vmmov %vm15500_vm0  ;;  %v11081_v26 = vld [vmem:[#allocation7 + $0x88] sm:$0xff]   ;;  %v4903_v31 = vrot.slane %v13930_v10, 7  ;;  %v4905_v57 = vrot.slane %v13935_v5, 7 }
 0x62e   : > { %v4896_v4 = vsel %vm15501_vm5, %v4893_v46, %v4895_v18  ;;  %vm15502_vm3 = vmmov %vm15500_vm0  ;;  %v4907_v46 = vrot.slane %v13938_v7, 7  ;;  %v11083_v7 = vld [vmem:[#allocation7 + $0x98] sm:$0xff]  }
 0x62f   : > { %15496 = vst [vmem:[#allocation49_spill] sm:$0xff] %v14203_v40  ;;  %v4898_v53 = vsel %vm15502_vm3, %v4895_v18, %v4897_v32  ;;  %vm15503_vm11 = vmmov %vm15500_vm0  ;;  %v14216_v11 = vpack.c.bf16 %v4896_v4, %v4894_v43  ;;  %v15505_v43 = vld [vmem:[#allocation34_spill] sm:$0xff]  ;;  %v4906_v18 = vsel %vm15500_vm0, %v4903_v31, %v4905_v57  ;;  %v4909_v4 = vrot.slane %v13958_v12, 7 }
 0x630   : > { %v4900_v6 = vsel %vm15503_vm11, %v4897_v32, %v4899_v45  ;;  %vm15506_vm4 = vmmov %vm15500_vm0 }
 0x631   : > { %9877 = vmatmul.mubr.bf16.gmra.mrb[44].mxu1 %v14196_v16  ;;  %v14218_v40 = vpack.c.bf16 %v4900_v6, %v4898_v53  ;;  %v11082_v53 = vld [vmem:[#allocation7 + $0x90] sm:$0xff]   ;;  %v4902_v25 = vsel %vm15506_vm4, %v4899_v45, %v4901_v44  ;;  %vm15507_vm1 = vmmov %vm15500_vm0  ;;  %v4911_v6 = vrot.slane %v13961_v28, 7  ;;  %v4913_v45 = vrot.slane %v13965_v61, 7  ;;  %v11085_v61 = vld [vmem:[#allocation7 + $0xa8] sm:$0xff]  }
 0x632   : > { %9896 = vmatprep.mubr.msk.bf16.mxu1 %vm12486_vm6, %v15497_v51  ;;  %v15504_v51 = vld [vmem:[#allocation33_spill] sm:$0xff]  ;;  %v4904_v10 = vsel %vm15507_vm1, %v4901_v44, %v4903_v31  ;;  %vm15508_vm5 = vmmov %vm15500_vm0  ;;  %v4915_v44 = vrot.slane %v13968_v54, 7 }
 0x633   : > { %v4908_v32 = vsel %vm15508_vm5, %v4905_v57, %v4907_v46  ;;  %v14235_v5 = vpack.c.bf16 %v4904_v10, %v4902_v25  ;;  %vm15511_vm3 = vmmov %vm15500_vm0  ;;  %v11103_v57 = vld [vmem:[#allocation7 + $0x138] sm:$0xff]  }
 0x634   : > { %v4910_v31 = vsel %vm15511_vm3, %v4907_v46, %v4909_v4  ;;  %vm15512_vm11 = vmmov %vm15500_vm0  ;;  %v4921_v46 = vrot.slane %v13987_v38, 7  ;;  %v11087_v38 = vld [vmem:[#allocation7 + $0xb8] sm:$0xff]  }
 0x635   : > { %v4912_v12 = vsel %vm15512_vm11, %v4909_v4, %v4911_v6  ;;  %vm15513_vm4 = vmmov %vm15500_vm0  ;;  %v4923_v4 = vrot.slane %v13990_v17, 7 }
 0x636   : > { %v4914_v28 = vsel %vm15513_vm4, %v4911_v6, %v4913_v45  ;;  %vm15514_vm1 = vmmov %vm15500_vm0  ;;  %v14253_v10 = vpack.c.bf16 %v4912_v12, %v4910_v31  ;;  %v11086_v6 = vld [vmem:[#allocation7 + $0xb0] sm:$0xff]  }
 0x637   : > { %v4916_v25 = vsel %vm15514_vm1, %v4913_v45, %v4915_v44  ;;  %vm15519_vm3 = vmmov %vm15514_vm1  ;;  %v4924_v31 = vsel %vm15514_vm1, %v4921_v46, %v4923_v4 }
 0x638   : > { %v14255_v54 = vpack.c.bf16 %v4916_v25, %v4914_v28  ;;  %vm15520_vm11 = vmmov %vm15514_vm1  ;;  %v4925_v28 = vrot.slane %v14003_v52, 7  ;;  %v15522_v25 = vld [vmem:[#allocation24_spill] sm:$0xff] }
 0x639   : > { %9897 = vmatmul.mubr.msk.bf16.vlgmr.msra.gmra.mrb[16].mxu1 %vm12533_vm9, %v14216_v11  ;;  %vm15521_vm4 = vmmov %vm15514_vm1 }
 0x63a   : > { %9929 = vmatpush3.bf16.msra.mxu1 %v14020_v23  ;;  %9900 = vmatprep.mubr.msk.bf16.mxu1 %vm12542_vm10, %v14218_v40  ;;  %v14237_v23 = vpack.c.bf16 %v4908_v32, %v4906_v18  ;;  %v4917_v18 = vrot.slane %v13981_v9, 7  ;;  %v15515_v32 = vld [vmem:[#allocation38_spill] sm:$0xff] }
 0x63b   : > { %9930 = vmatprep.subr.bf16.mxu1 %v11081_v26  ;;  %vm15516_vm0 = vnez %v15515_v32 }
 0x63c   : > { %v4918_v45 = vsel %vm15519_vm3, %v4915_v44, %v4917_v18  ;;  %vm15523_vm3 = vnez %v15522_v25  ;;  %v4929_v44 = vrot.slane %v14009_v1, 7 }
 0x63e   : > { %9931 = vmatpush3.bf16.msra.mxu1 %v11081_v26  ;;  %v11084_v26 = vld [vmem:[#allocation7 + $0xa0] sm:$0xff]  }
 0x63f   : > { %9932 = vmatprep.subr.bf16.mxu1 %v11082_v53 }
 0x641   : > { %9901 = vmatmul.mubr.msk.bf16.gmra.mrb[20].mxu1 %vm12593_vm13, %v14235_v5 }
 0x642   : > { %9904 = vmatprep.mubr.msk.bf16.mxu1 %vm12604_vm14, %v14237_v23  ;;  %9933 = vmatpush3.bf16.msra.mxu1 %v11082_v53  ;;  %v4919_v53 = vrot.slane %v13984_v34, 7 }
 0x643   : > { %9934 = vmatprep.subr.bf16.mxu1 %v11083_v7 }
 0x644   : > { %v4920_v9 = vsel %vm15520_vm11, %v4917_v18, %v4919_v53  ;;  %v4922_v34 = vsel %vm15521_vm4, %v4919_v53, %v4921_v46  ;;  %v4931_v18 = vrot.slane %v14012_v55, 7  ;;  %v11088_v53 = vld [vmem:[#allocation7 + $0xc0] sm:$0xff]   ;;  %vm15526_vm4 = vmmov %vm15514_vm1  ;;  %v4933_v55 = vrot.slane %v14015_v49, 7 }
 0x645   : > { %v14271_v12 = vpack.c.bf16 %v4920_v9, %v4918_v45  ;;  %v14273_v17 = vpack.c.bf16 %v4924_v31, %v4922_v34  ;;  %v4926_v46 = vsel %vm15526_vm4, %v4923_v4, %v4925_v28  ;;  %v15529_v34 = vld [vmem:[#allocation27_spill] sm:$0xff]  ;;  %v4937_v4 = vrot.slane %v14023_v3, 7  ;;  %vm15534_vm4 = vmmov %vm15514_vm1 }
 0x646   : > { %9935 = vmatpush3.bf16.msra.mxu1 %v11083_v7  ;;  %v15517_v7 = vld [vmem:[#allocation39_spill] sm:$0xff]  ;;  %v4939_v31 = vrot.slane %v14026_v13, 7  ;;  %v4941_v3 = vrot.slane %v14029_v58, 7  ;;  %v4943_v13 = vrot.slane %v14032_v30, 7 }
 0x647   : > { %9936 = vmatprep.subr.bf16.mxu1 %v11084_v26  ;;  %vm15518_vm5 = vnez %v15517_v7 }
 0x649   : > { %9905 = vmatmul.mubr.msk.bf16.gmra.mrb[24].mxu1 %vm15516_vm0, %v14253_v10  ;;  %vm15528_vm0 = vmmov %vm15514_vm1 }
 0x64a   : > { %9908 = vmatprep.mubr.msk.bf16.mxu1 %vm15518_vm5, %v14255_v54  ;;  %9937 = vmatpush3.bf16.msra.mxu1 %v11084_v26  ;;  %v4927_v26 = vrot.slane %v14006_v35, 7  ;;  %vm15527_vm5 = vmmov %vm15514_vm1  ;;  %v4932_v45 = vsel %vm15528_vm0, %v4929_v44, %v4931_v18 }
 0x64b   : > { %9938 = vmatprep.subr.bf16.mxu1 %v11085_v61 }
 0x64c   : > { %v4928_v52 = vsel %vm15514_vm1, %v4925_v28, %v4927_v26  ;;  %v4930_v35 = vsel %vm15527_vm5, %v4927_v26, %v4929_v44  ;;  %v15531_v28 = vld [vmem:[#allocation42_spill] sm:$0xff]  ;;  %vm15533_vm5 = vmmov %vm15514_vm1 }
 0x64d   : > { %v14289_v9 = vpack.c.bf16 %v4928_v52, %v4926_v46  ;;  %v14291_v1 = vpack.c.bf16 %v4932_v45, %v4930_v35  ;;  %vm15532_vm0 = vnez %v15531_v28  ;;  %v15536_v52 = vld [vmem:[#allocation43_spill] sm:$0xff]  ;;  %v4947_v35 = vrot.slane %v14038_v63, 7  ;;  %v15538_v45 = vld [vmem:[#allocation44_spill] sm:$0xff]  ;;  %v15543_v63 = vld [vmem:[#allocation46_spill] sm:$0xff] }
 0x64e   : > { %9939 = vmatpush3.bf16.msra.mxu1 %v11085_v61  ;;  %v15524_v61 = vld [vmem:[#allocation25_spill] sm:$0xff] }
 0x64f   : > { %9940 = vmatprep.subr.bf16.mxu1 %v11086_v6  ;;  %vm15525_vm11 = vnez %v15524_v61 }
 0x651   : > { %9909 = vmatmul.mubr.msk.bf16.gmra.mrb[28].mxu1 %vm15523_vm3, %v14271_v12  ;;  %vm15535_vm3 = vmmov %vm15514_vm1 }
 0x652   : > { %9912 = vmatprep.mubr.msk.bf16.mxu1 %vm15525_vm11, %v14273_v17  ;;  %9941 = vmatpush3.bf16.msra.mxu1 %v11086_v6  ;;  %v4935_v6 = vrot.slane %v14018_v8, 7  ;;  %vm15530_vm11 = vnez %v15529_v34  ;;  %v4940_v8 = vsel %vm15535_vm3, %v4937_v4, %v4939_v31  ;;  %vm15540_vm3 = vmmov %vm15514_vm1 }
 0x653   : > { %9942 = vmatprep.subr.bf16.mxu1 %v11087_v38 }
 0x654   : > { %v4936_v26 = vsel %vm15534_vm4, %v4933_v55, %v4935_v6  ;;  %v4938_v49 = vsel %vm15514_vm1, %v4935_v6, %v4937_v4  ;;  %vm15541_vm4 = vmmov %vm15514_vm1 }
 0x655   : > { %v14309_v46 = vpack.c.bf16 %v4940_v8, %v4938_v49  ;;  %v4944_v6 = vsel %vm15541_vm4, %v4941_v3, %v4943_v13  ;;  %v15548_v49 = vrot.slane %v14046_v47, 7  ;;  %v15556_v47 = vld [vmem:[#allocation52_spill] sm:$0xff] }
 0x656   : > { %9943 = vmatpush3.bf16.msra.mxu1 %v11087_v38  ;;  %v4934_v38 = vsel %vm15533_vm5, %v4931_v18, %v4933_v55  ;;  %v4945_v18 = vrot.slane %v14035_v60, 7  ;;  %vm15539_vm5 = vnez %v15538_v45  ;;  %v4942_v55 = vsel %vm15540_vm3, %v4939_v31, %v4941_v3 }
 0x657   : > { %9976 = vmatprep.subr.bf16.mxu1 %v11088_v53  ;;  %v14307_v44 = vpack.c.bf16 %v4936_v26, %v4934_v38  ;;  %v14325_v4 = vpack.c.bf16 %v4944_v6, %v4942_v55  ;;  %v4949_v60 = vrot.slane %v14071_v50, 7  ;;  %v15545_v26 = vld [vmem:[#allocation48_spill] sm:$0xff]  ;;  %v15550_v3 = vrot.slane %v13892_v48, 1  ;;  %v15552_v55 = vld [vmem:[#allocation50_spill] sm:$0xff]  ;;  %v15554_v6 = vld [vmem:[#allocation51_spill] sm:$0xff] }
 0x658   : > { %v4946_v58 = vsel %vm15514_vm1, %v4943_v13, %v4945_v18  ;;  %v15558_v48 = vld [vmem:[#allocation53_spill] sm:$0xff] }
 0x659   : > { %9913 = vmatmul.mubr.msk.bf16.gmra.mrb[32].mxu1 %vm15530_vm11, %v14289_v9  ;;  %vm15537_vm11 = vnez %v15536_v52 }
 0x65a   : > { %9916 = vmatprep.mubr.msk.bf16.mxu1 %vm15532_vm0, %v14291_v1  ;;  %vm15542_vm0 = vmmov %vm15514_vm1  ;;  %vm15553_vm1 = vnez %v15552_v55  ;;  %v11108_v55 = vld [vmem:[#allocation7 + $0x160] sm:$0xff]  }
 0x65b   : > { %v4948_v30 = vsel %vm15542_vm0, %v4945_v18, %v4947_v35  ;;  %vm15547_vm3 = vmmov %vm15542_vm0 }
 0x65c   : > { %v14327_v38 = vpack.c.bf16 %v4948_v30, %v4946_v58  ;;  %v4950_v31 = vsel %vm15547_vm3, %v4947_v35, %v4949_v60  ;;  %vm15549_vm4 = vmmov %vm15542_vm0  ;;  %vm15551_vm0 = vcmask 1046528   ;;  %v11089_v35 = vld [vmem:[#allocation7 + $0xc8] sm:$0xff]   ;;  %vm15557_vm3 = vnez %v15556_v47  ;;  %v11090_v58 = vld [vmem:[#allocation7 + $0xd0] sm:$0xff]  }
 0x65d   : > { %v4952_v8 = vsel %vm15549_vm4, %v4949_v60, %v15548_v49  ;;  %v5495_v13 = vsel %vm15551_vm0, %v15494_v36, %v15550_v3  ;;  %vm15559_vm4 = vnez %v15558_v48  ;;  %v15560_v30 = vld [vmem:[#allocation54_spill] sm:$0xff]  ;;  %v15561_v60 = vld [vmem:[#allocation55_spill] sm:$0xff]  ;;  %v15563_v49 = vld [vmem:[#allocation56_spill] sm:$0xff] }
 0x65e   : > { %v14344_v50 = vpack.c.bf16 %v4952_v8, %v4950_v31  ;;  %v8624_v18 = vpack.c.bf16 %v5495_v13, %v15494_v36  ;;  %v11091_v36 = vld [vmem:[#allocation7 + $0xd8] sm:$0xff]   ;;  %vm15562_vm0 = vnez %v15561_v60  ;;  %v11093_v31 = vld [vmem:[#allocation7 + $0xe8] sm:$0xff]   ;;  %v15565_v8 = vld [vmem:[#allocation57_spill] sm:$0xff] }
 0x65f   : > { %v11094_v3 = vld [vmem:[#allocation7 + $0xf0] sm:$0xff]   ;;  %v11095_v13 = vld [vmem:[#allocation7 + $0xf8] sm:$0xff]  }
 0x661   : > { %9917 = vmatmul.mubr.msk.bf16.gmra.mrb[36].mxu1 %vm15537_vm11, %v14307_v44  ;;  %vm15544_vm11 = vnez %v15543_v63  ;;  %v15592_v63 = vld [vmem:[#allocation21_spill] sm:$0xff] }
 0x662   : > { %9920 = vmatprep.mubr.msk.bf16.mxu1 %vm15539_vm5, %v14309_v46  ;;  %vm15546_vm5 = vnez %v15545_v26 }
 0x669   : > { %9921 = vmatmul.mubr.msk.bf16.gmra.mrb[40].mxu1 %vm15544_vm11, %v14325_v4 }
 0x66a   : > { %9924 = vmatprep.mubr.msk.bf16.mxu1 %vm15546_vm5, %v14327_v38  ;;  %vm15555_vm5 = vnez %v15554_v6  ;;  %v11114_v6 = vld [vmem:[#allocation7 + $0x190] sm:$0xff]  }
 0x671   : > { %9925 = vmatmul.mubr.msk.bf16.gmra.mrb[44].mxu1 %vm15553_vm1, %v14344_v50 }
 0x672   : > { %9944 = vmatprep.mubr.msk.bf16.mxu1 %vm15555_vm5, %v8624_v18  ;;  %v15566_v18 = vld [vmem:[#allocation58_spill] sm:$0xff] }
 0x679   : > { %9945 = vmatmul.mubr.msk.bf16.vlgmr.msra.gmra.mrb[16].mxu1 %vm15557_vm3, %v14087_v42 }
 0x67a   : > { %9977 = vmatpush3.bf16.msra.mxu1 %v11088_v53  ;;  %9948 = vmatprep.mubr.msk.bf16.mxu1 %vm15559_vm4, %v14100_v41  ;;  %v11092_v53 = vld [vmem:[#allocation7 + $0xe0] sm:$0xff]   ;;  %vm15564_vm4 = vnez %v15563_v49 }
 0x67b   : > { %9978 = vmatprep.subr.bf16.mxu1 %v11089_v35 }
 0x67e   : > { %9979 = vmatpush3.bf16.msra.mxu1 %v11089_v35  ;;  %v15573_v35 = vld [vmem:[#allocation63_spill] sm:$0xff] }
 0x67f   : > { %9980 = vmatprep.subr.bf16.mxu1 %v11090_v58 }
 0x681   : > { %9949 = vmatmul.mubr.msk.bf16.gmra.mrb[20].mxu1 %vm15428_vm2, %v14105_v37 }
 0x682   : > { %9952 = vmatprep.mubr.msk.bf16.mxu1 %vm15562_vm0, %v14110_v39  ;;  %9981 = vmatpush3.bf16.msra.mxu1 %v11090_v58  ;;  %v11096_v58 = vld [vmem:[#allocation7 + $0x100] sm:$0xff]  }
 0x683   : > { %9982 = vmatprep.subr.bf16.mxu1 %v11091_v36 }
 0x686   : > { %9983 = vmatpush3.bf16.msra.mxu1 %v11091_v36  ;;  %v15579_v36 = vld [vmem:[#allocation68_spill] sm:$0xff] }
 0x687   : > { %9984 = vmatprep.subr.bf16.mxu1 %v11092_v53 }
 0x689   : > { %9953 = vmatmul.mubr.msk.bf16.gmra.mrb[24].mxu1 %vm15564_vm4, %v14115_v14 }
 0x68a   : > { %9956 = vmatprep.mubr.msk.bf16.mxu1 %vm15432_vm7, %v14126_v27  ;;  %9985 = vmatpush3.bf16.msra.mxu1 %v11092_v53  ;;  %v15569_v53 = vld [vmem:[#allocation61_spill] sm:$0xff] }
 0x68b   : > { %9986 = vmatprep.subr.bf16.mxu1 %v11093_v31  ;;  %vm15570_vm7 = vnez %v15569_v53 }
 0x68e   : > { %9987 = vmatpush3.bf16.msra.mxu1 %v11093_v31  ;;  %v15571_v31 = vld [vmem:[#allocation62_spill] sm:$0xff] }
 0x68f   : > { %9988 = vmatprep.subr.bf16.mxu1 %v11094_v3 }
 0x691   : > { %9957 = vmatmul.mubr.msk.bf16.gmra.mrb[28].mxu1 %vm15433_vm12, %v14131_v20  ;;  %vm15572_vm12 = vnez %v15571_v31  ;;  %v11097_v31 = vld [vmem:[#allocation7 + $0x108] sm:$0xff]  }
 0x692   : > { %9960 = vmatprep.mubr.msk.bf16.mxu1 %vm15434_vm15, %v14136_v24  ;;  %9989 = vmatpush3.bf16.msra.mxu1 %v11094_v3  ;;  %vm15574_vm15 = vnez %v15573_v35  ;;  %v15575_v3 = vld [vmem:[#allocation65_spill] sm:$0xff] }
 0x693   : > { %9990 = vmatprep.subr.bf16.mxu1 %v11095_v13  ;;  %vm15576_vm4 = vnez %v15575_v3  ;;  %v15615_v35 = vld [vmem:[#allocation49_spill] sm:$0xff] }
 0x696   : > { %9991 = vmatpush3.bf16.msra.mxu1 %v11095_v13  ;;  %v15577_v13 = vld [vmem:[#allocation66_spill] sm:$0xff] }
 0x697   : > { %10024 = vmatprep.subr.bf16.mxu1 %v11096_v58  ;;  %vm15578_vm0 = vnez %v15577_v13  ;;  %v11098_v13 = vld [vmem:[#allocation7 + $0x110] sm:$0xff]  }
 0x699   : > { %9961 = vmatmul.mubr.msk.bf16.gmra.mrb[32].mxu1 %vm15386_vm8, %v14145_v2  ;;  %vm15580_vm8 = vnez %v15579_v36  ;;  %v11099_v36 = vld [vmem:[#allocation7 + $0x118] sm:$0xff]  }
 0x69a   : > { %9964 = vmatprep.mubr.msk.bf16.mxu1 %vm15570_vm7, %v14150_v21 }
 0x6a1   : > { %9965 = vmatmul.mubr.msk.bf16.gmra.mrb[36].mxu1 %vm15572_vm12, %v14155_v56 }
 0x6a2   : > { %9968 = vmatprep.mubr.msk.bf16.mxu1 %vm15574_vm15, %v14157_v29 }
 0x6a9   : > { %9969 = vmatmul.mubr.msk.bf16.gmra.mrb[40].mxu1 %vm15576_vm4, %v14171_v59 }
 0x6aa   : > { %9972 = vmatprep.mubr.msk.bf16.mxu1 %vm15578_vm0, %v14176_v62 }
 0x6b1   : > { %9973 = vmatmul.mubr.msk.bf16.gmra.mrb[44].mxu1 %vm15580_vm8, %v14185_v15 }
 0x6b2   : > { %9992 = vmatprep.mubr.msk.bf16.mxu1 %vm12486_vm6, %v14216_v11  ;;  %v11100_v11 = vld [vmem:[#allocation7 + $0x120] sm:$0xff]   ;;  %vm15589_vm6 = vnez %v15545_v26  ;;  %v15593_v26 = vld [vmem:[#allocation23_spill] sm:$0xff] }
 0x6b9   : > { %9993 = vmatmul.mubr.msk.bf16.vlgmr.msra.gmra.mrb[16].mxu1 %vm12533_vm9, %v14218_v40  ;;  %vm15582_vm9 = vnez %v15517_v7 }
 0x6ba   : > { %10025 = vmatpush3.bf16.msra.mxu1 %v11096_v58  ;;  %9996 = vmatprep.mubr.msk.bf16.mxu1 %vm12542_vm10, %v14235_v5  ;;  %v11101_v58 = vld [vmem:[#allocation7 + $0x128] sm:$0xff]   ;;  %vm15581_vm10 = vnez %v15515_v32 }
 0x6bb   : > { %10026 = vmatprep.subr.bf16.mxu1 %v11097_v31 }
 0x6be   : > { %10027 = vmatpush3.bf16.msra.mxu1 %v11097_v31  ;;  %v11102_v31 = vld [vmem:[#allocation7 + $0x130] sm:$0xff]  }
 0x6bf   : > { %10028 = vmatprep.subr.bf16.mxu1 %v11098_v13 }
 0x6c1   : > { %9997 = vmatmul.mubr.msk.bf16.gmra.mrb[20].mxu1 %vm12593_vm13, %v14237_v23  ;;  %vm15584_vm13 = vnez %v15524_v61 }
 0x6c2   : > { %10000 = vmatprep.mubr.msk.bf16.mxu1 %vm12604_vm14, %v14253_v10  ;;  %10029 = vmatpush3.bf16.msra.mxu1 %v11098_v13  ;;  %vm15583_vm14 = vnez %v15522_v25  ;;  %v15590_v13 = vld [vmem:[#allocation41_spill] sm:$0xff] }
 0x6c3   : > { %10030 = vmatprep.subr.bf16.mxu1 %v11099_v36 }
 0x6c6   : > { %10031 = vmatpush3.bf16.msra.mxu1 %v11099_v36  ;;  %v11104_v36 = vld [vmem:[#allocation7 + $0x140] sm:$0xff]  }
 0x6c7   : > { %10032 = vmatprep.subr.bf16.mxu1 %v11100_v11 }
 0x6c9   : > { %10001 = vmatmul.mubr.msk.bf16.gmra.mrb[24].mxu1 %vm15581_vm10, %v14255_v54  ;;  %vm15586_vm10 = vnez %v15531_v28  ;;  %v11427_v28 = vld [vmem:[%s11904_s16 + $0xd0] sm:$0xff] }
 0x6ca   : > { %10004 = vmatprep.mubr.msk.bf16.mxu1 %vm15582_vm9, %v14271_v12  ;;  %10033 = vmatpush3.bf16.msra.mxu1 %v11100_v11  ;;  %vm15585_vm9 = vnez %v15529_v34  ;;  %v15591_v11 = vld [vmem:[#allocation20_spill] sm:$0xff]  ;;  %v11426_v34 = vld [vmem:[%s11904_s16 + $0xc8] sm:$0xff] }
 0x6cb   : > { %10034 = vmatprep.subr.bf16.mxu1 %v11101_v58 }
 0x6ce   : > { %10035 = vmatpush3.bf16.msra.mxu1 %v11101_v58  ;;  %v11106_v58 = vld [vmem:[#allocation7 + $0x150] sm:$0xff]  }
 0x6cf   : > { %10036 = vmatprep.subr.bf16.mxu1 %v11102_v31 }
 0x6d1   : > { %10005 = vmatmul.mubr.msk.bf16.gmra.mrb[28].mxu1 %vm15583_vm14, %v14273_v17  ;;  %vm15587_vm14 = vnez %v15536_v52  ;;  %v15628_v52 = vld [vmem:[#allocation26_spill] sm:$0xff] }
 0x6d2   : > { %10008 = vmatprep.mubr.msk.bf16.mxu1 %vm15584_vm13, %v14289_v9  ;;  %10037 = vmatpush3.bf16.msra.mxu1 %v11102_v31  ;;  %vm15588_vm13 = vnez %v15538_v45  ;;  %v11107_v31 = vld [vmem:[#allocation7 + $0x158] sm:$0xff]   ;;  %v15630_v45 = vld [vmem:[#allocation18_spill] sm:$0xff] }
 0x6d3   : > { %10038 = vmatprep.subr.bf16.mxu1 %v11103_v57 }
 0x6d6   : > { %10039 = vmatpush3.bf16.msra.mxu1 %v11103_v57  ;;  %v11105_v57 = vld [vmem:[#allocation7 + $0x148] sm:$0xff]  }
 0x6d7   : > { %10072 = vmatprep.subr.bf16.mxu1 %v11104_v36 }
 0x6d9   : > { %10009 = vmatmul.mubr.msk.bf16.gmra.mrb[32].mxu1 %vm15585_vm9, %v14291_v1 }
 0x6da   : > { %10012 = vmatprep.mubr.msk.bf16.mxu1 %vm15586_vm10, %v14307_v44 }
 0x6e1   : > { %10013 = vmatmul.mubr.msk.bf16.gmra.mrb[36].mxu1 %vm15587_vm14, %v14309_v46 }
 0x6e2   : > { %10016 = vmatprep.mubr.msk.bf16.mxu1 %vm15588_vm13, %v14325_v4 }
 0x6e9   : > { %10017 = vmatmul.mubr.msk.bf16.gmra.mrb[40].mxu1 %vm15544_vm11, %v14327_v38 }
 0x6ea   : > { %10020 = vmatprep.mubr.msk.bf16.mxu1 %vm15589_vm6, %v14344_v50 }
 0x6f1   : > { %10021 = vmatmul.mubr.msk.bf16.gmra.mrb[44].mxu1 %vm15553_vm1, %v14187_v22  ;;  %v15594_v22 = vld [vmem:[#allocation28_spill] sm:$0xff]  ;;  %vm15604_vm1 = vnez %v15558_v48 }
 0x6f2   : > { %10040 = vmatprep.mubr.bf16.mxu1 %v13903_v33  ;;  %v11109_v33 = vld [vmem:[#allocation7 + $0x168] sm:$0xff]  }
 0x6f9   : > { %10041 = vmatmul.mubr.bf16.vlgmr.msra.gmra.mrb[16].mxu1 %v15590_v13  ;;  %v15596_v13 = vld [vmem:[#allocation31_spill] sm:$0xff] }
 0x6fa   : > { %10073 = vmatpush3.bf16.msra.mxu1 %v11104_v36  ;;  %10044 = vmatprep.mubr.bf16.mxu1 %v15591_v11  ;;  %v15595_v36 = vld [vmem:[#allocation30_spill] sm:$0xff]  ;;  %v11110_v11 = vld [vmem:[#allocation7 + $0x170] sm:$0xff]  }
 0x6fb   : > { %10074 = vmatprep.subr.bf16.mxu1 %v11105_v57 }
 0x6fe   : > { %10075 = vmatpush3.bf16.msra.mxu1 %v11105_v57  ;;  %v11111_v57 = vld [vmem:[#allocation7 + $0x178] sm:$0xff]  }
 0x6ff   : > { %10076 = vmatprep.subr.bf16.mxu1 %v11106_v58 }
 0x701   : > { %10045 = vmatmul.mubr.bf16.gmra.mrb[20].mxu1 %v15592_v63  ;;  %v15597_v63 = vld [vmem:[#allocation45_spill] sm:$0xff] }
 0x702   : > { %10048 = vmatprep.mubr.bf16.mxu1 %v15593_v26  ;;  %10077 = vmatpush3.bf16.msra.mxu1 %v11106_v58  ;;  %v11112_v58 = vld [vmem:[#allocation7 + $0x180] sm:$0xff]  }
 0x703   : > { %10078 = vmatprep.subr.bf16.mxu1 %v11107_v31 }
 0x706   : > { %10079 = vmatpush3.bf16.msra.mxu1 %v11107_v31  ;;  %v15598_v31 = vld [vmem:[#allocation47_spill] sm:$0xff] }
 0x707   : > { %10080 = vmatprep.subr.bf16.mxu1 %v11108_v55 }
 0x709   : > { %10049 = vmatmul.mubr.bf16.gmra.mrb[24].mxu1 %v15594_v22  ;;  %v15599_v22 = vld [vmem:[#allocation29_spill] sm:$0xff] }
 0x70a   : > { %10052 = vmatprep.mubr.bf16.mxu1 %v15595_v36  ;;  %10081 = vmatpush3.bf16.msra.mxu1 %v11108_v55  ;;  %v15600_v36 = vld [vmem:[#allocation22_spill] sm:$0xff]  ;;  %v15601_v55 = vld [vmem:[#allocation64_spill] sm:$0xff] }
 0x70b   : > { %10082 = vmatprep.subr.bf16.mxu1 %v11109_v33 }
 0x70e   : > { %10083 = vmatpush3.bf16.msra.mxu1 %v11109_v33  ;;  %v15602_v33 = vld [vmem:[#allocation67_spill] sm:$0xff] }
 0x70f   : > { %10084 = vmatprep.subr.bf16.mxu1 %v11110_v11 }
 0x711   : > { %10053 = vmatmul.mubr.bf16.gmra.mrb[28].mxu1 %v15596_v13  ;;  %v15603_v13 = vld [vmem:[#allocation40_spill] sm:$0xff] }
 0x712   : > { %10056 = vmatprep.mubr.bf16.mxu1 %v15597_v63  ;;  %10085 = vmatpush3.bf16.msra.mxu1 %v11110_v11  ;;  %v7674_v11 = vld [vmem:[#allocation8] sm:$0xff] }
 0x713   : > { %10086 = vmatprep.subr.bf16.mxu1 %v11111_v57 }
 0x716   : > { %10087 = vmatpush3.bf16.msra.mxu1 %v11111_v57  ;;  %v7675_v57 = vld [vmem:[#allocation8 + $0x8] sm:$0xff] }
 0x717   : > { %10120 = vmatprep.subr.bf16.mxu1 %v11112_v58  ;;  %v10344_v63 = vpack.c.bf16 %v7675_v57, %v7674_v11  ;;  %v7679_v11 = vld [vmem:[#allocation8 + $0x28] sm:$0xff]  ;;  %v11116_v57 = vld [vmem:[#allocation7 + $0x1a0] sm:$0xff]  }
 0x719   : > { %10057 = vmatmul.mubr.bf16.gmra.mrb[32].mxu1 %v15598_v31  ;;  %10345 = vmatprep.subr.bf16.mxu0 %v10344_v63 }
 0x71a   : > { %10060 = vmatprep.mubr.bf16.mxu1 %v15599_v22  ;;  %10347 = vmatpush3.bf16.msra.mxu0 %v10344_v63  ;;  %v11113_v22 = vld [vmem:[#allocation7 + $0x188] sm:$0xff]   ;;  %v11115_v63 = vld [vmem:[#allocation7 + $0x198] sm:$0xff]  }
 0x721   : > { %10061 = vmatmul.mubr.bf16.gmra.mrb[36].mxu1 %v15600_v36 }
 0x722   : > { %10064 = vmatprep.mubr.bf16.mxu1 %v15601_v55 }
 0x729   : > { %10065 = vmatmul.mubr.bf16.gmra.mrb[40].mxu1 %v15602_v33 }
 0x72a   : > { %10068 = vmatprep.mubr.bf16.mxu1 %v14196_v16  ;;  %v7677_v16 = vld [vmem:[#allocation8 + $0x18] sm:$0xff] }
 0x731   : > { %10069 = vmatmul.mubr.bf16.gmra.mrb[44].mxu1 %v15603_v13  ;;  %v7676_v13 = vld [vmem:[#allocation8 + $0x10] sm:$0xff] }
 0x732   : > { %10088 = vmatprep.mubr.msk.bf16.mxu1 %vm15555_vm5, %v14087_v42  ;;  %v10348_v42 = vpack.c.bf16 %v7677_v16, %v7676_v13  ;;  %v7680_v16 = vld [vmem:[#allocation8 + $0x30] sm:$0xff] }
 0x733   : > { %v11118_v13 = vld [vmem:[#allocation7 + $0x1b0] sm:$0xff]  }
 0x734   : > { %10349 = vmatprep.subr.bf16.mxu0 %v10348_v42 }
 0x735   : > { %10351 = vmatpush3.bf16.msra.mxu0 %v10348_v42 }
 0x739   : > { %10089 = vmatmul.mubr.msk.bf16.vlgmr.msra.gmra.mrb[16].mxu1 %vm15557_vm3, %v14100_v41  ;;  %vm15605_vm3 = vnez %v15561_v60 }
 0x73a   : > { %10121 = vmatpush3.bf16.msra.mxu1 %v11112_v58  ;;  %10092 = vmatprep.mubr.msk.bf16.mxu1 %vm15604_vm1, %v14105_v37  ;;  %v7678_v58 = vld [vmem:[#allocation8 + $0x20] sm:$0xff]  ;;  %vm15606_vm1 = vnez %v15563_v49 }
 0x73b   : > { %10122 = vmatprep.subr.bf16.mxu1 %v11113_v22  ;;  %v10352_v48 = vpack.c.bf16 %v7679_v11, %v7678_v58  ;;  %v7682_v58 = vld [vmem:[#allocation8 + $0x40] sm:$0xff]  ;;  %v7683_v11 = vld [vmem:[#allocation8 + $0x48] sm:$0xff] }
 0x73d   : > { %10353 = vmatprep.subr.bf16.mxu0 %v10352_v48 }
 0x73e   : > { %10123 = vmatpush3.bf16.msra.mxu1 %v11113_v22  ;;  %10355 = vmatpush3.bf16.msra.mxu0 %v10352_v48  ;;  %v11117_v22 = vld [vmem:[#allocation7 + $0x1a8] sm:$0xff]   ;;  %v11119_v48 = vld [vmem:[#allocation7 + $0x1b8] sm:$0xff]  }
 0x73f   : > { %10124 = vmatprep.subr.bf16.mxu1 %v11114_v6 }
 0x741   : > { %10093 = vmatmul.mubr.msk.bf16.gmra.mrb[20].mxu1 %vm15428_vm2, %v14110_v39  ;;  %vm15607_vm2 = vnez %v15565_v8  ;;  %v10360_v8 = vpack.c.bf16 %v7683_v11, %v7682_v58  ;;  %v11404_v11 = vld [vmem:[%s11904_s16 + $0x18] sm:$0xff] }
 0x742   : > { %10096 = vmatprep.mubr.msk.bf16.mxu1 %vm15605_vm3, %v14115_v14  ;;  %10125 = vmatpush3.bf16.msra.mxu1 %v11114_v6  ;;  %v7681_v6 = vld [vmem:[#allocation8 + $0x38] sm:$0xff]  ;;  %vm15608_vm3 = vnez %v15566_v18 }
 0x743   : > { %10126 = vmatprep.subr.bf16.mxu1 %v11115_v63  ;;  %v10356_v42 = vpack.c.bf16 %v7681_v6, %v7680_v16  ;;  %v7684_v16 = vld [vmem:[#allocation8 + $0x50] sm:$0xff]  ;;  %v7685_v6 = vld [vmem:[#allocation8 + $0x58] sm:$0xff] }
 0x745   : > { %10357 = vmatprep.subr.bf16.mxu0 %v10356_v42 }
 0x746   : > { %10127 = vmatpush3.bf16.msra.mxu1 %v11115_v63  ;;  %10359 = vmatpush3.bf16.msra.mxu0 %v10356_v42  ;;  %v15609_v63 = vld [vmem:[#allocation59_spill] sm:$0xff] }
 0x747   : > { %10128 = vmatprep.subr.bf16.mxu1 %v11116_v57  ;;  %10361 = vmatprep.subr.bf16.mxu0 %v10360_v8 }
 0x749   : > { %10097 = vmatmul.mubr.msk.bf16.gmra.mrb[24].mxu1 %vm15606_vm1, %v14126_v27  ;;  %vm15610_vm1 = vnez %v15609_v63 }
 0x74a   : > { %10100 = vmatprep.mubr.msk.bf16.mxu1 %vm15607_vm2, %v14131_v20  ;;  %10129 = vmatpush3.bf16.msra.mxu1 %v11116_v57  ;;  %v11120_v57 = vld [vmem:[#allocation7 + $0x1c0] sm:$0xff]  }
 0x74b   : > { %10130 = vmatprep.subr.bf16.mxu1 %v11117_v22  ;;  %10363 = vmatpush3.bf16.msra.mxu0 %v10360_v8  ;;  %v7686_v8 = vld [vmem:[#allocation8 + $0x60] sm:$0xff] }
 0x74e   : > { %10131 = vmatpush3.bf16.msra.mxu1 %v11117_v22  ;;  %v15611_v22 = vld [vmem:[#allocation60_spill] sm:$0xff] }
 0x74f   : > { %10132 = vmatprep.subr.bf16.mxu1 %v11118_v13  ;;  %vm15612_vm2 = vnez %v15611_v22 }
 0x751   : > { %10101 = vmatmul.mubr.msk.bf16.gmra.mrb[28].mxu1 %vm15608_vm3, %v14136_v24 }
 0x752   : > { %10104 = vmatprep.mubr.msk.bf16.mxu1 %vm15610_vm1, %v14145_v2  ;;  %10133 = vmatpush3.bf16.msra.mxu1 %v11118_v13  ;;  %v10364_v13 = vpack.c.bf16 %v7685_v6, %v7684_v16  ;;  %v7688_v16 = vld [vmem:[#allocation8 + $0x70] sm:$0xff]  ;;  %v7689_v6 = vld [vmem:[#allocation8 + $0x78] sm:$0xff] }
 0x753   : > { %10134 = vmatprep.subr.bf16.mxu1 %v11119_v48 }
 0x754   : > { %10365 = vmatprep.subr.bf16.mxu0 %v10364_v13 }
 0x755   : > { %10367 = vmatpush3.bf16.msra.mxu0 %v10364_v13  ;;  %v10372_v13 = vpack.c.bf16 %v7689_v6, %v7688_v16  ;;  %v11405_v16 = vld [vmem:[%s11904_s16 + $0x20] sm:$0xff]  ;;  %v11121_v6 = vld [vmem:[#allocation7 + $0x1c8] sm:$0xff]  }
 0x756   : > { %10135 = vmatpush3.bf16.msra.mxu1 %v11119_v48  ;;  %v7687_v48 = vld [vmem:[#allocation8 + $0x68] sm:$0xff] }
 0x757   : > { %10168 = vmatprep.subr.bf16.mxu1 %v11120_v57  ;;  %v10368_v58 = vpack.c.bf16 %v7687_v48, %v7686_v8  ;;  %v11402_v48 = vld [vmem:[%s11904_s16 + $0x8] sm:$0xff] }
 0x759   : > { %10105 = vmatmul.mubr.msk.bf16.gmra.mrb[32].mxu1 %vm15612_vm2, %v14150_v21  ;;  %10369 = vmatprep.subr.bf16.mxu0 %v10368_v58 }
 0x75a   : > { %10108 = vmatprep.mubr.msk.bf16.mxu1 %vm15570_vm7, %v14155_v56  ;;  %10371 = vmatpush3.bf16.msra.mxu0 %v10368_v58  ;;  %v11403_v58 = vld [vmem:[%s11904_s16 + $0x10] sm:$0xff] }
 0x75b   : > { %10373 = vmatprep.subr.bf16.mxu0 %v10372_v13 }
 0x75e   : > { %10375 = vmatpush3.bf16.msra.mxu0 %v10372_v13  ;;  %v11406_v13 = vld [vmem:[%s11904_s16 + $0x28] sm:$0xff] }
 0x761   : > { %10109 = vmatmul.mubr.msk.bf16.gmra.mrb[36].mxu1 %vm15572_vm12, %v14157_v29  ;;  %10297 = vmatmul.mubr.f32.vlgmr.msra.gmra.mrb[32].mxu0 %v11402_v48  ;;  %v11409_v48 = vld [vmem:[%s11904_s16 + $0x40] sm:$0xff] }
 0x762   : > { %10112 = vmatprep.mubr.msk.bf16.mxu1 %vm15574_vm15, %v14171_v59  ;;  %vm15617_vm15 = vnez %v15498_v0  ;;  %10299 = vmatprep.mubr.f32.mxu0 %v11403_v58  ;;  %v11407_v0 = vld [vmem:[%s11904_s16 + $0x30] sm:$0xff]  ;;  %v11412_v58 = vld [vmem:[%s11904_s16 + $0x58] sm:$0xff] }
 0x765   : > { %10300 = vmatmul.mubr.f32.gmra.mrb[34].mxu0 %v11404_v11  ;;  %v11408_v11 = vld [vmem:[%s11904_s16 + $0x38] sm:$0xff] }
 0x766   : > { %10302 = vmatprep.mubr.f32.mxu0 %v11405_v16  ;;  %v11413_v16 = vld [vmem:[%s11904_s16 + $0x60] sm:$0xff] }
 0x769   : > { %10113 = vmatmul.mubr.msk.bf16.gmra.mrb[40].mxu1 %vm15576_vm4, %v14176_v62  ;;  %10303 = vmatmul.mubr.f32.gmra.mrb[36].mxu0 %v11406_v13  ;;  %v11416_v13 = vld [vmem:[%s11904_s16 + $0x78] sm:$0xff] }
 0x76a   : > { %10116 = vmatprep.mubr.msk.bf16.mxu1 %vm15578_vm0, %v14185_v15  ;;  %vm15618_vm0 = vnez %v15504_v51  ;;  %10305 = vmatprep.mubr.f32.mxu0 %v11407_v0  ;;  %v11123_v51 = vld [vmem:[#allocation7 + $0x1d8] sm:$0xff]  }
 0x76b   : > { %v11420_v0 = vld [vmem:[%s11904_s16 + $0x98] sm:$0xff] }
 0x76d   : > { %10306 = vmatmul.mubr.f32.gmra.mrb[38].mxu0 %v11408_v11  ;;  %v11425_v11 = vld [vmem:[%s11904_s16 + $0xc0] sm:$0xff] }
 0x76e   : > { %10308 = vmatprep.mubr.f32.mxu0 %v11409_v48 }
 0x771   : > { %10117 = vmatmul.mubr.msk.bf16.gmra.mrb[44].mxu1 %vm15580_vm8, %v15615_v35 }
 0x772   : > { %10136 = vmatprep.mubr.msk.bf16.mxu1 %vm15617_vm15, %v14218_v40  ;;  %vm15619_vm15 = vnez %v15505_v43  ;;  %v11122_v40 = vld [vmem:[#allocation7 + $0x1d0] sm:$0xff]   ;;  %v11410_v43 = vld [vmem:[%s11904_s16 + $0x48] sm:$0xff] }
 0x773   : > { %10309 = vmatmul.mubr.f32.gmra.mrb[40].mxu0 %v11410_v43  ;;  %v11431_v43 = vld [vmem:[%s11904_s16 + $0xf0] sm:$0xff] }
 0x779   : > { %10137 = vmatmul.mubr.msk.bf16.vlgmr.msra.gmra.mrb[16].mxu1 %vm15618_vm0, %v14235_v5  ;;  %vm15620_vm0 = vnez %v15509_v19  ;;  %v15621_v5 = vld [vmem:[#allocation36_spill] sm:$0xff]  ;;  %v11125_v19 = vld [vmem:[#allocation7 + $0x1e8] sm:$0xff]  }
 0x77a   : > { %10169 = vmatpush3.bf16.msra.mxu1 %v11120_v57  ;;  %10140 = vmatprep.mubr.msk.bf16.mxu1 %vm15619_vm15, %v14237_v23  ;;  %vm15622_vm15 = vnez %v15621_v5  ;;  %v11124_v23 = vld [vmem:[#allocation7 + $0x1e0] sm:$0xff]   ;;  %v11411_v57 = vld [vmem:[%s11904_s16 + $0x50] sm:$0xff] }
 0x77b   : > { %10170 = vmatprep.subr.bf16.mxu1 %v11121_v6  ;;  %10311 = vmatprep.mubr.f32.mxu0 %v11411_v57  ;;  %v11432_v57 = vld [vmem:[%s11904_s16 + $0xf8] sm:$0xff] }
 0x77c   : > { %10312 = vmatmul.mubr.f32.gmra.mrb[42].mxu0 %v11412_v58 }
 0x77d   : > { %10314 = vmatprep.mubr.f32.mxu0 %v11413_v16  ;;  %v15634_v16 = vld [vmem:[#allocation50_spill] sm:$0xff] }
 0x77e   : > { %10171 = vmatpush3.bf16.msra.mxu1 %v11121_v6  ;;  %v11415_v6 = vld [vmem:[%s11904_s16 + $0x70] sm:$0xff] }
 0x77f   : > { %10172 = vmatprep.subr.bf16.mxu1 %v11122_v40 }
 0x781   : > { %10141 = vmatmul.mubr.msk.bf16.gmra.mrb[20].mxu1 %vm15620_vm0, %v14253_v10  ;;  %vm15623_vm0 = vnez %v15515_v32  ;;  %v11414_v10 = vld [vmem:[%s11904_s16 + $0x68] sm:$0xff]  ;;  %v11127_v32 = vld [vmem:[#allocation7 + $0x1f8] sm:$0xff]  }
 0x782   : > { %10144 = vmatprep.mubr.msk.bf16.mxu1 %vm15622_vm15, %v14255_v54  ;;  %10173 = vmatpush3.bf16.msra.mxu1 %v11122_v40  ;;  %vm15624_vm15 = vnez %v15517_v7  ;;  %v11126_v54 = vld [vmem:[#allocation7 + $0x1f0] sm:$0xff]   ;;  %v11417_v40 = vld [vmem:[%s11904_s16 + $0x80] sm:$0xff]  ;;  %v11418_v7 = vld [vmem:[%s11904_s16 + $0x88] sm:$0xff] }
 0x783   : > { %10174 = vmatprep.subr.bf16.mxu1 %v11123_v51  ;;  %10315 = vmatmul.mubr.f32.gmra.mrb[44].mxu0 %v11414_v10  ;;  %v15637_v10 = vld [vmem:[#allocation20_spill] sm:$0xff] }
 0x784   : > { %10317 = vmatprep.mubr.f32.mxu0 %v11415_v6  ;;  %v11130_v6 = vld [vmem:[#allocation7 + $0x210] sm:$0xff]  }
 0x786   : > { %10175 = vmatpush3.bf16.msra.mxu1 %v11123_v51  ;;  %v11430_v51 = vld [vmem:[%s11904_s16 + $0xe8] sm:$0xff] }
 0x787   : > { %10176 = vmatprep.subr.bf16.mxu1 %v11124_v23  ;;  %10318 = vmatmul.mubr.f32.gmra.mrb[46].mxu0 %v11416_v13  ;;  %v11131_v13 = vld [vmem:[#allocation7 + $0x218] sm:$0xff]  }
 0x788   : > { %10320 = vmatprep.mubr.f32.mxu0 %v11417_v40  ;;  %v15639_v40 = vld [vmem:[#allocation28_spill] sm:$0xff] }
 0x789   : > { %10145 = vmatmul.mubr.msk.bf16.gmra.mrb[24].mxu1 %vm15623_vm0, %v14271_v12  ;;  %vm15625_vm0 = vnez %v15522_v25  ;;  %v11128_v12 = vld [vmem:[#allocation7 + $0x200] sm:$0xff]  }
 0x78a   : > { %10148 = vmatprep.mubr.msk.bf16.mxu1 %vm15624_vm15, %v14273_v17  ;;  %10177 = vmatpush3.bf16.msra.mxu1 %v11124_v23  ;;  %vm15626_vm15 = vnez %v15524_v61  ;;  %v11419_v17 = vld [vmem:[%s11904_s16 + $0x90] sm:$0xff]  ;;  %v11421_v25 = vld [vmem:[%s11904_s16 + $0xa0] sm:$0xff]  ;;  %v11422_v61 = vld [vmem:[%s11904_s16 + $0xa8] sm:$0xff] }
 0x78b   : > { %10178 = vmatprep.subr.bf16.mxu1 %v11125_v19  ;;  %10321 = vmatmul.mubr.f32.gmra.mrb[48].mxu0 %v11418_v7  ;;  %v11133_v7 = vld [vmem:[#allocation7 + $0x228] sm:$0xff]  }
 0x78c   : > { %10323 = vmatprep.mubr.f32.mxu0 %v11419_v17  ;;  %v15640_v17 = vld [vmem:[#allocation30_spill] sm:$0xff] }
 0x78e   : > { %10179 = vmatpush3.bf16.msra.mxu1 %v11125_v19  ;;  %v11129_v19 = vld [vmem:[#allocation7 + $0x208] sm:$0xff]  }
 0x78f   : > { %10180 = vmatprep.subr.bf16.mxu1 %v11126_v54  ;;  %10324 = vmatmul.mubr.f32.gmra.mrb[50].mxu0 %v11420_v0  ;;  %v11134_v0 = vld [vmem:[#allocation7 + $0x230] sm:$0xff]  }
 0x790   : > { %10326 = vmatprep.mubr.f32.mxu0 %v11421_v25  ;;  %v11135_v25 = vld [vmem:[#allocation7 + $0x238] sm:$0xff]  }
 0x791   : > { %10149 = vmatmul.mubr.msk.bf16.gmra.mrb[28].mxu1 %vm15625_vm0, %v14289_v9  ;;  %v11423_v9 = vld [vmem:[%s11904_s16 + $0xb0] sm:$0xff]  ;;  %vm15653_vm0 = vnez %v15563_v49 }
 0x792   : > { %10152 = vmatprep.mubr.msk.bf16.mxu1 %vm15626_vm15, %v14291_v1  ;;  %10181 = vmatpush3.bf16.msra.mxu1 %v11126_v54  ;;  %v11424_v1 = vld [vmem:[%s11904_s16 + $0xb8] sm:$0xff]  ;;  %v15638_v54 = vld [vmem:[#allocation21_spill] sm:$0xff] }
 0x793   : > { %10182 = vmatprep.subr.bf16.mxu1 %v11127_v32  ;;  %10327 = vmatmul.mubr.f32.gmra.mrb[52].mxu0 %v11422_v61  ;;  %v15642_v61 = vld [vmem:[#allocation45_spill] sm:$0xff] }
 0x794   : > { %10329 = vmatprep.mubr.f32.mxu0 %v11423_v9  ;;  %v15644_v9 = vld [vmem:[#allocation69_spill] sm:$0xff] }
 0x796   : > { %10183 = vmatpush3.bf16.msra.mxu1 %v11127_v32  ;;  %v11132_v32 = vld [vmem:[#allocation7 + $0x220] sm:$0xff]  }
 0x797   : > { %10216 = vmatprep.subr.bf16.mxu1 %v11128_v12  ;;  %10330 = vmatmul.mubr.f32.gmra.mrb[54].mxu0 %v11424_v1  ;;  %v15645_v1 = vld [vmem:[#allocation40_spill] sm:$0xff] }
 0x798   : > { %10332 = vmatprep.mubr.f32.mxu0 %v11425_v11  ;;  %v15646_v11 = vmov 0.0|0.0  }
 0x799   : > { %10153 = vmatmul.mubr.msk.bf16.gmra.mrb[32].mxu1 %vm15585_vm9, %v14307_v44  ;;  %v11428_v44 = vld [vmem:[%s11904_s16 + $0xd8] sm:$0xff]  ;;  %vm15633_vm9 = vcmask 1040384  }
 0x79a   : > { %10156 = vmatprep.mubr.msk.bf16.mxu1 %vm15586_vm10, %v14309_v46  ;;  %v11429_v46 = vld [vmem:[%s11904_s16 + $0xe0] sm:$0xff]  ;;  %vm15635_vm10 = vnez %v15634_v16  ;;  %s11636_s16 = smov [#allocation10]  }
 0x79b   : > { %10333 = vmatmul.mubr.f32.gmra.mrb[56].mxu0 %v11426_v34  ;;  %s11551_s30 = sshll.u32 %s11636_s16, 4  ;;  %s11552_s30 = int_to_ptr.vmem [resolvable:$false] %s11551_s30 }
 0x79c   : > { %10335 = vmatprep.mubr.f32.mxu0 %v11427_v28  ;;  %p11554_p2 = scmp.lt.s32.totalorder %s14842_s26, %s11552_s30 }
 0x79f   : > { %10336 = vmatmul.mubr.f32.gmra.mrb[58].mxu0 %v11428_v44 }
 0x7a0   : > { %10338 = vmatprep.mubr.f32.mxu0 %v11429_v46 }
 0x7a1   : > { %10157 = vmatmul.mubr.msk.bf16.gmra.mrb[36].mxu1 %vm15587_vm14, %v14325_v4  ;;  %vm15651_vm14 = vnez %v15560_v30 }
 0x7a2   : > { %10160 = vmatprep.mubr.msk.bf16.mxu1 %vm15588_vm13, %v14327_v38  ;;  %v15631_v38 = vld [vmem:[#allocation17_spill] sm:$0xff] }
 0x7a3   : > { %10339 = vmatmul.mubr.f32.gmra.mrb[60].mxu0 %v11430_v51  ;;  %v15632_v5 = vrot.slane %v15631_v38, 7 }
 0x7a4   : > { %10341 = vmatprep.mubr.f32.mxu0 %v11431_v43  ;;  %v14707_v43 = vld [vmem:[%s15661_s24] ss:$0 sm:$0xff]  ;;  %s11553_s24 = scalar_lea.vmem %s11552_s30, 8192 }
 0x7a5   : > { %v6771_v23 = vsel %vm15633_vm9, %v15632_v5, %v15630_v45  ;;  %p11555_p1 = scmp.lt.s32.totalorder %s11553_s24, %s11547_s25 }
 0x7a6   : > { %v8845_v58 = vpack.c.bf16 %v15630_v45, %v6771_v23  ;;  %v14712_v45 = vld [vmem:[%s15662_s10] ss:$0 sm:$0xff] }
 0x7a7   : > { %10342 = vmatmul.mubr.f32.gmra.mrb[62].mxu0 %v11432_v57  ;;  %p11556_p4 = por %p11555_p1, %p11554_p2 }
 0x7a9   : > { %10161 = vmatmul.mubr.msk.bf16.gmra.mrb[40].mxu1 %vm15544_vm11, %v14344_v50  ;;  %v15636_v50 = vld [vmem:[#allocation41_spill] sm:$0xff]  ;;  %vm15652_vm11 = vnez %v15561_v60  ;;  %p11557_p9 = pnand %p11556_p4, %p11550_p12 }
 0x7aa   : > { %10164 = vmatprep.mubr.msk.bf16.mxu1 %vm15589_vm6, %v15628_v52  ;;  %vm15648_vm6 = vnez %v15556_v47 }
 0x7b1   : > { %10165 = vmatmul.mubr.msk.bf16.gmra.mrb[44].mxu1 %vm15635_vm10, %v8845_v58 }
 0x7b2   : > { %10184 = vmatprep.mubr.bf16.mxu1 %v15636_v50 }
 0x7b9   : > { %10185 = vmatmul.mubr.bf16.vlgmr.msra.gmra.mrb[16].mxu1 %v15637_v10 }
 0x7ba   : > { %10217 = vmatpush3.bf16.msra.mxu1 %v11128_v12  ;;  %10188 = vmatprep.mubr.bf16.mxu1 %v15638_v54  ;;  %v15641_v12 = vld [vmem:[#allocation31_spill] sm:$0xff] }
 0x7bb   : > { %10218 = vmatprep.subr.bf16.mxu1 %v11129_v19 }
 0x7be   : > { %10219 = vmatpush3.bf16.msra.mxu1 %v11129_v19 }
 0x7bf   : > { %10220 = vmatprep.subr.bf16.mxu1 %v11130_v6 }
 0x7c1   : > { %10189 = vmatmul.mubr.bf16.gmra.mrb[20].mxu1 %v15593_v26  ;;  %v15643_v26 = vld [vmem:[#allocation29_spill] sm:$0xff] }
 0x7c2   : > { %10192 = vmatprep.mubr.bf16.mxu1 %v15639_v40  ;;  %10221 = vmatpush3.bf16.msra.mxu1 %v11130_v6 }
 0x7c3   : > { %10222 = vmatprep.subr.bf16.mxu1 %v11131_v13 }
 0x7c6   : > { %10223 = vmatpush3.bf16.msra.mxu1 %v11131_v13 }
 0x7c7   : > { %10224 = vmatprep.subr.bf16.mxu1 %v11132_v32 }
 0x7c9   : > { %10193 = vmatmul.mubr.bf16.gmra.mrb[24].mxu1 %v15640_v17 }
 0x7ca   : > { %10196 = vmatprep.mubr.bf16.mxu1 %v15641_v12  ;;  %10225 = vmatpush3.bf16.msra.mxu1 %v11132_v32 }
 0x7cb   : > { %10226 = vmatprep.subr.bf16.mxu1 %v11133_v7 }
 0x7ce   : > { %10227 = vmatpush3.bf16.msra.mxu1 %v11133_v7 }
 0x7cf   : > { %10228 = vmatprep.subr.bf16.mxu1 %v11134_v0 }
 0x7d1   : > { %10197 = vmatmul.mubr.bf16.gmra.mrb[28].mxu1 %v15642_v61 }
 0x7d2   : > { %10200 = vmatprep.mubr.bf16.mxu1 %v15598_v31  ;;  %10229 = vmatpush3.bf16.msra.mxu1 %v11134_v0 }
 0x7d3   : > { %10230 = vmatprep.subr.bf16.mxu1 %v11135_v25 }
 0x7d6   : > { %10231 = vmatpush3.bf16.msra.mxu1 %v11135_v25 }
 0x7d9   : > { %10201 = vmatmul.mubr.bf16.gmra.mrb[32].mxu1 %v15643_v26 }
 0x7da   : > { %10204 = vmatprep.mubr.bf16.mxu1 %v15600_v36  ;;  %v15649_v36 = vld [vmem:[#allocation53_spill] sm:$0xff] }
 0x7db   : > { %vm15650_vm13 = vnez %v15649_v36 }
 0x7e1   : > { %10205 = vmatmul.mubr.bf16.gmra.mrb[36].mxu1 %v15601_v55 }
 0x7e2   : > { %10208 = vmatprep.mubr.bf16.mxu1 %v15602_v33 }
 0x7e9   : > { %10209 = vmatmul.mubr.bf16.gmra.mrb[40].mxu1 %v15644_v9 }
 0x7ea   : > { %10212 = vmatprep.mubr.bf16.mxu1 %v15645_v1 }
 0x7f1   : > { %10213 = vmatmul.mubr.bf16.gmra.mrb[44].mxu1 %v15646_v11 }
 0x7f2   : > { %10232 = vmatprep.mubr.msk.bf16.mxu1 %vm15555_vm5, %v14100_v41  ;;  %v15654_v41 = vld [vmem:[#allocation57_spill] sm:$0xff] }
 0x7f3   : > { %vm15655_vm5 = vnez %v15654_v41 }
 0x7f9   : > { %10233 = vmatmul.mubr.msk.bf16.vlgmr.msra.gmra.mrb[16].mxu1 %vm15648_vm6, %v14105_v37 }
 0x7fa   : > { %10236 = vmatprep.mubr.msk.bf16.mxu1 %vm15650_vm13, %v14110_v39 }
 0x801   : > { %10237 = vmatmul.mubr.msk.bf16.gmra.mrb[20].mxu1 %vm15651_vm14, %v14115_v14 }
 0x802   : > { %10240 = vmatprep.mubr.msk.bf16.mxu1 %vm15652_vm11, %v14126_v27 }
 0x809   : > { %10241 = vmatmul.mubr.msk.bf16.gmra.mrb[24].mxu1 %vm15653_vm0, %v14131_v20  ;;  %v15658_v20 = vld [vmem:[#allocation66_spill] sm:$0xff] }
 0x80a   : > { %10244 = vmatprep.mubr.msk.bf16.mxu1 %vm15655_vm5, %v14136_v24  ;;  %v15656_v24 = vld [vmem:[#allocation63_spill] sm:$0xff] }
 0x80b   : > { %vm15657_vm15 = vnez %v15656_v24 }
 0x811   : > { %10245 = vmatmul.mubr.msk.bf16.gmra.mrb[28].mxu1 %vm15608_vm3, %v14145_v2 }
 0x812   : > { %10248 = vmatprep.mubr.msk.bf16.mxu1 %vm15610_vm1, %v14150_v21  ;;  %vm15659_vm1 = vnez %v15658_v20 }
 0x819   : > { %10249 = vmatmul.mubr.msk.bf16.gmra.mrb[32].mxu1 %vm15612_vm2, %v14155_v56  ;;  %v15660_v56 = vld [vmem:[#allocation37_spill] sm:$0xff] }
 0x81a   : > { %10252 = vmatprep.mubr.msk.bf16.mxu1 %vm15570_vm7, %v14157_v29 }
 0x821   : > { %10253 = vmatmul.mubr.msk.bf16.gmra.mrb[36].mxu1 %vm15572_vm12, %v14171_v59 }
 0x822   : > { %10256 = vmatprep.mubr.msk.bf16.mxu1 %vm15657_vm15, %v14176_v62 }
 0x829   : > { %10257 = vmatmul.mubr.msk.bf16.gmra.mrb[40].mxu1 %vm15576_vm4, %v14185_v15 }
 0x82a   : > { %10260 = vmatprep.mubr.msk.bf16.mxu1 %vm15659_vm1, %v15615_v35 }
 0x831   : > { %10261 = vmatmul.mubr.msk.bf16.gmra.mrb[44].mxu1 %vm15580_vm8, %v15660_v56 }
 0x834   : > { %v10298_v29 = vpop.f32.mrb[32].mxu0 }
 0x835   : > { %v7763_v39 = vpop.f32.mrb[33].mxu0  ;;  %v7769_v13 = vadd.f32 %v10298_v29, %v14707_v43 }
 0x836   : > { %v7764_v16 = vadd.f32 %v14707_v43, %v7763_v39 }
 0x838   : > { %v10301_v37 = vpop.f32.mrb[34].mxu0 }
 0x839   : > { %v7773_v14 = vpop.f32.mrb[35].mxu0  ;;  %v7779_v23 = vadd.f32 %v10301_v37, %v14707_v43 }
 0x83a   : > { %v7774_v38 = vadd.f32 %v14707_v43, %v7773_v14 }
 0x83c   : > { %v10304_v27 = vpop.f32.mrb[36].mxu0 }
 0x83d   : > { %v7783_v2 = vpop.f32.mrb[37].mxu0  ;;  %v7789_v24 = vadd.f32 %v10304_v27, %v14707_v43 }
 0x83e   : > { %v7784_v9 = vadd.f32 %v14707_v43, %v7783_v2 }
 0x840   : > { %v10307_v21 = vpop.f32.mrb[38].mxu0 }
 0x841   : > { %v7793_v62 = vpop.f32.mrb[39].mxu0  ;;  %v7799_v25 = vadd.f32 %v10307_v21, %v14707_v43 }
 0x842   : > { %v7794_v12 = vadd.f32 %v14707_v43, %v7793_v62 }
 0x846   : > { %v14656_v59 = vpop.f32.mrb[40].mxu0 }
 0x847   : > { %v14658_v47 = vpop.f32.mrb[41].mxu0 }
 0x848   : > { %v7804_v62 = vadd.f32 %v14707_v43, %v14658_v47 }
 0x84f   : > { %v14660_v15 = vpop.f32.mrb[42].mxu0 }
 0x850   : > { %v14662_v30 = vpop.f32.mrb[43].mxu0  ;;  %v7819_v2 = vadd.f32 %v14660_v15, %v14707_v43 }
 0x851   : > { %v7814_v37 = vadd.f32 %v14707_v43, %v14662_v30 }
 0x856   : > { %v14664_v60 = vpop.f32.mrb[44].mxu0 }
 0x857   : > { %v14666_v49 = vpop.f32.mrb[45].mxu0 }
 0x85a   : > { %v14668_v18 = vpop.f32.mrb[46].mxu0 }
 0x85b   : > { %v14670_v35 = vpop.f32.mrb[47].mxu0 }
 0x85c   : > { %v7834_v47 = vadd.f32 %v14707_v43, %v14670_v35 }
 0x85e   : > { %v14672_v53 = vpop.f32.mrb[48].mxu0 }
 0x85f   : > { %v14674_v3 = vpop.f32.mrb[49].mxu0 }
 0x862   : > { %v14676_v31 = vpop.f32.mrb[50].mxu0 }
 0x863   : > { %v14678_v55 = vpop.f32.mrb[51].mxu0 }
 0x866   : > { %v14680_v33 = vpop.f32.mrb[52].mxu0 }
 0x867   : > { %v14682_v63 = vpop.f32.mrb[53].mxu0 }
 0x86a   : > { %v14684_v22 = vpop.f32.mrb[54].mxu0 }
 0x86b   : > { %v14686_v42 = vpop.f32.mrb[55].mxu0 }
 0x86e   : > { %v14688_v8 = vpop.f32.mrb[56].mxu0 }
 0x86f   : > { %v14690_v28 = vpop.f32.mrb[57].mxu0 }
 0x872   : > { %v14692_v44 = vpop.f32.mrb[58].mxu0 }
 0x873   : > { %v14694_v46 = vpop.f32.mrb[59].mxu0 }
 0x876   : > { %v14696_v48 = vpop.f32.mrb[60].mxu0 }
 0x877   : > { %v14698_v51 = vpop.f32.mrb[61].mxu0 }
 0x87a   : > { %v14700_v52 = vpop.f32.mrb[62].mxu0 }
 0x87b   : > { %v14702_v4 = vpop.f32.mrb[63].mxu0 }
 0x8cc   : > { %v10234_v5 = vpop.f32.mrb[16].mxu1 }
 0x8cd   : > { %v7644_v57 = vadd.f32 %v10234_v5, %v14712_v45  ;;  %v7477_v58 = vpop.f32.mrb[17].mxu1 }
 0x8ce   : > { %v7642_v50 = vadd.f32 %v14712_v45, %v7477_v58  ;;  %v10235_v19 = vpop.f32.mrb[18].mxu1  ;;  %v7809_v58 = vadd.f32 %v14656_v59, %v14707_v43 }
 0x8cf   : > { %v7924_v10 = vadd.f32 %v7774_v38, %v7644_v57  ;;  %v7645_v54 = vadd.f32 %v10235_v19, %v14712_v45  ;;  %v7480_v6 = vpop.f32.mrb[19].mxu1 }
 0x8d0   : > { %v7922_v40 = vadd.f32 %v7764_v16, %v7642_v50  ;;  %v7643_v32 = vadd.f32 %v14712_v45, %v7480_v6 }
 0x8d1   : > { %7956 = vst [vmem:[%s14724_s22 + $0x10] sm:$0xff] %v7924_v10  ;;  %v7925_v7 = vadd.f32 %v7779_v23, %v7645_v54  ;;  %v7839_v54 = vadd.f32 %v14668_v18, %v14707_v43 }
 0x8d2   : > { %7954 = vst [vmem:[%s14724_s22] sm:$0xff] %v7922_v40  ;;  %v7923_v17 = vadd.f32 %v7769_v13, %v7643_v32  ;;  %v7824_v13 = vadd.f32 %v14707_v43, %v14666_v49  ;;  %v7854_v49 = vadd.f32 %v14707_v43, %v14678_v55 }
 0x8d3   : > { %7957 = vst [vmem:[%s14724_s22 + $0x18] sm:$0xff] %v7925_v7 }
 0x8d4   : > { %7955 = vst [vmem:[%s14724_s22 + $0x8] sm:$0xff] %v7923_v17  ;;  %v10238_v0 = vpop.f32.mrb[20].mxu1 }
 0x8d5   : > { %v7648_v61 = vadd.f32 %v10238_v0, %v14712_v45  ;;  %v7493_v26 = vpop.f32.mrb[21].mxu1 }
 0x8d6   : > { %v7646_v1 = vadd.f32 %v14712_v45, %v7493_v26  ;;  %v10239_v11 = vpop.f32.mrb[22].mxu1 }
 0x8d7   : > { %v7928_v34 = vadd.f32 %v7794_v12, %v7648_v61  ;;  %v7649_v36 = vadd.f32 %v10239_v11, %v14712_v45  ;;  %v7496_v41 = vpop.f32.mrb[23].mxu1  ;;  %v7829_v12 = vadd.f32 %v14664_v60, %v14707_v43  ;;  %v7844_v11 = vadd.f32 %v14707_v43, %v14674_v3 }
 0x8d8   : > { %v7926_v20 = vadd.f32 %v7784_v9, %v7646_v1  ;;  %v7647_v56 = vadd.f32 %v14712_v45, %v7496_v41  ;;  %v7859_v9 = vadd.f32 %v14676_v31, %v14707_v43  ;;  %v7874_v3 = vadd.f32 %v14707_v43, %v14686_v42 }
 0x8d9   : > { %7960 = vst [vmem:[%s14724_s22 + $0x30] sm:$0xff] %v7928_v34  ;;  %v7929_v29 = vadd.f32 %v7799_v25, %v7649_v36 }
 0x8da   : > { %7958 = vst [vmem:[%s14724_s22 + $0x20] sm:$0xff] %v7926_v20  ;;  %v7927_v39 = vadd.f32 %v7789_v24, %v7647_v56  ;;  %v7849_v20 = vadd.f32 %v14672_v53, %v14707_v43 }
 0x8db   : > { %7961 = vst [vmem:[%s14724_s22 + $0x38] sm:$0xff] %v7929_v29 }
 0x8dc   : > { %7959 = vst [vmem:[%s14724_s22 + $0x28] sm:$0xff] %v7927_v39  ;;  %v10242_v14 = vpop.f32.mrb[24].mxu1 }
 0x8dd   : > { %v7652_v27 = vadd.f32 %v10242_v14, %v14712_v45  ;;  %v7509_v21 = vpop.f32.mrb[25].mxu1  ;;  %v7879_v14 = vadd.f32 %v14684_v22, %v14707_v43 }
 0x8de   : > { %v7650_v38 = vadd.f32 %v14712_v45, %v7509_v21  ;;  %v10243_v5 = vpop.f32.mrb[26].mxu1 }
 0x8df   : > { %v7932_v23 = vadd.f32 %v7814_v37, %v7652_v27  ;;  %v7653_v30 = vadd.f32 %v10243_v5, %v14712_v45  ;;  %v7512_v57 = vpop.f32.mrb[27].mxu1  ;;  %v7864_v27 = vadd.f32 %v14707_v43, %v14682_v63  ;;  %v7894_v63 = vadd.f32 %v14707_v43, %v14694_v46 }
 0x8e0   : > { %v7930_v16 = vadd.f32 %v7804_v62, %v7650_v38  ;;  %v7651_v15 = vadd.f32 %v14712_v45, %v7512_v57 }
 0x8e1   : > { %7964 = vst [vmem:[%s14724_s22 + $0x50] sm:$0xff] %v7932_v23  ;;  %v7933_v50 = vadd.f32 %v7819_v2, %v7653_v30  ;;  %v7869_v23 = vadd.f32 %v14680_v33, %v14707_v43 }
 0x8e2   : > { %7962 = vst [vmem:[%s14724_s22 + $0x40] sm:$0xff] %v7930_v16  ;;  %v7931_v19 = vadd.f32 %v7809_v58, %v7651_v15  ;;  %v7899_v15 = vadd.f32 %v14692_v44, %v14707_v43 }
 0x8e3   : > { %7965 = vst [vmem:[%s14724_s22 + $0x58] sm:$0xff] %v7933_v50 }
 0x8e4   : > { %7963 = vst [vmem:[%s14724_s22 + $0x48] sm:$0xff] %v7931_v19  ;;  %v10246_v10 = vpop.f32.mrb[28].mxu1  ;;  %v7884_v19 = vadd.f32 %v14707_v43, %v14690_v28  ;;  %v7914_v28 = vadd.f32 %v14707_v43, %v14702_v4 }
 0x8e5   : > { %v7656_v59 = vadd.f32 %v10246_v10, %v14712_v45  ;;  %v7525_v6 = vpop.f32.mrb[29].mxu1 }
 0x8e6   : > { %v7654_v40 = vadd.f32 %v14712_v45, %v7525_v6  ;;  %v10247_v32 = vpop.f32.mrb[30].mxu1  ;;  %v7889_v6 = vadd.f32 %v14688_v8, %v14707_v43 }
 0x8e7   : > { %v7936_v7 = vadd.f32 %v7834_v47, %v7656_v59  ;;  %v7657_v35 = vadd.f32 %v10247_v32, %v14712_v45  ;;  %v7528_v17 = vpop.f32.mrb[31].mxu1 }
 0x8e8   : > { %v7934_v0 = vadd.f32 %v7824_v13, %v7654_v40  ;;  %v7655_v18 = vadd.f32 %v14712_v45, %v7528_v17 }
 0x8e9   : > { %7968 = vst [vmem:[%s14724_s22 + $0x70] sm:$0xff] %v7936_v7  ;;  %v7937_v25 = vadd.f32 %v7839_v54, %v7657_v35  ;;  %v7919_v35 = vadd.f32 %v14700_v52, %v14707_v43 }
 0x8ea   : > { %7966 = vst [vmem:[%s14724_s22 + $0x60] sm:$0xff] %v7934_v0  ;;  %v7935_v61 = vadd.f32 %v7829_v12, %v7655_v18  ;;  %v7904_v12 = vadd.f32 %v14707_v43, %v14698_v51 }
 0x8eb   : > { %7969 = vst [vmem:[%s14724_s22 + $0x78] sm:$0xff] %v7937_v25 }
 0x8ec   : > { %7967 = vst [vmem:[%s14724_s22 + $0x68] sm:$0xff] %v7935_v61  ;;  %v10250_v26 = vpop.f32.mrb[32].mxu1  ;;  %v7909_v61 = vadd.f32 %v14696_v48, %v14707_v43 }
 0x8ed   : > { %v7660_v60 = vadd.f32 %v10250_v26, %v14712_v45  ;;  %v7541_v1 = vpop.f32.mrb[33].mxu1 }
 0x8ee   : > { %v7658_v34 = vadd.f32 %v14712_v45, %v7541_v1  ;;  %v10251_v36 = vpop.f32.mrb[34].mxu1 }
 0x8ef   : > { %v7940_v41 = vadd.f32 %v7854_v49, %v7660_v60  ;;  %v7661_v55 = vadd.f32 %v10251_v36, %v14712_v45  ;;  %v7544_v24 = vpop.f32.mrb[35].mxu1 }
 0x8f0   : > { %v7938_v56 = vadd.f32 %v7844_v11, %v7658_v34  ;;  %v7659_v31 = vadd.f32 %v14712_v45, %v7544_v24 }
 0x8f1   : > { %7972 = vst [vmem:[%s14724_s22 + $0x90] sm:$0xff] %v7940_v41  ;;  %v7941_v29 = vadd.f32 %v7859_v9, %v7661_v55 }
 0x8f2   : > { %7970 = vst [vmem:[%s14724_s22 + $0x80] sm:$0xff] %v7938_v56  ;;  %v7939_v39 = vadd.f32 %v7849_v20, %v7659_v31 }
 0x8f3   : > { %7973 = vst [vmem:[%s14724_s22 + $0x98] sm:$0xff] %v7941_v29 }
 0x8f4   : > { %7971 = vst [vmem:[%s14724_s22 + $0x88] sm:$0xff] %v7939_v39  ;;  %v10254_v37 = vpop.f32.mrb[36].mxu1 }
 0x8f5   : > { %v7664_v53 = vadd.f32 %v10254_v37, %v14712_v45  ;;  %v7557_v2 = vpop.f32.mrb[37].mxu1 }
 0x8f6   : > { %v7662_v21 = vadd.f32 %v14712_v45, %v7557_v2  ;;  %v10255_v62 = vpop.f32.mrb[38].mxu1 }
 0x8f7   : > { %v7944_v38 = vadd.f32 %v7874_v3, %v7664_v53  ;;  %v7665_v42 = vadd.f32 %v10255_v62, %v14712_v45  ;;  %v7560_v5 = vpop.f32.mrb[39].mxu1 }
 0x8f8   : > { %v7942_v30 = vadd.f32 %v7864_v27, %v7662_v21  ;;  %v7663_v22 = vadd.f32 %v14712_v45, %v7560_v5 }
 0x8f9   : > { %7976 = vst [vmem:[%s14724_s22 + $0xb0] sm:$0xff] %v7944_v38  ;;  %v7945_v57 = vadd.f32 %v7879_v14, %v7665_v42 }
 0x8fa   : > { %7974 = vst [vmem:[%s14724_s22 + $0xa0] sm:$0xff] %v7942_v30  ;;  %v7943_v58 = vadd.f32 %v7869_v23, %v7663_v22 }
 0x8fb   : > { %7977 = vst [vmem:[%s14724_s22 + $0xb8] sm:$0xff] %v7945_v57 }
 0x8fc   : > { %7975 = vst [vmem:[%s14724_s22 + $0xa8] sm:$0xff] %v7943_v58  ;;  %v10258_v16 = vpop.f32.mrb[40].mxu1 }
 0x8fd   : > { %v7668_v33 = vadd.f32 %v10258_v16, %v14712_v45  ;;  %v7573_v50 = vpop.f32.mrb[41].mxu1 }
 0x8fe   : > { %v7666_v47 = vadd.f32 %v14712_v45, %v7573_v50  ;;  %v10259_v10 = vpop.f32.mrb[42].mxu1 }
 0x8ff   : > { %v7948_v54 = vadd.f32 %v7894_v63, %v7668_v33  ;;  %v7669_v46 = vadd.f32 %v10259_v10, %v14712_v45  ;;  %v7576_v59 = vpop.f32.mrb[43].mxu1 }
 0x900   : > { %v7946_v13 = vadd.f32 %v7884_v19, %v7666_v47  ;;  %v7667_v44 = vadd.f32 %v14712_v45, %v7576_v59 }
 0x901   : > { %7980 = vst [vmem:[%s14724_s22 + $0xd0] sm:$0xff] %v7948_v54  ;;  %v7949_v40 = vadd.f32 %v7899_v15, %v7669_v46 }
 0x902   : > { %7978 = vst [vmem:[%s14724_s22 + $0xc0] sm:$0xff] %v7946_v13  ;;  %v7947_v32 = vadd.f32 %v7889_v6, %v7667_v44 }
 0x903   : > { %7981 = vst [vmem:[%s14724_s22 + $0xd8] sm:$0xff] %v7949_v40 }
 0x904   : > { %7979 = vst [vmem:[%s14724_s22 + $0xc8] sm:$0xff] %v7947_v32  ;;  %v10262_v7 = vpop.f32.mrb[44].mxu1 }
 0x905   : > { %v7672_v8 = vadd.f32 %v10262_v7, %v14712_v45  ;;  %v7589_v17 = vpop.f32.mrb[45].mxu1 }
 0x906   : > { %v7670_v0 = vadd.f32 %v14712_v45, %v7589_v17  ;;  %v10263_v18 = vpop.f32.mrb[46].mxu1 }
 0x907   : > { %v7952_v4 = vadd.f32 %v7914_v28, %v7672_v8  ;;  %v7673_v25 = vadd.f32 %v10263_v18, %v14712_v45  ;;  %v7592_v52 = vpop.f32.mrb[47].mxu1 }
 0x908   : > { %v7950_v49 = vadd.f32 %v7904_v12, %v7670_v0  ;;  %v7671_v26 = vadd.f32 %v14712_v45, %v7592_v52 }
 0x909   : > { %7984 = vst [vmem:[%s14724_s22 + $0xf0] sm:$0xff] %v7952_v4  ;;  %v7953_v51 = vadd.f32 %v7919_v35, %v7673_v25 }
 0x90a   : > { %7982 = vst [vmem:[%s14724_s22 + $0xe0] sm:$0xff] %v7950_v49  ;;  %v7951_v9 = vadd.f32 %v7909_v61, %v7671_v26 }
 0x90b   : > { %7985 = vst [vmem:[%s14724_s22 + $0xf8] sm:$0xff] %v7953_v51 }
 0x90c   : > { %7983 = vst [vmem:[%s14724_s22 + $0xe8] sm:$0xff] %v7951_v9 }
 0x90d   : > { %11560 = shalt.err (!%p11557_p9)
}
 0x90e   : > { %s11561_s14 = scalar_lea.hbm %s14840_s23, 4096  ;;  %s11565_s22 = scalar_lea.hbm %s15663_s27, 8192 }
 0x90f   : > { %p11562_p0 = scmp.ne.s32.totalorder %s14840_s23, %s11561_s14  ;;  %p11566_p13 = scmp.lt.u32.totalorder %s14840_s23, %s15663_s27 }
 0x910   : > { %p11567_p6 = scmp.lt.u32.totalorder %s11565_s22, %s11561_s14  ;;  %p11569_p3 = scmp.lt.u32.totalorder %s11561_s14, %s14840_s23 }
 0x911   : > { %p11563_p11 = pnand %p11562_p0, %p11847_p5 }
 0x912   : > { %p11568_p10 = por %p11567_p6, %p11566_p13 }
 0x913   : > { %p11564_p8 = pneg %p11563_p11 }
 0x914   : > { %p11570_p7 = por %p11569_p3, %p11568_p10 }
 0x916   : > { %p11571_p12 = pnand %p11570_p7, %p11564_p8 }
 0x918   : > { %11574 = shalt.err (!%p11571_p12)
}
 0x919   : > { %s11637_s12 = smov 128   ;;  %s11638_s25 = smov 8  }
 0x91a   : > { %10918 = dma.vmem_to_hbm [thread:$0]  (%p11847_p5), %s14842_s26, 4096, %s14840_s23, %s7987_s21, %s11637_s12, %s11637_s12, %s11638_s25  }
 0x91b PF: > { %s15664_s16 = sld [smem:[#allocation15_spill]]  ;;  %s15665_s30 = sld [smem:[#allocation16_spill]] }
 0x91c   : > { %p15667_p1 = scmp.ge.s32.totalorder %s11621_s20, 2 }
 0x921   : > { %s8015_s24 = sand.u32 1, %s15664_s16   ;;  %p15666_p2 = scmp.ne.s32.totalorder %s15665_s30, 0 }
 0x922   : > { %s8016_s14 = scalar_lea.sflag [#allocation4], %s8015_s24 }
 0x923   : > { %p10935_p4 = pnand %p15667_p1, %p15666_p2 }
 0x925   : > { %11604 = dma.done.wait (!%p10935_p4), %s8016_s14, 4096  }
 0x926   : > { %11606 = vsyncadd (!%p10935_p4), %s8016_s14, 4294963200  ;;  %s15668_s15 = smov %s11843_s17  ;;  %p26_p9 = scmp.ge.s32.totalorder %s11833_s8, 4  }
 0x927   : > { %s15669_s17 = smov %s11613_s18  ;;  %s15670_s18 = smov %s11617_s19 }
 0x928   : > { %s15671_s19 = smov %s15668_s15  ;;  %s15672_s20 = smov %s11833_s8 }
 0x929   :  { %28 = sbr.rel (!%p26_p9) target bundleno = 11 (0xb), region = 124 }
 0x930   :  { %8021 = vsyncpa [#allocation3], 1 }
 0x931   :  { %8023 = vsyncpa [#allocation3 + $0x1], 1 }
 0x932   :  { %8024 = vsyncpa [#allocation6], 1 }
 0x933   :  { %8025 = vsyncpa [#allocation9], 1 }
 0x934   :  { %8026 = vsyncpa [#allocation4], 1 }
 0x935   :  { %8028 = vsyncpa [#allocation4 + $0x1], 1 }

// kernel: tpu_custom_call.1
= control target key start
LH: loop header
LB: loop body
LE: loop exit
PB: predicated region body
PF: predicated region fallthrough
CT: control target
= control target key end

     0   :  { %s14889_s0 = inlined_call_operand.hbm [shape: f32[2,256,128], index: 0, kind: input, shape index: {}]   ;;  %s14890_s1 = inlined_call_operand.vmem [shape: f32[2,1,128], index: 1, kind: input, shape index: {}]   ;;  %s14891_s2 = inlined_call_operand.vmem [shape: f32[1,128], index: 2, kind: input, shape index: {}]   ;;  %s14892_s3 = inlined_call_operand.vmem [shape: f32[1,128], index: 3, kind: input, shape index: {}]   ;;  %s14893_s4 = inlined_call_operand.hbm [shape: bf16[1152,128], index: 4, kind: input, shape index: {}]   ;;  %s14894_s5 = inlined_call_operand.vmem [shape: f32[1,128], index: 5, kind: input, shape index: {}]   ;;  %s14895_s6 = inlined_call_operand.vmem [shape: f32[1,128], index: 6, kind: input, shape index: {}]   ;;  %s14896_s7 = inlined_call_operand.hbm [shape: bf16[1152,128], index: 7, kind: input, shape index: {}]   ;;  %s14897_s8 = inlined_call_operand.vmem [shape: f32[1,128], index: 8, kind: input, shape index: {}]   ;;  %s14898_s9 = inlined_call_operand.hbm [shape: f32[128,128], index: 9, kind: input, shape index: {}]   ;;  %s14899_s10 = inlined_call_operand.vmem [shape: f32[1,128], index: 10, kind: input, shape index: {}]   ;;  %s14900_s11 = inlined_call_operand.hbm [shape: f32[2,256,128], index: 11, kind: output, shape index: {}]  }
   0x1   :  { %15145 = sst [smem:[#allocation70_spill]] %s14897_s8 }
   0x2   :  { %15146 = sst [smem:[#allocation71_spill]] %s14899_s10 }
   0x3   :  { %15147 = sst [smem:[#allocation72_spill]] %s14900_s11 }
   0x4   :  { %16 = vsyncpa [#allocation3], 0 }
   0x5   :  { %18 = vsyncpa [#allocation3 + $0x1], 0 }
   0x6   :  { %19 = vsyncpa [#allocation6], 0 }
   0x7   :  { %20 = vsyncpa [#allocation9], 0 }
   0x8   :  { %21 = vsyncpa [#allocation4], 0 }
   0x9   :  { %23 = vsyncpa [#allocation4 + $0x1], 0  ;;  %s11699_s17 = smov 0   ;;  %s11701_s18 = smov 0  }
   0xa   :  { %s11703_s19 = smov 0   ;;  %s11705_s20 = smov 0  }
   0xb LB: > { %15148 = sst [smem:[#allocation15_spill]] %s11609_s17  ;;  %s11720_s21 = sadd.s32 4294967295, %s11621_s20   ;;  %s11621_s20 = sphi %s11705_s20, %s15672_s20   ;;  %s11617_s19 = sphi %s11703_s19, %s15671_s19   ;;  %s11613_s18 = sphi %s11701_s18, %s15670_s18   ;;  %s11609_s17 = sphi %s11699_s17, %s15669_s17  }
   0xc   : > { %s8111_s22 = sadd.s32 4294967294, %s11621_s20   ;;  %p49_p0 = scmp.ne.s32.totalorder %s11613_s18, %s11609_s17 }
   0xd   : > { %p14902_p1 = scmp.eq.s32.totalorder %s11720_s21, 0  ;;  %p294_p3 = scmp.eq.s32.totalorder %s8111_s22, 1 }
   0xe   : > { %p8112_p5 = scmp.ge.s32.totalorder %s11621_s20, 1  ;;  %p301_p7 = scmp.lt.s32.totalorder %s11621_s20, 3 }
   0xf   : > { %p11729_p4 = por %p14902_p1, %p49_p0  ;;  %p11734_p6 = por %p294_p3, %p49_p0 }
  0x10   : > { %p11739_p8 = pnand %p8112_p5, %p301_p7  ;;  %s11623_s26 = smov [#allocation5]  }
  0x11   : > { %s15149_s23 = scalar_select %p11729_p4, 1, 0 }
  0x12   : > { %s15150_s24 = scalar_select %p11734_p6, 1, 0 }
  0x13   : > { %s15152_s25 = scalar_select %p11739_p8, 1, 0 }
  0x14   : > { %15151 = sst [smem:[#allocation16_spill]] %s15150_s24  ;;  %s319_s27 = sshll.u32 %s11623_s26, 4  ;;  %s11743_s27 = int_to_ptr.vmem [resolvable:$true] %s319_s27 }
  0x15   : > { %p10920_p9 = pneg %p11739_p8  ;;  %s11624_s29 = smov [#allocation7]  }
  0x16   : > { %s338_s30 = sshll.u32 %s11624_s29, 4  ;;  %s11625_s12 = smov [#allocation8]   ;;  %s11754_s30 = int_to_ptr.vmem [resolvable:$true] %s338_s30 }
  0x17   : > { %p11750_p11 = pnand %p10920_p9, %p14902_p1  ;;  %s11756_s13 = sshll.u32 %s11625_s12, 4  ;;  %s355_s13 = int_to_ptr.vmem [resolvable:$true] %s11756_s13 }
  0x18   : > { %s11433_s16 = scalar_lea.hbm %s14893_s4, 9216 }
  0x19   : > { %p11434_p12 = scmp.ne.s32.totalorder %s14893_s4, %s11433_s16  ;;  %p11766_p13 = pneg %p11750_p11 }
  0x1a   : > { %p11440_p5 = scmp.lt.u32.totalorder %s11433_s16, %s14893_s4 }
  0x1b   : > { %p11436_p0 = pnand %p11766_p13, %p11434_p12 }
  0x1d   : > { %p11437_p3 = pneg %p11436_p0 }
  0x1f   : > { %p11442_p7 = pnand %p11440_p5, %p11437_p3 }
  0x21   : > { %11445 = shalt.err (!%p11442_p7)
}
  0x22   : > { %s11446_s14 = scalar_lea.vmem %s11743_s27, 9216  ;;  %p11454_p2 = scmp.lt.s32.totalorder %s11743_s27, %s11743_s27 }
  0x23   : > { %p11447_p9 = scmp.ne.s32.totalorder %s11743_s27, %s11446_s14  ;;  %p11455_p6 = scmp.lt.s32.totalorder %s11446_s14, %s11446_s14 }
  0x25   : > { %p11449_p10 = pnand %p11447_p9, %p11766_p13  ;;  %p11456_p12 = por %p11455_p6, %p11454_p2 }
  0x27   : > { %p11450_p1 = pneg %p11449_p10 }
  0x29   : > { %p11457_p0 = pnand %p11456_p12, %p11450_p1 }
  0x2b   : > { %11460 = shalt.err (!%p11457_p0)
}
  0x2c   : > { %s11626_s15 = smov 64   ;;  %s11627_s16 = smov 4  }
  0x2d   : > { %10923 = dma.hbm_to_vmem [thread:$0]  (!%p11750_p11), %s14893_s4, 9216, %s11743_s27, [#allocation6], %s11626_s15, %s11626_s15, %s11627_s16  }
  0x2e   : > { %s11461_s17 = scalar_lea.hbm %s14896_s7, 9216 }
  0x2f   : > { %p11462_p2 = scmp.ne.s32.totalorder %s14896_s7, %s11461_s17  ;;  %p11468_p10 = scmp.lt.u32.totalorder %s11461_s17, %s14896_s7 }
  0x31   : > { %p11464_p1 = pnand %p11462_p2, %p11766_p13 }
  0x33   : > { %p11465_p6 = pneg %p11464_p1 }
  0x35   : > { %p11470_p3 = pnand %p11468_p10, %p11465_p6 }
  0x37   : > { %11473 = shalt.err (!%p11470_p3)
}
  0x38   : > { %s11474_s27 = scalar_lea.vmem %s11754_s30, 9216  ;;  %p11482_p12 = scmp.lt.s32.totalorder %s11754_s30, %s11754_s30 }
  0x39   : > { %p11475_p5 = scmp.ne.s32.totalorder %s11754_s30, %s11474_s27  ;;  %p11483_p0 = scmp.lt.s32.totalorder %s11474_s27, %s11474_s27 }
  0x3b   : > { %p11477_p7 = pnand %p11475_p5, %p11766_p13  ;;  %p11484_p2 = por %p11483_p0, %p11482_p12 }
  0x3d   : > { %p11478_p9 = pneg %p11477_p7 }
  0x3f   : > { %p11485_p1 = pnand %p11484_p2, %p11478_p9 }
  0x41   : > { %11488 = shalt.err (!%p11485_p1)
}
  0x42   : > { %10926 = dma.hbm_to_vmem [thread:$0]  (!%p11750_p11), %s14896_s7, 9216, %s11754_s30, [#allocation6], %s11626_s15, %s11626_s15, %s11627_s16  }
  0x43   : > { %s11489_s22 = scalar_lea.hbm %s14898_s9, 2048 }
  0x44   : > { %p11490_p6 = scmp.ne.s32.totalorder %s14898_s9, %s11489_s22  ;;  %p11496_p5 = scmp.lt.u32.totalorder %s11489_s22, %s14898_s9 }
  0x46   : > { %p11492_p10 = pnand %p11490_p6, %p11766_p13 }
  0x48   : > { %p11493_p3 = pneg %p11492_p10 }
  0x4a   : > { %p11498_p7 = pnand %p11496_p5, %p11493_p3 }
  0x4c   : > { %11501 = shalt.err (!%p11498_p7)
}
  0x4d   : > { %s11502_s27 = scalar_lea.vmem %s355_s13, 2048  ;;  %p11510_p2 = scmp.lt.s32.totalorder %s355_s13, %s355_s13 }
  0x4e   : > { %p11503_p9 = scmp.ne.s32.totalorder %s355_s13, %s11502_s27  ;;  %p11511_p1 = scmp.lt.s32.totalorder %s11502_s27, %s11502_s27 }
  0x50   : > { %p11505_p12 = pnand %p11503_p9, %p11766_p13  ;;  %p11512_p4 = por %p11511_p1, %p11510_p2 }
  0x52   : > { %p11506_p0 = pneg %p11505_p12 }
  0x54   : > { %p11513_p8 = pnand %p11512_p4, %p11506_p0 }
  0x56   : > { %11516 = shalt.err (!%p11513_p8)
}
  0x57   : > { %s11628_s30 = smov 128   ;;  %s11629_s24 = smov 8  }
  0x58   : > { %10929 = dma.hbm_to_vmem [thread:$0]  (!%p11750_p11), %s14898_s9, 2048, %s355_s13, [#allocation9], %s11628_s30, %s11628_s30, %s11629_s24  }
  0x59   : > { %s11833_s8 = sadd.s32 1, %s11621_s20   ;;  %s36_s11 = sadd.s32 1, %s11617_s19 }
  0x5a   : > { %s33_s10 = ssub.s32 %s11621_s20, %s11833_s8  ;;  %p43_p8 = scmp.ne.s32.totalorder %s11617_s19, %s11613_s18 }
  0x5b   : > { %p34_p4 = scmp.eq.s32.totalorder %s33_s10, 0  ;;  %p44_p13 = scmp.eq.s32.totalorder %s11621_s20, 0 }
  0x5c   : > { %p10941_p6 = scmp.lt.s32.totalorder %s11621_s20, 2  ;;  %p15155_p3 = scmp.eq.s32.totalorder %s11720_s21, 1 }
  0x5d   : > { %s11843_s17 = scalar_select %p34_p4, %s11617_s19, %s36_s11  }
  0x5e   : > { %p45_p10 = por %p44_p13, %p43_p8  ;;  %p11847_p5 = por %p15155_p3, %p43_p8 }
  0x5f   : > { %s371_s22 = sand.u32 1, %s11617_s19   ;;  %s8918_s26 = sshll.u32 %s11621_s20, 12 }
  0x60   : > { %s8117_s13 = sshll.u32 %s371_s22, 8  ;;  %s11856_s14 = scalar_lea.hbm %s14889_s0, %s8918_s26 }
  0x61   : > { %s375_s27 = scalar_lea.vmem [#allocation2], %s8117_s13  ;;  %p11858_p11 = pnand %p10941_p6, %p45_p10 }
  0x62   : > { %s382_s15 = sshll.u32 %s375_s27, 4  ;;  %s11864_s10 = scalar_lea.sflag [#allocation3], %s371_s22  ;;  %s11862_s15 = int_to_ptr.vmem [resolvable:$true] %s382_s15 }
  0x63   : > { %s11517_s11 = scalar_lea.hbm %s11856_s14, 4096  ;;  %p11519_p9 = pneg %p11858_p11 }
  0x64   : > { %p11518_p7 = scmp.ne.s32.totalorder %s11856_s14, %s11517_s11  ;;  %s11522_s29 = scalar_lea.hbm %s14889_s0, 8192 }
  0x65   : > { %p11523_p2 = scmp.lt.u32.totalorder %s11856_s14, %s14889_s0  ;;  %p11524_p1 = scmp.lt.u32.totalorder %s11522_s29, %s11517_s11 }
  0x66   : > { %p11520_p12 = pnand %p11519_p9, %p11518_p7  ;;  %p11526_p8 = scmp.lt.u32.totalorder %s11517_s11, %s11856_s14 }
  0x67   : > { %p11525_p4 = por %p11524_p1, %p11523_p2 }
  0x68   : > { %p11521_p0 = pneg %p11520_p12 }
  0x69   : > { %p11527_p13 = por %p11526_p8, %p11525_p4 }
  0x6b   : > { %p11528_p6 = pnand %p11527_p13, %p11521_p0 }
  0x6d   : > { %11531 = shalt.err (!%p11528_p6)
}
  0x6e   : > { %s11532_s22 = scalar_lea.vmem %s11862_s15, 4096  ;;  %s11630_s26 = smov [#allocation2]  }
  0x6f   : > { %p11533_p10 = scmp.ne.s32.totalorder %s11862_s15, %s11532_s22  ;;  %s11537_s13 = sshll.u32 %s11630_s26, 4  ;;  %s11538_s13 = int_to_ptr.vmem [resolvable:$false] %s11537_s13 }
  0x70   : > { %s11539_s12 = scalar_lea.vmem %s11538_s13, 8192  ;;  %p11540_p12 = scmp.lt.s32.totalorder %s11862_s15, %s11538_s13 }
  0x71   : > { %p11535_p3 = pnand %p11533_p10, %p11519_p9  ;;  %p11541_p2 = scmp.lt.s32.totalorder %s11539_s12, %s11532_s22 }
  0x73   : > { %p11536_p7 = pneg %p11535_p3  ;;  %p11542_p1 = por %p11541_p2, %p11540_p12 }
  0x75   : > { %p11543_p4 = pnand %p11542_p1, %p11536_p7 }
  0x77   : > { %11546 = shalt.err (!%p11543_p4)
}
  0x78   : > { %10933 = dma.hbm_to_vmem [thread:$0]  (!%p11858_p11), %s11856_s14, 4096, %s11862_s15, %s11864_s10, %s11628_s30, %s11628_s30, %s11629_s24  }
  0x79   : > { %p15158_p9 = scmp.ne.s32.totalorder %s15152_s25, 0 }
  0x7b   : > { %400 = sbr.rel (%p15158_p9) target bundleno = 2331 (0x91b), region = 64 }
  0x82   : > { %s11898_s11 = sand.u32 1, %s11613_s18   ;;  %p15159_p0 = scmp.ne.s32.totalorder %s15149_s23, 0 }
  0x83   : > { %s8121_s29 = sshll.u32 %s11898_s11, 8  ;;  %s403_s27 = scalar_lea.sflag [#allocation3], %s11898_s11 }
  0x84   : > { %s11904_s16 = scalar_lea.vmem [#allocation2], %s8121_s29 }
  0x85   : > { %11592 = dma.done.wait (%p15159_p0), %s403_s27, 4096  }
  0x86   : > { %11594 = vsyncadd (%p15159_p0), %s403_s27, 4294963200  ;;  %p15160_p11 = scmp.eq.s32.totalorder %s11720_s21, 0 }
  0x88   : > { %11596 = dma.done.wait (%p15160_p11), [#allocation6], 18432   ;;  %p15161_p8 = pmov %p15160_p11 }
  0x8a   : > { %11598 = vsyncadd (%p15161_p8), [#allocation6], 4294948864  ;;  %p15162_p13 = pmov %p15161_p8 }
  0x8b   : > { %p15163_p6 = pmov %p15161_p8 }
  0x8c   : > { %11600 = dma.done.wait (%p15162_p13), [#allocation9], 2048  }
  0x8d   : > { %11602 = vsyncadd (%p15163_p6), [#allocation9], 4294965248  ;;  %v14908_v0 = vmov 0.0|0.0   ;;  %v10992_v1 = vld [vmem:[#allocation5 + $0x40] sm:$0xff]   ;;  %v10993_v2 = vld [vmem:[#allocation5 + $0x48] sm:$0xff]   ;;  %vm14959_vm0 = vcmask 1046528  }
  0x8e   : > { %9416 = vmatprep.mubr.bf16.mxu0 %v14908_v0  ;;  %9400 = vmatprep.subr.bf16.mxu0 %v10992_v1  ;;  %v10994_v3 = vld [vmem:[#allocation5 + $0x50] sm:$0xff]   ;;  %v10995_v4 = vld [vmem:[#allocation5 + $0x58] sm:$0xff]   ;;  %v11920_v5 = vld [vmem:[%s11904_s16] sm:$0xff]  ;;  %vm14958_vm1 = vcmask 1040384   ;;  %vm14960_vm5 = vmmov 1   ;;  %p460_p10 = scmp.lt.s32.totalorder %s11720_s21, 1 }
  0x8f   : > { %10376 = vmatprep.subr.bf16.mxu1 %v10992_v1  ;;  %9401 = vmatpush3.bf16.msra.mxu0 %v10992_v1  ;;  %v11923_v6 = vld [vmem:[%s11904_s16 + $0x8] sm:$0xff]  ;;  %v11926_v7 = vld [vmem:[%s11904_s16 + $0x10] sm:$0xff]  ;;  %v11931_v9 = vld [vmem:[%s11904_s16 + $0x18] sm:$0xff]  ;;  %s11634_s26 = smov 127   ;;  %s11635_s13 = smov 1  }
  0x90   : > { %10384 = vmatpush3.bf16.msra.mxu1 %v10992_v1  ;;  %9402 = vmatprep.subr.bf16.mxu0 %v10993_v2  ;;  %v979_v8 = vadd.f32 %v11923_v6, %v11920_v5  ;;  %v10996_v10 = vld [vmem:[#allocation5 + $0x60] sm:$0xff]   ;;  %v11939_v14 = vld [vmem:[%s11904_s16 + $0x28] sm:$0xff]  ;;  %v11943_v17 = vld [vmem:[%s11904_s16 + $0x30] sm:$0xff]  ;;  %s461_s14 = scalar_select %p460_p10, %s11720_s21, 1 }
  0x91   : > { %10377 = vmatprep.subr.bf16.mxu1 %v10993_v2  ;;  %v11935_v12 = vld [vmem:[%s11904_s16 + $0x20] sm:$0xff]  ;;  %v10997_v15 = vld [vmem:[#allocation5 + $0x68] sm:$0xff]   ;;  %v10998_v19 = vld [vmem:[#allocation5 + $0x70] sm:$0xff]   ;;  %s15661_s24 = sld [smem:[#allocation71_spill]]  ;;  %s15662_s10 = sld [smem:[#allocation70_spill]] }
  0x92   : > { %v980_v11 = vadd.f32 %v979_v8, %v11926_v7  ;;  %v11947_v20 = vld [vmem:[%s11904_s16 + $0x38] sm:$0xff]  ;;  %v11950_v21 = vld [vmem:[%s11904_s16 + $0x40] sm:$0xff]  ;;  %v11954_v23 = vld [vmem:[%s11904_s16 + $0x48] sm:$0xff]  ;;  %s462_s22 = scalar_lea.vmem %s14890_s1, %s461_s14  ;;  %s15663_s27 = sld [smem:[#allocation72_spill]] }
  0x93   : > { %9403 = vmatpush3.bf16.msra.mxu0 %v10993_v2  ;;  %v10999_v24 = vld [vmem:[#allocation5 + $0x78] sm:$0xff]   ;;  %v11958_v26 = vld [vmem:[%s11904_s16 + $0x50] sm:$0xff]  ;;  %v11000_v29 = vld [vmem:[#allocation5] sm:$0xff]  }
  0x94   : > { %10385 = vmatpush3.bf16.msra.mxu1 %v10993_v2  ;;  %9404 = vmatprep.subr.bf16.mxu0 %v10994_v3  ;;  %v981_v13 = vadd.f32 %v980_v11, %v11931_v9  ;;  %v11962_v28 = vld [vmem:[%s11904_s16 + $0x58] sm:$0xff]  ;;  %v11966_v31 = vld [vmem:[%s11904_s16 + $0x60] sm:$0xff]  ;;  %v11970_v33 = vld [vmem:[%s11904_s16 + $0x68] sm:$0xff] }
  0x95   : > { %10378 = vmatprep.subr.bf16.mxu1 %v10994_v3  ;;  %v11974_v35 = vld [vmem:[%s11904_s16 + $0x70] sm:$0xff]  ;;  %v11978_v37 = vld [vmem:[%s11904_s16 + $0x78] sm:$0xff]  ;;  %v11982_v39 = vld [vmem:[%s11904_s16 + $0x80] sm:$0xff] }
  0x96   : > { %v982_v16 = vadd.f32 %v981_v13, %v11935_v12  ;;  %v11986_v41 = vld [vmem:[%s11904_s16 + $0x88] sm:$0xff]  ;;  %v11990_v43 = vld [vmem:[%s11904_s16 + $0x90] sm:$0xff]  ;;  %v11994_v45 = vld [vmem:[%s11904_s16 + $0x98] sm:$0xff] }
  0x97   : > { %9405 = vmatpush3.bf16.msra.mxu0 %v10994_v3  ;;  %v11998_v47 = vld [vmem:[%s11904_s16 + $0xa0] sm:$0xff]  ;;  %v12002_v49 = vld [vmem:[%s11904_s16 + $0xa8] sm:$0xff]  ;;  %v12006_v51 = vld [vmem:[%s11904_s16 + $0xb0] sm:$0xff] }
  0x98   : > { %10386 = vmatpush3.bf16.msra.mxu1 %v10994_v3  ;;  %9406 = vmatprep.subr.bf16.mxu0 %v10995_v4  ;;  %v983_v18 = vadd.f32 %v982_v16, %v11939_v14  ;;  %v12010_v53 = vld [vmem:[%s11904_s16 + $0xb8] sm:$0xff]  ;;  %v12014_v55 = vld [vmem:[%s11904_s16 + $0xc0] sm:$0xff]  ;;  %v12018_v57 = vld [vmem:[%s11904_s16 + $0xc8] sm:$0xff] }
  0x99   : > { %10379 = vmatprep.subr.bf16.mxu1 %v10995_v4  ;;  %v12022_v59 = vld [vmem:[%s11904_s16 + $0xd0] sm:$0xff]  ;;  %v12026_v61 = vld [vmem:[%s11904_s16 + $0xd8] sm:$0xff]  ;;  %v12030_v63 = vld [vmem:[%s11904_s16 + $0xe0] sm:$0xff] }
  0x9a   : > { %v984_v22 = vadd.f32 %v983_v18, %v11943_v17  ;;  %v12034_v2 = vld [vmem:[%s11904_s16 + $0xe8] sm:$0xff] }
  0x9b   : > { %9407 = vmatpush3.bf16.msra.mxu0 %v10995_v4 }
  0x9c   : > { %10387 = vmatpush3.bf16.msra.mxu1 %v10995_v4  ;;  %9408 = vmatprep.subr.bf16.mxu0 %v10996_v10  ;;  %v985_v25 = vadd.f32 %v984_v22, %v11947_v20  ;;  %v12038_v4 = vld [vmem:[%s11904_s16 + $0xf0] sm:$0xff] }
  0x9d   : > { %10380 = vmatprep.subr.bf16.mxu1 %v10996_v10 }
  0x9e   : > { %v986_v27 = vadd.f32 %v985_v25, %v11950_v21 }
  0x9f   : > { %9409 = vmatpush3.bf16.msra.mxu0 %v10996_v10 }
  0xa0   : > { %10388 = vmatpush3.bf16.msra.mxu1 %v10996_v10  ;;  %9410 = vmatprep.subr.bf16.mxu0 %v10997_v15  ;;  %v987_v30 = vadd.f32 %v986_v27, %v11954_v23  ;;  %v12042_v10 = vld [vmem:[%s11904_s16 + $0xf8] sm:$0xff] }
  0xa1   : > { %10381 = vmatprep.subr.bf16.mxu1 %v10997_v15 }
  0xa2   : > { %v988_v32 = vadd.f32 %v987_v30, %v11958_v26 }
  0xa3   : > { %9411 = vmatpush3.bf16.msra.mxu0 %v10997_v15 }
  0xa4   : > { %10389 = vmatpush3.bf16.msra.mxu1 %v10997_v15  ;;  %9412 = vmatprep.subr.bf16.mxu0 %v10998_v19  ;;  %v989_v34 = vadd.f32 %v988_v32, %v11962_v28 }
  0xa5   : > { %10382 = vmatprep.subr.bf16.mxu1 %v10998_v19 }
  0xa6   : > { %v990_v36 = vadd.f32 %v989_v34, %v11966_v31 }
  0xa7   : > { %9413 = vmatpush3.bf16.msra.mxu0 %v10998_v19 }
  0xa8   : > { %10390 = vmatpush3.bf16.msra.mxu1 %v10998_v19  ;;  %9414 = vmatprep.subr.bf16.mxu0 %v10999_v24  ;;  %v991_v38 = vadd.f32 %v990_v36, %v11970_v33 }
  0xa9   : > { %10383 = vmatprep.subr.bf16.mxu1 %v10999_v24 }
  0xaa   : > { %v992_v40 = vadd.f32 %v991_v38, %v11974_v35 }
  0xab   : > { %9415 = vmatpush3.bf16.msra.mxu0 %v10999_v24 }
  0xac   : > { %10391 = vmatpush3.bf16.msra.mxu1 %v10999_v24  ;;  %9448 = vmatprep.subr.bf16.mxu0 %v11000_v29  ;;  %v993_v42 = vadd.f32 %v992_v40, %v11978_v37 }
  0xae   : > { %v994_v44 = vadd.f32 %v993_v42, %v11982_v39 }
  0xb0   : > { %v995_v46 = vadd.f32 %v994_v44, %v11986_v41 }
  0xb2   : > { %v996_v48 = vadd.f32 %v995_v46, %v11990_v43 }
  0xb4   : > { %v997_v50 = vadd.f32 %v996_v48, %v11994_v45 }
  0xb6   : > { %v998_v52 = vadd.f32 %v997_v50, %v11998_v47 }
  0xb8   : > { %v999_v54 = vadd.f32 %v998_v52, %v12002_v49 }
  0xba   : > { %v1000_v56 = vadd.f32 %v999_v54, %v12006_v51 }
  0xbc   : > { %v1001_v58 = vadd.f32 %v1000_v56, %v12010_v53 }
  0xbe   : > { %v1002_v60 = vadd.f32 %v1001_v58, %v12014_v55 }
  0xc0   : > { %v1003_v62 = vadd.f32 %v1002_v60, %v12018_v57 }
  0xc2   : > { %v1004_v1 = vadd.f32 %v1003_v62, %v12022_v59 }
  0xc4   : > { %v1005_v3 = vadd.f32 %v1004_v1, %v12026_v61 }
  0xc6   : > { %v1006_v8 = vadd.f32 %v1005_v3, %v12030_v63 }
  0xc8   : > { %v1007_v11 = vadd.f32 %v1006_v8, %v12034_v2 }
  0xca   : > { %v1008_v13 = vadd.f32 %v1007_v11, %v12038_v4 }
  0xcc   : > { %v1009_v15 = vadd.f32 %v1008_v13, %v12042_v10 }
  0xce   : > { %v1010_v16 = vrot.slane %v1009_v15, 4 }
  0xd0   : > { %v1011_v18 = vadd.f32 %v1010_v16, %v1009_v15 }
  0xd2   : > { %v1012_v19 = vrot.slane %v1011_v18, 2 }
  0xd4   : > { %v1013_v22 = vadd.f32 %v1012_v19, %v1011_v18 }
  0xd6   : > { %v1014_v24 = vrot.slane %v1013_v22, 1 }
  0xd8   : > { %v1015_v25 = vadd.f32 %v1014_v24, %v1013_v22 }
  0xda   : > { %v12047_v27 = vmul.f32 0.00390625, %v1015_v25 }
  0xdc   : > { %v1017_v29 = vsub.f32 %v11920_v5, %v12047_v27  ;;  %v1018_v30 = vsub.f32 %v11923_v6, %v12047_v27  ;;  %v1019_v32 = vsub.f32 %v11926_v7, %v12047_v27  ;;  %v1020_v34 = vsub.f32 %v11931_v9, %v12047_v27 }
  0xdd   : > { %v1021_v40 = vsub.f32 %v11935_v12, %v12047_v27  ;;  %v1022_v44 = vsub.f32 %v11939_v14, %v12047_v27  ;;  %v1023_v50 = vsub.f32 %v11943_v17, %v12047_v27  ;;  %v1024_v56 = vsub.f32 %v11947_v20, %v12047_v27 }
  0xde   : > { %v1049_v36 = vmul.f32 %v1017_v29, %v1017_v29  ;;  %v1050_v38 = vmul.f32 %v1018_v30, %v1018_v30  ;;  %v1051_v42 = vmul.f32 %v1019_v32, %v1019_v32  ;;  %v1052_v46 = vmul.f32 %v1020_v34, %v1020_v34 }
  0xdf   : > { %v1053_v52 = vmul.f32 %v1021_v40, %v1021_v40  ;;  %v1054_v58 = vmul.f32 %v1022_v44, %v1022_v44  ;;  %v1025_v62 = vsub.f32 %v11950_v21, %v12047_v27  ;;  %v1055_v1 = vmul.f32 %v1023_v50, %v1023_v50 }
  0xe0   : > { %v1081_v48 = vadd.f32 %v1050_v38, %v1049_v36  ;;  %v1026_v8 = vsub.f32 %v11954_v23, %v12047_v27  ;;  %v1056_v11 = vmul.f32 %v1024_v56, %v1024_v56  ;;  %v1027_v15 = vsub.f32 %v11958_v26, %v12047_v27 }
  0xe1   : > { %v1057_v16 = vmul.f32 %v1025_v62, %v1025_v62  ;;  %v1028_v19 = vsub.f32 %v11962_v28, %v12047_v27  ;;  %v1029_v25 = vsub.f32 %v11966_v31, %v12047_v27  ;;  %v1030_v32 = vsub.f32 %v11970_v33, %v12047_v27 }
  0xe2   : > { %v1082_v54 = vadd.f32 %v1081_v48, %v1051_v42  ;;  %v1058_v22 = vmul.f32 %v1026_v8, %v1026_v8  ;;  %v1059_v29 = vmul.f32 %v1027_v15, %v1027_v15  ;;  %v1031_v38 = vsub.f32 %v11974_v35, %v12047_v27 }
  0xe3   : > { %v1060_v34 = vmul.f32 %v1028_v19, %v1028_v19  ;;  %v1061_v40 = vmul.f32 %v1029_v25, %v1029_v25  ;;  %v1032_v44 = vsub.f32 %v11978_v37, %v12047_v27  ;;  %v1033_v50 = vsub.f32 %v11982_v39, %v12047_v27 }
  0xe4   : > { %v1083_v60 = vadd.f32 %v1082_v54, %v1052_v46  ;;  %v1062_v46 = vmul.f32 %v1030_v32, %v1030_v32  ;;  %v1034_v56 = vsub.f32 %v11986_v41, %v12047_v27  ;;  %v1035_v62 = vsub.f32 %v11990_v43, %v12047_v27 }
  0xe5   : > { %v1036_v8 = vsub.f32 %v11994_v45, %v12047_v27  ;;  %v1037_v15 = vsub.f32 %v11998_v47, %v12047_v27  ;;  %v1038_v19 = vsub.f32 %v12002_v49, %v12047_v27  ;;  %v1039_v25 = vsub.f32 %v12006_v51, %v12047_v27 }
  0xe6   : > { %v1084_v3 = vadd.f32 %v1083_v60, %v1053_v52  ;;  %v1063_v52 = vmul.f32 %v1031_v38, %v1031_v38  ;;  %v1040_v32 = vsub.f32 %v12010_v53, %v12047_v27  ;;  %v1041_v38 = vsub.f32 %v12014_v55, %v12047_v27 }
  0xe8   : > { %v1085_v13 = vadd.f32 %v1084_v3, %v1054_v58  ;;  %v1064_v58 = vmul.f32 %v1032_v44, %v1032_v44  ;;  %v1042_v44 = vsub.f32 %v12018_v57, %v12047_v27 }
  0xea   : > { %v1086_v18 = vadd.f32 %v1085_v13, %v1055_v1  ;;  %v1065_v1 = vmul.f32 %v1033_v50, %v1033_v50  ;;  %v1043_v50 = vsub.f32 %v12022_v59, %v12047_v27 }
  0xec   : > { %v1087_v24 = vadd.f32 %v1086_v18, %v1056_v11  ;;  %v1066_v11 = vmul.f32 %v1034_v56, %v1034_v56  ;;  %v1044_v56 = vsub.f32 %v12026_v61, %v12047_v27 }
  0xee   : > { %v1088_v30 = vadd.f32 %v1087_v24, %v1057_v16  ;;  %v1067_v16 = vmul.f32 %v1035_v62, %v1035_v62  ;;  %v1045_v62 = vsub.f32 %v12030_v63, %v12047_v27 }
  0xf0   : > { %v1089_v36 = vadd.f32 %v1088_v30, %v1058_v22  ;;  %v1068_v22 = vmul.f32 %v1036_v8, %v1036_v8  ;;  %v1046_v8 = vsub.f32 %v12034_v2, %v12047_v27 }
  0xf2   : > { %v1090_v42 = vadd.f32 %v1089_v36, %v1059_v29  ;;  %v1069_v29 = vmul.f32 %v1037_v15, %v1037_v15  ;;  %v1047_v15 = vsub.f32 %v12038_v4, %v12047_v27 }
  0xf4   : > { %v1091_v48 = vadd.f32 %v1090_v42, %v1060_v34  ;;  %v1070_v34 = vmul.f32 %v1038_v19, %v1038_v19  ;;  %v1048_v19 = vsub.f32 %v12042_v10, %v12047_v27 }
  0xf6   : > { %v1092_v54 = vadd.f32 %v1091_v48, %v1061_v40  ;;  %v1071_v40 = vmul.f32 %v1039_v25, %v1039_v25  ;;  %v1079_v25 = vmul.f32 %v1047_v15, %v1047_v15  ;;  %v1080_v63 = vmul.f32 %v1048_v19, %v1048_v19 }
  0xf8   : > { %v1093_v60 = vadd.f32 %v1092_v54, %v1062_v46  ;;  %v1072_v46 = vmul.f32 %v1040_v32, %v1040_v32 }
  0xfa   : > { %v1094_v3 = vadd.f32 %v1093_v60, %v1063_v52  ;;  %v1073_v52 = vmul.f32 %v1041_v38, %v1041_v38 }
  0xfc   : > { %v1095_v13 = vadd.f32 %v1094_v3, %v1064_v58  ;;  %v1074_v58 = vmul.f32 %v1042_v44, %v1042_v44 }
  0xfe   : > { %v1096_v18 = vadd.f32 %v1095_v13, %v1065_v1  ;;  %v1075_v1 = vmul.f32 %v1043_v50, %v1043_v50  ;;  %v977_v50 = vld [vmem:[%s14891_s2] sm:$0x1] }
 0x100   : > { %v1097_v24 = vadd.f32 %v1096_v18, %v1066_v11  ;;  %v1076_v11 = vmul.f32 %v1044_v56, %v1044_v56 }
 0x102   : > { %v1098_v30 = vadd.f32 %v1097_v24, %v1067_v16  ;;  %v1077_v16 = vmul.f32 %v1045_v62, %v1045_v62 }
 0x104   : > { %v1099_v36 = vadd.f32 %v1098_v30, %v1068_v22  ;;  %v1078_v22 = vmul.f32 %v1046_v8, %v1046_v8 }
 0x106   : > { %v1100_v42 = vadd.f32 %v1099_v36, %v1069_v29 }
 0x108   : > { %v1101_v48 = vadd.f32 %v1100_v42, %v1070_v34 }
 0x10a   : > { %v1102_v54 = vadd.f32 %v1101_v48, %v1071_v40  ;;  %v14907_v48 = vlaneseq }
 0x10c   : > { %v1103_v60 = vadd.f32 %v1102_v54, %v1072_v46  ;;  %v12114_v10 = vshrl.u32 %v14907_v48, 7 }
 0x10e   : > { %v1104_v3 = vadd.f32 %v1103_v60, %v1073_v52  ;;  %v12120_v52 = vsub.s32 0, %v12114_v10 }
 0x110   : > { %v1105_v13 = vadd.f32 %v1104_v3, %v1074_v58  ;;  %15164 = vst [vmem:[#allocation17_spill] sm:$0xff] %v12120_v52  ;;  %v978_v58 = vld [vmem:[%s14892_s3] sm:$0x1] }
 0x112   : > { %v1106_v18 = vadd.f32 %v1105_v13, %v1075_v1 }
 0x114   : > { %v1107_v24 = vadd.f32 %v1106_v18, %v1076_v11 }
 0x116   : > { %v1108_v29 = vadd.f32 %v1107_v24, %v1077_v16 }
 0x118   : > { %v1109_v30 = vadd.f32 %v1108_v29, %v1078_v22 }
 0x11a   : > { %v1110_v32 = vadd.f32 %v1109_v30, %v1079_v25 }
 0x11c   : > { %v1111_v34 = vadd.f32 %v1110_v32, %v1080_v63 }
 0x11e   : > { %v1112_v36 = vrot.slane %v1111_v34, 4 }
 0x120   : > { %v1113_v2 = vadd.f32 %v1112_v36, %v1111_v34 }
 0x122   : > { %v1114_v38 = vrot.slane %v1113_v2, 2 }
 0x124   : > { %v1115_v40 = vadd.f32 %v1114_v38, %v1113_v2 }
 0x126   : > { %v1116_v42 = vrot.slane %v1115_v40, 1 }
 0x128   : > { %v1117_v44 = vadd.f32 %v1116_v42, %v1115_v40 }
 0x12a   : > { %v1118_v4 = vmul.f32 0.00390625, %v1117_v44 }
 0x12c   : > { %v1119_v46 = vadd.f32 1e-05, %v1118_v4 }
 0x12e   : > { %11136 = vrsqrt.f32 %v1119_v46 }
 0x138   : > { %v11137_v54 = vpop.eup %11136 }
 0x139   : > { %v1121_v56 = vmul.f32 %v11137_v54, %v977_v50 }
 0x13b   : > { %v12126_v60 = vrot.slane %v1121_v56, %v12120_v52  ;;  %v1158_v62 = vmul.f32 %v1121_v56, %v12047_v27 }
 0x13d   : > { %v1126_v1 = vmul.f32 %v12126_v60, %v11920_v5  ;;  %v1127_v3 = vmul.f32 %v12126_v60, %v11923_v6  ;;  %v1159_v8 = vsub.f32 %v978_v58, %v1158_v62  ;;  %v1128_v11 = vmul.f32 %v12126_v60, %v11926_v7 }
 0x13e   : > { %v1129_v13 = vmul.f32 %v12126_v60, %v11931_v9  ;;  %v1130_v15 = vmul.f32 %v12126_v60, %v11935_v12  ;;  %v1131_v16 = vmul.f32 %v12126_v60, %v11939_v14  ;;  %v1132_v5 = vmul.f32 %v12126_v60, %v11943_v17 }
 0x13f   : > { %v12142_v27 = vrot.slane %v1159_v8, %v12120_v52  ;;  %v1133_v6 = vmul.f32 %v12126_v60, %v11947_v20  ;;  %v1134_v7 = vmul.f32 %v12126_v60, %v11950_v21  ;;  %v1135_v21 = vmul.f32 %v12126_v60, %v11954_v23 }
 0x140   : > { %v1136_v19 = vmul.f32 %v12126_v60, %v11958_v26  ;;  %v1137_v23 = vmul.f32 %v12126_v60, %v11962_v28  ;;  %v1138_v34 = vmul.f32 %v12126_v60, %v11966_v31  ;;  %v1145_v0 = vmul.f32 %v12126_v60, %v11994_v45 }
 0x141   : > { %v12151_v9 = vadd.f32 %v12142_v27, %v1126_v1  ;;  %v12154_v12 = vadd.f32 %v12142_v27, %v1127_v3  ;;  %v12157_v14 = vadd.f32 %v12142_v27, %v1128_v11  ;;  %v12160_v18 = vadd.f32 %v12142_v27, %v1129_v13 }
 0x142   : > { %v12163_v17 = vadd.f32 %v12142_v27, %v1130_v15  ;;  %v12166_v20 = vadd.f32 %v12142_v27, %v1131_v16  ;;  %v12176_v29 = vadd.f32 %v12142_v27, %v1132_v5  ;;  %v12180_v30 = vadd.f32 %v12142_v27, %v1133_v6 }
 0x143   : > { %v8126_v22 = vmul.f32 -1.442695, %v12151_v9  ;;  %v8127_v24 = vmul.f32 -1.442695, %v12154_v12  ;;  %v8128_v25 = vmul.f32 -1.442695, %v12157_v14  ;;  %v12186_v32 = vadd.f32 %v12142_v27, %v1134_v7 }
 0x144   : > { %v8129_v63 = vmul.f32 -1.442695, %v12160_v18  ;;  %v8130_v26 = vmul.f32 -1.442695, %v12163_v17  ;;  %v8131_v36 = vmul.f32 -1.442695, %v12166_v20  ;;  %v12192_v2 = vadd.f32 %v12142_v27, %v1135_v21 }
 0x145   : > { %11138 = vpow2.f32 %v8126_v22  ;;  %v8132_v38 = vmul.f32 -1.442695, %v12176_v29  ;;  %v12196_v28 = vadd.f32 %v12142_v27, %v1136_v19  ;;  %v8133_v40 = vmul.f32 -1.442695, %v12180_v30 }
 0x146   : > { %11140 = vpow2.f32 %v8127_v24  ;;  %v12200_v42 = vadd.f32 %v12142_v27, %v1137_v23  ;;  %v8134_v31 = vmul.f32 -1.442695, %v12186_v32  ;;  %v12204_v44 = vadd.f32 %v12142_v27, %v1138_v34  ;;  %v11003_v34 = vld [vmem:[#allocation5 + $0x18] sm:$0xff]  }
 0x147   : > { %11142 = vpow2.f32 %v8128_v25  ;;  %v8135_v4 = vmul.f32 -1.442695, %v12192_v2  ;;  %v8136_v46 = vmul.f32 -1.442695, %v12196_v28  ;;  %v1139_v13 = vmul.f32 %v12126_v60, %v11970_v33 }
 0x148   : > { %11144 = vpow2.f32 %v8129_v63  ;;  %v8137_v50 = vmul.f32 -1.442695, %v12200_v42  ;;  %v8138_v54 = vmul.f32 -1.442695, %v12204_v44  ;;  %v14910_v16 = vmov 0.0  }
 0x149   : > { %11146 = vpow2.f32 %v8130_v26  ;;  %v12213_v5 = vrot.slane %v14910_v16, 7  ;;  %v12216_v7 = vadd.s32 16, %v12114_v10  ;;  %v12219_v25 = vadd.s32 32, %v12114_v10 }
 0x14a   : > { %11148 = vpow2.f32 %v8131_v36  ;;  %v12222_v33 = vadd.s32 48, %v12114_v10  ;;  %v12225_v26 = vadd.f32 %v12142_v27, %v1139_v13  ;;  %v12243_v13 = vadd.s32 96, %v12114_v10 }
 0x14b   : > { %11150 = vpow2.f32 %v8132_v38  ;;  %15165 = vst [vmem:[#allocation18_spill] sm:$0xff] %v12213_v5  ;;  %v1152_v52 = vmul.f32 %v12126_v60, %v12022_v59 }
 0x14c   : > { %11152 = vpow2.f32 %v8133_v40  ;;  %v12230_v40 = vpack.c.bf16 %v12213_v5, %v12213_v5 }
 0x14d   : > { %11154 = vpow2.f32 %v8134_v31 }
 0x14e   : > { %11156 = vpow2.f32 %v8135_v4  ;;  %15166 = vst [vmem:[#allocation19_spill] sm:$0xff] %v12230_v40 }
 0x14f   : > { %v11139_v56 = vpop.eup %11138  ;;  %11158 = vpow2.f32 %v8136_v46 }
 0x150   : > { %v11141_v58 = vpop.eup %11140  ;;  %v1294_v62 = vadd.f32 1.0, %v11139_v56  ;;  %11160 = vpow2.f32 %v8137_v50  ;;  %v12234_v50 = vadd.s32 64, %v12114_v10 }
 0x151   : > { %v11143_v1 = vpop.eup %11142  ;;  %v1295_v3 = vadd.f32 1.0, %v11141_v58  ;;  %11162 = vpow2.f32 %v8138_v54  ;;  %v12237_v54 = vadd.s32 80, %v12114_v10 }
 0x152   : > { %v11145_v8 = vpop.eup %11144  ;;  %11164 = vrcp.f32 %v1294_v62  ;;  %v1296_v11 = vadd.f32 1.0, %v11143_v1  ;;  %v12346_v62 = vadd.f32 %v12142_v27, %v1145_v0 }
 0x153   : > { %v11147_v15 = vpop.eup %11146  ;;  %11166 = vrcp.f32 %v1295_v3  ;;  %v1297_v6 = vadd.f32 1.0, %v11145_v8 }
 0x154   : > { %v11149_v21 = vpop.eup %11148  ;;  %11168 = vrcp.f32 %v1296_v11  ;;  %v1298_v19 = vadd.f32 1.0, %v11147_v15  ;;  %v8139_v11 = vmul.f32 -1.442695, %v12225_v26  ;;  %v8145_v59 = vmul.f32 -1.442695, %v12346_v62 }
 0x155   : > { %v11151_v22 = vpop.eup %11150  ;;  %11170 = vrcp.f32 %v1297_v6  ;;  %v1299_v24 = vadd.f32 1.0, %v11149_v21  ;;  %v12246_v21 = vadd.s32 112, %v12114_v10 }
 0x156   : > { %v11153_v63 = vpop.eup %11152  ;;  %11172 = vrcp.f32 %v1298_v19  ;;  %v1300_v23 = vadd.f32 1.0, %v11151_v22  ;;  %v1140_v19 = vmul.f32 %v12126_v60, %v11974_v35  ;;  %v1143_v35 = vmul.f32 %v12126_v60, %v11986_v41 }
 0x157   : > { %v11155_v36 = vpop.eup %11154  ;;  %11174 = vrcp.f32 %v1299_v24  ;;  %v1301_v38 = vadd.f32 1.0, %v11153_v63  ;;  %v1147_v63 = vmul.f32 %v12126_v60, %v12002_v49  ;;  %v1150_v24 = vmul.f32 %v12126_v60, %v12014_v55 }
 0x158   : > { %v11157_v4 = vpop.eup %11156  ;;  %11176 = vrcp.f32 %v1300_v23  ;;  %v1302_v46 = vadd.f32 1.0, %v11155_v36  ;;  %v1141_v23 = vmul.f32 %v12126_v60, %v11978_v37  ;;  %v1144_v37 = vmul.f32 %v12126_v60, %v11990_v43  ;;  %v11001_v43 = vld [vmem:[#allocation5 + $0x8] sm:$0xff]  }
 0x159   : > { %v11159_v56 = vpop.eup %11158  ;;  %11178 = vrcp.f32 %v1301_v38  ;;  %v1303_v58 = vadd.f32 1.0, %v11157_v4  ;;  %v1142_v4 = vmul.f32 %v12126_v60, %v11982_v39  ;;  %v12272_v39 = vadd.s32 128, %v12114_v10 }
 0x15a   : > { %v11161_v3 = vpop.eup %11160  ;;  %11180 = vrcp.f32 %v1302_v46  ;;  %v1304_v8 = vadd.f32 1.0, %v11159_v56  ;;  %v12275_v41 = vadd.f32 %v12142_v27, %v1140_v19  ;;  %v12293_v48 = vadd.f32 %v12142_v27, %v1143_v35 }
 0x15b   : > { %v11163_v15 = vpop.eup %11162  ;;  %11182 = vrcp.f32 %v1303_v58  ;;  %v1305_v6 = vadd.f32 1.0, %v11161_v3  ;;  %v12290_v19 = vadd.f32 %v12142_v27, %v1142_v4  ;;  %v12309_v4 = vadd.f32 %v12142_v27, %v1144_v37  ;;  %v11002_v37 = vld [vmem:[#allocation5 + $0x10] sm:$0xff]  }
 0x15c   : > { %v11165_v22 = vpop.eup %11164  ;;  %11184 = vrcp.f32 %v1304_v8  ;;  %v11396_v8 = vld [vmem:[#allocation5] sm:$0xff]   ;;  %v12358_v0 = vadd.f32 %v12142_v27, %v1147_v63 }
 0x15d   : > { %v11167_v36 = vpop.eup %11166  ;;  %v12255_v38 = vmul.f32 %v11165_v22, %v12151_v9  ;;  %11186 = vrcp.f32 %v1305_v6  ;;  %v8142_v49 = vmul.f32 -1.442695, %v12290_v19  ;;  %v8144_v55 = vmul.f32 -1.442695, %v12309_v4 }
 0x15e   : > { %v11169_v46 = vpop.eup %11168  ;;  %v12262_v56 = vmul.f32 %v11167_v36, %v12154_v12  ;;  %11188 = vpow2.f32 %v8139_v11 }
 0x15f   : > { %v11171_v3 = vpop.eup %11170  ;;  %v12268_v9 = vmul.f32 %v11169_v46, %v12157_v14  ;;  %v12286_v14 = vadd.f32 %v12142_v27, %v1141_v23 }
 0x160   : > { %v11173_v12 = vpop.eup %11172  ;;  %v12279_v11 = vpack.c.bf16 %v12262_v56, %v12255_v38  ;;  %v14912_v6 = vrot.slane %v12262_v56, 1  ;;  %v12283_v22 = vmul.f32 %v11171_v3, %v12160_v18 }
 0x161   : > { %v11175_v36 = vpop.eup %11174  ;;  %v14911_v46 = vrot.slane %v12268_v9, 1  ;;  %v12303_v23 = vmul.f32 %v11173_v12, %v12163_v17  ;;  %v1306_v17 = vadd.f32 1.0, %v11163_v15  ;;  %v8141_v15 = vmul.f32 -1.442695, %v12286_v14 }
 0x162   : > { %15167 = vst [vmem:[#allocation20_spill] sm:$0xff] %v12279_v11  ;;  %v11177_v16 = vpop.eup %11176  ;;  %9417 = vmatmul.mubr.bf16.vlgmr.msra.gmra.mrb[0].mxu0 %v12279_v11  ;;  %v12300_v18 = vpack.c.bf16 %v12283_v22, %v12268_v9  ;;  %v12306_v3 = vmul.f32 %v11175_v36, %v12166_v20  ;;  %v1146_v20 = vmul.f32 %v12126_v60, %v11998_v47  ;;  %v8140_v36 = vmul.f32 -1.442695, %v12275_v41 }
 0x163   : > { %v11179_v35 = vpop.eup %11178  ;;  %9449 = vmatpush3.bf16.msra.mxu0 %v11396_v8  ;;  %v12316_v45 = vsel %vm14959_vm0, %v14912_v6, %v14911_v46  ;;  %v12319_v58 = vmul.f32 %v11177_v16, %v12176_v29  ;;  %v1148_v29 = vmul.f32 %v12126_v60, %v12006_v51  ;;  %v1149_v47 = vmul.f32 %v12126_v60, %v12010_v53 }
 0x164   : > { %15168 = vst [vmem:[#allocation21_spill] sm:$0xff] %v12300_v18  ;;  %v11181_v12 = vpop.eup %11180  ;;  %9450 = vmatprep.subr.bf16.mxu0 %v11001_v43  ;;  %9420 = vmatprep.mubr.bf16.mxu0 %v12300_v18  ;;  %v12325_v8 = vmul.f32 %v11179_v35, %v12180_v30  ;;  %v1151_v30 = vmul.f32 %v12126_v60, %v12018_v57  ;;  %v8143_v51 = vmul.f32 -1.442695, %v12293_v48  ;;  %11190 = vrcp.f32 %v1306_v17 }
 0x165   : > { %v11183_v16 = vpop.eup %11182  ;;  %v12341_v1 = vpack.c.bf16 %v12306_v3, %v12303_v23  ;;  %v12355_v6 = vadd.f32 %v12142_v27, %v1146_v20  ;;  %v12366_v18 = vadd.f32 %v12142_v27, %v1149_v47  ;;  %v12369_v57 = vadd.f32 %v12142_v27, %v1150_v24  ;;  %v11004_v24 = vld [vmem:[#allocation5 + $0x20] sm:$0xff]  }
 0x166   : > { %v11185_v35 = vpop.eup %11184  ;;  %v12350_v53 = vpack.c.bf16 %v12325_v8, %v12319_v58  ;;  %v12372_v11 = vadd.f32 %v12142_v27, %v1151_v30  ;;  %v12376_v63 = vmul.f32 %v11181_v12, %v12186_v32  ;;  %v12379_v20 = vmul.f32 %v11183_v16, %v12192_v2 }
 0x167   : > { %15169 = vst [vmem:[#allocation22_spill] sm:$0xff] %v12341_v1  ;;  %v11187_v31 = vpop.eup %11186  ;;  %9451 = vmatpush3.bf16.msra.mxu0 %v11001_v43  ;;  %v12361_v43 = vadd.f32 %v12142_v27, %v1148_v29  ;;  %15171 = vst [vmem:[#allocation24_spill] sm:$0xff] %v12366_v18  ;;  %v12386_v29 = vmul.f32 %v11185_v35, %v12196_v28  ;;  %v15174_v32 = vrot.slane %v12262_v56, 1  ;;  %v15175_v2 = vrot.slane %v12255_v38, 1 }
 0x168   : > { %15170 = vst [vmem:[#allocation23_spill] sm:$0xff] %v12350_v53  ;;  %v11189_v46 = vpop.eup %11188  ;;  %9452 = vmatprep.subr.bf16.mxu0 %v11002_v37  ;;  %15172 = vst [vmem:[#allocation25_spill] sm:$0xff] %v12369_v57  ;;  %v12389_v47 = vmul.f32 %v11187_v31, %v12200_v42  ;;  %v12400_v28 = vadd.f32 %v12142_v27, %v1152_v52  ;;  %v15177_v42 = vand.u32 15, %v12114_v10  ;;  %v8149_v30 = vmul.f32 -1.442695, %v12366_v18 }
 0x169   : > { %v1307_v17 = vadd.f32 1.0, %v11189_v46  ;;  %15173 = vst [vmem:[#allocation26_spill] sm:$0xff] %v12372_v11  ;;  %v1153_v46 = vmul.f32 %v12126_v60, %v12026_v61  ;;  %v2197_v12 = vsel %vm14959_vm0, %v15175_v2, %v15174_v32  ;;  %v8146_v61 = vmul.f32 -1.442695, %v12355_v6 }
 0x16a   : > { %9421 = vmatmul.mubr.bf16.gmra.mrb[4].mxu0 %v12341_v1  ;;  %v8148_v16 = vmul.f32 -1.442695, %v12361_v43  ;;  %15176 = vst [vmem:[#allocation27_spill] sm:$0xff] %v12400_v28  ;;  %vm12404_vm2 = vcmp.ge.s32.totalorder %v15177_v42, 1  ;;  %v8150_v35 = vmul.f32 -1.442695, %v12369_v57  ;;  %v12415_v32 = vpack.c.bf16 %v12379_v20, %v12376_v63 }
 0x16b   : > { %9453 = vmatpush3.bf16.msra.mxu0 %v11002_v37  ;;  %9424 = vmatprep.mubr.bf16.mxu0 %v12350_v53  ;;  %11192 = vrcp.f32 %v1307_v17  ;;  %v8147_v37 = vmul.f32 -1.442695, %v12358_v0  ;;  %v12411_v17 = vmul.f32 -1.442695, %v12372_v11  ;;  %v12418_v52 = vadd.f32 %v12142_v27, %v1153_v46  ;;  %v11005_v1 = vld [vmem:[#allocation5 + $0x28] sm:$0xff]   ;;  %vm12486_vm6 = vmpackc.low %vm14960_vm5, %vm12404_vm2 }
 0x16c   : > { %9454 = vmatprep.subr.bf16.mxu0 %v11003_v34  ;;  %11194 = vpow2.f32 %v8140_v36  ;;  %15180 = vst [vmem:[#allocation28_spill] sm:$0xff] %v12415_v32  ;;  %v12421_v2 = vpack.c.bf16 %v12316_v45, %v2197_v12  ;;  %v12425_v36 = vpack.c.bf16 %v12389_v47, %v12386_v29  ;;  %v2200_v42 = vrot.slane %v12283_v22, 1 }
 0x16d   : > { %11196 = vpow2.f32 %v8141_v15  ;;  %v2202_v53 = vrot.slane %v12303_v23, 1  ;;  %v8152_v15 = vmul.f32 -1.442695, %v12400_v28  ;;  %v2204_v46 = vrot.slane %v12306_v3, 1 }
 0x16e   : > { %15181 = vst [vmem:[#allocation29_spill] sm:$0xff] %v12421_v2  ;;  %15182 = vst [vmem:[#allocation30_spill] sm:$0xff] %v12425_v36  ;;  %11198 = vpow2.f32 %v8142_v49  ;;  %v2206_v45 = vrot.slane %v12319_v58, 1  ;;  %v11191_v12 = vpop.eup %11190  ;;  %v15183_v2 = vrot.slane %v12268_v9, 1  ;;  %v1523_v18 = vrot.slane %v12262_v56, 7 }
 0x16f   : > { %9455 = vmatpush3.bf16.msra.mxu0 %v11003_v34  ;;  %11200 = vpow2.f32 %v8143_v51  ;;  %v1521_v34 = vrot.slane %v12255_v38, 7  ;;  %v2203_v11 = vsel %vm14959_vm0, %v2200_v42, %v2202_v53  ;;  %v2205_v28 = vsel %vm14959_vm0, %v2202_v53, %v2204_v46  ;;  %v11009_v53 = vld [vmem:[#allocation5 + $0x88] sm:$0xff]  }
 0x170   : > { %9456 = vmatprep.subr.bf16.mxu0 %v11004_v24  ;;  %11202 = vpow2.f32 %v8144_v55  ;;  %v2201_v49 = vsel %vm14959_vm0, %v15183_v2, %v2200_v42  ;;  %v2207_v57 = vsel %vm14959_vm0, %v2204_v46, %v2206_v45  ;;  %v1525_v55 = vrot.slane %v12268_v9, 7  ;;  %v11006_v42 = vld [vmem:[#allocation5 + $0x30] sm:$0xff]  }
 0x171   : > { %11204 = vpow2.f32 %v8145_v59  ;;  %v12438_v51 = vpack.c.bf16 %v2203_v11, %v2201_v49  ;;  %v12445_v2 = vpack.c.bf16 %v2207_v57, %v2205_v28  ;;  %v12448_v59 = vmul.f32 %v11191_v12, %v12204_v44 }
 0x172   : > { %9425 = vmatmul.mubr.bf16.gmra.mrb[8].mxu0 %v12415_v32  ;;  %11206 = vpow2.f32 %v8146_v61  ;;  %v15184_v11 = vand.u32 15, %v12216_v7  ;;  %v2208_v56 = vrot.slane %v12325_v8, 1  ;;  %v2210_v9 = vrot.slane %v12376_v63, 1 }
 0x173   : > { %9457 = vmatpush3.bf16.msra.mxu0 %v11004_v24  ;;  %9428 = vmatprep.mubr.bf16.mxu0 %v12425_v36  ;;  %11208 = vpow2.f32 %v8147_v37  ;;  %v15187_v57 = vand.u32 15, %v12219_v25  ;;  %v2212_v7 = vrot.slane %v12379_v20, 1  ;;  %v2214_v28 = vrot.slane %v12386_v29, 1 }
 0x174   : > { %9458 = vmatprep.subr.bf16.mxu0 %v11005_v1  ;;  %vm12452_vm3 = vcmp.ge.s32.totalorder %v15184_v11, 1  ;;  %11210 = vpow2.f32 %v8148_v16  ;;  %v2209_v46 = vsel %vm14959_vm0, %v2206_v45, %v2208_v56  ;;  %v2211_v12 = vsel %vm14959_vm0, %v2208_v56, %v2210_v9  ;;  %v11397_v11 = vld [vmem:[%s11904_s16 + $0xe0] sm:$0xff]  ;;  %v11007_v45 = vld [vmem:[#allocation5 + $0x38] sm:$0xff]  }
 0x175   : > { %v11193_v24 = vpop.eup %11192  ;;  %vm12460_vm4 = vcmp.ge.s32.totalorder %v15187_v57, 1  ;;  %11212 = vpow2.f32 %v8149_v30  ;;  %v1522_v49 = vsel %vm14958_vm1, %v12213_v5, %v1521_v34  ;;  %v1154_v16 = vmul.f32 %v11397_v11, %v12126_v60  ;;  %vm12533_vm9 = vmpackc.low %vm14960_vm5, %vm12452_vm3 }
 0x176   : > { %v12468_v37 = vmul.f32 %v11193_v24, %v12225_v26  ;;  %v11195_v25 = vpop.eup %11194  ;;  %11214 = vpow2.f32 %v8150_v35  ;;  %v12476_v57 = vpack.c.bf16 %v2211_v12, %v2209_v46  ;;  %v1524_v26 = vsel %vm14958_vm1, %v1521_v34, %v1523_v18  ;;  %vm12542_vm10 = vmpackc.low %vm14960_vm5, %vm12460_vm4 }
 0x177   : > { %9459 = vmatpush3.bf16.msra.mxu0 %v11005_v1  ;;  %v11197_v44 = vpop.eup %11196  ;;  %v15191_v1 = vmov 0  ;;  %v1308_v35 = vadd.f32 1.0, %v11195_v25  ;;  %11216 = vpow2.f32 %v12411_v17  ;;  %v1526_v34 = vsel %vm14958_vm1, %v1523_v18, %v1525_v55 }
 0x178   : > { %9460 = vmatprep.subr.bf16.mxu0 %v11006_v42  ;;  %v12481_v30 = vpack.c.bf16 %v12468_v37, %v12448_v59  ;;  %v15192_v1 = vsel %vm12486_vm6, 4294967295, %v15191_v1  ;;  %v11199_v56 = vpop.eup %11198  ;;  %v1309_v24 = vadd.f32 1.0, %v11197_v44  ;;  %11218 = vpow2.f32 %v8152_v15  ;;  %v11398_v15 = vld [vmem:[%s11904_s16 + $0xe8] sm:$0xff] }
 0x179   : > { %15193 = vst [vmem:[#allocation32_spill] sm:$0xff] %v15192_v1  ;;  %v2213_v46 = vsel %vm14959_vm0, %v2210_v9, %v2212_v7  ;;  %v11201_v12 = vpop.eup %11200  ;;  %v15194_v31 = vrot.slane %v12283_v22, 7  ;;  %11220 = vrcp.f32 %v1308_v35  ;;  %v1310_v5 = vadd.f32 1.0, %v11199_v56 }
 0x17a   : > { %15190 = vst [vmem:[#allocation31_spill] sm:$0xff] %v12481_v30  ;;  %9429 = vmatmul.mubr.bf16.gmra.mrb[12].mxu0 %v12481_v30  ;;  %v2215_v25 = vsel %vm14959_vm0, %v2212_v7, %v2214_v28  ;;  %v11203_v17 = vpop.eup %11202  ;;  %11222 = vrcp.f32 %v1309_v24  ;;  %v1311_v18 = vadd.f32 1.0, %v11201_v12  ;;  %v1155_v9 = vmul.f32 %v11398_v15, %v12126_v60 }
 0x17b   : > { %v1528_v11 = vsel %vm14958_vm1, %v1525_v55, %v15194_v31  ;;  %9461 = vmatpush3.bf16.msra.mxu0 %v11006_v42  ;;  %9464 = vmatprep.mubr.msk.bf16.mxu0 %vm12486_vm6, %v12230_v40  ;;  %v12503_v44 = vpack.c.bf16 %v2215_v25, %v2213_v46  ;;  %v11205_v30 = vpop.eup %11204  ;;  %v11008_v55 = vld [vmem:[#allocation5 + $0x80] sm:$0xff]   ;;  %v12505_v35 = vpack.c.bf16 %v1524_v26, %v1522_v49  ;;  %v15195_v7 = vand.u32 15, %v12222_v33 }
 0x17c   : > { %9462 = vmatprep.subr.bf16.mxu0 %v11007_v45  ;;  %v1529_v56 = vrot.slane %v12303_v23, 7  ;;  %v12515_v24 = vadd.f32 %v12142_v27, %v1154_v16  ;;  %v2216_v12 = vrot.slane %v12389_v47, 1  ;;  %v11207_v46 = vpop.eup %11206  ;;  %v12518_v31 = vpack.c.bf16 %v1528_v11, %v1526_v34 }
 0x17d   : > { %vm12509_vm7 = vcmp.ge.s32.totalorder %v15195_v7, 1  ;;  %v1531_v25 = vrot.slane %v12306_v3, 7  ;;  %v15198_v49 = vand.u32 15, %v12234_v50  ;;  %v1312_v26 = vadd.f32 1.0, %v11203_v17  ;;  %v11209_v23 = vpop.eup %11208 }
 0x17e   : > { %v2218_v15 = vrot.slane %v12448_v59, 1  ;;  %v1533_v16 = vrot.slane %v12319_v58, 7  ;;  %11224 = vrcp.f32 %v1310_v5  ;;  %v1313_v7 = vadd.f32 1.0, %v11205_v30  ;;  %v11211_v34 = vpop.eup %11210  ;;  %vm12593_vm13 = vmpackc.low %vm14960_vm5, %vm12509_vm7 }
 0x17f   : > { %vm12523_vm8 = vcmp.ge.s32.totalorder %v15198_v49, 1  ;;  %v2217_v40 = vsel %vm14959_vm0, %v2214_v28, %v2216_v12  ;;  %9463 = vmatpush3.bf16.msra.mxu0 %v11007_v45  ;;  %v15201_v50 = vmov 0  ;;  %v1535_v3 = vrot.slane %v12325_v8, 7  ;;  %v11213_v58 = vpop.eup %11212 }
 0x180   : > { %v15202_v50 = vsel %vm12533_vm9, 4294967295, %v15201_v50  ;;  %11226 = vrcp.f32 %v1311_v18  ;;  %v1314_v11 = vadd.f32 1.0, %v11207_v46  ;;  %v2219_v17 = vsel %vm14959_vm0, %v2216_v12, %v2218_v15  ;;  %9496 = vmatprep.subr.bf16.mxu0 %v11008_v55  ;;  %v11215_v18 = vpop.eup %11214  ;;  %vm12604_vm14 = vmpackc.low %vm14960_vm5, %vm12523_vm8 }
 0x181   : > { %15203 = vst [vmem:[#allocation33_spill] sm:$0xff] %v15202_v50  ;;  %v15204_v5 = vmov 0  ;;  %v1315_v28 = vadd.f32 1.0, %v11209_v23  ;;  %v8153_v30 = vmul.f32 -1.442695, %v12418_v52  ;;  %v12548_v45 = vadd.f32 %v12142_v27, %v1155_v9  ;;  %v11217_v49 = vpop.eup %11216 }
 0x182   : > { %v15205_v5 = vsel %vm12542_vm10, 4294967295, %v15204_v5  ;;  %v12550_v8 = vpack.c.bf16 %v2219_v17, %v2217_v40  ;;  %11228 = vrcp.f32 %v1312_v26  ;;  %v1316_v12 = vadd.f32 1.0, %v11211_v34  ;;  %9465 = vmatmul.mubr.msk.bf16.vlgmr.msra.gmra.mrb[0].mxu0 %vm12533_vm9, %v12505_v35  ;;  %v11219_v26 = vpop.eup %11218 }
 0x183   : > { %15206 = vst [vmem:[#allocation34_spill] sm:$0xff] %v15205_v5  ;;  %v8154_v46 = vmul.f32 -1.442695, %v12515_v24  ;;  %v2220_v61 = vrot.slane %v12468_v37, 1  ;;  %v15207_v23 = vrot.slane %v12283_v22, 7  ;;  %v1532_v9 = vsel %vm14958_vm1, %v1529_v56, %v1531_v25  ;;  %9497 = vmatpush3.bf16.msra.mxu0 %v11008_v55  ;;  %9468 = vmatprep.mubr.msk.bf16.mxu0 %vm12542_vm10, %v12518_v31  ;;  %v11221_v22 = vpop.eup %11220 }
 0x184   : > { %v1534_v40 = vsel %vm14958_vm1, %v1531_v25, %v1533_v16  ;;  %11230 = vrcp.f32 %v1313_v7  ;;  %v1536_v34 = vsel %vm14958_vm1, %v1533_v16, %v1535_v3  ;;  %v1317_v17 = vadd.f32 1.0, %v11213_v58  ;;  %9498 = vmatprep.subr.bf16.mxu0 %v11009_v53  ;;  %v11223_v16 = vpop.eup %11222 }
 0x185   : > { %v1530_v36 = vsel %vm14958_vm1, %v15207_v23, %v1529_v56  ;;  %11232 = vrcp.f32 %v1314_v11  ;;  %v2221_v32 = vsel %vm14959_vm0, %v2218_v15, %v2220_v61  ;;  %v11010_v23 = vld [vmem:[#allocation5 + $0x90] sm:$0xff]   ;;  %v15208_v56 = vand.u32 15, %v12237_v54 }
 0x186   : > { %v1537_v55 = vrot.slane %v12376_v63, 7  ;;  %v1539_v7 = vrot.slane %v12379_v20, 7  ;;  %v1541_v5 = vrot.slane %v12386_v29, 7  ;;  %11234 = vrcp.f32 %v1315_v28 }
 0x187   : > { %vm12569_vm11 = vcmp.ge.s32.totalorder %v15208_v56, 1  ;;  %v15211_v11 = vand.u32 15, %v12243_v13  ;;  %v1543_v54 = vrot.slane %v12389_v47, 7  ;;  %v12584_v58 = vmul.f32 %v11221_v22, %v12275_v41  ;;  %9499 = vmatpush3.bf16.msra.mxu0 %v11009_v53 }
 0x188   : > { %11236 = vrcp.f32 %v1316_v12  ;;  %v1318_v56 = vadd.f32 1.0, %v11215_v18  ;;  %v12586_v63 = vpack.c.bf16 %v1532_v9, %v1530_v36  ;;  %v12588_v20 = vpack.c.bf16 %v1536_v34, %v1534_v40  ;;  %v11225_v28 = vpop.eup %11224  ;;  %9500 = vmatprep.subr.bf16.mxu0 %v11010_v23  ;;  %v11011_v18 = vld [vmem:[#allocation5 + $0x98] sm:$0xff]   ;;  %vm12651_vm15 = vmpackc.low %vm14960_vm5, %vm12569_vm11 }
 0x189   : > { %vm12578_vm12 = vcmp.ge.s32.totalorder %v15211_v11, 1  ;;  %v1319_v29 = vadd.f32 1.0, %v11217_v49  ;;  %11238 = vpow2.f32 %v8153_v30  ;;  %v15214_v13 = vmov 0 }
 0x18a   : > { %v15215_v13 = vsel %vm12593_vm13, 4294967295, %v15214_v13  ;;  %v12598_v47 = vmul.f32 %v11223_v16, %v12286_v14  ;;  %11240 = vrcp.f32 %v1317_v17  ;;  %v1320_v41 = vadd.f32 1.0, %v11219_v26  ;;  %v11227_v12 = vpop.eup %11226  ;;  %9469 = vmatmul.mubr.msk.bf16.gmra.mrb[4].mxu0 %vm12593_vm13, %v12586_v63  ;;  %v11012_v17 = vld [vmem:[#allocation5 + $0xa0] sm:$0xff]   ;;  %vm12664_vm2 = vmpackc.low %vm14960_vm5, %vm12578_vm12 }
 0x18b   : > { %15216 = vst [vmem:[#allocation35_spill] sm:$0xff] %v15215_v13  ;;  %v2222_v36 = vrot.slane %v12584_v58, 1  ;;  %v15217_v30 = vmov 0  ;;  %v1538_v42 = vsel %vm14958_vm1, %v1535_v3, %v1537_v55  ;;  %v1540_v53 = vsel %vm14958_vm1, %v1537_v55, %v1539_v7  ;;  %9472 = vmatprep.mubr.msk.bf16.mxu0 %vm12604_vm14, %v12588_v20  ;;  %9501 = vmatpush3.bf16.msra.mxu0 %v11010_v23 }
 0x18c   : > { %v15218_v30 = vsel %vm12604_vm14, 4294967295, %v15217_v30  ;;  %11242 = vpow2.f32 %v8154_v46  ;;  %v8155_v14 = vmul.f32 -1.442695, %v12548_v45  ;;  %v1542_v49 = vsel %vm14958_vm1, %v1539_v7, %v1541_v5  ;;  %v11229_v26 = vpop.eup %11228  ;;  %9502 = vmatprep.subr.bf16.mxu0 %v11011_v18 }
 0x18d   : > { %15219 = vst [vmem:[#allocation36_spill] sm:$0xff] %v15218_v30  ;;  %v1544_v9 = vsel %vm14958_vm1, %v1541_v5, %v1543_v54  ;;  %v1545_v33 = vrot.slane %v12448_v59, 7  ;;  %11244 = vrcp.f32 %v1318_v56  ;;  %v1547_v3 = vrot.slane %v12468_v37, 7 }
 0x18e   : > { %11246 = vrcp.f32 %v1319_v29  ;;  %v2223_v40 = vsel %vm14959_vm0, %v2220_v61, %v2222_v36  ;;  %v2224_v46 = vrot.slane %v12598_v47, 1  ;;  %v1549_v59 = vrot.slane %v12584_v58, 7  ;;  %v11231_v37 = vpop.eup %11230 }
 0x18f   : > { %v1551_v5 = vrot.slane %v12598_v47, 7  ;;  %v12626_v34 = vmul.f32 %v11225_v28, %v12290_v19  ;;  %11248 = vrcp.f32 %v1320_v41  ;;  %v515_v61 = vadd.s32 144, %v12114_v10  ;;  %v11233_v23 = vpop.eup %11232  ;;  %9503 = vmatpush3.bf16.msra.mxu0 %v11011_v18 }
 0x190   : > { %v12630_v22 = vmul.f32 %v11227_v12, %v12293_v48  ;;  %11250 = vpow2.f32 %v8155_v14  ;;  %v12632_v55 = vpack.c.bf16 %v2223_v40, %v2221_v32  ;;  %v12634_v7 = vpack.c.bf16 %v1540_v53, %v1538_v42  ;;  %v11235_v56 = vpop.eup %11234  ;;  %9504 = vmatprep.subr.bf16.mxu0 %v11012_v17 }
 0x191   : > { %v645_v16 = vand.u32 15, %v12272_v39  ;;  %v12638_v19 = vadd.s32 160, %v12114_v10  ;;  %v12641_v11 = vadd.s32 176, %v12114_v10  ;;  %v12643_v29 = vpack.c.bf16 %v1544_v9, %v1542_v49  ;;  %v11013_v9 = vld [vmem:[#allocation5 + $0xa8] sm:$0xff]  }
 0x192   : > { %v1546_v48 = vsel %vm14958_vm1, %v1543_v54, %v1545_v33  ;;  %v1548_v41 = vsel %vm14958_vm1, %v1545_v33, %v1547_v3  ;;  %v2225_v32 = vsel %vm14959_vm0, %v2222_v36, %v2224_v46  ;;  %v11237_v28 = vpop.eup %11236  ;;  %v15221_v39 = vmov 0  ;;  %9473 = vmatmul.mubr.msk.bf16.gmra.mrb[8].mxu0 %vm12651_vm15, %v12634_v7 }
 0x193   : > { %15220 = vst [vmem:[#allocation37_spill] sm:$0xff] %v12643_v29  ;;  %v15222_v39 = vsel %vm12651_vm15, 4294967295, %v15221_v39  ;;  %v1550_v42 = vsel %vm14958_vm1, %v1547_v3, %v1549_v59  ;;  %v1552_v53 = vsel %vm14958_vm1, %v1549_v59, %v1551_v5  ;;  %v1553_v14 = vrot.slane %v12626_v34, 7  ;;  %v11239_v12 = vpop.eup %11238  ;;  %9476 = vmatprep.mubr.msk.bf16.mxu0 %vm12664_vm2, %v12643_v29  ;;  %9505 = vmatpush3.bf16.msra.mxu0 %v11012_v17 }
 0x194   : > { %15223 = vst [vmem:[#allocation38_spill] sm:$0xff] %v15222_v39  ;;  %v12659_v54 = vmul.f32 %v11229_v26, %v12309_v4  ;;  %v15224_v25 = vmov 0  ;;  %v659_v36 = vand.u32 15, %v515_v61  ;;  %v12670_v49 = vmul.f32 %v11231_v37, %v12346_v62  ;;  %v11241_v4 = vpop.eup %11240  ;;  %9506 = vmatprep.subr.bf16.mxu0 %v11013_v9 }
 0x195   : > { %v15225_v25 = vsel %vm12664_vm2, 4294967295, %v15224_v25  ;;  %v2226_v33 = vrot.slane %v12626_v34, 1  ;;  %v15227_v3 = vand.u32 15, %v12246_v21  ;;  %vm12679_vm4 = vcmp.ge.s32.totalorder %v645_v16, 1 }
 0x196   : > { %15226 = vst [vmem:[#allocation39_spill] sm:$0xff] %v15225_v25  ;;  %v673_v26 = vand.u32 15, %v12638_v19  ;;  %v1321_v59 = vadd.f32 1.0, %v11239_v12  ;;  %v11243_v61 = vpop.eup %11242  ;;  %v12687_v62 = vpack.c.bf16 %v1548_v41, %v1546_v48  ;;  %v12689_v37 = vpack.c.bf16 %v1552_v53, %v1550_v42  ;;  %vm12742_vm11 = vmpackc.low %vm14960_vm5, %vm12679_vm4 }
 0x197   : > { %vm12675_vm3 = vcmp.ge.s32.totalorder %v15227_v3, 1  ;;  %v2227_v3 = vsel %vm14959_vm0, %v2224_v46, %v2226_v33  ;;  %v11245_v16 = vpop.eup %11244  ;;  %v1554_v19 = vsel %vm14958_vm1, %v1551_v5, %v1553_v14  ;;  %v1557_v12 = vrot.slane %v12659_v54, 7  ;;  %v11014_v5 = vld [vmem:[#allocation5 + $0xb0] sm:$0xff]   ;;  %9507 = vmatpush3.bf16.msra.mxu0 %v11013_v9 }
 0x198   : > { %15232 = vst [vmem:[#allocation40_spill] sm:$0xff] %v12689_v37  ;;  %11252 = vrcp.f32 %v1321_v59  ;;  %v1322_v18 = vadd.f32 1.0, %v11243_v61  ;;  %v11247_v48 = vpop.eup %11246  ;;  %vm12698_vm7 = vcmp.ge.s32.totalorder %v659_v36, 1  ;;  %v15235_v42 = vrot.slane %v12630_v22, 7  ;;  %vm12729_vm8 = vmpackc.low %vm14960_vm5, %vm12675_vm3  ;;  %9508 = vmatprep.subr.bf16.mxu0 %v11014_v5 }
 0x199   : > { %v12707_v21 = vmul.f32 %v11233_v23, %v12355_v6  ;;  %v12709_v17 = vpack.c.bf16 %v2227_v3, %v2225_v32  ;;  %v11249_v59 = vpop.eup %11248  ;;  %v12712_v61 = vmul.f32 %v11235_v56, %v12358_v0  ;;  %v2228_v36 = vrot.slane %v12630_v22, 1  ;;  %v15237_v6 = vld [vmem:[#allocation25_spill] sm:$0xff]  ;;  %v15241_v56 = vld [vmem:[#allocation26_spill] sm:$0xff]  ;;  %v11015_v3 = vld [vmem:[#allocation5 + $0xb8] sm:$0xff]  }
 0x19a   : > { %v1556_v46 = vsel %vm14958_vm1, %v1553_v14, %v15235_v42  ;;  %11254 = vrcp.f32 %v1322_v18  ;;  %v2230_v25 = vrot.slane %v12659_v54, 1  ;;  %v11251_v39 = vpop.eup %11250  ;;  %v12717_v14 = vmul.f32 %v11237_v28, %v12361_v43  ;;  %v15236_v42 = vld [vmem:[#allocation24_spill] sm:$0xff]  ;;  %9477 = vmatmul.mubr.msk.bf16.gmra.mrb[12].mxu0 %vm12729_vm8, %v12687_v62  ;;  %vm12799_vm3 = vmpackc.low %vm14960_vm5, %vm12698_vm7 }
 0x19b   : > { %v12720_v53 = vmul.f32 %v11241_v4, %v15236_v42  ;;  %v12723_v23 = vmul.f32 %v11245_v16, %v15237_v6  ;;  %v2232_v32 = vrot.slane %v12670_v49, 1  ;;  %v15238_v0 = vmov 0  ;;  %9480 = vmatprep.mubr.msk.bf16.mxu0 %vm12742_vm11, %v12689_v37  ;;  %9509 = vmatpush3.bf16.msra.mxu0 %v11014_v5 }
 0x19c   : > { %v15239_v0 = vsel %vm12729_vm8, 4294967295, %v15238_v0  ;;  %v12734_v18 = vmul.f32 %v11247_v48, %v15241_v56  ;;  %v2229_v43 = vsel %vm14959_vm0, %v2226_v33, %v2228_v36  ;;  %v2231_v28 = vsel %vm14959_vm0, %v2228_v36, %v2230_v25  ;;  %v15245_v36 = vld [vmem:[#allocation27_spill] sm:$0xff]  ;;  %9510 = vmatprep.subr.bf16.mxu0 %v11015_v3 }
 0x19d   : > { %15240 = vst [vmem:[#allocation24_spill] sm:$0xff] %v15239_v0  ;;  %v2234_v4 = vrot.slane %v12707_v21, 1  ;;  %v15242_v15 = vmov 0  ;;  %v12746_v16 = vpack.c.bf16 %v2231_v28, %v2229_v43  ;;  %v2233_v9 = vsel %vm14959_vm0, %v2230_v25, %v2232_v32 }
 0x19e   : > { %v15243_v15 = vsel %vm12742_vm11, 4294967295, %v15242_v15  ;;  %v2236_v48 = vrot.slane %v12712_v61, 1  ;;  %v2238_v33 = vrot.slane %v12717_v14, 1  ;;  %v12752_v42 = vmul.f32 %v11249_v59, %v15245_v36 }
 0x19f   : > { %15244 = vst [vmem:[#allocation25_spill] sm:$0xff] %v15243_v15  ;;  %v1323_v6 = vadd.f32 1.0, %v11251_v39  ;;  %v2235_v40 = vsel %vm14959_vm0, %v2232_v32, %v2234_v4  ;;  %v2240_v56 = vrot.slane %v12720_v53, 1  ;;  %v2242_v29 = vrot.slane %v12723_v23, 1  ;;  %9511 = vmatpush3.bf16.msra.mxu0 %v11015_v3  ;;  %v11400_v39 = vld [vmem:[%s11904_s16 + $0xf8] sm:$0xff] }
 0x1a0   : > { %v12759_v43 = vpack.c.bf16 %v2235_v40, %v2233_v9  ;;  %v2237_v25 = vsel %vm14959_vm0, %v2234_v4, %v2236_v48  ;;  %v2239_v28 = vsel %vm14959_vm0, %v2236_v48, %v2238_v33  ;;  %vm12767_vm12 = vcmp.ge.s32.totalorder %v673_v26, 1  ;;  %v12780_v40 = vld [vmem:[#allocation5 + $0xc0] sm:$0xff]  }
 0x1a1   : > { %v15248_v59 = vrot.slane %v12630_v22, 7  ;;  %v12774_v9 = vpack.c.bf16 %v2239_v28, %v2237_v25  ;;  %v2241_v4 = vsel %vm14959_vm0, %v2238_v33, %v2240_v56  ;;  %v15249_v48 = vrot.slane %v12670_v49, 7  ;;  %vm12813_vm4 = vmpackc.low %vm14960_vm5, %vm12767_vm12  ;;  %9544 = vmatprep.subr.bf16.mxu0 %v12780_v40 }
 0x1a2   : > { %v2243_v26 = vsel %vm14959_vm0, %v2240_v56, %v2242_v29  ;;  %v2244_v15 = vrot.slane %v12734_v18, 1  ;;  %v2246_v0 = vrot.slane %v12752_v42, 1  ;;  %v12785_v5 = vpack.c.bf16 %v1556_v46, %v1554_v19 }
 0x1a3   : > { %v1558_v32 = vsel %vm14958_vm1, %v15248_v59, %v1557_v12  ;;  %v1560_v36 = vsel %vm14958_vm1, %v1557_v12, %v15249_v48  ;;  %v11253_v59 = vpop.eup %11252  ;;  %v1561_v25 = vrot.slane %v12707_v21, 7  ;;  %v521_v33 = vadd.s32 192, %v12114_v10 }
 0x1a4   : > { %15250 = vst [vmem:[#allocation26_spill] sm:$0xff] %v12785_v5  ;;  %v12789_v28 = vpack.c.bf16 %v2243_v26, %v2241_v4  ;;  %v12792_v12 = vmul.f32 %v11253_v59, %v12418_v52  ;;  %11256 = vrcp.f32 %v1323_v6  ;;  %v2245_v56 = vsel %vm14959_vm0, %v2242_v29, %v2244_v15  ;;  %v11255_v37 = vpop.eup %11254  ;;  %v11399_v6 = vld [vmem:[%s11904_s16 + $0xf0] sm:$0xff]  ;;  %9481 = vmatmul.mubr.msk.bf16.gmra.mrb[16].mxu0 %vm12799_vm3, %v12785_v5 }
 0x1a5   : > { %v2247_v48 = vsel %vm14959_vm0, %v2244_v15, %v2246_v0  ;;  %v15251_v19 = vmov 0  ;;  %v12803_v46 = vpack.c.bf16 %v1560_v36, %v1558_v32  ;;  %v1563_v4 = vrot.slane %v12712_v61, 7 }
 0x1a6   : > { %v15252_v19 = vsel %vm12799_vm3, 4294967295, %v15251_v19  ;;  %v12806_v52 = vpack.c.bf16 %v2247_v48, %v2245_v56  ;;  %v1156_v29 = vmul.f32 %v11399_v6, %v12126_v60  ;;  %v15255_v41 = vmov 0  ;;  %v15354_v13 = vld [vmem:[#allocation25_spill] sm:$0xff] }
 0x1a7   : > { %15253 = vst [vmem:[#allocation27_spill] sm:$0xff] %v15252_v19  ;;  %15254 = vst [vmem:[#allocation41_spill] sm:$0xff] %v12803_v46  ;;  %v15256_v41 = vsel %vm12813_vm4, 4294967295, %v15255_v41  ;;  %v1565_v15 = vrot.slane %v12717_v14, 7  ;;  %v1567_v32 = vrot.slane %v12720_v53, 7  ;;  %v12820_v36 = vmul.f32 %v11255_v37, %v12515_v24  ;;  %9484 = vmatprep.mubr.msk.bf16.mxu0 %vm12813_vm4, %v12803_v46 }
 0x1a8   : > { %15257 = vst [vmem:[#allocation42_spill] sm:$0xff] %v15256_v41  ;;  %v2248_v3 = vrot.slane %v12792_v12, 1  ;;  %v701_v26 = vand.u32 15, %v521_v33  ;;  %v12825_v59 = vadd.f32 %v12142_v27, %v1156_v29  ;;  %v1157_v56 = vmul.f32 %v11400_v39, %v12126_v60 }
 0x1a9   : > { %v15258_v48 = vand.u32 15, %v12641_v11  ;;  %v14968_v33 = vrot.slane %v12820_v36, 1  ;;  %v15261_v60 = vrot.slane %v12670_v49, 7  ;;  %v1564_v29 = vsel %vm14958_vm1, %v1561_v25, %v1563_v4 }
 0x1aa   : > { %v2249_v37 = vsel %vm14959_vm0, %v2246_v0, %v2248_v3  ;;  %v523_v11 = vadd.s32 208, %v12114_v10  ;;  %v8156_v39 = vmul.f32 -1.442695, %v12825_v59  ;;  %v1568_v0 = vsel %vm14958_vm1, %v1565_v15, %v1567_v32 }
 0x1ab   : > { %vm12834_vm7 = vcmp.ge.s32.totalorder %v15258_v48, 1  ;;  %v1562_v6 = vsel %vm14958_vm1, %v15261_v60, %v1561_v25  ;;  %v1566_v48 = vsel %vm14958_vm1, %v1563_v4, %v1565_v15  ;;  %v2251_v19 = vsel %vm14959_vm0, %v2248_v3, %v14968_v33 }
 0x1ac   : > { %v12855_v41 = vadd.f32 %v12142_v27, %v1157_v56  ;;  %vm937_vm12 = vcmp.ge.s32.totalorder %v701_v26, 1  ;;  %v525_v60 = vadd.s32 224, %v12114_v10  ;;  %v12858_v46 = vpack.c.bf16 %v2251_v19, %v2249_v37  ;;  %vm12866_vm1 = vmpackc.low %vm14960_vm5, %vm12834_vm7 }
 0x1ad   : > { %11258 = vpow2.f32 %v8156_v39  ;;  %v12860_v25 = vpack.c.bf16 %v1564_v29, %v1562_v6  ;;  %v15262_v4 = vmov 0  ;;  %v12870_v15 = vpack.c.bf16 %v1568_v0, %v1566_v48  ;;  %vm12875_vm0 = vmpackc.low %vm14960_vm5, %vm937_vm12 }
 0x1ae   : > { %v8157_v5 = vmul.f32 -1.442695, %v12855_v41  ;;  %v15263_v4 = vsel %vm12866_vm1, 4294967295, %v15262_v4  ;;  %v1569_v27 = vrot.slane %v12723_v23, 7  ;;  %v1571_v3 = vrot.slane %v12734_v18, 7  ;;  %v11257_v19 = vpop.eup %11256 }
 0x1af   : > { %15264 = vst [vmem:[#allocation43_spill] sm:$0xff] %v15263_v4  ;;  %v15265_v26 = vmov 0  ;;  %v715_v56 = vand.u32 15, %v523_v11  ;;  %v1573_v24 = vrot.slane %v12752_v42, 7  ;;  %v1575_v37 = vrot.slane %v12792_v12, 7  ;;  %9485 = vmatmul.mubr.msk.bf16.gmra.mrb[20].mxu0 %vm12866_vm1, %v12860_v25 }
 0x1b0   : > { %v15266_v26 = vsel %vm12875_vm0, 4294967295, %v15265_v26  ;;  %11260 = vpow2.f32 %v8157_v5  ;;  %v729_v6 = vand.u32 15, %v525_v60  ;;  %9488 = vmatprep.mubr.msk.bf16.mxu0 %vm12875_vm0, %v12870_v15  ;;  %vm15268_vm7 = vcmask 1040384  }
 0x1b1   : > { %15267 = vst [vmem:[#allocation44_spill] sm:$0xff] %v15266_v26  ;;  %v1570_v29 = vsel %vm15268_vm7, %v1567_v32, %v1569_v27  ;;  %vm15269_vm12 = vmmov %vm15268_vm7  ;;  %v12890_v11 = vmul.f32 %v11257_v19, %v12548_v45  ;;  %vm939_vm5 = vcmp.ge.s32.totalorder %v715_v56, 1  ;;  %v527_v0 = vadd.s32 240, %v12114_v10 }
 0x1b2   : > { %v1572_v39 = vsel %vm15269_vm12, %v1569_v27, %v1571_v3  ;;  %vm15270_vm4 = vmmov %vm15268_vm7  ;;  %vm941_vm11 = vcmp.ge.s32.totalorder %v729_v6, 1  ;;  %v498_v60 = vadd.s32 8, %v12114_v10  ;;  %vm15273_vm0 = vmmov 1  }
 0x1b3   : > { %v1574_v48 = vsel %vm15270_vm4, %v1571_v3, %v1573_v24  ;;  %vm15271_vm3 = vmmov %vm15270_vm4  ;;  %v12896_v33 = vpack.c.bf16 %v1572_v39, %v1570_v29  ;;  %v15274_v32 = vmov 0  ;;  %v1577_v27 = vrot.slane %v12820_v36, 7 }
 0x1b4   : > { %v1576_v5 = vsel %vm15271_vm3, %v1573_v24, %v1575_v37  ;;  %vm12899_vm7 = vmpackc.low %vm15273_vm0, %vm939_vm5  ;;  %v1579_v3 = vrot.slane %v12890_v11, 7  ;;  %v15278_v19 = vmov 0  ;;  %v743_v56 = vand.u32 15, %v527_v0 }
 0x1b5   : > { %15272 = vst [vmem:[#allocation45_spill] sm:$0xff] %v12896_v33  ;;  %v15275_v32 = vsel %vm12899_vm7, 4294967295, %v15274_v32  ;;  %v12903_v45 = vpack.c.bf16 %v1576_v5, %v1574_v48  ;;  %vm12908_vm3 = vmpackc.low %vm15273_vm0, %vm941_vm11  ;;  %v15281_v24 = vmov 0.0   ;;  %v540_v39 = vand.u32 15, %v498_v60 }
 0x1b6   : > { %15276 = vst [vmem:[#allocation46_spill] sm:$0xff] %v15275_v32  ;;  %v15279_v19 = vsel %vm12908_vm3, 4294967295, %v15278_v19  ;;  %v12913_v6 = vrot.slane %v15281_v24, 1  ;;  %vm15283_vm5 = vmmov %vm15270_vm4  ;;  %v15285_v24 = vrot.slane %v12255_v38, 1  ;;  %vm15286_vm12 = vcmask 1046528   ;;  %v15361_v30 = vld [vmem:[#allocation43_spill] sm:$0xff] }
 0x1b7   : > { %v11259_v26 = vpop.eup %11258  ;;  %15277 = vst [vmem:[#allocation47_spill] sm:$0xff] %v12903_v45  ;;  %15280 = vst [vmem:[#allocation48_spill] sm:$0xff] %v15279_v19  ;;  %9489 = vmatmul.mubr.msk.bf16.gmra.mrb[24].mxu0 %vm12899_vm7, %v12896_v33  ;;  %v1578_v48 = vsel %vm15283_vm5, %v1575_v37, %v1577_v27  ;;  %v500_v60 = vadd.s32 24, %v12114_v10  ;;  %vm946_vm1 = vcmp.le.s32.totalorder %v540_v39, 14  ;;  %v15287_v37 = vmov 0 }
 0x1b8   : > { %15282 = vst [vmem:[#allocation49_spill] sm:$0xff] %v12913_v6  ;;  %v1324_v29 = vadd.f32 1.0, %v11259_v26  ;;  %9492 = vmatprep.mubr.msk.bf16.mxu0 %vm12908_vm3, %v12903_v45  ;;  %vm15284_vm11 = vmmov %vm15270_vm4  ;;  %vm943_vm4 = vcmp.ge.s32.totalorder %v743_v56, 1  ;;  %v2195_v26 = vsel %vm15286_vm12, %v12913_v6, %v15285_v24  ;;  %v15290_v38 = vmov 0 }
 0x1b9   : > { %v1580_v5 = vsel %vm15284_vm11, %v1577_v27, %v1579_v3  ;;  %vm12932_vm3 = vmpackc.low %vm15273_vm0, %vm943_vm4  ;;  %v554_v27 = vand.u32 15, %v500_v60 }
 0x1ba   : > { %v11261_v4 = vpop.eup %11260  ;;  %11262 = vrcp.f32 %v1324_v29  ;;  %v502_v29 = vadd.s32 40, %v12114_v10  ;;  %v12929_v32 = vpack.c.bf16 %v1580_v5, %v1578_v48  ;;  %v15288_v37 = vsel %vm12932_vm3, 4294967295, %v15287_v37  ;;  %vm12938_vm5 = vmpackc.low %vm946_vm1, %vm15273_vm0 }
 0x1bb   : > { %v1325_v0 = vadd.f32 1.0, %v11261_v4  ;;  %15289 = vst [vmem:[#allocation50_spill] sm:$0xff] %v15288_v37  ;;  %v8231_v4 = vpack.c.bf16 %v2195_v26, %v12913_v6  ;;  %v15291_v38 = vsel %vm12938_vm5, 4294967295, %v15290_v38  ;;  %vm948_vm11 = vcmp.le.s32.totalorder %v554_v27, 14  ;;  %v15300_v6 = vld [vmem:[#allocation29_spill] sm:$0xff] }
 0x1bc   : > { %15292 = vst [vmem:[#allocation51_spill] sm:$0xff] %v15291_v38  ;;  %v568_v56 = vand.u32 15, %v502_v29  ;;  %v504_v48 = vadd.s32 56, %v12114_v10  ;;  %v506_v5 = vadd.s32 72, %v12114_v10  ;;  %vm12953_vm1 = vmpackc.low %vm948_vm11, %vm15273_vm0  ;;  %v15293_v26 = vmov 0  ;;  %v11036_v37 = vld [vmem:[#allocation5 + $0x160] sm:$0xff]  }
 0x1bd   : > { %11264 = vrcp.f32 %v1325_v0  ;;  %v15294_v26 = vsel %vm12953_vm1, 4294967295, %v15293_v26  ;;  %v15296_v29 = vmov 0 }
 0x1be   : > { %vm950_vm4 = vcmp.le.s32.totalorder %v568_v56, 14  ;;  %15295 = vst [vmem:[#allocation52_spill] sm:$0xff] %v15294_v26  ;;  %v582_v27 = vand.u32 15, %v504_v48  ;;  %v11018_v48 = vld [vmem:[#allocation5 + $0xd0] sm:$0xff]   ;;  %v11019_v26 = vld [vmem:[#allocation5 + $0xd8] sm:$0xff]  }
 0x1bf   : > { %9493 = vmatmul.mubr.msk.bf16.gmra.mrb[28].mxu0 %vm12932_vm3, %v12929_v32  ;;  %vm12959_vm12 = vmpackc.low %vm950_vm4, %vm15273_vm0 }
 0x1c0   : > { %9512 = vmatprep.mubr.msk.bf16.mxu0 %vm12938_vm5, %v8231_v4  ;;  %v15297_v29 = vsel %vm12959_vm12, 4294967295, %v15296_v29  ;;  %v11017_v4 = vld [vmem:[#allocation5 + $0xc8] sm:$0xff]   ;;  %vm15299_vm5 = vcmask 1040384   ;;  %vm952_vm11 = vcmp.le.s32.totalorder %v582_v27, 14  ;;  %v15305_v27 = vmov 0 }
 0x1c1   : > { %15298 = vst [vmem:[#allocation53_spill] sm:$0xff] %v15297_v29 }
 0x1c4   : > { %v11263_v39 = vpop.eup %11262 }
 0x1c5   : > { %v12950_v0 = vmul.f32 %v11263_v39, %v12825_v59  ;;  %v596_v59 = vand.u32 15, %v506_v5  ;;  %v510_v5 = vadd.s32 104, %v12114_v10 }
 0x1c7   : > { %v11265_v24 = vpop.eup %11264  ;;  %v2594_v60 = vrot.slane %v12950_v0, 7  ;;  %9513 = vmatmul.mubr.msk.bf16.vlgmr.msra.gmra.mrb[0].mxu0 %vm12953_vm1, %v15300_v6  ;;  %vm954_vm4 = vcmp.le.s32.totalorder %v596_v59, 14  ;;  %vm12983_vm1 = vmpackc.low %vm952_vm11, %vm15273_vm0  ;;  %v11020_v59 = vld [vmem:[#allocation5 + $0xe0] sm:$0xff]  }
 0x1c8   : > { %v12964_v56 = vmul.f32 %v11265_v24, %v12855_v41  ;;  %9545 = vmatpush3.bf16.msra.mxu0 %v12780_v40  ;;  %9516 = vmatprep.mubr.msk.bf16.mxu0 %vm12959_vm12, %v12438_v51  ;;  %v508_v41 = vadd.s32 88, %v12114_v10  ;;  %v15302_v40 = vmov 0  ;;  %vm12988_vm12 = vmpackc.low %vm954_vm4, %vm15273_vm0 }
 0x1c9   : > { %v2595_v39 = vsel %vm15299_vm5, %v1579_v3, %v2594_v60  ;;  %9546 = vmatprep.subr.bf16.mxu0 %v11017_v4  ;;  %v15303_v40 = vsel %vm12983_vm1, 4294967295, %v15302_v40  ;;  %v15306_v27 = vsel %vm12988_vm12, 4294967295, %v15305_v27 }
 0x1ca   : > { %v14999_v38 = vrot.slane %v12964_v56, 7  ;;  %15304 = vst [vmem:[#allocation54_spill] sm:$0xff] %v15303_v40  ;;  %15307 = vst [vmem:[#allocation55_spill] sm:$0xff] %v15306_v27  ;;  %v610_v29 = vand.u32 15, %v508_v41  ;;  %v15308_v41 = vmov 0 }
 0x1cc   : > { %v2597_v3 = vsel %vm15299_vm5, %v2594_v60, %v14999_v38  ;;  %9547 = vmatpush3.bf16.msra.mxu0 %v11017_v4  ;;  %v624_v60 = vand.u32 15, %v510_v5  ;;  %vm956_vm11 = vcmp.le.s32.totalorder %v610_v29, 14  ;;  %v512_v4 = vadd.s32 120, %v12114_v10  ;;  %v11021_v29 = vld [vmem:[#allocation5 + $0xe8] sm:$0xff]  }
 0x1cd   : > { %v12980_v24 = vpack.c.bf16 %v2597_v3, %v2595_v39  ;;  %9548 = vmatprep.subr.bf16.mxu0 %v11018_v48  ;;  %v514_v39 = vadd.s32 136, %v12114_v10  ;;  %vm13001_vm4 = vmpackc.low %vm956_vm11, %vm15273_vm0  ;;  %v15311_v3 = vmov 0  ;;  %v15314_v38 = vmov 0 }
 0x1ce   : > { %vm958_vm5 = vcmp.le.s32.totalorder %v624_v60, 14  ;;  %v15309_v41 = vsel %vm13001_vm4, 4294967295, %v15308_v41  ;;  %v516_v60 = vadd.s32 152, %v12114_v10 }
 0x1cf   : > { %15301 = vst [vmem:[#allocation29_spill] sm:$0xff] %v12980_v24  ;;  %9517 = vmatmul.mubr.msk.bf16.gmra.mrb[4].mxu0 %vm12983_vm1, %v12445_v2  ;;  %15310 = vst [vmem:[#allocation56_spill] sm:$0xff] %v15309_v41  ;;  %v652_v5 = vand.u32 15, %v514_v39  ;;  %v518_v39 = vadd.s32 168, %v12114_v10 }
 0x1d0   : > { %9520 = vmatprep.mubr.msk.bf16.mxu0 %vm12988_vm12, %v12476_v57  ;;  %9549 = vmatpush3.bf16.msra.mxu0 %v11018_v48  ;;  %vm13006_vm1 = vmpackc.low %vm958_vm5, %vm15273_vm0  ;;  %v638_v48 = vand.u32 15, %v512_v4  ;;  %v11022_v4 = vld [vmem:[#allocation5 + $0xf0] sm:$0xff]  }
 0x1d1   : > { %9550 = vmatprep.subr.bf16.mxu0 %v11019_v26  ;;  %v15312_v3 = vsel %vm13006_vm1, 4294967295, %v15311_v3  ;;  %vm962_vm5 = vcmp.le.s32.totalorder %v652_v5, 14  ;;  %v13038_v5 = vpack.c.bf16 %v12630_v22, %v12626_v34  ;;  %v522_v34 = vadd.s32 200, %v12114_v10 }
 0x1d2   : > { %15313 = vst [vmem:[#allocation57_spill] sm:$0xff] %v15312_v3  ;;  %vm960_vm11 = vcmp.le.s32.totalorder %v638_v48, 14  ;;  %v680_v48 = vand.u32 15, %v518_v39  ;;  %v11024_v39 = vld [vmem:[#allocation5 + $0x100] sm:$0xff]   ;;  %v15320_v22 = vmov 0 }
 0x1d4   : > { %9551 = vmatpush3.bf16.msra.mxu0 %v11019_v26  ;;  %v13018_v26 = vpack.c.bf16 %v12598_v47, %v12584_v58  ;;  %v15317_v58 = vmov 0  ;;  %v666_v47 = vand.u32 15, %v516_v60  ;;  %v520_v60 = vadd.s32 184, %v12114_v10 }
 0x1d5   : > { %9552 = vmatprep.subr.bf16.mxu0 %v11020_v59 }
 0x1d6   : > { %9432 = vmatprep.mubr.bf16.mxu1 %v13018_v26 }
 0x1d7   : > { %9521 = vmatmul.mubr.msk.bf16.gmra.mrb[8].mxu0 %vm13001_vm4, %v12503_v44  ;;  %vm13024_vm4 = vmpackc.low %vm960_vm11, %vm15273_vm0  ;;  %vm964_vm11 = vcmp.le.s32.totalorder %v666_v47, 14  ;;  %9433 = vmatmul.mubr.bf16.vlgmr.msra.gmra.mrb[0].mxu1 %v13038_v5  ;;  %v13066_v47 = vpack.c.bf16 %v12712_v61, %v12707_v21  ;;  %v15326_v21 = vmov 0  ;;  %v15329_v61 = vmov 0 }
 0x1d8   : > { %9524 = vmatprep.mubr.msk.bf16.mxu0 %vm13006_vm1, %v12550_v8  ;;  %9553 = vmatpush3.bf16.msra.mxu0 %v11020_v59  ;;  %v15315_v38 = vsel %vm13024_vm4, 4294967295, %v15314_v38  ;;  %vm13029_vm1 = vmpackc.low %vm962_vm5, %vm15273_vm0  ;;  %v11023_v59 = vld [vmem:[#allocation5 + $0xf8] sm:$0xff]   ;;  %vm966_vm5 = vcmp.le.s32.totalorder %v680_v48, 14  ;;  %v524_v48 = vadd.s32 216, %v12114_v10 }
 0x1d9   : > { %9554 = vmatprep.subr.bf16.mxu0 %v11021_v29  ;;  %15316 = vst [vmem:[#allocation58_spill] sm:$0xff] %v15315_v38  ;;  %v15318_v58 = vsel %vm13029_vm1, 4294967295, %v15317_v58 }
 0x1da   : > { %15319 = vst [vmem:[#allocation59_spill] sm:$0xff] %v15318_v58 }
 0x1dc   : > { %9555 = vmatpush3.bf16.msra.mxu0 %v11021_v29  ;;  %v13045_v29 = vpack.c.bf16 %v12670_v49, %v12659_v54  ;;  %v15323_v54 = vmov 0  ;;  %v694_v49 = vand.u32 15, %v520_v60  ;;  %v526_v60 = vadd.s32 232, %v12114_v10 }
 0x1dd   : > { %9556 = vmatprep.subr.bf16.mxu0 %v11022_v4 }
 0x1de   : > { %9436 = vmatprep.mubr.bf16.mxu1 %v13045_v29 }
 0x1df   : > { %9525 = vmatmul.mubr.msk.bf16.gmra.mrb[12].mxu0 %vm13024_vm4, %v12632_v55  ;;  %vm13052_vm4 = vmpackc.low %vm964_vm11, %vm15273_vm0  ;;  %vm968_vm11 = vcmp.le.s32.totalorder %v694_v49, 14  ;;  %9437 = vmatmul.mubr.bf16.gmra.mrb[4].mxu1 %v13066_v47  ;;  %v13101_v49 = vpack.c.bf16 %v12792_v12, %v12752_v42  ;;  %v15336_v42 = vmov 0  ;;  %v13123_v12 = vpack.c.bf16 %v12890_v11, %v12820_v36 }
 0x1e0   : > { %9528 = vmatprep.mubr.msk.bf16.mxu0 %vm13029_vm1, %v12709_v17  ;;  %9557 = vmatpush3.bf16.msra.mxu0 %v11022_v4  ;;  %v15321_v22 = vsel %vm13052_vm4, 4294967295, %v15320_v22  ;;  %vm13057_vm1 = vmpackc.low %vm966_vm5, %vm15273_vm0  ;;  %v708_v4 = vand.u32 15, %v522_v34  ;;  %v13094_v34 = vpack.c.bf16 %v12734_v18, %v12723_v23  ;;  %v15333_v23 = vmov 0 }
 0x1e1   : > { %9558 = vmatprep.subr.bf16.mxu0 %v11023_v59  ;;  %15322 = vst [vmem:[#allocation60_spill] sm:$0xff] %v15321_v22  ;;  %v15324_v54 = vsel %vm13057_vm1, 4294967295, %v15323_v54  ;;  %15332 = vst [vmem:[#allocation64_spill] sm:$0xff] %v13101_v49  ;;  %v2252_v18 = vrot.slane %v12890_v11, 1  ;;  %v15344_v11 = vmov 0 }
 0x1e2   : > { %15325 = vst [vmem:[#allocation61_spill] sm:$0xff] %v15324_v54  ;;  %vm970_vm5 = vcmp.le.s32.totalorder %v708_v4, 14  ;;  %v528_v4 = vadd.s32 248, %v12114_v10  ;;  %15339 = vst [vmem:[#allocation67_spill] sm:$0xff] %v13123_v12 }
 0x1e4   : > { %9559 = vmatpush3.bf16.msra.mxu0 %v11023_v59  ;;  %v13073_v59 = vpack.c.bf16 %v12720_v53, %v12717_v14  ;;  %v722_v53 = vand.u32 15, %v524_v48  ;;  %v736_v14 = vand.u32 15, %v526_v60  ;;  %v15020_v48 = vrot.slane %v12950_v0, 1 }
 0x1e5   : > { %9592 = vmatprep.subr.bf16.mxu0 %v11024_v39  ;;  %v750_v10 = vand.u32 15, %v528_v4  ;;  %v15340_v60 = vrot.slane %v12820_v36, 1  ;;  %v15343_v4 = vmov 0.0|0.0   ;;  %v11025_v36 = vld [vmem:[#allocation5 + $0x108] sm:$0xff]  }
 0x1e6   : > { %9440 = vmatprep.mubr.bf16.mxu1 %v13073_v59 }
 0x1e7   : > { %9529 = vmatmul.mubr.msk.bf16.gmra.mrb[16].mxu0 %vm13052_vm4, %v12746_v16  ;;  %vm13080_vm4 = vmpackc.low %vm968_vm11, %vm15273_vm0  ;;  %vm972_vm11 = vcmp.le.s32.totalorder %v722_v53, 14  ;;  %9441 = vmatmul.mubr.bf16.gmra.mrb[8].mxu1 %v13094_v34  ;;  %vm976_vm12 = vcmp.le.s32.totalorder %v750_v10, 14  ;;  %v11026_v10 = vld [vmem:[#allocation5 + $0x110] sm:$0xff]  }
 0x1e8   : > { %9532 = vmatprep.mubr.msk.bf16.mxu0 %vm13057_vm1, %v12759_v43  ;;  %v15327_v21 = vsel %vm13080_vm4, 4294967295, %v15326_v21  ;;  %vm13085_vm1 = vmpackc.low %vm970_vm5, %vm15273_vm0  ;;  %vm974_vm5 = vcmp.le.s32.totalorder %v736_v14, 14  ;;  %9444 = vmatprep.mubr.bf16.mxu1 %v13101_v49 }
 0x1e9   : > { %15328 = vst [vmem:[#allocation62_spill] sm:$0xff] %v15327_v21  ;;  %v15330_v61 = vsel %vm13085_vm1, 4294967295, %v15329_v61 }
 0x1ea   : > { %15331 = vst [vmem:[#allocation63_spill] sm:$0xff] %v15330_v61 }
 0x1ef   : > { %9533 = vmatmul.mubr.msk.bf16.gmra.mrb[20].mxu0 %vm13080_vm4, %v12774_v9  ;;  %vm13107_vm4 = vmpackc.low %vm972_vm11, %vm15273_vm0  ;;  %vm15341_vm11 = vcmask 1046528   ;;  %9445 = vmatmul.mubr.bf16.gmra.mrb[12].mxu1 %v13123_v12 }
 0x1f0   : > { %9536 = vmatprep.mubr.msk.bf16.mxu0 %vm13085_vm1, %v12789_v28  ;;  %v15334_v23 = vsel %vm13107_vm4, 4294967295, %v15333_v23  ;;  %vm13114_vm1 = vmpackc.low %vm974_vm5, %vm15273_vm0  ;;  %v2253_v53 = vsel %vm15341_vm11, %v15340_v60, %v2252_v18  ;;  %9848 = vmatprep.mubr.bf16.mxu1 %v15343_v4  ;;  %v11027_v60 = vld [vmem:[#allocation5 + $0x118] sm:$0xff]  }
 0x1f1   : > { %15335 = vst [vmem:[#allocation65_spill] sm:$0xff] %v15334_v23  ;;  %v15337_v42 = vsel %vm13114_vm1, 4294967295, %v15336_v42  ;;  %vm15342_vm5 = vmmov %vm15341_vm11  ;;  %v11031_v4 = vld [vmem:[#allocation5 + $0x138] sm:$0xff]  }
 0x1f2   : > { %15338 = vst [vmem:[#allocation66_spill] sm:$0xff] %v15337_v42  ;;  %v2255_v14 = vsel %vm15342_vm5, %v2252_v18, %v15020_v48  ;;  %v11030_v48 = vld [vmem:[#allocation5 + $0x130] sm:$0xff]   ;;  %vm15362_vm5 = vnez %v15361_v30  ;;  %v11033_v30 = vld [vmem:[#allocation5 + $0x148] sm:$0xff]  }
 0x1f3   : > { %v13136_v23 = vpack.c.bf16 %v2255_v14, %v2253_v53  ;;  %v15348_v53 = vld [vmem:[#allocation37_spill] sm:$0xff] }
 0x1f4   : > { %v11032_v14 = vld [vmem:[#allocation5 + $0x140] sm:$0xff]  }
 0x1f7   : > { %9537 = vmatmul.mubr.msk.bf16.gmra.mrb[24].mxu0 %vm13107_vm4, %v12806_v52  ;;  %vm13139_vm4 = vmpackc.low %vm976_vm12, %vm15273_vm0  ;;  %vm15355_vm0 = vnez %v15354_v13  ;;  %v15363_v13 = vld [vmem:[#allocation44_spill] sm:$0xff] }
 0x1f8   : > { %9540 = vmatprep.mubr.msk.bf16.mxu0 %vm13114_vm1, %v12858_v46  ;;  %v15345_v11 = vsel %vm13139_vm4, 4294967295, %v15344_v11 }
 0x1f9   : > { %15346 = vst [vmem:[#allocation68_spill] sm:$0xff] %v15345_v11 }
 0x1ff   : > { %9541 = vmatmul.mubr.msk.bf16.gmra.mrb[28].mxu0 %vm13139_vm4, %v13136_v23 }
 0x200   : > { %9560 = vmatprep.mubr.msk.bf16.mxu0 %vm12486_vm6, %v12505_v35  ;;  %v11028_v35 = vld [vmem:[#allocation5 + $0x120] sm:$0xff]  }
 0x207   : > { %9561 = vmatmul.mubr.msk.bf16.vlgmr.msra.gmra.mrb[0].mxu0 %vm12533_vm9, %v12518_v31 }
 0x208   : > { %9593 = vmatpush3.bf16.msra.mxu0 %v11024_v39  ;;  %9564 = vmatprep.mubr.msk.bf16.mxu0 %vm12542_vm10, %v12586_v63  ;;  %v11029_v39 = vld [vmem:[#allocation5 + $0x128] sm:$0xff]  }
 0x209   : > { %9594 = vmatprep.subr.bf16.mxu0 %v11025_v36 }
 0x20c   : > { %9595 = vmatpush3.bf16.msra.mxu0 %v11025_v36  ;;  %v15356_v36 = vld [vmem:[#allocation41_spill] sm:$0xff] }
 0x20d   : > { %9596 = vmatprep.subr.bf16.mxu0 %v11026_v10 }
 0x20f   : > { %9565 = vmatmul.mubr.msk.bf16.gmra.mrb[4].mxu0 %vm12593_vm13, %v12588_v20 }
 0x210   : > { %9568 = vmatprep.mubr.msk.bf16.mxu0 %vm12604_vm14, %v12634_v7  ;;  %9597 = vmatpush3.bf16.msra.mxu0 %v11026_v10  ;;  %v15351_v10 = vld [vmem:[#allocation40_spill] sm:$0xff] }
 0x211   : > { %9598 = vmatprep.subr.bf16.mxu0 %v11027_v60 }
 0x214   : > { %9599 = vmatpush3.bf16.msra.mxu0 %v11027_v60  ;;  %v15353_v60 = vld [vmem:[#allocation26_spill] sm:$0xff] }
 0x215   : > { %9600 = vmatprep.subr.bf16.mxu0 %v11028_v35 }
 0x217   : > { %9569 = vmatmul.mubr.msk.bf16.gmra.mrb[8].mxu0 %vm12651_vm15, %v15348_v53 }
 0x218   : > { %9572 = vmatprep.mubr.msk.bf16.mxu0 %vm12664_vm2, %v12687_v62  ;;  %9601 = vmatpush3.bf16.msra.mxu0 %v11028_v35  ;;  %v15357_v35 = vld [vmem:[#allocation27_spill] sm:$0xff] }
 0x219   : > { %9602 = vmatprep.subr.bf16.mxu0 %v11029_v39  ;;  %vm15358_vm12 = vnez %v15357_v35 }
 0x21c   : > { %9603 = vmatpush3.bf16.msra.mxu0 %v11029_v39  ;;  %v15359_v39 = vld [vmem:[#allocation42_spill] sm:$0xff] }
 0x21d   : > { %9604 = vmatprep.subr.bf16.mxu0 %v11030_v48  ;;  %vm15360_vm11 = vnez %v15359_v39  ;;  %v15368_v39 = vld [vmem:[#allocation21_spill] sm:$0xff] }
 0x21f   : > { %9573 = vmatmul.mubr.msk.bf16.gmra.mrb[12].mxu0 %vm12729_vm8, %v15351_v10  ;;  %vm15366_vm8 = vnez %v15279_v19  ;;  %v15371_v19 = vld [vmem:[#allocation28_spill] sm:$0xff] }
 0x220   : > { %9576 = vmatprep.mubr.msk.bf16.mxu0 %vm15355_vm0, %v15353_v60  ;;  %9605 = vmatpush3.bf16.msra.mxu0 %v11030_v48  ;;  %vm15364_vm0 = vnez %v15363_v13  ;;  %v15369_v13 = vld [vmem:[#allocation22_spill] sm:$0xff]  ;;  %v11035_v48 = vld [vmem:[#allocation5 + $0x158] sm:$0xff]  }
 0x221   : > { %9606 = vmatprep.subr.bf16.mxu0 %v11031_v4 }
 0x224   : > { %9607 = vmatpush3.bf16.msra.mxu0 %v11031_v4  ;;  %v15367_v4 = vld [vmem:[#allocation20_spill] sm:$0xff] }
 0x225   : > { %9640 = vmatprep.subr.bf16.mxu0 %v11032_v14 }
 0x227   : > { %9577 = vmatmul.mubr.msk.bf16.gmra.mrb[16].mxu0 %vm15358_vm12, %v15356_v36 }
 0x228   : > { %9580 = vmatprep.mubr.msk.bf16.mxu0 %vm15360_vm11, %v12860_v25 }
 0x22f   : > { %9581 = vmatmul.mubr.msk.bf16.gmra.mrb[20].mxu0 %vm15362_vm5, %v12870_v15 }
 0x230   : > { %9584 = vmatprep.mubr.msk.bf16.mxu0 %vm15364_vm0, %v12896_v33  ;;  %v11034_v33 = vld [vmem:[#allocation5 + $0x150] sm:$0xff]   ;;  %vm15380_vm0 = vnez %v15303_v40 }
 0x237   : > { %9585 = vmatmul.mubr.msk.bf16.gmra.mrb[24].mxu0 %vm12899_vm7, %v12903_v45  ;;  %v15370_v45 = vld [vmem:[#allocation23_spill] sm:$0xff] }
 0x238   : > { %9588 = vmatprep.mubr.msk.bf16.mxu0 %vm15366_vm8, %v12929_v32 }
 0x23f   : > { %9589 = vmatmul.mubr.msk.bf16.gmra.mrb[28].mxu0 %vm12932_vm3, %v12980_v24  ;;  %v15372_v24 = vld [vmem:[#allocation30_spill] sm:$0xff] }
 0x240   : > { %9608 = vmatprep.mubr.bf16.mxu0 %v15367_v4  ;;  %v11037_v4 = vld [vmem:[#allocation5 + $0x168] sm:$0xff]  }
 0x247   : > { %9609 = vmatmul.mubr.bf16.vlgmr.msra.gmra.mrb[0].mxu0 %v15368_v39 }
 0x248   : > { %9641 = vmatpush3.bf16.msra.mxu0 %v11032_v14  ;;  %9612 = vmatprep.mubr.bf16.mxu0 %v15369_v13  ;;  %v15373_v14 = vld [vmem:[#allocation31_spill] sm:$0xff] }
 0x249   : > { %9642 = vmatprep.subr.bf16.mxu0 %v11033_v30  ;;  %v11038_v13 = vld [vmem:[#allocation5 + $0x170] sm:$0xff]  }
 0x24c   : > { %9643 = vmatpush3.bf16.msra.mxu0 %v11033_v30  ;;  %v11039_v30 = vld [vmem:[#allocation5 + $0x178] sm:$0xff]  }
 0x24d   : > { %9644 = vmatprep.subr.bf16.mxu0 %v11034_v33 }
 0x24f   : > { %9613 = vmatmul.mubr.bf16.gmra.mrb[4].mxu0 %v15370_v45 }
 0x250   : > { %9616 = vmatprep.mubr.bf16.mxu0 %v15371_v19  ;;  %9645 = vmatpush3.bf16.msra.mxu0 %v11034_v33  ;;  %v11040_v33 = vld [vmem:[#allocation5 + $0x180] sm:$0xff]  }
 0x251   : > { %9646 = vmatprep.subr.bf16.mxu0 %v11035_v48 }
 0x254   : > { %9647 = vmatpush3.bf16.msra.mxu0 %v11035_v48  ;;  %v11041_v48 = vld [vmem:[#allocation5 + $0x188] sm:$0xff]  }
 0x255   : > { %9648 = vmatprep.subr.bf16.mxu0 %v11036_v37 }
 0x257   : > { %9617 = vmatmul.mubr.bf16.gmra.mrb[8].mxu0 %v15372_v24 }
 0x258   : > { %9620 = vmatprep.mubr.bf16.mxu0 %v15373_v14  ;;  %9649 = vmatpush3.bf16.msra.mxu0 %v11036_v37  ;;  %v13211_v37 = vpack.c.bf16 %v12964_v56, %v12950_v0 }
 0x259   : > { %9650 = vmatprep.subr.bf16.mxu0 %v11037_v4 }
 0x25c   : > { %9651 = vmatpush3.bf16.msra.mxu0 %v11037_v4  ;;  %v15376_v4 = vld [vmem:[#allocation52_spill] sm:$0xff] }
 0x25d   : > { %9652 = vmatprep.subr.bf16.mxu0 %v11038_v13  ;;  %vm15377_vm8 = vnez %v15376_v4 }
 0x25f   : > { %9621 = vmatmul.mubr.bf16.gmra.mrb[12].mxu0 %v13018_v26 }
 0x260   : > { %9624 = vmatprep.mubr.bf16.mxu0 %v13038_v5  ;;  %9653 = vmatpush3.bf16.msra.mxu0 %v11038_v13  ;;  %v15374_v13 = vld [vmem:[#allocation51_spill] sm:$0xff] }
 0x261   : > { %9654 = vmatprep.subr.bf16.mxu0 %v11039_v30  ;;  %vm15375_vm3 = vnez %v15374_v13 }
 0x264   : > { %9655 = vmatpush3.bf16.msra.mxu0 %v11039_v30  ;;  %v15378_v30 = vld [vmem:[#allocation53_spill] sm:$0xff] }
 0x265   : > { %9688 = vmatprep.subr.bf16.mxu0 %v11040_v33  ;;  %vm15379_vm7 = vnez %v15378_v30 }
 0x267   : > { %9625 = vmatmul.mubr.bf16.gmra.mrb[16].mxu0 %v13045_v29 }
 0x268   : > { %9628 = vmatprep.mubr.bf16.mxu0 %v13066_v47 }
 0x26f   : > { %9629 = vmatmul.mubr.bf16.gmra.mrb[20].mxu0 %v13073_v59 }
 0x270   : > { %9632 = vmatprep.mubr.bf16.mxu0 %v13094_v34 }
 0x277   : > { %9633 = vmatmul.mubr.bf16.gmra.mrb[24].mxu0 %v13101_v49  ;;  %v11043_v49 = vld [vmem:[#allocation5 + $0x198] sm:$0xff]  }
 0x278   : > { %9636 = vmatprep.mubr.bf16.mxu0 %v13123_v12  ;;  %v11042_v12 = vld [vmem:[#allocation5 + $0x190] sm:$0xff]  }
 0x27f   : > { %9637 = vmatmul.mubr.bf16.gmra.mrb[28].mxu0 %v13211_v37 }
 0x280   : > { %9656 = vmatprep.mubr.msk.bf16.mxu0 %vm15375_vm3, %v15300_v6  ;;  %vm15381_vm3 = vnez %v15306_v27  ;;  %v11044_v6 = vld [vmem:[#allocation5 + $0x1a0] sm:$0xff]   ;;  %v11047_v27 = vld [vmem:[#allocation5 + $0x1b8] sm:$0xff]  }
 0x287   : > { %9657 = vmatmul.mubr.msk.bf16.vlgmr.msra.gmra.mrb[0].mxu0 %vm15377_vm8, %v12438_v51  ;;  %vm15383_vm8 = vnez %v15312_v3 }
 0x288   : > { %9689 = vmatpush3.bf16.msra.mxu0 %v11040_v33  ;;  %9660 = vmatprep.mubr.msk.bf16.mxu0 %vm15379_vm7, %v12445_v2  ;;  %v11045_v33 = vld [vmem:[#allocation5 + $0x1a8] sm:$0xff]   ;;  %vm15382_vm7 = vnez %v15309_v41 }
 0x289   : > { %9690 = vmatprep.subr.bf16.mxu0 %v11041_v48 }
 0x28c   : > { %9691 = vmatpush3.bf16.msra.mxu0 %v11041_v48  ;;  %v11046_v48 = vld [vmem:[#allocation5 + $0x1b0] sm:$0xff]  }
 0x28d   : > { %9692 = vmatprep.subr.bf16.mxu0 %v11042_v12 }
 0x28f   : > { %9661 = vmatmul.mubr.msk.bf16.gmra.mrb[4].mxu0 %vm15380_vm0, %v12476_v57  ;;  %vm15385_vm0 = vnez %v15318_v58 }
 0x290   : > { %9664 = vmatprep.mubr.msk.bf16.mxu0 %vm15381_vm3, %v12503_v44  ;;  %9693 = vmatpush3.bf16.msra.mxu0 %v11042_v12  ;;  %vm15384_vm3 = vnez %v15315_v38  ;;  %v3163_v12 = vrot.slane %v12964_v56, 1 }
 0x291   : > { %9694 = vmatprep.subr.bf16.mxu0 %v11043_v49 }
 0x294   : > { %9695 = vmatpush3.bf16.msra.mxu0 %v11043_v49  ;;  %v11048_v49 = vld [vmem:[#allocation5 + $0x1c0] sm:$0xff]  }
 0x295   : > { %9696 = vmatprep.subr.bf16.mxu0 %v11044_v6 }
 0x297   : > { %9665 = vmatmul.mubr.msk.bf16.gmra.mrb[8].mxu0 %vm15382_vm7, %v12550_v8  ;;  %vm15387_vm7 = vnez %v15324_v54 }
 0x298   : > { %9668 = vmatprep.mubr.msk.bf16.mxu0 %vm15383_vm8, %v12632_v55  ;;  %9697 = vmatpush3.bf16.msra.mxu0 %v11044_v6  ;;  %vm15386_vm8 = vnez %v15321_v22  ;;  %v15392_v6 = vrot.slane %v12950_v0, 1  ;;  %v11050_v0 = vld [vmem:[#allocation5 + $0x1d0] sm:$0xff]  }
 0x299   : > { %9698 = vmatprep.subr.bf16.mxu0 %v11045_v33 }
 0x29c   : > { %9699 = vmatpush3.bf16.msra.mxu0 %v11045_v33 }
 0x29d   : > { %9700 = vmatprep.subr.bf16.mxu0 %v11046_v48 }
 0x29f   : > { %9669 = vmatmul.mubr.msk.bf16.gmra.mrb[12].mxu0 %vm15384_vm3, %v12709_v17  ;;  %vm15388_vm3 = vnez %v15327_v21 }
 0x2a0   : > { %9672 = vmatprep.mubr.msk.bf16.mxu0 %vm15385_vm0, %v12746_v16  ;;  %9701 = vmatpush3.bf16.msra.mxu0 %v11046_v48  ;;  %vm15389_vm0 = vnez %v15330_v61  ;;  %v15394_v48 = vld [vmem:[#allocation49_spill] sm:$0xff] }
 0x2a1   : > { %9702 = vmatprep.subr.bf16.mxu0 %v11047_v27 }
 0x2a4   : > { %9703 = vmatpush3.bf16.msra.mxu0 %v11047_v27  ;;  %v15390_v27 = vld [vmem:[#allocation65_spill] sm:$0xff] }
 0x2a5   : > { %9736 = vmatprep.subr.bf16.mxu0 %v11048_v49  ;;  %vm15391_vm5 = vnez %v15390_v27  ;;  %v11049_v27 = vld [vmem:[#allocation5 + $0x1c8] sm:$0xff]  }
 0x2a7   : > { %9673 = vmatmul.mubr.msk.bf16.gmra.mrb[16].mxu0 %vm15386_vm8, %v12759_v43 }
 0x2a8   : > { %9676 = vmatprep.mubr.msk.bf16.mxu0 %vm15387_vm7, %v12774_v9  ;;  %vm15393_vm7 = vcmask 1046528  }
 0x2a9   : > { %v3164_v33 = vsel %vm15393_vm7, %v15392_v6, %v3163_v12  ;;  %v15400_v6 = vld [vmem:[#allocation24_spill] sm:$0xff] }
 0x2af   : > { %9677 = vmatmul.mubr.msk.bf16.gmra.mrb[20].mxu0 %vm15388_vm3, %v12789_v28  ;;  %vm15395_vm3 = vmmov %vm15393_vm7  ;;  %vm15401_vm7 = vnez %v15400_v6 }
 0x2b0   : > { %9680 = vmatprep.mubr.msk.bf16.mxu0 %vm15389_vm0, %v12806_v52  ;;  %v3165_v21 = vsel %vm15395_vm3, %v3163_v12, %v15394_v48 }
 0x2b1   : > { %v13265_v54 = vpack.c.bf16 %v3165_v21, %v3164_v33  ;;  %v11051_v21 = vld [vmem:[#allocation5 + $0x1d8] sm:$0xff]   ;;  %v15402_v33 = vld [vmem:[#allocation25_spill] sm:$0xff] }
 0x2b2   : > { %vm15403_vm3 = vnez %v15402_v33 }
 0x2b7   : > { %9681 = vmatmul.mubr.msk.bf16.gmra.mrb[24].mxu0 %vm15391_vm5, %v12858_v46 }
 0x2b8   : > { %9684 = vmatprep.mubr.msk.bf16.mxu0 %vm13114_vm1, %v13136_v23 }
 0x2bf   : > { %9685 = vmatmul.mubr.msk.bf16.gmra.mrb[28].mxu0 %vm13139_vm4, %v13265_v54 }
 0x2c0   : > { %9704 = vmatprep.mubr.msk.bf16.mxu0 %vm12486_vm6, %v12518_v31 }
 0x2c7   : > { %9705 = vmatmul.mubr.msk.bf16.vlgmr.msra.gmra.mrb[0].mxu0 %vm12533_vm9, %v12586_v63  ;;  %v11052_v63 = vld [vmem:[#allocation5 + $0x1e0] sm:$0xff]  }
 0x2c8   : > { %9737 = vmatpush3.bf16.msra.mxu0 %v11048_v49  ;;  %9708 = vmatprep.mubr.msk.bf16.mxu0 %vm12542_vm10, %v12588_v20  ;;  %v11053_v49 = vld [vmem:[#allocation5 + $0x1e8] sm:$0xff]  }
 0x2c9   : > { %9738 = vmatprep.subr.bf16.mxu0 %v11049_v27 }
 0x2cc   : > { %9739 = vmatpush3.bf16.msra.mxu0 %v11049_v27 }
 0x2cd   : > { %9740 = vmatprep.subr.bf16.mxu0 %v11050_v0 }
 0x2cf   : > { %9709 = vmatmul.mubr.msk.bf16.gmra.mrb[4].mxu0 %vm12593_vm13, %v12634_v7  ;;  %v11054_v7 = vld [vmem:[#allocation5 + $0x1f0] sm:$0xff]  }
 0x2d0   : > { %9712 = vmatprep.mubr.msk.bf16.mxu0 %vm12604_vm14, %v15348_v53  ;;  %9741 = vmatpush3.bf16.msra.mxu0 %v11050_v0  ;;  %v11055_v53 = vld [vmem:[#allocation5 + $0x1f8] sm:$0xff]   ;;  %v15405_v0 = vld [vmem:[#allocation45_spill] sm:$0xff] }
 0x2d1   : > { %9742 = vmatprep.subr.bf16.mxu0 %v11051_v21 }
 0x2d4   : > { %9743 = vmatpush3.bf16.msra.mxu0 %v11051_v21  ;;  %v15406_v21 = vld [vmem:[#allocation43_spill] sm:$0xff] }
 0x2d5   : > { %9744 = vmatprep.subr.bf16.mxu0 %v11052_v63 }
 0x2d7   : > { %9713 = vmatmul.mubr.msk.bf16.gmra.mrb[8].mxu0 %vm12651_vm15, %v12687_v62  ;;  %v11056_v62 = vld [vmem:[#allocation5 + $0x200] sm:$0xff]  }
 0x2d8   : > { %9716 = vmatprep.mubr.msk.bf16.mxu0 %vm12664_vm2, %v15351_v10  ;;  %9745 = vmatpush3.bf16.msra.mxu0 %v11052_v63  ;;  %v15409_v63 = vld [vmem:[#allocation44_spill] sm:$0xff] }
 0x2d9   : > { %9746 = vmatprep.subr.bf16.mxu0 %v11053_v49 }
 0x2dc   : > { %9747 = vmatpush3.bf16.msra.mxu0 %v11053_v49  ;;  %v15413_v49 = vld [vmem:[#allocation29_spill] sm:$0xff] }
 0x2dd   : > { %9748 = vmatprep.subr.bf16.mxu0 %v11054_v7 }
 0x2df   : > { %9717 = vmatmul.mubr.msk.bf16.gmra.mrb[12].mxu0 %vm15401_vm7, %v15353_v60  ;;  %vm15407_vm7 = vnez %v15406_v21  ;;  %v15408_v60 = vld [vmem:[#allocation47_spill] sm:$0xff] }
 0x2e0   : > { %9720 = vmatprep.mubr.msk.bf16.mxu0 %vm15403_vm3, %v15356_v36  ;;  %9749 = vmatpush3.bf16.msra.mxu0 %v11054_v7  ;;  %vm15410_vm3 = vnez %v15409_v63  ;;  %v15411_v36 = vld [vmem:[#allocation46_spill] sm:$0xff]  ;;  %v15414_v7 = vld [vmem:[#allocation48_spill] sm:$0xff] }
 0x2e1   : > { %9750 = vmatprep.subr.bf16.mxu0 %v11055_v53  ;;  %vm15412_vm2 = vnez %v15411_v36  ;;  %vm15415_vm15 = vnez %v15414_v7  ;;  %v15421_v63 = vld [vmem:[#allocation22_spill] sm:$0xff] }
 0x2e4   : > { %9751 = vmatpush3.bf16.msra.mxu0 %v11055_v53  ;;  %v15417_v53 = vrot.slane %v12964_v56, 7  ;;  %v11059_v56 = vld [vmem:[#allocation5 + $0x218] sm:$0xff]  }
 0x2e5   : > { %9784 = vmatprep.subr.bf16.mxu0 %v11056_v62 }
 0x2e7   : > { %9721 = vmatmul.mubr.msk.bf16.gmra.mrb[16].mxu0 %vm15358_vm12, %v12860_v25  ;;  %v15416_v25 = vld [vmem:[#allocation18_spill] sm:$0xff]  ;;  %vm15433_vm12 = vnez %v15315_v38 }
 0x2e8   : > { %9724 = vmatprep.mubr.msk.bf16.mxu0 %vm15360_vm11, %v12870_v15  ;;  %vm15418_vm11 = vcmask 1040384  }
 0x2e9   : > { %v3473_v15 = vsel %vm15418_vm11, %v15417_v53, %v15416_v25  ;;  %vm15425_vm11 = vnez %v15374_v13 }
 0x2ea   : > { %v8452_v21 = vpack.c.bf16 %v15416_v25, %v3473_v15 }
 0x2ef   : > { %9725 = vmatmul.mubr.msk.bf16.gmra.mrb[20].mxu0 %vm15407_vm7, %v15405_v0  ;;  %v15419_v0 = vld [vmem:[#allocation50_spill] sm:$0xff] }
 0x2f0   : > { %9728 = vmatprep.mubr.msk.bf16.mxu0 %vm15410_vm3, %v15408_v60  ;;  %vm15420_vm7 = vnez %v15419_v0  ;;  %v11057_v60 = vld [vmem:[#allocation5 + $0x208] sm:$0xff]  }
 0x2f7   : > { %9729 = vmatmul.mubr.msk.bf16.gmra.mrb[24].mxu0 %vm15412_vm2, %v12929_v32  ;;  %v11058_v32 = vld [vmem:[#allocation5 + $0x210] sm:$0xff]   ;;  %vm15428_vm2 = vnez %v15303_v40 }
 0x2f8   : > { %9732 = vmatprep.mubr.msk.bf16.mxu0 %vm15415_vm15, %v15413_v49  ;;  %vm15427_vm15 = vnez %v15378_v30  ;;  %v13428_v49 = vld [vmem:[%s462_s22] ss:$0 sm:$0xff]  ;;  %s14724_s22 = scalar_lea.vmem [#allocation10], %s8121_s29  ;;  %s8919_s29 = sshll.u32 %s11720_s21, 12 }
 0x2f9   : > { %s14840_s23 = scalar_lea.hbm %s15663_s27, %s8919_s29  ;;  %s7987_s21 = scalar_lea.sflag [#allocation4], %s11898_s11 }
 0x2ff   : > { %9733 = vmatmul.mubr.msk.bf16.gmra.mrb[28].mxu0 %vm15420_vm7, %v8452_v21  ;;  %v11060_v21 = vld [vmem:[#allocation5 + $0x220] sm:$0xff]   ;;  %vm15426_vm7 = vnez %v15376_v4 }
 0x300   : > { %9752 = vmatprep.mubr.bf16.mxu0 %v15368_v39  ;;  %v11061_v39 = vld [vmem:[#allocation5 + $0x228] sm:$0xff]  }
 0x307   : > { %9753 = vmatmul.mubr.bf16.vlgmr.msra.gmra.mrb[0].mxu0 %v15421_v63 }
 0x308   : > { %9785 = vmatpush3.bf16.msra.mxu0 %v11056_v62  ;;  %9756 = vmatprep.mubr.bf16.mxu0 %v15370_v45  ;;  %v11062_v45 = vld [vmem:[#allocation5 + $0x230] sm:$0xff]   ;;  %v11063_v62 = vld [vmem:[#allocation5 + $0x238] sm:$0xff]  }
 0x309   : > { %9786 = vmatprep.subr.bf16.mxu0 %v11057_v60 }
 0x30c   : > { %9787 = vmatpush3.bf16.msra.mxu0 %v11057_v60 }
 0x30d   : > { %9788 = vmatprep.subr.bf16.mxu0 %v11058_v32 }
 0x30f   : > { %9757 = vmatmul.mubr.bf16.gmra.mrb[4].mxu0 %v15371_v19  ;;  %v15422_v19 = vld [vmem:[#allocation64_spill] sm:$0xff] }
 0x310   : > { %9760 = vmatprep.mubr.bf16.mxu0 %v15372_v24  ;;  %9789 = vmatpush3.bf16.msra.mxu0 %v11058_v32  ;;  %v15423_v24 = vld [vmem:[#allocation67_spill] sm:$0xff] }
 0x311   : > { %9790 = vmatprep.subr.bf16.mxu0 %v11059_v56 }
 0x314   : > { %9791 = vmatpush3.bf16.msra.mxu0 %v11059_v56 }
 0x315   : > { %9792 = vmatprep.subr.bf16.mxu0 %v11060_v21 }
 0x317   : > { %9761 = vmatmul.mubr.bf16.gmra.mrb[8].mxu0 %v15373_v14 }
 0x318   : > { %9764 = vmatprep.mubr.bf16.mxu0 %v13018_v26  ;;  %9793 = vmatpush3.bf16.msra.mxu0 %v11060_v21  ;;  %v15424_v26 = vmov 0.0|0.0  }
 0x319   : > { %9794 = vmatprep.subr.bf16.mxu0 %v11061_v39 }
 0x31c   : > { %9795 = vmatpush3.bf16.msra.mxu0 %v11061_v39 }
 0x31d   : > { %9796 = vmatprep.subr.bf16.mxu0 %v11062_v45 }
 0x31f   : > { %9765 = vmatmul.mubr.bf16.gmra.mrb[12].mxu0 %v13038_v5  ;;  %v15429_v5 = vld [vmem:[#allocation55_spill] sm:$0xff] }
 0x320   : > { %9768 = vmatprep.mubr.bf16.mxu0 %v13045_v29  ;;  %9797 = vmatpush3.bf16.msra.mxu0 %v11062_v45  ;;  %vm15430_vm3 = vnez %v15429_v5 }
 0x321   : > { %9798 = vmatprep.subr.bf16.mxu0 %v11063_v62 }
 0x324   : > { %9799 = vmatpush3.bf16.msra.mxu0 %v11063_v62 }
 0x327   : > { %9769 = vmatmul.mubr.bf16.gmra.mrb[16].mxu0 %v13066_v47 }
 0x328   : > { %9772 = vmatprep.mubr.bf16.mxu0 %v13073_v59 }
 0x32f   : > { %9773 = vmatmul.mubr.bf16.gmra.mrb[20].mxu0 %v13094_v34 }
 0x330   : > { %9776 = vmatprep.mubr.bf16.mxu0 %v15422_v19 }
 0x337   : > { %9777 = vmatmul.mubr.bf16.gmra.mrb[24].mxu0 %v15423_v24 }
 0x338   : > { %9780 = vmatprep.mubr.bf16.mxu0 %v13211_v37 }
 0x33f   : > { %9781 = vmatmul.mubr.bf16.gmra.mrb[28].mxu0 %v15424_v26 }
 0x340   : > { %9800 = vmatprep.mubr.msk.bf16.mxu0 %vm15425_vm11, %v12438_v51  ;;  %vm15431_vm11 = vnez %v15309_v41  ;;  %v15435_v51 = vld [vmem:[#allocation61_spill] sm:$0xff] }
 0x347   : > { %9801 = vmatmul.mubr.msk.bf16.vlgmr.msra.gmra.mrb[0].mxu0 %vm15426_vm7, %v12445_v2  ;;  %vm15432_vm7 = vnez %v15312_v3  ;;  %v15437_v2 = vld [vmem:[#allocation62_spill] sm:$0xff] }
 0x348   : > { %9804 = vmatprep.mubr.msk.bf16.mxu0 %vm15427_vm15, %v12476_v57  ;;  %vm15434_vm15 = vnez %v15318_v58 }
 0x34f   : > { %9805 = vmatmul.mubr.msk.bf16.gmra.mrb[4].mxu0 %vm15428_vm2, %v12503_v44  ;;  %v13385_v44 = vpack.c.bf16 %v15394_v48, %v15394_v48 }
 0x350   : > { %9808 = vmatprep.mubr.msk.bf16.mxu0 %vm15430_vm3, %v12550_v8  ;;  %vm15436_vm3 = vnez %v15435_v51  ;;  %v11401_v8 = vld [vmem:[%s11904_s16] sm:$0xff] }
 0x351   : > { %15440 = vst [vmem:[#allocation37_spill] sm:$0xff] %v13385_v44 }
 0x357   : > { %9809 = vmatmul.mubr.msk.bf16.gmra.mrb[8].mxu0 %vm15431_vm11, %v12632_v55  ;;  %vm15438_vm11 = vnez %v15437_v2  ;;  %v13391_v55 = vpop.f32.mrb[0].mxu1 }
 0x358   : > { %9812 = vmatprep.mubr.msk.bf16.mxu0 %vm15432_vm7, %v12709_v17  ;;  %v13393_v17 = vpop.f32.mrb[1].mxu1 }
 0x35f   : > { %9813 = vmatmul.mubr.msk.bf16.gmra.mrb[12].mxu0 %vm15433_vm12, %v12746_v16  ;;  %v13395_v16 = vpop.f32.mrb[2].mxu1 }
 0x360   : > { %9816 = vmatprep.mubr.msk.bf16.mxu0 %vm15434_vm15, %v12759_v43  ;;  %v13397_v43 = vpop.f32.mrb[3].mxu1 }
 0x367   : > { %9817 = vmatmul.mubr.msk.bf16.gmra.mrb[16].mxu0 %vm15386_vm8, %v12774_v9  ;;  %v13399_v9 = vpop.f32.mrb[4].mxu1 }
 0x368   : > { %9820 = vmatprep.mubr.msk.bf16.mxu0 %vm15436_vm3, %v12789_v28  ;;  %v13401_v28 = vpop.f32.mrb[5].mxu1 }
 0x36f   : > { %9821 = vmatmul.mubr.msk.bf16.gmra.mrb[20].mxu0 %vm15438_vm11, %v12806_v52 }
 0x370   : > { %9824 = vmatprep.mubr.msk.bf16.mxu0 %vm15389_vm0, %v12858_v46  ;;  %v13403_v46 = vpop.f32.mrb[6].mxu1 }
 0x371   : > { %v13405_v52 = vpop.f32.mrb[7].mxu1 }
 0x372   : > { %v13407_v29 = vpop.f32.mrb[8].mxu1 }
 0x377   : > { %9825 = vmatmul.mubr.msk.bf16.gmra.mrb[24].mxu0 %vm15391_vm5, %v13136_v23 }
 0x378   : > { %9828 = vmatprep.mubr.msk.bf16.mxu0 %vm13114_vm1, %v13265_v54  ;;  %v13409_v54 = vpop.f32.mrb[9].mxu1 }
 0x379   : > { %v13411_v47 = vpop.f32.mrb[10].mxu1 }
 0x37a   : > { %v13413_v59 = vpop.f32.mrb[11].mxu1 }
 0x37b   : > { %v13415_v34 = vpop.f32.mrb[12].mxu1 }
 0x37c   : > { %v13417_v23 = vpop.f32.mrb[13].mxu1 }
 0x37d   : > { %v13419_v14 = vpop.f32.mrb[14].mxu1 }
 0x37e   : > { %v13421_v37 = vpop.f32.mrb[15].mxu1 }
 0x37f   : > { %9829 = vmatmul.mubr.msk.bf16.gmra.mrb[28].mxu0 %vm13139_vm4, %v13385_v44 }
 0x380   : > { %10296 = vmatprep.mubr.f32.mxu0 %v11401_v8 }
 0x41a   : > { %v9802_v63 = vpop.f32.mrb[0].mxu0 }
 0x41b   : > { %v4183_v53 = vpop.f32.mrb[1].mxu0  ;;  %v13437_v21 = vadd.f32 %v9802_v63, %v13428_v49 }
 0x41c   : > { %v9803_v15 = vpop.f32.mrb[2].mxu0  ;;  %v13431_v32 = vadd.f32 %v13428_v49, %v4183_v53 }
 0x41d   : > { %v4186_v60 = vpop.f32.mrb[3].mxu0  ;;  %v13442_v45 = vadd.f32 %v9803_v15, %v13428_v49 }
 0x41e   : > { %v13434_v56 = vadd.f32 %v13428_v49, %v4186_v60 }
 0x420   : > { %v4382_v39 = vadd.f32 %v13434_v56, %v13431_v32 }
 0x422   : > { %v4383_v62 = vadd.f32 %v4382_v39, %v13437_v21  ;;  %v9806_v19 = vpop.f32.mrb[4].mxu0 }
 0x423   : > { %v4199_v24 = vpop.f32.mrb[5].mxu0  ;;  %v13454_v11 = vadd.f32 %v9806_v19, %v13428_v49 }
 0x424   : > { %v13446_v8 = vadd.f32 %v13428_v49, %v4199_v24  ;;  %v4384_v53 = vadd.f32 %v4383_v62, %v13442_v45  ;;  %v9807_v60 = vpop.f32.mrb[6].mxu0 }
 0x425   : > { %v4202_v44 = vpop.f32.mrb[7].mxu0  ;;  %v13458_v39 = vadd.f32 %v9807_v60, %v13428_v49 }
 0x426   : > { %v4385_v63 = vadd.f32 %v4384_v53, %v13446_v8  ;;  %v13451_v26 = vadd.f32 %v13428_v49, %v4202_v44 }
 0x428   : > { %v4386_v15 = vadd.f32 %v4385_v63, %v13451_v26 }
 0x42a   : > { %v4387_v24 = vadd.f32 %v4386_v15, %v13454_v11  ;;  %v9810_v42 = vpop.f32.mrb[8].mxu0 }
 0x42b   : > { %v4215_v57 = vpop.f32.mrb[9].mxu0  ;;  %v13470_v63 = vadd.f32 %v9810_v42, %v13428_v49 }
 0x42c   : > { %v13462_v62 = vadd.f32 %v13428_v49, %v4215_v57  ;;  %v4388_v53 = vadd.f32 %v4387_v24, %v13458_v39  ;;  %v9811_v61 = vpop.f32.mrb[10].mxu0 }
 0x42d   : > { %v4218_v44 = vpop.f32.mrb[11].mxu0  ;;  %v13474_v15 = vadd.f32 %v9811_v61, %v13428_v49 }
 0x42e   : > { %v4389_v2 = vadd.f32 %v4388_v53, %v13462_v62  ;;  %v13467_v19 = vadd.f32 %v13428_v49, %v4218_v44 }
 0x430   : > { %v4390_v60 = vadd.f32 %v4389_v2, %v13467_v19 }
 0x432   : > { %v4391_v57 = vadd.f32 %v4390_v60, %v13470_v63  ;;  %v9814_v51 = vpop.f32.mrb[12].mxu0 }
 0x433   : > { %v4231_v22 = vpop.f32.mrb[13].mxu0  ;;  %v13486_v2 = vadd.f32 %v9814_v51, %v13428_v49 }
 0x434   : > { %v13478_v24 = vadd.f32 %v13428_v49, %v4231_v22  ;;  %v4392_v53 = vadd.f32 %v4391_v57, %v13474_v15  ;;  %v9815_v58 = vpop.f32.mrb[14].mxu0 }
 0x435   : > { %v4234_v44 = vpop.f32.mrb[15].mxu0  ;;  %v13492_v57 = vadd.f32 %v9815_v58, %v13428_v49 }
 0x436   : > { %v4393_v38 = vadd.f32 %v4392_v53, %v13478_v24  ;;  %v13483_v42 = vadd.f32 %v13428_v49, %v4234_v44 }
 0x438   : > { %v4394_v61 = vadd.f32 %v4393_v38, %v13483_v42 }
 0x43a   : > { %v4395_v60 = vadd.f32 %v4394_v61, %v13486_v2  ;;  %v9818_v3 = vpop.f32.mrb[16].mxu0 }
 0x43b   : > { %v10392_v22 = vadd.f32 %v9818_v3, %v13391_v55  ;;  %v4247_v41 = vpop.f32.mrb[17].mxu0 }
 0x43c   : > { %v10393_v5 = vadd.f32 %v4247_v41, %v13393_v17  ;;  %v9819_v53 = vpop.f32.mrb[18].mxu0  ;;  %v4396_v38 = vadd.f32 %v4395_v60, %v13492_v57 }
 0x43d   : > { %v10394_v44 = vadd.f32 %v9819_v53, %v13395_v16  ;;  %v4250_v40 = vpop.f32.mrb[19].mxu0  ;;  %v13506_v58 = vadd.f32 %v10392_v22, %v13428_v49 }
 0x43e   : > { %v13497_v51 = vadd.f32 %v10393_v5, %v13428_v49  ;;  %v10395_v61 = vadd.f32 %v4250_v40, %v13397_v43 }
 0x43f   : > { %v13511_v5 = vadd.f32 %v10394_v44, %v13428_v49 }
 0x440   : > { %v4397_v30 = vadd.f32 %v4396_v38, %v13497_v51  ;;  %v13503_v3 = vadd.f32 %v10395_v61, %v13428_v49 }
 0x442   : > { %v4398_v41 = vadd.f32 %v4397_v30, %v13503_v3  ;;  %v9822_v55 = vpop.f32.mrb[20].mxu0 }
 0x443   : > { %v10396_v17 = vadd.f32 %v9822_v55, %v13399_v9  ;;  %v4263_v16 = vpop.f32.mrb[21].mxu0 }
 0x444   : > { %v4399_v60 = vadd.f32 %v4398_v41, %v13506_v58  ;;  %v10397_v40 = vadd.f32 %v4263_v16, %v13401_v28  ;;  %v9823_v43 = vpop.f32.mrb[22].mxu0 }
 0x445   : > { %v10398_v53 = vadd.f32 %v9823_v43, %v13403_v46  ;;  %v4266_v38 = vpop.f32.mrb[23].mxu0  ;;  %v13526_v41 = vadd.f32 %v10396_v17, %v13428_v49 }
 0x446   : > { %v13517_v22 = vadd.f32 %v10397_v40, %v13428_v49  ;;  %v4400_v30 = vadd.f32 %v4399_v60, %v13511_v5  ;;  %v10399_v61 = vadd.f32 %v4266_v38, %v13405_v52 }
 0x447   : > { %v13531_v40 = vadd.f32 %v10398_v53, %v13428_v49 }
 0x448   : > { %v4401_v9 = vadd.f32 %v4400_v30, %v13517_v22  ;;  %v13523_v44 = vadd.f32 %v10399_v61, %v13428_v49 }
 0x44a   : > { %v4402_v28 = vadd.f32 %v4401_v9, %v13523_v44  ;;  %v9826_v55 = vpop.f32.mrb[24].mxu0 }
 0x44b   : > { %v10400_v46 = vadd.f32 %v9826_v55, %v13407_v29  ;;  %v4279_v16 = vpop.f32.mrb[25].mxu0 }
 0x44c   : > { %v4403_v60 = vadd.f32 %v4402_v28, %v13526_v41  ;;  %v10401_v52 = vadd.f32 %v4279_v16, %v13409_v54  ;;  %v9827_v43 = vpop.f32.mrb[26].mxu0 }
 0x44d   : > { %v10402_v38 = vadd.f32 %v9827_v43, %v13411_v47  ;;  %v4282_v30 = vpop.f32.mrb[27].mxu0  ;;  %v13546_v28 = vadd.f32 %v10400_v46, %v13428_v49 }
 0x44e   : > { %v13537_v17 = vadd.f32 %v10401_v52, %v13428_v49  ;;  %v4404_v61 = vadd.f32 %v4403_v60, %v13531_v40  ;;  %v10403_v9 = vadd.f32 %v4282_v30, %v13413_v59 }
 0x44f   : > { %v13551_v52 = vadd.f32 %v10402_v38, %v13428_v49 }
 0x450   : > { %v4405_v29 = vadd.f32 %v4404_v61, %v13537_v17  ;;  %v13543_v53 = vadd.f32 %v10403_v9, %v13428_v49 }
 0x452   : > { %v4406_v54 = vadd.f32 %v4405_v29, %v13543_v53  ;;  %v9830_v55 = vpop.f32.mrb[28].mxu0 }
 0x453   : > { %v10404_v47 = vadd.f32 %v9830_v55, %v13415_v34  ;;  %v4295_v16 = vpop.f32.mrb[29].mxu0 }
 0x454   : > { %v4407_v60 = vadd.f32 %v4406_v54, %v13546_v28  ;;  %v10405_v59 = vadd.f32 %v4295_v16, %v13417_v23  ;;  %v9831_v43 = vpop.f32.mrb[30].mxu0 }
 0x455   : > { %v10406_v30 = vadd.f32 %v9831_v43, %v13419_v14  ;;  %v4298_v61 = vpop.f32.mrb[31].mxu0  ;;  %v13566_v54 = vadd.f32 %v10404_v47, %v13428_v49  ;;  %v15441_v47 = vlaneseq }
 0x456   : > { %v13557_v46 = vadd.f32 %v10405_v59, %v13428_v49  ;;  %v4408_v9 = vadd.f32 %v4407_v60, %v13551_v52  ;;  %v10407_v29 = vadd.f32 %v4298_v61, %v13421_v37 }
 0x457   : > { %v13570_v14 = vadd.f32 %v10406_v30, %v13428_v49 }
 0x458   : > { %v4409_v34 = vadd.f32 %v4408_v9, %v13557_v46  ;;  %v13563_v38 = vadd.f32 %v10407_v29, %v13428_v49  ;;  %v4420_v29 = vand.u32 127, %v15441_v47 }
 0x45a   : > { %v4410_v23 = vadd.f32 %v4409_v34, %v13563_v38  ;;  %v4425_v49 = vand.u32 1, %v4420_v29 }
 0x45c   : > { %v4411_v55 = vadd.f32 %v4410_v23, %v13566_v54  ;;  %vm13577_vm4 = vcmp.lt.s32.totalorder %v4425_v49, 1 }
 0x45e   : > { %v4412_v16 = vadd.f32 %v4411_v55, %v13570_v14 }
 0x460   : > { %v4413_v60 = vrot.slane %v4412_v16, 4 }
 0x462   : > { %v4414_v59 = vadd.f32 %v4413_v60, %v4412_v16 }
 0x464   : > { %v4415_v37 = vrot.slane %v4414_v59, 2 }
 0x466   : > { %v4416_v43 = vadd.f32 %v4415_v37, %v4414_v59  ;;  %v15444_v59 = vld [vmem:[#allocation17_spill] sm:$0xff] }
 0x468   : > { %v4417_v61 = vrot.slane %v4416_v43, 1 }
 0x46a   : > { %v4418_v9 = vadd.f32 %v4417_v61, %v4416_v43 }
 0x46c   : > { %4434 = vrot.lane.b32.xlu0 %v4418_v9, %s11634_s26 }
 0x470   : > { %4437 = vrot.lane.b32.xlu0 %v4418_v9, %s11635_s13 }
 0x4de   : > { %v4435_v30 = vpop.permute.xlu0 %4434 }
 0x4e2   : > { %v4438_v23 = vpop.permute.xlu0 %4437 }
 0x4e3   : > { %v4441_v55 = vsel %vm13577_vm4, %v4435_v30, %v4438_v23 }
 0x4e4   : > { %v4442_v16 = vadd.f32 %v4441_v55, %v4418_v9 }
 0x4e6   : > { %v13583_v60 = vmul.f32 0.001953125, %v4442_v16 }
 0x4e8   : > { %v13587_v37 = vrot.slane %v13583_v60, %v15444_v59 }
 0x4ea   : > { %v4448_v43 = vsub.f32 %v13431_v32, %v13587_v37  ;;  %v4449_v61 = vsub.f32 %v13434_v56, %v13587_v37  ;;  %v4450_v47 = vsub.f32 %v13437_v21, %v13587_v37  ;;  %v4451_v9 = vsub.f32 %v13442_v45, %v13587_v37 }
 0x4eb   : > { %v4452_v30 = vsub.f32 %v13446_v8, %v13587_v37  ;;  %v4453_v16 = vsub.f32 %v13451_v26, %v13587_v37  ;;  %v4454_v0 = vsub.f32 %v13454_v11, %v13587_v37  ;;  %v4456_v35 = vsub.f32 %v13462_v62, %v13587_v37 }
 0x4ec   : > { %v4480_v29 = vmul.f32 %v4448_v43, %v4448_v43  ;;  %v4481_v49 = vmul.f32 %v4449_v61, %v4449_v61  ;;  %v4482_v23 = vmul.f32 %v4450_v47, %v4450_v47  ;;  %v4483_v4 = vmul.f32 %v4451_v9, %v4451_v9 }
 0x4ed   : > { %v4484_v7 = vmul.f32 %v4452_v30, %v4452_v30  ;;  %v4455_v43 = vsub.f32 %v13458_v39, %v13587_v37  ;;  %v4485_v61 = vmul.f32 %v4453_v16, %v4453_v16  ;;  %v4486_v47 = vmul.f32 %v4454_v0, %v4454_v0 }
 0x4ee   : > { %v4512_v55 = vadd.f32 %v4481_v49, %v4480_v29  ;;  %v4457_v49 = vsub.f32 %v13467_v19, %v13587_v37  ;;  %v4488_v30 = vmul.f32 %v4456_v35, %v4456_v35 }
 0x4ef   : > { %v4487_v9 = vmul.f32 %v4455_v43, %v4455_v43 }
 0x4f0   : > { %v4513_v13 = vadd.f32 %v4512_v55, %v4482_v23  ;;  %v4458_v55 = vsub.f32 %v13470_v63, %v13587_v37  ;;  %v4489_v16 = vmul.f32 %v4457_v49, %v4457_v49 }
 0x4f2   : > { %v4514_v36 = vadd.f32 %v4513_v13, %v4483_v4  ;;  %v4459_v4 = vsub.f32 %v13474_v15, %v13587_v37  ;;  %v4490_v0 = vmul.f32 %v4458_v55, %v4458_v55 }
 0x4f4   : > { %v4515_v10 = vadd.f32 %v4514_v36, %v4484_v7  ;;  %v4460_v7 = vsub.f32 %v13478_v24, %v13587_v37  ;;  %v4491_v43 = vmul.f32 %v4459_v4, %v4459_v4 }
 0x4f6   : > { %v4516_v29 = vadd.f32 %v4515_v10, %v4485_v61  ;;  %v4461_v61 = vsub.f32 %v13483_v42, %v13587_v37  ;;  %v4492_v35 = vmul.f32 %v4460_v7, %v4460_v7 }
 0x4f8   : > { %v4517_v23 = vadd.f32 %v4516_v29, %v4486_v47  ;;  %v4462_v29 = vsub.f32 %v13486_v2, %v13587_v37  ;;  %v4493_v49 = vmul.f32 %v4461_v61, %v4461_v61 }
 0x4fa   : > { %v4518_v13 = vadd.f32 %v4517_v23, %v4487_v9  ;;  %v4463_v23 = vsub.f32 %v13492_v57, %v13587_v37  ;;  %v4494_v55 = vmul.f32 %v4462_v29, %v4462_v29 }
 0x4fc   : > { %v4519_v36 = vadd.f32 %v4518_v13, %v4488_v30  ;;  %v4464_v13 = vsub.f32 %v13497_v51, %v13587_v37  ;;  %v4495_v4 = vmul.f32 %v4463_v23, %v4463_v23 }
 0x4fe   : > { %v4520_v10 = vadd.f32 %v4519_v36, %v4489_v16  ;;  %v4465_v36 = vsub.f32 %v13503_v3, %v13587_v37  ;;  %v4496_v7 = vmul.f32 %v4464_v13, %v4464_v13 }
 0x500   : > { %v4521_v47 = vadd.f32 %v4520_v10, %v4490_v0  ;;  %v4466_v10 = vsub.f32 %v13506_v58, %v13587_v37  ;;  %v4497_v61 = vmul.f32 %v4465_v36, %v4465_v36 }
 0x502   : > { %v4522_v9 = vadd.f32 %v4521_v47, %v4491_v43  ;;  %v4467_v47 = vsub.f32 %v13511_v5, %v13587_v37  ;;  %v4498_v29 = vmul.f32 %v4466_v10, %v4466_v10 }
 0x504   : > { %v4523_v30 = vadd.f32 %v4522_v9, %v4492_v35  ;;  %v4468_v9 = vsub.f32 %v13517_v22, %v13587_v37  ;;  %v4499_v23 = vmul.f32 %v4467_v47, %v4467_v47 }
 0x506   : > { %v4524_v16 = vadd.f32 %v4523_v30, %v4493_v49  ;;  %v4469_v30 = vsub.f32 %v13523_v44, %v13587_v37  ;;  %v4500_v13 = vmul.f32 %v4468_v9, %v4468_v9 }
 0x508   : > { %v4525_v0 = vadd.f32 %v4524_v16, %v4494_v55  ;;  %v4470_v16 = vsub.f32 %v13526_v41, %v13587_v37  ;;  %v4501_v36 = vmul.f32 %v4469_v30, %v4469_v30 }
 0x50a   : > { %v4526_v43 = vadd.f32 %v4525_v0, %v4495_v4  ;;  %v4471_v0 = vsub.f32 %v13531_v40, %v13587_v37  ;;  %v4502_v10 = vmul.f32 %v4470_v16, %v4470_v16 }
 0x50c   : > { %v4527_v35 = vadd.f32 %v4526_v43, %v4496_v7  ;;  %v4472_v43 = vsub.f32 %v13537_v17, %v13587_v37  ;;  %v4503_v47 = vmul.f32 %v4471_v0, %v4471_v0 }
 0x50e   : > { %v4528_v49 = vadd.f32 %v4527_v35, %v4497_v61  ;;  %v4473_v35 = vsub.f32 %v13543_v53, %v13587_v37  ;;  %v4504_v9 = vmul.f32 %v4472_v43, %v4472_v43 }
 0x510   : > { %v4529_v55 = vadd.f32 %v4528_v49, %v4498_v29  ;;  %v4474_v49 = vsub.f32 %v13546_v28, %v13587_v37  ;;  %v4505_v30 = vmul.f32 %v4473_v35, %v4473_v35 }
 0x512   : > { %v4530_v4 = vadd.f32 %v4529_v55, %v4499_v23  ;;  %v4475_v55 = vsub.f32 %v13551_v52, %v13587_v37  ;;  %v4506_v16 = vmul.f32 %v4474_v49, %v4474_v49 }
 0x514   : > { %v4531_v7 = vadd.f32 %v4530_v4, %v4500_v13  ;;  %v4476_v4 = vsub.f32 %v13557_v46, %v13587_v37  ;;  %v4507_v0 = vmul.f32 %v4475_v55, %v4475_v55 }
 0x516   : > { %v4532_v61 = vadd.f32 %v4531_v7, %v4501_v36  ;;  %v4477_v7 = vsub.f32 %v13563_v38, %v13587_v37  ;;  %v4508_v43 = vmul.f32 %v4476_v4, %v4476_v4  ;;  %v11064_v4 = vld [vmem:[#allocation7 + $0x40] sm:$0xff]  }
 0x517   : > { %9832 = vmatprep.subr.bf16.mxu1 %v11064_v4 }
 0x518   : > { %v4533_v29 = vadd.f32 %v4532_v61, %v4502_v10  ;;  %v4478_v61 = vsub.f32 %v13566_v54, %v13587_v37  ;;  %v4509_v35 = vmul.f32 %v4477_v7, %v4477_v7  ;;  %9833 = vmatpush3.bf16.msra.mxu1 %v11064_v4  ;;  %v11066_v7 = vld [vmem:[#allocation7 + $0x50] sm:$0xff]  }
 0x51a   : > { %v4534_v23 = vadd.f32 %v4533_v29, %v4503_v47  ;;  %v4479_v29 = vsub.f32 %v13570_v14, %v13587_v37  ;;  %v11065_v37 = vld [vmem:[#allocation7 + $0x48] sm:$0xff]  }
 0x51b   : > { %9834 = vmatprep.subr.bf16.mxu1 %v11065_v37 }
 0x51c   : > { %v4535_v13 = vadd.f32 %v4534_v23, %v4504_v9  ;;  %v4510_v23 = vmul.f32 %v4478_v61, %v4478_v61  ;;  %v4511_v6 = vmul.f32 %v4479_v29, %v4479_v29  ;;  %9835 = vmatpush3.bf16.msra.mxu1 %v11065_v37 }
 0x51d   : > { %9836 = vmatprep.subr.bf16.mxu1 %v11066_v7 }
 0x51e   : > { %v4536_v36 = vadd.f32 %v4535_v13, %v4505_v30 }
 0x520   : > { %v4537_v10 = vadd.f32 %v4536_v36, %v4506_v16  ;;  %9837 = vmatpush3.bf16.msra.mxu1 %v11066_v7 }
 0x522   : > { %v4538_v47 = vadd.f32 %v4537_v10, %v4507_v0  ;;  %v11071_v0 = vld [vmem:[#allocation7 + $0x78] sm:$0xff]   ;;  %v13655_v10 = vld [vmem:[#allocation7] sm:$0xff]  }
 0x524   : > { %v4539_v9 = vadd.f32 %v4538_v47, %v4508_v43 }
 0x526   : > { %v4540_v33 = vadd.f32 %v4539_v9, %v4509_v35 }
 0x528   : > { %v4541_v49 = vadd.f32 %v4540_v33, %v4510_v23  ;;  %v11068_v33 = vld [vmem:[#allocation7 + $0x60] sm:$0xff]  }
 0x52a   : > { %v4542_v30 = vadd.f32 %v4541_v49, %v4511_v6  ;;  %v11067_v6 = vld [vmem:[#allocation7 + $0x58] sm:$0xff]   ;;  %v4380_v49 = vld [vmem:[%s14894_s5] sm:$0x1] }
 0x52b   : > { %9838 = vmatprep.subr.bf16.mxu1 %v11067_v6 }
 0x52c   : > { %v4543_v13 = vrot.slane %v4542_v30, 4  ;;  %9839 = vmatpush3.bf16.msra.mxu1 %v11067_v6 }
 0x52d   : > { %9840 = vmatprep.subr.bf16.mxu1 %v11068_v33 }
 0x52e   : > { %v4544_v27 = vadd.f32 %v4543_v13, %v4542_v30 }
 0x530   : > { %v4545_v20 = vrot.slane %v4544_v27, 2  ;;  %9841 = vmatpush3.bf16.msra.mxu1 %v11068_v33 }
 0x532   : > { %v4546_v55 = vadd.f32 %v4545_v20, %v4544_v27  ;;  %v11069_v20 = vld [vmem:[#allocation7 + $0x68] sm:$0xff]   ;;  %v11070_v27 = vld [vmem:[#allocation7 + $0x70] sm:$0xff]  }
 0x533   : > { %9842 = vmatprep.subr.bf16.mxu1 %v11069_v20 }
 0x534   : > { %v4547_v16 = vrot.slane %v4546_v55, 1  ;;  %9843 = vmatpush3.bf16.msra.mxu1 %v11069_v20 }
 0x535   : > { %9844 = vmatprep.subr.bf16.mxu1 %v11070_v27 }
 0x536   : > { %v4548_v36 = vadd.f32 %v4547_v16, %v4546_v55  ;;  %v4381_v55 = vld [vmem:[%s14895_s6] sm:$0x1] }
 0x538   : > { %4550 = vrot.lane.b32.xlu1 %v4548_v36, %s11634_s26  ;;  %9845 = vmatpush3.bf16.msra.mxu1 %v11070_v27  ;;  %s8000_s26 = sshll.u32 %s14724_s22, 4  ;;  %s14842_s26 = int_to_ptr.vmem [resolvable:$true] %s8000_s26 }
 0x539   : > { %9846 = vmatprep.subr.bf16.mxu1 %v11071_v0  ;;  %s11547_s25 = scalar_lea.vmem %s14842_s26, 4096 }
 0x53a   : > { %p11548_p3 = scmp.ne.s32.totalorder %s14842_s26, %s11547_s25 }
 0x53c   : > { %4553 = vrot.lane.b32.xlu1 %v4548_v36, %s11635_s13  ;;  %9847 = vmatpush3.bf16.msra.mxu1 %v11071_v0  ;;  %p11549_p7 = pnand %p11548_p3, %p11847_p5 }
 0x53d   : > { %9880 = vmatprep.subr.bf16.mxu1 %v13655_v10 }
 0x53e   : > { %p11550_p12 = pneg %p11549_p7 }
 0x5aa   : > { %v4551_v61 = vpop.permute.xlu1 %4550 }
 0x5ae   : > { %v4554_v43 = vpop.permute.xlu1 %4553 }
 0x5af   : > { %v4556_v47 = vsel %vm13577_vm4, %v4551_v61, %v4554_v43  ;;  %vm15448_vm4 = vcmask 1046528  }
 0x5b0   : > { %v4557_v29 = vadd.f32 %v4556_v47, %v4548_v36  ;;  %vm15464_vm1 = vmmov %vm15448_vm4 }
 0x5b1   : > { %vm15465_vm5 = vmmov %vm15464_vm1 }
 0x5b2   : > { %v4558_v35 = vmul.f32 0.001953125, %v4557_v29  ;;  %vm15466_vm0 = vmmov %vm15464_vm1 }
 0x5b3   : > { %vm15468_vm11 = vmmov %vm15466_vm0 }
 0x5b4   : > { %v4559_v9 = vadd.f32 1e-05, %v4558_v35  ;;  %vm15470_vm3 = vmmov %vm15466_vm0 }
 0x5b6   : > { %11266 = vrsqrt.f32 %v4559_v9 }
 0x5c0   : > { %v11267_v23 = vpop.eup %11266 }
 0x5c1   : > { %v4561_v30 = vmul.f32 %v11267_v23, %v4380_v49 }
 0x5c3   : > { %v4598_v13 = vmul.f32 %v4561_v30, %v13583_v60  ;;  %v13668_v34 = vrot.slane %v4561_v30, %v15444_v59 }
 0x5c5   : > { %v4599_v16 = vsub.f32 %v4381_v55, %v4598_v13  ;;  %v4566_v4 = vmul.f32 %v13668_v34, %v13431_v32  ;;  %v4567_v37 = vmul.f32 %v13668_v34, %v13434_v56  ;;  %v4568_v60 = vmul.f32 %v13668_v34, %v13437_v21 }
 0x5c6   : > { %v4596_v7 = vmul.f32 %v13668_v34, %v13566_v54  ;;  %v4597_v6 = vmul.f32 %v13668_v34, %v13570_v14  ;;  %v4570_v56 = vmul.f32 %v13668_v34, %v13446_v8  ;;  %v4571_v20 = vmul.f32 %v13668_v34, %v13451_v26 }
 0x5c7   : > { %v13671_v36 = vrot.slane %v4599_v16, %v15444_v59  ;;  %v4569_v59 = vmul.f32 %v13668_v34, %v13442_v45  ;;  %v4572_v27 = vmul.f32 %v13668_v34, %v13454_v11  ;;  %v4573_v61 = vmul.f32 %v13668_v34, %v13458_v39 }
 0x5c8   : > { %v4574_v26 = vmul.f32 %v13668_v34, %v13462_v62  ;;  %v4575_v35 = vmul.f32 %v13668_v34, %v13467_v19  ;;  %v4576_v23 = vmul.f32 %v13668_v34, %v13470_v63  ;;  %v4577_v30 = vmul.f32 %v13668_v34, %v13474_v15 }
 0x5c9   : > { %v13684_v33 = vadd.f32 %v13671_v36, %v4566_v4  ;;  %v13689_v32 = vadd.f32 %v13671_v36, %v4567_v37  ;;  %v13694_v21 = vadd.f32 %v13671_v36, %v4568_v60  ;;  %v13697_v54 = vadd.f32 %v13671_v36, %v4596_v7 }
 0x5ca   : > { %v13700_v14 = vadd.f32 %v13671_v36, %v4597_v6  ;;  %v13705_v45 = vadd.f32 %v13671_v36, %v4569_v59  ;;  %v13710_v8 = vadd.f32 %v13671_v36, %v4570_v56  ;;  %v13716_v43 = vadd.f32 %v13671_v36, %v4571_v20 }
 0x5cb   : > { %15445 = vst [vmem:[#allocation40_spill] sm:$0xff] %v13697_v54  ;;  %v8519_v0 = vmul.f32 -1.442695, %v13684_v33  ;;  %v8520_v47 = vmul.f32 -1.442695, %v13689_v32  ;;  %v13722_v29 = vadd.f32 %v13671_v36, %v4572_v27  ;;  %v13728_v9 = vadd.f32 %v13671_v36, %v4573_v61 }
 0x5cc   : > { %v8521_v11 = vmul.f32 -1.442695, %v13694_v21  ;;  %v8522_v39 = vmul.f32 -1.442695, %v13705_v45  ;;  %v13734_v49 = vadd.f32 %v13671_v36, %v4574_v26  ;;  %v8523_v62 = vmul.f32 -1.442695, %v13710_v8 }
 0x5cd   : > { %11268 = vpow2.f32 %v8519_v0  ;;  %v13740_v13 = vadd.f32 %v13671_v36, %v4575_v35  ;;  %v8524_v19 = vmul.f32 -1.442695, %v13716_v43  ;;  %v4578_v55 = vmul.f32 %v13668_v34, %v13478_v24 }
 0x5ce   : > { %11270 = vpow2.f32 %v8520_v47  ;;  %v13746_v63 = vadd.f32 %v13671_v36, %v4576_v23  ;;  %v8525_v16 = vmul.f32 -1.442695, %v13722_v29  ;;  %v4579_v4 = vmul.f32 %v13668_v34, %v13483_v42 }
 0x5cf   : > { %11272 = vpow2.f32 %v8521_v11  ;;  %v13752_v15 = vadd.f32 %v13671_v36, %v4577_v30  ;;  %v8526_v37 = vmul.f32 -1.442695, %v13728_v9  ;;  %v4580_v60 = vmul.f32 %v13668_v34, %v13486_v2 }
 0x5d0   : > { %11274 = vpow2.f32 %v8522_v39  ;;  %v13758_v24 = vadd.f32 %v13671_v36, %v4578_v55  ;;  %v8527_v7 = vmul.f32 -1.442695, %v13734_v49  ;;  %v4581_v6 = vmul.f32 %v13668_v34, %v13492_v57 }
 0x5d1   : > { %11276 = vpow2.f32 %v8523_v62  ;;  %v13764_v42 = vadd.f32 %v13671_v36, %v4579_v4  ;;  %v8528_v59 = vmul.f32 -1.442695, %v13740_v13  ;;  %v4582_v56 = vmul.f32 %v13668_v34, %v13497_v51 }
 0x5d2   : > { %11278 = vpow2.f32 %v8524_v19  ;;  %v13770_v2 = vadd.f32 %v13671_v36, %v4580_v60  ;;  %v8529_v20 = vmul.f32 -1.442695, %v13746_v63  ;;  %v4583_v27 = vmul.f32 %v13668_v34, %v13503_v3 }
 0x5d3   : > { %11280 = vpow2.f32 %v8525_v16  ;;  %v13776_v57 = vadd.f32 %v13671_v36, %v4581_v6  ;;  %v8530_v0 = vmul.f32 -1.442695, %v13752_v15  ;;  %v4584_v61 = vmul.f32 %v13668_v34, %v13506_v58 }
 0x5d4   : > { %11282 = vpow2.f32 %v8526_v37  ;;  %v13782_v51 = vadd.f32 %v13671_v36, %v4582_v56  ;;  %v8531_v47 = vmul.f32 -1.442695, %v13758_v24  ;;  %v4585_v26 = vmul.f32 %v13668_v34, %v13511_v5 }
 0x5d5   : > { %11284 = vpow2.f32 %v8527_v7  ;;  %v13788_v3 = vadd.f32 %v13671_v36, %v4583_v27  ;;  %v8532_v11 = vmul.f32 -1.442695, %v13764_v42  ;;  %v4586_v39 = vmul.f32 %v13668_v34, %v13517_v22 }
 0x5d6   : > { %11286 = vpow2.f32 %v8528_v59  ;;  %v13794_v58 = vadd.f32 %v13671_v36, %v4584_v61  ;;  %v8533_v23 = vmul.f32 -1.442695, %v13770_v2  ;;  %v4587_v5 = vmul.f32 %v13668_v34, %v13523_v44 }
 0x5d7   : > { %v11269_v35 = vpop.eup %11268  ;;  %11288 = vpow2.f32 %v8529_v20  ;;  %v13800_v30 = vadd.f32 %v13671_v36, %v4585_v26  ;;  %v8534_v19 = vmul.f32 -1.442695, %v13776_v57  ;;  %v4588_v22 = vmul.f32 %v13668_v34, %v13526_v41 }
 0x5d8   : > { %v11271_v62 = vpop.eup %11270  ;;  %11290 = vpow2.f32 %v8530_v0  ;;  %v13806_v16 = vadd.f32 %v13671_v36, %v4586_v39  ;;  %v8535_v4 = vmul.f32 -1.442695, %v13782_v51  ;;  %v4589_v44 = vmul.f32 %v13668_v34, %v13531_v40 }
 0x5d9   : > { %v11273_v55 = vpop.eup %11272  ;;  %11292 = vpow2.f32 %v8531_v47  ;;  %v13812_v60 = vadd.f32 %v13671_v36, %v4587_v5  ;;  %v8536_v7 = vmul.f32 -1.442695, %v13788_v3  ;;  %v4590_v41 = vmul.f32 %v13668_v34, %v13537_v17 }
 0x5da   : > { %v11275_v37 = vpop.eup %11274  ;;  %11294 = vpow2.f32 %v8532_v11  ;;  %v13818_v59 = vadd.f32 %v13671_v36, %v4588_v22  ;;  %v8537_v56 = vmul.f32 -1.442695, %v13794_v58  ;;  %v4591_v40 = vmul.f32 %v13668_v34, %v13543_v53 }
 0x5db   : > { %v11277_v6 = vpop.eup %11276  ;;  %11296 = vpow2.f32 %v8533_v23  ;;  %v13824_v27 = vadd.f32 %v13671_v36, %v4589_v44  ;;  %v8538_v0 = vmul.f32 -1.442695, %v13800_v30  ;;  %v4592_v17 = vmul.f32 %v13668_v34, %v13546_v28 }
 0x5dc   : > { %v11279_v20 = vpop.eup %11278  ;;  %11298 = vpow2.f32 %v8534_v19  ;;  %v13830_v47 = vadd.f32 %v13671_v36, %v4590_v41  ;;  %v8539_v26 = vmul.f32 -1.442695, %v13806_v16  ;;  %v4593_v53 = vmul.f32 %v13668_v34, %v13551_v52 }
 0x5dd   : > { %v11281_v61 = vpop.eup %11280  ;;  %11300 = vpow2.f32 %v8535_v4  ;;  %v13836_v39 = vadd.f32 %v13671_v36, %v4591_v40  ;;  %v8540_v23 = vmul.f32 -1.442695, %v13812_v60  ;;  %v13840_v19 = vadd.f32 %v13671_v36, %v4592_v17 }
 0x5de   : > { %v11283_v11 = vpop.eup %11282  ;;  %11302 = vpow2.f32 %v8536_v7  ;;  %v8541_v28 = vmul.f32 -1.442695, %v13818_v59  ;;  %v13844_v4 = vadd.f32 %v13671_v36, %v4593_v53  ;;  %v8542_v52 = vmul.f32 -1.442695, %v13824_v27 }
 0x5df   : > { %v11285_v5 = vpop.eup %11284  ;;  %11304 = vpow2.f32 %v8537_v56  ;;  %v8543_v7 = vmul.f32 -1.442695, %v13830_v47  ;;  %v8544_v40 = vmul.f32 -1.442695, %v13836_v39  ;;  %v8545_v56 = vmul.f32 -1.442695, %v13840_v19 }
 0x5e0   : > { %v11287_v22 = vpop.eup %11286  ;;  %11306 = vpow2.f32 %v8538_v0  ;;  %v8546_v53 = vmul.f32 -1.442695, %v13844_v4  ;;  %v4734_v0 = vadd.f32 1.0, %v11269_v35  ;;  %v4737_v1 = vadd.f32 1.0, %v11275_v37 }
 0x5e1   : > { %v11289_v44 = vpop.eup %11288  ;;  %11308 = vpow2.f32 %v8539_v26  ;;  %v4735_v26 = vadd.f32 1.0, %v11271_v62  ;;  %v4738_v62 = vadd.f32 1.0, %v11277_v6  ;;  %v4740_v48 = vadd.f32 1.0, %v11281_v61 }
 0x5e2   : > { %v11291_v41 = vpop.eup %11290  ;;  %11310 = vpow2.f32 %v8540_v23  ;;  %v4594_v23 = vmul.f32 %v13668_v34, %v13557_v46 }
 0x5e3   : > { %v11293_v17 = vpop.eup %11292  ;;  %11312 = vpow2.f32 %v8541_v28  ;;  %v4736_v28 = vadd.f32 1.0, %v11273_v55  ;;  %v4739_v55 = vadd.f32 1.0, %v11279_v20 }
 0x5e4   : > { %v11295_v31 = vpop.eup %11294  ;;  %11314 = vpow2.f32 %v8542_v52  ;;  %v4595_v52 = vmul.f32 %v13668_v34, %v13563_v38  ;;  %v13864_v35 = vadd.f32 %v13671_v36, %v4594_v23  ;;  %v4741_v34 = vadd.f32 1.0, %v11283_v11 }
 0x5e5   : > { %v11297_v12 = vpop.eup %11296  ;;  %11316 = vpow2.f32 %v8543_v7  ;;  %v4743_v11 = vadd.f32 1.0, %v11287_v22 }
 0x5e6   : > { %v13851_v18 = vpop.eup %11298  ;;  %11318 = vpow2.f32 %v8544_v40  ;;  %15446 = vst [vmem:[#allocation26_spill] sm:$0xff] %v13864_v35  ;;  %v13869_v46 = vadd.f32 %v13671_v36, %v4595_v52  ;;  %v8547_v6 = vmul.f32 -1.442695, %v13864_v35  ;;  %v8550_v35 = vmul.f32 -1.442695, %v13700_v14 }
 0x5e7   : > { %v13853_v50 = vpop.eup %11300  ;;  %11320 = vpow2.f32 %v8545_v56 }
 0x5e8   : > { %v13857_v25 = vpop.eup %11302  ;;  %11322 = vpow2.f32 %v8546_v53  ;;  %v8548_v36 = vmul.f32 -1.442695, %v13869_v46 }
 0x5e9   : > { %v13861_v7 = vpop.eup %11304  ;;  %11324 = vrcp.f32 %v4734_v0  ;;  %v8549_v0 = vmul.f32 -1.442695, %v13697_v54  ;;  %v4747_v54 = vadd.f32 1.0, %v11295_v31 }
 0x5ea   : > { %v13866_v40 = vpop.eup %11306  ;;  %11326 = vrcp.f32 %v4735_v26  ;;  %v4742_v26 = vadd.f32 1.0, %v11285_v5 }
 0x5eb   : > { %v13871_v56 = vpop.eup %11308  ;;  %11328 = vrcp.f32 %v4736_v28  ;;  %v4744_v28 = vadd.f32 1.0, %v11289_v44 }
 0x5ec   : > { %v13873_v38 = vpop.eup %11310  ;;  %11330 = vrcp.f32 %v4737_v1 }
 0x5ed   : > { %v13875_v37 = vpop.eup %11312  ;;  %11332 = vrcp.f32 %v4738_v62  ;;  %v4745_v62 = vadd.f32 1.0, %v11291_v41 }
 0x5ee   : > { %v13878_v53 = vpop.eup %11314  ;;  %11334 = vrcp.f32 %v4739_v55 }
 0x5ef   : > { %v13881_v20 = vpop.eup %11316  ;;  %11336 = vrcp.f32 %v4740_v48 }
 0x5f0   : > { %v13884_v61 = vpop.eup %11318  ;;  %11338 = vrcp.f32 %v4741_v34  ;;  %v4746_v34 = vadd.f32 1.0, %v11293_v17  ;;  %v11073_v17 = vld [vmem:[#allocation7 + $0x8] sm:$0xff]  }
 0x5f1   : > { %v13886_v1 = vpop.eup %11320  ;;  %11340 = vpow2.f32 %v8547_v6 }
 0x5f2   : > { %v13888_v23 = vpop.eup %11322  ;;  %11342 = vpow2.f32 %v8548_v36  ;;  %v4748_v36 = vadd.f32 1.0, %v11297_v12  ;;  %v4750_v12 = vadd.f32 1.0, %v13853_v50 }
 0x5f3   : > { %v11325_v52 = vpop.eup %11324  ;;  %11344 = vpow2.f32 %v8549_v0 }
 0x5f4   : > { %v11327_v55 = vpop.eup %11326  ;;  %11346 = vrcp.f32 %v4742_v26  ;;  %v13892_v48 = vmul.f32 %v11325_v52, %v13684_v33  ;;  %v4751_v52 = vadd.f32 1.0, %v13857_v25 }
 0x5f5   : > { %v11329_v5 = vpop.eup %11328  ;;  %11348 = vrcp.f32 %v4743_v11  ;;  %v13895_v6 = vmul.f32 %v11327_v55, %v13689_v32  ;;  %v4749_v32 = vadd.f32 1.0, %v13851_v18  ;;  %v4753_v55 = vadd.f32 1.0, %v13866_v40 }
 0x5f6   : > { %v11331_v22 = vpop.eup %11330  ;;  %11350 = vrcp.f32 %v4744_v28  ;;  %v13898_v44 = vmul.f32 %v11329_v5, %v13694_v21  ;;  %v4756_v40 = vadd.f32 1.0, %v13875_v37 }
 0x5f7   : > { %v11333_v41 = vpop.eup %11332  ;;  %11352 = vrcp.f32 %v4745_v62  ;;  %v5496_v0 = vrot.slane %v13895_v6, 1  ;;  %v13903_v33 = vpack.c.bf16 %v13895_v6, %v13892_v48  ;;  %v13907_v31 = vmul.f32 %v11331_v22, %v13705_v45 }
 0x5f8   : > { %v11335_v26 = vpop.eup %11334  ;;  %11354 = vpow2.f32 %v8550_v35  ;;  %v5498_v21 = vrot.slane %v13898_v44, 1  ;;  %v4752_v35 = vadd.f32 1.0, %v13861_v7  ;;  %v13927_v25 = vmul.f32 %v11333_v41, %v13710_v8 }
 0x5f9   : > { %v11337_v11 = vpop.eup %11336  ;;  %11356 = vrcp.f32 %v4746_v34  ;;  %9849 = vmatmul.mubr.bf16.vlgmr.msra.gmra.mrb[16].mxu1 %v13903_v33  ;;  %v13916_v18 = vpack.c.bf16 %v13907_v31, %v13898_v44  ;;  %v4754_v8 = vadd.f32 1.0, %v13871_v56 }
 0x5fa   : > { %v11339_v28 = vpop.eup %11338  ;;  %11358 = vrcp.f32 %v4747_v54  ;;  %9881 = vmatpush3.bf16.msra.mxu1 %v13655_v10  ;;  %v13923_v45 = vsel %vm15448_vm4, %v5496_v0, %v5498_v21  ;;  %v13930_v10 = vmul.f32 %v11335_v26, %v13716_v43  ;;  %v11074_v54 = vld [vmem:[#allocation7 + $0x10] sm:$0xff]   ;;  %v13935_v5 = vmul.f32 %v11337_v11, %v13722_v29 }
 0x5fb   : > { %15447 = vst [vmem:[#allocation41_spill] sm:$0xff] %v13916_v18  ;;  %v11341_v50 = vpop.eup %11340  ;;  %11360 = vrcp.f32 %v4748_v36  ;;  %9882 = vmatprep.subr.bf16.mxu1 %v11073_v17  ;;  %9852 = vmatprep.mubr.bf16.mxu1 %v13916_v18  ;;  %v13938_v7 = vmul.f32 %v11339_v28, %v13728_v9  ;;  %v4755_v43 = vadd.f32 1.0, %v13873_v38  ;;  %v11075_v9 = vld [vmem:[#allocation7 + $0x18] sm:$0xff]   ;;  %v4757_v26 = vadd.f32 1.0, %v13878_v53 }
 0x5fc   : > { %v11343_v62 = vpop.eup %11342  ;;  %11362 = vrcp.f32 %v4749_v32  ;;  %v13945_v29 = vpack.c.bf16 %v13930_v10, %v13927_v25  ;;  %v4759_v32 = vadd.f32 1.0, %v13884_v61  ;;  %v4760_v53 = vadd.f32 1.0, %v13886_v1 }
 0x5fd   : > { %v11345_v34 = vpop.eup %11344  ;;  %11364 = vrcp.f32 %v4750_v12  ;;  %v13950_v56 = vpack.c.bf16 %v13938_v7, %v13935_v5 }
 0x5fe   : > { %v11347_v22 = vpop.eup %11346  ;;  %11366 = vrcp.f32 %v4751_v52  ;;  %9883 = vmatpush3.bf16.msra.mxu1 %v11073_v17  ;;  %15449 = vst [vmem:[#allocation20_spill] sm:$0xff] %v13945_v29  ;;  %v4758_v17 = vadd.f32 1.0, %v13881_v20  ;;  %v11076_v20 = vld [vmem:[#allocation7 + $0x20] sm:$0xff]  }
 0x5ff   : > { %v11349_v41 = vpop.eup %11348  ;;  %11368 = vrcp.f32 %v4752_v35  ;;  %9884 = vmatprep.subr.bf16.mxu1 %v11074_v54  ;;  %15450 = vst [vmem:[#allocation21_spill] sm:$0xff] %v13950_v56  ;;  %v13958_v12 = vmul.f32 %v11347_v22, %v13734_v49  ;;  %v4761_v35 = vadd.f32 1.0, %v13888_v23  ;;  %v4763_v49 = vadd.f32 1.0, %v11343_v62  ;;  %v11077_v23 = vld [vmem:[#allocation7 + $0x28] sm:$0xff]  }
 0x600   : > { %v11351_v36 = vpop.eup %11350  ;;  %11370 = vrcp.f32 %v4753_v55  ;;  %v13961_v28 = vmul.f32 %v11349_v41, %v13740_v13 }
 0x601   : > { %v11353_v38 = vpop.eup %11352  ;;  %11372 = vrcp.f32 %v4754_v8  ;;  %9853 = vmatmul.mubr.bf16.gmra.mrb[20].mxu1 %v13945_v29  ;;  %v13965_v61 = vmul.f32 %v11351_v36, %v13746_v63  ;;  %v4762_v8 = vadd.f32 1.0, %v11341_v50  ;;  %v11078_v36 = vld [vmem:[#allocation7 + $0x30] sm:$0xff]  }
 0x602   : > { %v11355_v37 = vpop.eup %11354  ;;  %11374 = vrcp.f32 %v4755_v43  ;;  %9856 = vmatprep.mubr.bf16.mxu1 %v13950_v56  ;;  %9885 = vmatpush3.bf16.msra.mxu1 %v11074_v54  ;;  %v13968_v54 = vmul.f32 %v11353_v38, %v13752_v15  ;;  %v13972_v22 = vpack.c.bf16 %v13961_v28, %v13958_v12  ;;  %v4764_v43 = vadd.f32 1.0, %v11345_v34 }
 0x603   : > { %v11357_v11 = vpop.eup %11356  ;;  %11376 = vrcp.f32 %v4756_v40  ;;  %9886 = vmatprep.subr.bf16.mxu1 %v11075_v9  ;;  %v4765_v62 = vadd.f32 1.0, %v11355_v37 }
 0x604   : > { %v11359_v52 = vpop.eup %11358  ;;  %11378 = vrcp.f32 %v4757_v26  ;;  %15451 = vst [vmem:[#allocation23_spill] sm:$0xff] %v13972_v22  ;;  %v13976_v15 = vpack.c.bf16 %v13968_v54, %v13965_v61 }
 0x605   : > { %v11361_v1 = vpop.eup %11360  ;;  %11380 = vrcp.f32 %v4758_v17  ;;  %v13984_v34 = vmul.f32 %v11359_v52, %v13764_v42  ;;  %v11079_v42 = vld [vmem:[#allocation7 + $0x38] sm:$0xff]  }
 0x606   : > { %v11363_v55 = vpop.eup %11362  ;;  %11382 = vrcp.f32 %v4759_v32  ;;  %9887 = vmatpush3.bf16.msra.mxu1 %v11075_v9  ;;  %15452 = vst [vmem:[#allocation28_spill] sm:$0xff] %v13976_v15  ;;  %v13981_v9 = vmul.f32 %v11357_v11, %v13758_v24  ;;  %v13987_v38 = vmul.f32 %v11361_v1, %v13770_v2 }
 0x607   : > { %v11365_v13 = vpop.eup %11364  ;;  %11384 = vrcp.f32 %v4760_v53  ;;  %9888 = vmatprep.subr.bf16.mxu1 %v11076_v20  ;;  %v13990_v17 = vmul.f32 %v11363_v55, %v13776_v57 }
 0x608   : > { %v11367_v63 = vpop.eup %11366  ;;  %11386 = vrcp.f32 %v4761_v35  ;;  %v13994_v24 = vpack.c.bf16 %v13984_v34, %v13981_v9  ;;  %v14003_v52 = vmul.f32 %v11365_v13, %v13782_v51 }
 0x609   : > { %v11369_v41 = vpop.eup %11368  ;;  %9857 = vmatmul.mubr.bf16.gmra.mrb[24].mxu1 %v13972_v22  ;;  %11388 = vrcp.f32 %v4763_v49  ;;  %v14006_v35 = vmul.f32 %v11367_v63, %v13788_v3 }
 0x60a   : > { %v11371_v40 = vpop.eup %11370  ;;  %9860 = vmatprep.mubr.bf16.mxu1 %v13976_v15  ;;  %9889 = vmatpush3.bf16.msra.mxu1 %v11076_v20  ;;  %11390 = vrcp.f32 %v4762_v8  ;;  %15453 = vst [vmem:[#allocation30_spill] sm:$0xff] %v13994_v24  ;;  %v13998_v20 = vpack.c.bf16 %v13990_v17, %v13987_v38  ;;  %v14009_v1 = vmul.f32 %v11369_v41, %v13794_v58 }
 0x60b   : > { %v11373_v50 = vpop.eup %11372  ;;  %9890 = vmatprep.subr.bf16.mxu1 %v11077_v23  ;;  %11392 = vrcp.f32 %v4764_v43  ;;  %v14012_v55 = vmul.f32 %v11371_v40, %v13800_v30  ;;  %v15090_v43 = vrot.slane %v13892_v48, 1  ;;  %v15461_v40 = vld [vmem:[#allocation26_spill] sm:$0xff] }
 0x60c   : > { %v11375_v26 = vpop.eup %11374  ;;  %11394 = vrcp.f32 %v4765_v62  ;;  %15454 = vst [vmem:[#allocation31_spill] sm:$0xff] %v13998_v20  ;;  %v14015_v49 = vmul.f32 %v11373_v50, %v13806_v16 }
 0x60d   : > { %v11377_v37 = vpop.eup %11376  ;;  %v14018_v8 = vmul.f32 %v11375_v26, %v13812_v60  ;;  %v5500_v26 = vrot.slane %v13907_v31, 1 }
 0x60e   : > { %v11379_v32 = vpop.eup %11378  ;;  %9891 = vmatpush3.bf16.msra.mxu1 %v11077_v23  ;;  %v14020_v23 = vld [vmem:[#allocation7 + $0x80] sm:$0xff]   ;;  %v14023_v3 = vmul.f32 %v11377_v37, %v13818_v59  ;;  %v15462_v37 = vld [vmem:[#allocation40_spill] sm:$0xff] }
 0x60f   : > { %v11381_v53 = vpop.eup %11380  ;;  %9892 = vmatprep.subr.bf16.mxu1 %v11078_v36  ;;  %v14026_v13 = vmul.f32 %v11379_v32, %v13824_v27  ;;  %v14043_v27 = vpack.c.bf16 %v14006_v35, %v14003_v52 }
 0x610   : > { %v11383_v11 = vpop.eup %11382  ;;  %v14029_v58 = vmul.f32 %v11381_v53, %v13830_v47 }
 0x611   : > { %v11385_v2 = vpop.eup %11384  ;;  %9861 = vmatmul.mubr.bf16.gmra.mrb[28].mxu1 %v13994_v24  ;;  %v14032_v30 = vmul.f32 %v11383_v11, %v13836_v39  ;;  %15455 = vst [vmem:[#allocation45_spill] sm:$0xff] %v14043_v27  ;;  %v14051_v39 = vpack.c.bf16 %v14012_v55, %v14009_v1  ;;  %v5502_v11 = vrot.slane %v13927_v25, 1 }
 0x612   : > { %v11387_v57 = vpop.eup %11386  ;;  %9864 = vmatprep.mubr.bf16.mxu1 %v13998_v20  ;;  %9893 = vmatpush3.bf16.msra.mxu1 %v11078_v36  ;;  %v14035_v60 = vmul.f32 %v11385_v2, %v13840_v19  ;;  %v14055_v19 = vpack.c.bf16 %v14018_v8, %v14015_v49  ;;  %v5497_v36 = vsel %vm15448_vm4, %v15090_v43, %v5496_v0 }
 0x613   : > { %9894 = vmatprep.subr.bf16.mxu1 %v11079_v42  ;;  %v11389_v51 = vpop.eup %11388  ;;  %v14038_v63 = vmul.f32 %v11387_v57, %v13844_v4  ;;  %15456 = vst [vmem:[#allocation47_spill] sm:$0xff] %v14051_v39  ;;  %v14059_v4 = vpack.c.bf16 %v14026_v13, %v14023_v3  ;;  %v14063_v62 = vpack.c.bf16 %v14032_v30, %v14029_v58  ;;  %v5504_v57 = vrot.slane %v13930_v10, 1 }
 0x614   : > { %v11391_v16 = vpop.eup %11390  ;;  %v14046_v47 = vmul.f32 %v11389_v51, %v13869_v46  ;;  %15457 = vst [vmem:[#allocation29_spill] sm:$0xff] %v14055_v19  ;;  %v5501_v0 = vsel %vm15448_vm4, %v5498_v21, %v5500_v26  ;;  %v5506_v51 = vrot.slane %v13935_v5, 1  ;;  %v5514_v21 = vrot.slane %v13965_v61, 1  ;;  %vm15467_vm4 = vmmov %vm15466_vm0 }
 0x615   : > { %v11393_v59 = vpop.eup %11392  ;;  %15458 = vst [vmem:[#allocation22_spill] sm:$0xff] %v14059_v4  ;;  %15459 = vst [vmem:[#allocation64_spill] sm:$0xff] %v14063_v62  ;;  %v14068_v46 = vpack.c.bf16 %v14038_v63, %v14035_v60  ;;  %v14071_v50 = vmul.f32 %v11391_v16, %v15461_v40  ;;  %v5508_v16 = vrot.slane %v13938_v7, 1  ;;  %v5505_v40 = vsel %vm15465_vm5, %v5502_v11, %v5504_v57 }
 0x616   : > { %9895 = vmatpush3.bf16.msra.mxu1 %v11079_v42  ;;  %v11395_v41 = vpop.eup %11394  ;;  %v14080_v32 = vmul.f32 %v11393_v59, %v15462_v37  ;;  %v14087_v42 = vpack.c.bf16 %v13923_v45, %v5497_v36  ;;  %v5510_v59 = vrot.slane %v13958_v12, 1  ;;  %v5512_v45 = vrot.slane %v13961_v28, 1  ;;  %vm15471_vm5 = vmmov %vm15466_vm0 }
 0x617   : > { %9928 = vmatprep.subr.bf16.mxu1 %v14020_v23  ;;  %15460 = vst [vmem:[#allocation67_spill] sm:$0xff] %v14068_v46  ;;  %v14083_v53 = vmul.f32 %v11395_v41, %v13700_v14  ;;  %v5503_v14 = vsel %vm15464_vm1, %v5500_v26, %v5502_v11  ;;  %v5507_v36 = vsel %vm15466_vm0, %v5504_v57, %v5506_v51  ;;  %vm15469_vm1 = vmmov %vm15466_vm0  ;;  %v5518_v11 = vrot.slane %v13981_v9, 1 }
 0x618   : > { %v14100_v41 = vpack.c.bf16 %v5503_v14, %v5501_v0  ;;  %v14105_v37 = vpack.c.bf16 %v5507_v36, %v5505_v40  ;;  %v5509_v43 = vsel %vm15467_vm4, %v5506_v51, %v5508_v16  ;;  %v5511_v26 = vsel %vm15468_vm11, %v5508_v16, %v5510_v59  ;;  %vm15473_vm11 = vmmov %vm15466_vm0 }
 0x619   : > { %9865 = vmatmul.mubr.bf16.gmra.mrb[32].mxu1 %v14043_v27  ;;  %15463 = vst [vmem:[#allocation17_spill] sm:$0xff] %v14083_v53  ;;  %v5513_v2 = vsel %vm15469_vm1, %v5510_v59, %v5512_v45  ;;  %v5515_v27 = vsel %vm15470_vm3, %v5512_v45, %v5514_v21  ;;  %v5516_v0 = vrot.slane %v13968_v54, 1  ;;  %v5520_v57 = vrot.slane %v13984_v34, 1  ;;  %vm15472_vm3 = vmmov %vm15466_vm0 }
 0x61a   : > { %9868 = vmatprep.mubr.bf16.mxu1 %v14051_v39  ;;  %v14110_v39 = vpack.c.bf16 %v5511_v26, %v5509_v43  ;;  %v14115_v14 = vpack.c.bf16 %v5515_v27, %v5513_v2  ;;  %v5522_v40 = vrot.slane %v13987_v38, 1  ;;  %v5524_v51 = vrot.slane %v13990_v17, 1  ;;  %vm15474_vm4 = vmmov %vm15466_vm0 }
 0x61b   : > { %v5517_v16 = vsel %vm15466_vm0, %v5514_v21, %v5516_v0  ;;  %v5519_v43 = vsel %vm15471_vm5, %v5516_v0, %v5518_v11  ;;  %v5526_v59 = vrot.slane %v14003_v52, 1  ;;  %v5528_v45 = vrot.slane %v14006_v35, 1  ;;  %vm15475_vm1 = vmmov %vm15466_vm0 }
 0x61c   : > { %v14126_v27 = vpack.c.bf16 %v5519_v43, %v5517_v16  ;;  %v5521_v2 = vsel %vm15472_vm3, %v5518_v11, %v5520_v57  ;;  %v5523_v36 = vsel %vm15473_vm11, %v5520_v57, %v5522_v40  ;;  %v5525_v26 = vsel %vm15474_vm4, %v5522_v40, %v5524_v51  ;;  %vm15476_vm5 = vmmov %vm15466_vm0 }
 0x61d   : > { %v14131_v20 = vpack.c.bf16 %v5523_v36, %v5521_v2  ;;  %v5527_v21 = vsel %vm15475_vm1, %v5524_v51, %v5526_v59  ;;  %v5529_v0 = vsel %vm15466_vm0, %v5526_v59, %v5528_v45  ;;  %v5534_v16 = vrot.slane %v14015_v49, 1  ;;  %vm15477_vm3 = vmmov %vm15466_vm0 }
 0x61e   : > { %v14136_v24 = vpack.c.bf16 %v5527_v21, %v5525_v26  ;;  %v5536_v11 = vrot.slane %v14018_v8, 1  ;;  %v5538_v40 = vrot.slane %v14023_v3, 1  ;;  %v5540_v43 = vrot.slane %v14026_v13, 1  ;;  %vm15478_vm11 = vmmov %vm15466_vm0 }
 0x61f   : > { %v5542_v51 = vrot.slane %v14029_v58, 1  ;;  %vm15479_vm4 = vmmov %vm15466_vm0 }
 0x620   : > { %v5537_v26 = vsel %vm15479_vm4, %v5534_v16, %v5536_v11  ;;  %vm15480_vm1 = vmmov %vm15466_vm0 }
 0x621   : > { %9869 = vmatmul.mubr.bf16.gmra.mrb[36].mxu1 %v14055_v19  ;;  %v5530_v19 = vrot.slane %v14009_v1, 1  ;;  %v5539_v15 = vsel %vm15480_vm1, %v5536_v11, %v5538_v40  ;;  %v5552_v11 = vrot.slane %v14046_v47, 1  ;;  %vm15484_vm4 = vmmov %vm15466_vm0 }
 0x622   : > { %9872 = vmatprep.mubr.bf16.mxu1 %v14059_v4  ;;  %v5532_v4 = vrot.slane %v14012_v55, 1  ;;  %v14155_v56 = vpack.c.bf16 %v5539_v15, %v5537_v26  ;;  %vm15485_vm1 = vmmov %vm15466_vm0 }
 0x623   : > { %v5531_v57 = vsel %vm15476_vm5, %v5528_v45, %v5530_v19  ;;  %v5541_v45 = vsel %vm15466_vm0, %v5538_v40, %v5540_v43  ;;  %vm15481_vm5 = vmmov %vm15466_vm0  ;;  %v5892_v40 = vrot.slane %v14080_v32, 7 }
 0x624   : > { %v14145_v2 = vpack.c.bf16 %v5531_v57, %v5529_v0  ;;  %v5533_v59 = vsel %vm15477_vm3, %v5530_v19, %v5532_v4  ;;  %v5535_v36 = vsel %vm15478_vm11, %v5532_v4, %v5534_v16  ;;  %v5543_v22 = vsel %vm15481_vm5, %v5540_v43, %v5542_v51  ;;  %vm15482_vm3 = vmmov %vm15466_vm0 }
 0x625   : > { %v14150_v21 = vpack.c.bf16 %v5535_v36, %v5533_v59  ;;  %v14157_v29 = vpack.c.bf16 %v5543_v22, %v5541_v45  ;;  %v5544_v0 = vrot.slane %v14032_v30, 1  ;;  %v5546_v19 = vrot.slane %v14035_v60, 1  ;;  %vm15483_vm11 = vmmov %vm15466_vm0 }
 0x626   : > { %v5548_v4 = vrot.slane %v14038_v63, 1  ;;  %v5550_v16 = vrot.slane %v14071_v50, 1  ;;  %v5554_v57 = vrot.slane %v14080_v32, 1  ;;  %v15117_v43 = vrot.slane %v14083_v53, 7  ;;  %vm15486_vm5 = vmmov %vm15466_vm0 }
 0x627   : > { %v5545_v15 = vsel %vm15482_vm3, %v5542_v51, %v5544_v0  ;;  %v5547_v22 = vsel %vm15483_vm11, %v5544_v0, %v5546_v19  ;;  %v15487_v51 = vrot.slane %v14046_v47, 7  ;;  %vm15488_vm3 = vcmask 1040384  }
 0x628   : > { %v14171_v59 = vpack.c.bf16 %v5547_v22, %v5545_v15  ;;  %v5549_v36 = vsel %vm15484_vm4, %v5546_v19, %v5548_v4  ;;  %v5551_v26 = vsel %vm15485_vm1, %v5548_v4, %v5550_v16  ;;  %v5553_v45 = vsel %vm15466_vm0, %v5550_v16, %v5552_v11  ;;  %vm15489_vm11 = vmmov %vm15488_vm3 }
 0x629   : > { %9873 = vmatmul.mubr.bf16.gmra.mrb[40].mxu1 %v14063_v62  ;;  %v14176_v62 = vpack.c.bf16 %v5551_v26, %v5549_v36  ;;  %v5893_v0 = vsel %vm15488_vm3, %v15487_v51, %v5892_v40  ;;  %v5895_v18 = vsel %vm15489_vm11, %v5892_v40, %v15117_v43  ;;  %v14191_v19 = vpack.c.bf16 %v14083_v53, %v14080_v32  ;;  %vm15493_vm4 = vmmov %vm15466_vm0  ;;  %v15494_v36 = vld [vmem:[#allocation49_spill] sm:$0xff]  ;;  %v15497_v51 = vld [vmem:[#allocation19_spill] sm:$0xff] }
 0x62a   : > { %9876 = vmatprep.mubr.bf16.mxu1 %v14068_v46  ;;  %v5555_v46 = vsel %vm15486_vm5, %v5552_v11, %v5554_v57  ;;  %v14187_v22 = vpack.c.bf16 %v5895_v18, %v5893_v0  ;;  %v6461_v4 = vrot.slane %v14083_v53, 1  ;;  %v14196_v16 = vpack.c.bf16 %v14046_v47, %v14071_v50  ;;  %vm15495_vm1 = vmmov %vm15466_vm0  ;;  %v15498_v0 = vld [vmem:[#allocation32_spill] sm:$0xff] }
 0x62b   : > { %v14185_v15 = vpack.c.bf16 %v5555_v46, %v5553_v45  ;;  %15491 = vst [vmem:[#allocation40_spill] sm:$0xff] %v14191_v19  ;;  %v4893_v46 = vrot.slane %v13892_v48, 7  ;;  %v4895_v18 = vrot.slane %v13895_v6, 7  ;;  %v4897_v32 = vrot.slane %v13898_v44, 7  ;;  %vm15500_vm0 = vmmov %vm15488_vm3  ;;  %v15509_v19 = vld [vmem:[#allocation35_spill] sm:$0xff] }
 0x62c   : > { %15490 = vst [vmem:[#allocation26_spill] sm:$0xff] %v14187_v22  ;;  %15492 = vst [vmem:[#allocation69_spill] sm:$0xff] %v14196_v16  ;;  %v6462_v11 = vsel %vm15493_vm4, %v5554_v57, %v6461_v4  ;;  %v6463_v26 = vsel %vm15495_vm1, %v6461_v4, %v15494_v36  ;;  %v4899_v45 = vrot.slane %v13907_v31, 7  ;;  %v15499_v57 = vld [vmem:[#allocation18_spill] sm:$0xff]  ;;  %v4901_v44 = vrot.slane %v13927_v25, 7 }
 0x62d   : > { %v14203_v40 = vpack.c.bf16 %v6463_v26, %v6462_v11  ;;  %v4894_v43 = vsel %vm15500_vm0, %v15499_v57, %v4893_v46  ;;  %vm15501_vm5 = vmmov %vm15500_vm0  ;;  %v11081_v26 = vld [vmem:[#allocation7 + $0x88] sm:$0xff]   ;;  %v4903_v31 = vrot.slane %v13930_v10, 7  ;;  %v4905_v57 = vrot.slane %v13935_v5, 7 }
 0x62e   : > { %v4896_v4 = vsel %vm15501_vm5, %v4893_v46, %v4895_v18  ;;  %vm15502_vm3 = vmmov %vm15500_vm0  ;;  %v4907_v46 = vrot.slane %v13938_v7, 7  ;;  %v11083_v7 = vld [vmem:[#allocation7 + $0x98] sm:$0xff]  }
 0x62f   : > { %15496 = vst [vmem:[#allocation49_spill] sm:$0xff] %v14203_v40  ;;  %v4898_v53 = vsel %vm15502_vm3, %v4895_v18, %v4897_v32  ;;  %vm15503_vm11 = vmmov %vm15500_vm0  ;;  %v14216_v11 = vpack.c.bf16 %v4896_v4, %v4894_v43  ;;  %v15505_v43 = vld [vmem:[#allocation34_spill] sm:$0xff]  ;;  %v4906_v18 = vsel %vm15500_vm0, %v4903_v31, %v4905_v57  ;;  %v4909_v4 = vrot.slane %v13958_v12, 7 }
 0x630   : > { %v4900_v6 = vsel %vm15503_vm11, %v4897_v32, %v4899_v45  ;;  %vm15506_vm4 = vmmov %vm15500_vm0 }
 0x631   : > { %9877 = vmatmul.mubr.bf16.gmra.mrb[44].mxu1 %v14196_v16  ;;  %v14218_v40 = vpack.c.bf16 %v4900_v6, %v4898_v53  ;;  %v11082_v53 = vld [vmem:[#allocation7 + $0x90] sm:$0xff]   ;;  %v4902_v25 = vsel %vm15506_vm4, %v4899_v45, %v4901_v44  ;;  %vm15507_vm1 = vmmov %vm15500_vm0  ;;  %v4911_v6 = vrot.slane %v13961_v28, 7  ;;  %v4913_v45 = vrot.slane %v13965_v61, 7  ;;  %v11085_v61 = vld [vmem:[#allocation7 + $0xa8] sm:$0xff]  }
 0x632   : > { %9896 = vmatprep.mubr.msk.bf16.mxu1 %vm12486_vm6, %v15497_v51  ;;  %v15504_v51 = vld [vmem:[#allocation33_spill] sm:$0xff]  ;;  %v4904_v10 = vsel %vm15507_vm1, %v4901_v44, %v4903_v31  ;;  %vm15508_vm5 = vmmov %vm15500_vm0  ;;  %v4915_v44 = vrot.slane %v13968_v54, 7 }
 0x633   : > { %v4908_v32 = vsel %vm15508_vm5, %v4905_v57, %v4907_v46  ;;  %v14235_v5 = vpack.c.bf16 %v4904_v10, %v4902_v25  ;;  %vm15511_vm3 = vmmov %vm15500_vm0  ;;  %v11103_v57 = vld [vmem:[#allocation7 + $0x138] sm:$0xff]  }
 0x634   : > { %v4910_v31 = vsel %vm15511_vm3, %v4907_v46, %v4909_v4  ;;  %vm15512_vm11 = vmmov %vm15500_vm0  ;;  %v4921_v46 = vrot.slane %v13987_v38, 7  ;;  %v11087_v38 = vld [vmem:[#allocation7 + $0xb8] sm:$0xff]  }
 0x635   : > { %v4912_v12 = vsel %vm15512_vm11, %v4909_v4, %v4911_v6  ;;  %vm15513_vm4 = vmmov %vm15500_vm0  ;;  %v4923_v4 = vrot.slane %v13990_v17, 7 }
 0x636   : > { %v4914_v28 = vsel %vm15513_vm4, %v4911_v6, %v4913_v45  ;;  %vm15514_vm1 = vmmov %vm15500_vm0  ;;  %v14253_v10 = vpack.c.bf16 %v4912_v12, %v4910_v31  ;;  %v11086_v6 = vld [vmem:[#allocation7 + $0xb0] sm:$0xff]  }
 0x637   : > { %v4916_v25 = vsel %vm15514_vm1, %v4913_v45, %v4915_v44  ;;  %vm15519_vm3 = vmmov %vm15514_vm1  ;;  %v4924_v31 = vsel %vm15514_vm1, %v4921_v46, %v4923_v4 }
 0x638   : > { %v14255_v54 = vpack.c.bf16 %v4916_v25, %v4914_v28  ;;  %vm15520_vm11 = vmmov %vm15514_vm1  ;;  %v4925_v28 = vrot.slane %v14003_v52, 7  ;;  %v15522_v25 = vld [vmem:[#allocation24_spill] sm:$0xff] }
 0x639   : > { %9897 = vmatmul.mubr.msk.bf16.vlgmr.msra.gmra.mrb[16].mxu1 %vm12533_vm9, %v14216_v11  ;;  %vm15521_vm4 = vmmov %vm15514_vm1 }
 0x63a   : > { %9929 = vmatpush3.bf16.msra.mxu1 %v14020_v23  ;;  %9900 = vmatprep.mubr.msk.bf16.mxu1 %vm12542_vm10, %v14218_v40  ;;  %v14237_v23 = vpack.c.bf16 %v4908_v32, %v4906_v18  ;;  %v4917_v18 = vrot.slane %v13981_v9, 7  ;;  %v15515_v32 = vld [vmem:[#allocation38_spill] sm:$0xff] }
 0x63b   : > { %9930 = vmatprep.subr.bf16.mxu1 %v11081_v26  ;;  %vm15516_vm0 = vnez %v15515_v32 }
 0x63c   : > { %v4918_v45 = vsel %vm15519_vm3, %v4915_v44, %v4917_v18  ;;  %vm15523_vm3 = vnez %v15522_v25  ;;  %v4929_v44 = vrot.slane %v14009_v1, 7 }
 0x63e   : > { %9931 = vmatpush3.bf16.msra.mxu1 %v11081_v26  ;;  %v11084_v26 = vld [vmem:[#allocation7 + $0xa0] sm:$0xff]  }
 0x63f   : > { %9932 = vmatprep.subr.bf16.mxu1 %v11082_v53 }
 0x641   : > { %9901 = vmatmul.mubr.msk.bf16.gmra.mrb[20].mxu1 %vm12593_vm13, %v14235_v5 }
 0x642   : > { %9904 = vmatprep.mubr.msk.bf16.mxu1 %vm12604_vm14, %v14237_v23  ;;  %9933 = vmatpush3.bf16.msra.mxu1 %v11082_v53  ;;  %v4919_v53 = vrot.slane %v13984_v34, 7 }
 0x643   : > { %9934 = vmatprep.subr.bf16.mxu1 %v11083_v7 }
 0x644   : > { %v4920_v9 = vsel %vm15520_vm11, %v4917_v18, %v4919_v53  ;;  %v4922_v34 = vsel %vm15521_vm4, %v4919_v53, %v4921_v46  ;;  %v4931_v18 = vrot.slane %v14012_v55, 7  ;;  %v11088_v53 = vld [vmem:[#allocation7 + $0xc0] sm:$0xff]   ;;  %vm15526_vm4 = vmmov %vm15514_vm1  ;;  %v4933_v55 = vrot.slane %v14015_v49, 7 }
 0x645   : > { %v14271_v12 = vpack.c.bf16 %v4920_v9, %v4918_v45  ;;  %v14273_v17 = vpack.c.bf16 %v4924_v31, %v4922_v34  ;;  %v4926_v46 = vsel %vm15526_vm4, %v4923_v4, %v4925_v28  ;;  %v15529_v34 = vld [vmem:[#allocation27_spill] sm:$0xff]  ;;  %v4937_v4 = vrot.slane %v14023_v3, 7  ;;  %vm15534_vm4 = vmmov %vm15514_vm1 }
 0x646   : > { %9935 = vmatpush3.bf16.msra.mxu1 %v11083_v7  ;;  %v15517_v7 = vld [vmem:[#allocation39_spill] sm:$0xff]  ;;  %v4939_v31 = vrot.slane %v14026_v13, 7  ;;  %v4941_v3 = vrot.slane %v14029_v58, 7  ;;  %v4943_v13 = vrot.slane %v14032_v30, 7 }
 0x647   : > { %9936 = vmatprep.subr.bf16.mxu1 %v11084_v26  ;;  %vm15518_vm5 = vnez %v15517_v7 }
 0x649   : > { %9905 = vmatmul.mubr.msk.bf16.gmra.mrb[24].mxu1 %vm15516_vm0, %v14253_v10  ;;  %vm15528_vm0 = vmmov %vm15514_vm1 }
 0x64a   : > { %9908 = vmatprep.mubr.msk.bf16.mxu1 %vm15518_vm5, %v14255_v54  ;;  %9937 = vmatpush3.bf16.msra.mxu1 %v11084_v26  ;;  %v4927_v26 = vrot.slane %v14006_v35, 7  ;;  %vm15527_vm5 = vmmov %vm15514_vm1  ;;  %v4932_v45 = vsel %vm15528_vm0, %v4929_v44, %v4931_v18 }
 0x64b   : > { %9938 = vmatprep.subr.bf16.mxu1 %v11085_v61 }
 0x64c   : > { %v4928_v52 = vsel %vm15514_vm1, %v4925_v28, %v4927_v26  ;;  %v4930_v35 = vsel %vm15527_vm5, %v4927_v26, %v4929_v44  ;;  %v15531_v28 = vld [vmem:[#allocation42_spill] sm:$0xff]  ;;  %vm15533_vm5 = vmmov %vm15514_vm1 }
 0x64d   : > { %v14289_v9 = vpack.c.bf16 %v4928_v52, %v4926_v46  ;;  %v14291_v1 = vpack.c.bf16 %v4932_v45, %v4930_v35  ;;  %vm15532_vm0 = vnez %v15531_v28  ;;  %v15536_v52 = vld [vmem:[#allocation43_spill] sm:$0xff]  ;;  %v4947_v35 = vrot.slane %v14038_v63, 7  ;;  %v15538_v45 = vld [vmem:[#allocation44_spill] sm:$0xff]  ;;  %v15543_v63 = vld [vmem:[#allocation46_spill] sm:$0xff] }
 0x64e   : > { %9939 = vmatpush3.bf16.msra.mxu1 %v11085_v61  ;;  %v15524_v61 = vld [vmem:[#allocation25_spill] sm:$0xff] }
 0x64f   : > { %9940 = vmatprep.subr.bf16.mxu1 %v11086_v6  ;;  %vm15525_vm11 = vnez %v15524_v61 }
 0x651   : > { %9909 = vmatmul.mubr.msk.bf16.gmra.mrb[28].mxu1 %vm15523_vm3, %v14271_v12  ;;  %vm15535_vm3 = vmmov %vm15514_vm1 }
 0x652   : > { %9912 = vmatprep.mubr.msk.bf16.mxu1 %vm15525_vm11, %v14273_v17  ;;  %9941 = vmatpush3.bf16.msra.mxu1 %v11086_v6  ;;  %v4935_v6 = vrot.slane %v14018_v8, 7  ;;  %vm15530_vm11 = vnez %v15529_v34  ;;  %v4940_v8 = vsel %vm15535_vm3, %v4937_v4, %v4939_v31  ;;  %vm15540_vm3 = vmmov %vm15514_vm1 }
 0x653   : > { %9942 = vmatprep.subr.bf16.mxu1 %v11087_v38 }
 0x654   : > { %v4936_v26 = vsel %vm15534_vm4, %v4933_v55, %v4935_v6  ;;  %v4938_v49 = vsel %vm15514_vm1, %v4935_v6, %v4937_v4  ;;  %vm15541_vm4 = vmmov %vm15514_vm1 }
 0x655   : > { %v14309_v46 = vpack.c.bf16 %v4940_v8, %v4938_v49  ;;  %v4944_v6 = vsel %vm15541_vm4, %v4941_v3, %v4943_v13  ;;  %v15548_v49 = vrot.slane %v14046_v47, 7  ;;  %v15556_v47 = vld [vmem:[#allocation52_spill] sm:$0xff] }
 0x656   : > { %9943 = vmatpush3.bf16.msra.mxu1 %v11087_v38  ;;  %v4934_v38 = vsel %vm15533_vm5, %v4931_v18, %v4933_v55  ;;  %v4945_v18 = vrot.slane %v14035_v60, 7  ;;  %vm15539_vm5 = vnez %v15538_v45  ;;  %v4942_v55 = vsel %vm15540_vm3, %v4939_v31, %v4941_v3 }
 0x657   : > { %9976 = vmatprep.subr.bf16.mxu1 %v11088_v53  ;;  %v14307_v44 = vpack.c.bf16 %v4936_v26, %v4934_v38  ;;  %v14325_v4 = vpack.c.bf16 %v4944_v6, %v4942_v55  ;;  %v4949_v60 = vrot.slane %v14071_v50, 7  ;;  %v15545_v26 = vld [vmem:[#allocation48_spill] sm:$0xff]  ;;  %v15550_v3 = vrot.slane %v13892_v48, 1  ;;  %v15552_v55 = vld [vmem:[#allocation50_spill] sm:$0xff]  ;;  %v15554_v6 = vld [vmem:[#allocation51_spill] sm:$0xff] }
 0x658   : > { %v4946_v58 = vsel %vm15514_vm1, %v4943_v13, %v4945_v18  ;;  %v15558_v48 = vld [vmem:[#allocation53_spill] sm:$0xff] }
 0x659   : > { %9913 = vmatmul.mubr.msk.bf16.gmra.mrb[32].mxu1 %vm15530_vm11, %v14289_v9  ;;  %vm15537_vm11 = vnez %v15536_v52 }
 0x65a   : > { %9916 = vmatprep.mubr.msk.bf16.mxu1 %vm15532_vm0, %v14291_v1  ;;  %vm15542_vm0 = vmmov %vm15514_vm1  ;;  %vm15553_vm1 = vnez %v15552_v55  ;;  %v11108_v55 = vld [vmem:[#allocation7 + $0x160] sm:$0xff]  }
 0x65b   : > { %v4948_v30 = vsel %vm15542_vm0, %v4945_v18, %v4947_v35  ;;  %vm15547_vm3 = vmmov %vm15542_vm0 }
 0x65c   : > { %v14327_v38 = vpack.c.bf16 %v4948_v30, %v4946_v58  ;;  %v4950_v31 = vsel %vm15547_vm3, %v4947_v35, %v4949_v60  ;;  %vm15549_vm4 = vmmov %vm15542_vm0  ;;  %vm15551_vm0 = vcmask 1046528   ;;  %v11089_v35 = vld [vmem:[#allocation7 + $0xc8] sm:$0xff]   ;;  %vm15557_vm3 = vnez %v15556_v47  ;;  %v11090_v58 = vld [vmem:[#allocation7 + $0xd0] sm:$0xff]  }
 0x65d   : > { %v4952_v8 = vsel %vm15549_vm4, %v4949_v60, %v15548_v49  ;;  %v5495_v13 = vsel %vm15551_vm0, %v15494_v36, %v15550_v3  ;;  %vm15559_vm4 = vnez %v15558_v48  ;;  %v15560_v30 = vld [vmem:[#allocation54_spill] sm:$0xff]  ;;  %v15561_v60 = vld [vmem:[#allocation55_spill] sm:$0xff]  ;;  %v15563_v49 = vld [vmem:[#allocation56_spill] sm:$0xff] }
 0x65e   : > { %v14344_v50 = vpack.c.bf16 %v4952_v8, %v4950_v31  ;;  %v8624_v18 = vpack.c.bf16 %v5495_v13, %v15494_v36  ;;  %v11091_v36 = vld [vmem:[#allocation7 + $0xd8] sm:$0xff]   ;;  %vm15562_vm0 = vnez %v15561_v60  ;;  %v11093_v31 = vld [vmem:[#allocation7 + $0xe8] sm:$0xff]   ;;  %v15565_v8 = vld [vmem:[#allocation57_spill] sm:$0xff] }
 0x65f   : > { %v11094_v3 = vld [vmem:[#allocation7 + $0xf0] sm:$0xff]   ;;  %v11095_v13 = vld [vmem:[#allocation7 + $0xf8] sm:$0xff]  }
 0x661   : > { %9917 = vmatmul.mubr.msk.bf16.gmra.mrb[36].mxu1 %vm15537_vm11, %v14307_v44  ;;  %vm15544_vm11 = vnez %v15543_v63  ;;  %v15592_v63 = vld [vmem:[#allocation21_spill] sm:$0xff] }
 0x662   : > { %9920 = vmatprep.mubr.msk.bf16.mxu1 %vm15539_vm5, %v14309_v46  ;;  %vm15546_vm5 = vnez %v15545_v26 }
 0x669   : > { %9921 = vmatmul.mubr.msk.bf16.gmra.mrb[40].mxu1 %vm15544_vm11, %v14325_v4 }
 0x66a   : > { %9924 = vmatprep.mubr.msk.bf16.mxu1 %vm15546_vm5, %v14327_v38  ;;  %vm15555_vm5 = vnez %v15554_v6  ;;  %v11114_v6 = vld [vmem:[#allocation7 + $0x190] sm:$0xff]  }
 0x671   : > { %9925 = vmatmul.mubr.msk.bf16.gmra.mrb[44].mxu1 %vm15553_vm1, %v14344_v50 }
 0x672   : > { %9944 = vmatprep.mubr.msk.bf16.mxu1 %vm15555_vm5, %v8624_v18  ;;  %v15566_v18 = vld [vmem:[#allocation58_spill] sm:$0xff] }
 0x679   : > { %9945 = vmatmul.mubr.msk.bf16.vlgmr.msra.gmra.mrb[16].mxu1 %vm15557_vm3, %v14087_v42 }
 0x67a   : > { %9977 = vmatpush3.bf16.msra.mxu1 %v11088_v53  ;;  %9948 = vmatprep.mubr.msk.bf16.mxu1 %vm15559_vm4, %v14100_v41  ;;  %v11092_v53 = vld [vmem:[#allocation7 + $0xe0] sm:$0xff]   ;;  %vm15564_vm4 = vnez %v15563_v49 }
 0x67b   : > { %9978 = vmatprep.subr.bf16.mxu1 %v11089_v35 }
 0x67e   : > { %9979 = vmatpush3.bf16.msra.mxu1 %v11089_v35  ;;  %v15573_v35 = vld [vmem:[#allocation63_spill] sm:$0xff] }
 0x67f   : > { %9980 = vmatprep.subr.bf16.mxu1 %v11090_v58 }
 0x681   : > { %9949 = vmatmul.mubr.msk.bf16.gmra.mrb[20].mxu1 %vm15428_vm2, %v14105_v37 }
 0x682   : > { %9952 = vmatprep.mubr.msk.bf16.mxu1 %vm15562_vm0, %v14110_v39  ;;  %9981 = vmatpush3.bf16.msra.mxu1 %v11090_v58  ;;  %v11096_v58 = vld [vmem:[#allocation7 + $0x100] sm:$0xff]  }
 0x683   : > { %9982 = vmatprep.subr.bf16.mxu1 %v11091_v36 }
 0x686   : > { %9983 = vmatpush3.bf16.msra.mxu1 %v11091_v36  ;;  %v15579_v36 = vld [vmem:[#allocation68_spill] sm:$0xff] }
 0x687   : > { %9984 = vmatprep.subr.bf16.mxu1 %v11092_v53 }
 0x689   : > { %9953 = vmatmul.mubr.msk.bf16.gmra.mrb[24].mxu1 %vm15564_vm4, %v14115_v14 }
 0x68a   : > { %9956 = vmatprep.mubr.msk.bf16.mxu1 %vm15432_vm7, %v14126_v27  ;;  %9985 = vmatpush3.bf16.msra.mxu1 %v11092_v53  ;;  %v15569_v53 = vld [vmem:[#allocation61_spill] sm:$0xff] }
 0x68b   : > { %9986 = vmatprep.subr.bf16.mxu1 %v11093_v31  ;;  %vm15570_vm7 = vnez %v15569_v53 }
 0x68e   : > { %9987 = vmatpush3.bf16.msra.mxu1 %v11093_v31  ;;  %v15571_v31 = vld [vmem:[#allocation62_spill] sm:$0xff] }
 0x68f   : > { %9988 = vmatprep.subr.bf16.mxu1 %v11094_v3 }
 0x691   : > { %9957 = vmatmul.mubr.msk.bf16.gmra.mrb[28].mxu1 %vm15433_vm12, %v14131_v20  ;;  %vm15572_vm12 = vnez %v15571_v31  ;;  %v11097_v31 = vld [vmem:[#allocation7 + $0x108] sm:$0xff]  }
 0x692   : > { %9960 = vmatprep.mubr.msk.bf16.mxu1 %vm15434_vm15, %v14136_v24  ;;  %9989 = vmatpush3.bf16.msra.mxu1 %v11094_v3  ;;  %vm15574_vm15 = vnez %v15573_v35  ;;  %v15575_v3 = vld [vmem:[#allocation65_spill] sm:$0xff] }
 0x693   : > { %9990 = vmatprep.subr.bf16.mxu1 %v11095_v13  ;;  %vm15576_vm4 = vnez %v15575_v3  ;;  %v15615_v35 = vld [vmem:[#allocation49_spill] sm:$0xff] }
 0x696   : > { %9991 = vmatpush3.bf16.msra.mxu1 %v11095_v13  ;;  %v15577_v13 = vld [vmem:[#allocation66_spill] sm:$0xff] }
 0x697   : > { %10024 = vmatprep.subr.bf16.mxu1 %v11096_v58  ;;  %vm15578_vm0 = vnez %v15577_v13  ;;  %v11098_v13 = vld [vmem:[#allocation7 + $0x110] sm:$0xff]  }
 0x699   : > { %9961 = vmatmul.mubr.msk.bf16.gmra.mrb[32].mxu1 %vm15386_vm8, %v14145_v2  ;;  %vm15580_vm8 = vnez %v15579_v36  ;;  %v11099_v36 = vld [vmem:[#allocation7 + $0x118] sm:$0xff]  }
 0x69a   : > { %9964 = vmatprep.mubr.msk.bf16.mxu1 %vm15570_vm7, %v14150_v21 }
 0x6a1   : > { %9965 = vmatmul.mubr.msk.bf16.gmra.mrb[36].mxu1 %vm15572_vm12, %v14155_v56 }
 0x6a2   : > { %9968 = vmatprep.mubr.msk.bf16.mxu1 %vm15574_vm15, %v14157_v29 }
 0x6a9   : > { %9969 = vmatmul.mubr.msk.bf16.gmra.mrb[40].mxu1 %vm15576_vm4, %v14171_v59 }
 0x6aa   : > { %9972 = vmatprep.mubr.msk.bf16.mxu1 %vm15578_vm0, %v14176_v62 }
 0x6b1   : > { %9973 = vmatmul.mubr.msk.bf16.gmra.mrb[44].mxu1 %vm15580_vm8, %v14185_v15 }
 0x6b2   : > { %9992 = vmatprep.mubr.msk.bf16.mxu1 %vm12486_vm6, %v14216_v11  ;;  %v11100_v11 = vld [vmem:[#allocation7 + $0x120] sm:$0xff]   ;;  %vm15589_vm6 = vnez %v15545_v26  ;;  %v15593_v26 = vld [vmem:[#allocation23_spill] sm:$0xff] }
 0x6b9   : > { %9993 = vmatmul.mubr.msk.bf16.vlgmr.msra.gmra.mrb[16].mxu1 %vm12533_vm9, %v14218_v40  ;;  %vm15582_vm9 = vnez %v15517_v7 }
 0x6ba   : > { %10025 = vmatpush3.bf16.msra.mxu1 %v11096_v58  ;;  %9996 = vmatprep.mubr.msk.bf16.mxu1 %vm12542_vm10, %v14235_v5  ;;  %v11101_v58 = vld [vmem:[#allocation7 + $0x128] sm:$0xff]   ;;  %vm15581_vm10 = vnez %v15515_v32 }
 0x6bb   : > { %10026 = vmatprep.subr.bf16.mxu1 %v11097_v31 }
 0x6be   : > { %10027 = vmatpush3.bf16.msra.mxu1 %v11097_v31  ;;  %v11102_v31 = vld [vmem:[#allocation7 + $0x130] sm:$0xff]  }
 0x6bf   : > { %10028 = vmatprep.subr.bf16.mxu1 %v11098_v13 }
 0x6c1   : > { %9997 = vmatmul.mubr.msk.bf16.gmra.mrb[20].mxu1 %vm12593_vm13, %v14237_v23  ;;  %vm15584_vm13 = vnez %v15524_v61 }
 0x6c2   : > { %10000 = vmatprep.mubr.msk.bf16.mxu1 %vm12604_vm14, %v14253_v10  ;;  %10029 = vmatpush3.bf16.msra.mxu1 %v11098_v13  ;;  %vm15583_vm14 = vnez %v15522_v25  ;;  %v15590_v13 = vld [vmem:[#allocation41_spill] sm:$0xff] }
 0x6c3   : > { %10030 = vmatprep.subr.bf16.mxu1 %v11099_v36 }
 0x6c6   : > { %10031 = vmatpush3.bf16.msra.mxu1 %v11099_v36  ;;  %v11104_v36 = vld [vmem:[#allocation7 + $0x140] sm:$0xff]  }
 0x6c7   : > { %10032 = vmatprep.subr.bf16.mxu1 %v11100_v11 }
 0x6c9   : > { %10001 = vmatmul.mubr.msk.bf16.gmra.mrb[24].mxu1 %vm15581_vm10, %v14255_v54  ;;  %vm15586_vm10 = vnez %v15531_v28  ;;  %v11427_v28 = vld [vmem:[%s11904_s16 + $0xd0] sm:$0xff] }
 0x6ca   : > { %10004 = vmatprep.mubr.msk.bf16.mxu1 %vm15582_vm9, %v14271_v12  ;;  %10033 = vmatpush3.bf16.msra.mxu1 %v11100_v11  ;;  %vm15585_vm9 = vnez %v15529_v34  ;;  %v15591_v11 = vld [vmem:[#allocation20_spill] sm:$0xff]  ;;  %v11426_v34 = vld [vmem:[%s11904_s16 + $0xc8] sm:$0xff] }
 0x6cb   : > { %10034 = vmatprep.subr.bf16.mxu1 %v11101_v58 }
 0x6ce   : > { %10035 = vmatpush3.bf16.msra.mxu1 %v11101_v58  ;;  %v11106_v58 = vld [vmem:[#allocation7 + $0x150] sm:$0xff]  }
 0x6cf   : > { %10036 = vmatprep.subr.bf16.mxu1 %v11102_v31 }
 0x6d1   : > { %10005 = vmatmul.mubr.msk.bf16.gmra.mrb[28].mxu1 %vm15583_vm14, %v14273_v17  ;;  %vm15587_vm14 = vnez %v15536_v52  ;;  %v15628_v52 = vld [vmem:[#allocation26_spill] sm:$0xff] }
 0x6d2   : > { %10008 = vmatprep.mubr.msk.bf16.mxu1 %vm15584_vm13, %v14289_v9  ;;  %10037 = vmatpush3.bf16.msra.mxu1 %v11102_v31  ;;  %vm15588_vm13 = vnez %v15538_v45  ;;  %v11107_v31 = vld [vmem:[#allocation7 + $0x158] sm:$0xff]   ;;  %v15630_v45 = vld [vmem:[#allocation18_spill] sm:$0xff] }
 0x6d3   : > { %10038 = vmatprep.subr.bf16.mxu1 %v11103_v57 }
 0x6d6   : > { %10039 = vmatpush3.bf16.msra.mxu1 %v11103_v57  ;;  %v11105_v57 = vld [vmem:[#allocation7 + $0x148] sm:$0xff]  }
 0x6d7   : > { %10072 = vmatprep.subr.bf16.mxu1 %v11104_v36 }
 0x6d9   : > { %10009 = vmatmul.mubr.msk.bf16.gmra.mrb[32].mxu1 %vm15585_vm9, %v14291_v1 }
 0x6da   : > { %10012 = vmatprep.mubr.msk.bf16.mxu1 %vm15586_vm10, %v14307_v44 }
 0x6e1   : > { %10013 = vmatmul.mubr.msk.bf16.gmra.mrb[36].mxu1 %vm15587_vm14, %v14309_v46 }
 0x6e2   : > { %10016 = vmatprep.mubr.msk.bf16.mxu1 %vm15588_vm13, %v14325_v4 }
 0x6e9   : > { %10017 = vmatmul.mubr.msk.bf16.gmra.mrb[40].mxu1 %vm15544_vm11, %v14327_v38 }
 0x6ea   : > { %10020 = vmatprep.mubr.msk.bf16.mxu1 %vm15589_vm6, %v14344_v50 }
 0x6f1   : > { %10021 = vmatmul.mubr.msk.bf16.gmra.mrb[44].mxu1 %vm15553_vm1, %v14187_v22  ;;  %v15594_v22 = vld [vmem:[#allocation28_spill] sm:$0xff]  ;;  %vm15604_vm1 = vnez %v15558_v48 }
 0x6f2   : > { %10040 = vmatprep.mubr.bf16.mxu1 %v13903_v33  ;;  %v11109_v33 = vld [vmem:[#allocation7 + $0x168] sm:$0xff]  }
 0x6f9   : > { %10041 = vmatmul.mubr.bf16.vlgmr.msra.gmra.mrb[16].mxu1 %v15590_v13  ;;  %v15596_v13 = vld [vmem:[#allocation31_spill] sm:$0xff] }
 0x6fa   : > { %10073 = vmatpush3.bf16.msra.mxu1 %v11104_v36  ;;  %10044 = vmatprep.mubr.bf16.mxu1 %v15591_v11  ;;  %v15595_v36 = vld [vmem:[#allocation30_spill] sm:$0xff]  ;;  %v11110_v11 = vld [vmem:[#allocation7 + $0x170] sm:$0xff]  }
 0x6fb   : > { %10074 = vmatprep.subr.bf16.mxu1 %v11105_v57 }
 0x6fe   : > { %10075 = vmatpush3.bf16.msra.mxu1 %v11105_v57  ;;  %v11111_v57 = vld [vmem:[#allocation7 + $0x178] sm:$0xff]  }
 0x6ff   : > { %10076 = vmatprep.subr.bf16.mxu1 %v11106_v58 }
 0x701   : > { %10045 = vmatmul.mubr.bf16.gmra.mrb[20].mxu1 %v15592_v63  ;;  %v15597_v63 = vld [vmem:[#allocation45_spill] sm:$0xff] }
 0x702   : > { %10048 = vmatprep.mubr.bf16.mxu1 %v15593_v26  ;;  %10077 = vmatpush3.bf16.msra.mxu1 %v11106_v58  ;;  %v11112_v58 = vld [vmem:[#allocation7 + $0x180] sm:$0xff]  }
 0x703   : > { %10078 = vmatprep.subr.bf16.mxu1 %v11107_v31 }
 0x706   : > { %10079 = vmatpush3.bf16.msra.mxu1 %v11107_v31  ;;  %v15598_v31 = vld [vmem:[#allocation47_spill] sm:$0xff] }
 0x707   : > { %10080 = vmatprep.subr.bf16.mxu1 %v11108_v55 }
 0x709   : > { %10049 = vmatmul.mubr.bf16.gmra.mrb[24].mxu1 %v15594_v22  ;;  %v15599_v22 = vld [vmem:[#allocation29_spill] sm:$0xff] }
 0x70a   : > { %10052 = vmatprep.mubr.bf16.mxu1 %v15595_v36  ;;  %10081 = vmatpush3.bf16.msra.mxu1 %v11108_v55  ;;  %v15600_v36 = vld [vmem:[#allocation22_spill] sm:$0xff]  ;;  %v15601_v55 = vld [vmem:[#allocation64_spill] sm:$0xff] }
 0x70b   : > { %10082 = vmatprep.subr.bf16.mxu1 %v11109_v33 }
 0x70e   : > { %10083 = vmatpush3.bf16.msra.mxu1 %v11109_v33  ;;  %v15602_v33 = vld [vmem:[#allocation67_spill] sm:$0xff] }
 0x70f   : > { %10084 = vmatprep.subr.bf16.mxu1 %v11110_v11 }
 0x711   : > { %10053 = vmatmul.mubr.bf16.gmra.mrb[28].mxu1 %v15596_v13  ;;  %v15603_v13 = vld [vmem:[#allocation40_spill] sm:$0xff] }
 0x712   : > { %10056 = vmatprep.mubr.bf16.mxu1 %v15597_v63  ;;  %10085 = vmatpush3.bf16.msra.mxu1 %v11110_v11  ;;  %v7674_v11 = vld [vmem:[#allocation8] sm:$0xff] }
 0x713   : > { %10086 = vmatprep.subr.bf16.mxu1 %v11111_v57 }
 0x716   : > { %10087 = vmatpush3.bf16.msra.mxu1 %v11111_v57  ;;  %v7675_v57 = vld [vmem:[#allocation8 + $0x8] sm:$0xff] }
 0x717   : > { %10120 = vmatprep.subr.bf16.mxu1 %v11112_v58  ;;  %v10344_v63 = vpack.c.bf16 %v7675_v57, %v7674_v11  ;;  %v7679_v11 = vld [vmem:[#allocation8 + $0x28] sm:$0xff]  ;;  %v11116_v57 = vld [vmem:[#allocation7 + $0x1a0] sm:$0xff]  }
 0x719   : > { %10057 = vmatmul.mubr.bf16.gmra.mrb[32].mxu1 %v15598_v31  ;;  %10345 = vmatprep.subr.bf16.mxu0 %v10344_v63 }
 0x71a   : > { %10060 = vmatprep.mubr.bf16.mxu1 %v15599_v22  ;;  %10347 = vmatpush3.bf16.msra.mxu0 %v10344_v63  ;;  %v11113_v22 = vld [vmem:[#allocation7 + $0x188] sm:$0xff]   ;;  %v11115_v63 = vld [vmem:[#allocation7 + $0x198] sm:$0xff]  }
 0x721   : > { %10061 = vmatmul.mubr.bf16.gmra.mrb[36].mxu1 %v15600_v36 }
 0x722   : > { %10064 = vmatprep.mubr.bf16.mxu1 %v15601_v55 }
 0x729   : > { %10065 = vmatmul.mubr.bf16.gmra.mrb[40].mxu1 %v15602_v33 }
 0x72a   : > { %10068 = vmatprep.mubr.bf16.mxu1 %v14196_v16  ;;  %v7677_v16 = vld [vmem:[#allocation8 + $0x18] sm:$0xff] }
 0x731   : > { %10069 = vmatmul.mubr.bf16.gmra.mrb[44].mxu1 %v15603_v13  ;;  %v7676_v13 = vld [vmem:[#allocation8 + $0x10] sm:$0xff] }
 0x732   : > { %10088 = vmatprep.mubr.msk.bf16.mxu1 %vm15555_vm5, %v14087_v42  ;;  %v10348_v42 = vpack.c.bf16 %v7677_v16, %v7676_v13  ;;  %v7680_v16 = vld [vmem:[#allocation8 + $0x30] sm:$0xff] }
 0x733   : > { %v11118_v13 = vld [vmem:[#allocation7 + $0x1b0] sm:$0xff]  }
 0x734   : > { %10349 = vmatprep.subr.bf16.mxu0 %v10348_v42 }
 0x735   : > { %10351 = vmatpush3.bf16.msra.mxu0 %v10348_v42 }
 0x739   : > { %10089 = vmatmul.mubr.msk.bf16.vlgmr.msra.gmra.mrb[16].mxu1 %vm15557_vm3, %v14100_v41  ;;  %vm15605_vm3 = vnez %v15561_v60 }
 0x73a   : > { %10121 = vmatpush3.bf16.msra.mxu1 %v11112_v58  ;;  %10092 = vmatprep.mubr.msk.bf16.mxu1 %vm15604_vm1, %v14105_v37  ;;  %v7678_v58 = vld [vmem:[#allocation8 + $0x20] sm:$0xff]  ;;  %vm15606_vm1 = vnez %v15563_v49 }
 0x73b   : > { %10122 = vmatprep.subr.bf16.mxu1 %v11113_v22  ;;  %v10352_v48 = vpack.c.bf16 %v7679_v11, %v7678_v58  ;;  %v7682_v58 = vld [vmem:[#allocation8 + $0x40] sm:$0xff]  ;;  %v7683_v11 = vld [vmem:[#allocation8 + $0x48] sm:$0xff] }
 0x73d   : > { %10353 = vmatprep.subr.bf16.mxu0 %v10352_v48 }
 0x73e   : > { %10123 = vmatpush3.bf16.msra.mxu1 %v11113_v22  ;;  %10355 = vmatpush3.bf16.msra.mxu0 %v10352_v48  ;;  %v11117_v22 = vld [vmem:[#allocation7 + $0x1a8] sm:$0xff]   ;;  %v11119_v48 = vld [vmem:[#allocation7 + $0x1b8] sm:$0xff]  }
 0x73f   : > { %10124 = vmatprep.subr.bf16.mxu1 %v11114_v6 }
 0x741   : > { %10093 = vmatmul.mubr.msk.bf16.gmra.mrb[20].mxu1 %vm15428_vm2, %v14110_v39  ;;  %vm15607_vm2 = vnez %v15565_v8  ;;  %v10360_v8 = vpack.c.bf16 %v7683_v11, %v7682_v58  ;;  %v11404_v11 = vld [vmem:[%s11904_s16 + $0x18] sm:$0xff] }
 0x742   : > { %10096 = vmatprep.mubr.msk.bf16.mxu1 %vm15605_vm3, %v14115_v14  ;;  %10125 = vmatpush3.bf16.msra.mxu1 %v11114_v6  ;;  %v7681_v6 = vld [vmem:[#allocation8 + $0x38] sm:$0xff]  ;;  %vm15608_vm3 = vnez %v15566_v18 }
 0x743   : > { %10126 = vmatprep.subr.bf16.mxu1 %v11115_v63  ;;  %v10356_v42 = vpack.c.bf16 %v7681_v6, %v7680_v16  ;;  %v7684_v16 = vld [vmem:[#allocation8 + $0x50] sm:$0xff]  ;;  %v7685_v6 = vld [vmem:[#allocation8 + $0x58] sm:$0xff] }
 0x745   : > { %10357 = vmatprep.subr.bf16.mxu0 %v10356_v42 }
 0x746   : > { %10127 = vmatpush3.bf16.msra.mxu1 %v11115_v63  ;;  %10359 = vmatpush3.bf16.msra.mxu0 %v10356_v42  ;;  %v15609_v63 = vld [vmem:[#allocation59_spill] sm:$0xff] }
 0x747   : > { %10128 = vmatprep.subr.bf16.mxu1 %v11116_v57  ;;  %10361 = vmatprep.subr.bf16.mxu0 %v10360_v8 }
 0x749   : > { %10097 = vmatmul.mubr.msk.bf16.gmra.mrb[24].mxu1 %vm15606_vm1, %v14126_v27  ;;  %vm15610_vm1 = vnez %v15609_v63 }
 0x74a   : > { %10100 = vmatprep.mubr.msk.bf16.mxu1 %vm15607_vm2, %v14131_v20  ;;  %10129 = vmatpush3.bf16.msra.mxu1 %v11116_v57  ;;  %v11120_v57 = vld [vmem:[#allocation7 + $0x1c0] sm:$0xff]  }
 0x74b   : > { %10130 = vmatprep.subr.bf16.mxu1 %v11117_v22  ;;  %10363 = vmatpush3.bf16.msra.mxu0 %v10360_v8  ;;  %v7686_v8 = vld [vmem:[#allocation8 + $0x60] sm:$0xff] }
 0x74e   : > { %10131 = vmatpush3.bf16.msra.mxu1 %v11117_v22  ;;  %v15611_v22 = vld [vmem:[#allocation60_spill] sm:$0xff] }
 0x74f   : > { %10132 = vmatprep.subr.bf16.mxu1 %v11118_v13  ;;  %vm15612_vm2 = vnez %v15611_v22 }
 0x751   : > { %10101 = vmatmul.mubr.msk.bf16.gmra.mrb[28].mxu1 %vm15608_vm3, %v14136_v24 }
 0x752   : > { %10104 = vmatprep.mubr.msk.bf16.mxu1 %vm15610_vm1, %v14145_v2  ;;  %10133 = vmatpush3.bf16.msra.mxu1 %v11118_v13  ;;  %v10364_v13 = vpack.c.bf16 %v7685_v6, %v7684_v16  ;;  %v7688_v16 = vld [vmem:[#allocation8 + $0x70] sm:$0xff]  ;;  %v7689_v6 = vld [vmem:[#allocation8 + $0x78] sm:$0xff] }
 0x753   : > { %10134 = vmatprep.subr.bf16.mxu1 %v11119_v48 }
 0x754   : > { %10365 = vmatprep.subr.bf16.mxu0 %v10364_v13 }
 0x755   : > { %10367 = vmatpush3.bf16.msra.mxu0 %v10364_v13  ;;  %v10372_v13 = vpack.c.bf16 %v7689_v6, %v7688_v16  ;;  %v11405_v16 = vld [vmem:[%s11904_s16 + $0x20] sm:$0xff]  ;;  %v11121_v6 = vld [vmem:[#allocation7 + $0x1c8] sm:$0xff]  }
 0x756   : > { %10135 = vmatpush3.bf16.msra.mxu1 %v11119_v48  ;;  %v7687_v48 = vld [vmem:[#allocation8 + $0x68] sm:$0xff] }
 0x757   : > { %10168 = vmatprep.subr.bf16.mxu1 %v11120_v57  ;;  %v10368_v58 = vpack.c.bf16 %v7687_v48, %v7686_v8  ;;  %v11402_v48 = vld [vmem:[%s11904_s16 + $0x8] sm:$0xff] }
 0x759   : > { %10105 = vmatmul.mubr.msk.bf16.gmra.mrb[32].mxu1 %vm15612_vm2, %v14150_v21  ;;  %10369 = vmatprep.subr.bf16.mxu0 %v10368_v58 }
 0x75a   : > { %10108 = vmatprep.mubr.msk.bf16.mxu1 %vm15570_vm7, %v14155_v56  ;;  %10371 = vmatpush3.bf16.msra.mxu0 %v10368_v58  ;;  %v11403_v58 = vld [vmem:[%s11904_s16 + $0x10] sm:$0xff] }
 0x75b   : > { %10373 = vmatprep.subr.bf16.mxu0 %v10372_v13 }
 0x75e   : > { %10375 = vmatpush3.bf16.msra.mxu0 %v10372_v13  ;;  %v11406_v13 = vld [vmem:[%s11904_s16 + $0x28] sm:$0xff] }
 0x761   : > { %10109 = vmatmul.mubr.msk.bf16.gmra.mrb[36].mxu1 %vm15572_vm12, %v14157_v29  ;;  %10297 = vmatmul.mubr.f32.vlgmr.msra.gmra.mrb[32].mxu0 %v11402_v48  ;;  %v11409_v48 = vld [vmem:[%s11904_s16 + $0x40] sm:$0xff] }
 0x762   : > { %10112 = vmatprep.mubr.msk.bf16.mxu1 %vm15574_vm15, %v14171_v59  ;;  %vm15617_vm15 = vnez %v15498_v0  ;;  %10299 = vmatprep.mubr.f32.mxu0 %v11403_v58  ;;  %v11407_v0 = vld [vmem:[%s11904_s16 + $0x30] sm:$0xff]  ;;  %v11412_v58 = vld [vmem:[%s11904_s16 + $0x58] sm:$0xff] }
 0x765   : > { %10300 = vmatmul.mubr.f32.gmra.mrb[34].mxu0 %v11404_v11  ;;  %v11408_v11 = vld [vmem:[%s11904_s16 + $0x38] sm:$0xff] }
 0x766   : > { %10302 = vmatprep.mubr.f32.mxu0 %v11405_v16  ;;  %v11413_v16 = vld [vmem:[%s11904_s16 + $0x60] sm:$0xff] }
 0x769   : > { %10113 = vmatmul.mubr.msk.bf16.gmra.mrb[40].mxu1 %vm15576_vm4, %v14176_v62  ;;  %10303 = vmatmul.mubr.f32.gmra.mrb[36].mxu0 %v11406_v13  ;;  %v11416_v13 = vld [vmem:[%s11904_s16 + $0x78] sm:$0xff] }
 0x76a   : > { %10116 = vmatprep.mubr.msk.bf16.mxu1 %vm15578_vm0, %v14185_v15  ;;  %vm15618_vm0 = vnez %v15504_v51  ;;  %10305 = vmatprep.mubr.f32.mxu0 %v11407_v0  ;;  %v11123_v51 = vld [vmem:[#allocation7 + $0x1d8] sm:$0xff]  }
 0x76b   : > { %v11420_v0 = vld [vmem:[%s11904_s16 + $0x98] sm:$0xff] }
 0x76d   : > { %10306 = vmatmul.mubr.f32.gmra.mrb[38].mxu0 %v11408_v11  ;;  %v11425_v11 = vld [vmem:[%s11904_s16 + $0xc0] sm:$0xff] }
 0x76e   : > { %10308 = vmatprep.mubr.f32.mxu0 %v11409_v48 }
 0x771   : > { %10117 = vmatmul.mubr.msk.bf16.gmra.mrb[44].mxu1 %vm15580_vm8, %v15615_v35 }
 0x772   : > { %10136 = vmatprep.mubr.msk.bf16.mxu1 %vm15617_vm15, %v14218_v40  ;;  %vm15619_vm15 = vnez %v15505_v43  ;;  %v11122_v40 = vld [vmem:[#allocation7 + $0x1d0] sm:$0xff]   ;;  %v11410_v43 = vld [vmem:[%s11904_s16 + $0x48] sm:$0xff] }
 0x773   : > { %10309 = vmatmul.mubr.f32.gmra.mrb[40].mxu0 %v11410_v43  ;;  %v11431_v43 = vld [vmem:[%s11904_s16 + $0xf0] sm:$0xff] }
 0x779   : > { %10137 = vmatmul.mubr.msk.bf16.vlgmr.msra.gmra.mrb[16].mxu1 %vm15618_vm0, %v14235_v5  ;;  %vm15620_vm0 = vnez %v15509_v19  ;;  %v15621_v5 = vld [vmem:[#allocation36_spill] sm:$0xff]  ;;  %v11125_v19 = vld [vmem:[#allocation7 + $0x1e8] sm:$0xff]  }
 0x77a   : > { %10169 = vmatpush3.bf16.msra.mxu1 %v11120_v57  ;;  %10140 = vmatprep.mubr.msk.bf16.mxu1 %vm15619_vm15, %v14237_v23  ;;  %vm15622_vm15 = vnez %v15621_v5  ;;  %v11124_v23 = vld [vmem:[#allocation7 + $0x1e0] sm:$0xff]   ;;  %v11411_v57 = vld [vmem:[%s11904_s16 + $0x50] sm:$0xff] }
 0x77b   : > { %10170 = vmatprep.subr.bf16.mxu1 %v11121_v6  ;;  %10311 = vmatprep.mubr.f32.mxu0 %v11411_v57  ;;  %v11432_v57 = vld [vmem:[%s11904_s16 + $0xf8] sm:$0xff] }
 0x77c   : > { %10312 = vmatmul.mubr.f32.gmra.mrb[42].mxu0 %v11412_v58 }
 0x77d   : > { %10314 = vmatprep.mubr.f32.mxu0 %v11413_v16  ;;  %v15634_v16 = vld [vmem:[#allocation50_spill] sm:$0xff] }
 0x77e   : > { %10171 = vmatpush3.bf16.msra.mxu1 %v11121_v6  ;;  %v11415_v6 = vld [vmem:[%s11904_s16 + $0x70] sm:$0xff] }
 0x77f   : > { %10172 = vmatprep.subr.bf16.mxu1 %v11122_v40 }
 0x781   : > { %10141 = vmatmul.mubr.msk.bf16.gmra.mrb[20].mxu1 %vm15620_vm0, %v14253_v10  ;;  %vm15623_vm0 = vnez %v15515_v32  ;;  %v11414_v10 = vld [vmem:[%s11904_s16 + $0x68] sm:$0xff]  ;;  %v11127_v32 = vld [vmem:[#allocation7 + $0x1f8] sm:$0xff]  }
 0x782   : > { %10144 = vmatprep.mubr.msk.bf16.mxu1 %vm15622_vm15, %v14255_v54  ;;  %10173 = vmatpush3.bf16.msra.mxu1 %v11122_v40  ;;  %vm15624_vm15 = vnez %v15517_v7  ;;  %v11126_v54 = vld [vmem:[#allocation7 + $0x1f0] sm:$0xff]   ;;  %v11417_v40 = vld [vmem:[%s11904_s16 + $0x80] sm:$0xff]  ;;  %v11418_v7 = vld [vmem:[%s11904_s16 + $0x88] sm:$0xff] }
 0x783   : > { %10174 = vmatprep.subr.bf16.mxu1 %v11123_v51  ;;  %10315 = vmatmul.mubr.f32.gmra.mrb[44].mxu0 %v11414_v10  ;;  %v15637_v10 = vld [vmem:[#allocation20_spill] sm:$0xff] }
 0x784   : > { %10317 = vmatprep.mubr.f32.mxu0 %v11415_v6  ;;  %v11130_v6 = vld [vmem:[#allocation7 + $0x210] sm:$0xff]  }
 0x786   : > { %10175 = vmatpush3.bf16.msra.mxu1 %v11123_v51  ;;  %v11430_v51 = vld [vmem:[%s11904_s16 + $0xe8] sm:$0xff] }
 0x787   : > { %10176 = vmatprep.subr.bf16.mxu1 %v11124_v23  ;;  %10318 = vmatmul.mubr.f32.gmra.mrb[46].mxu0 %v11416_v13  ;;  %v11131_v13 = vld [vmem:[#allocation7 + $0x218] sm:$0xff]  }
 0x788   : > { %10320 = vmatprep.mubr.f32.mxu0 %v11417_v40  ;;  %v15639_v40 = vld [vmem:[#allocation28_spill] sm:$0xff] }
 0x789   : > { %10145 = vmatmul.mubr.msk.bf16.gmra.mrb[24].mxu1 %vm15623_vm0, %v14271_v12  ;;  %vm15625_vm0 = vnez %v15522_v25  ;;  %v11128_v12 = vld [vmem:[#allocation7 + $0x200] sm:$0xff]  }
 0x78a   : > { %10148 = vmatprep.mubr.msk.bf16.mxu1 %vm15624_vm15, %v14273_v17  ;;  %10177 = vmatpush3.bf16.msra.mxu1 %v11124_v23  ;;  %vm15626_vm15 = vnez %v15524_v61  ;;  %v11419_v17 = vld [vmem:[%s11904_s16 + $0x90] sm:$0xff]  ;;  %v11421_v25 = vld [vmem:[%s11904_s16 + $0xa0] sm:$0xff]  ;;  %v11422_v61 = vld [vmem:[%s11904_s16 + $0xa8] sm:$0xff] }
 0x78b   : > { %10178 = vmatprep.subr.bf16.mxu1 %v11125_v19  ;;  %10321 = vmatmul.mubr.f32.gmra.mrb[48].mxu0 %v11418_v7  ;;  %v11133_v7 = vld [vmem:[#allocation7 + $0x228] sm:$0xff]  }
 0x78c   : > { %10323 = vmatprep.mubr.f32.mxu0 %v11419_v17  ;;  %v15640_v17 = vld [vmem:[#allocation30_spill] sm:$0xff] }
 0x78e   : > { %10179 = vmatpush3.bf16.msra.mxu1 %v11125_v19  ;;  %v11129_v19 = vld [vmem:[#allocation7 + $0x208] sm:$0xff]  }
 0x78f   : > { %10180 = vmatprep.subr.bf16.mxu1 %v11126_v54  ;;  %10324 = vmatmul.mubr.f32.gmra.mrb[50].mxu0 %v11420_v0  ;;  %v11134_v0 = vld [vmem:[#allocation7 + $0x230] sm:$0xff]  }
 0x790   : > { %10326 = vmatprep.mubr.f32.mxu0 %v11421_v25  ;;  %v11135_v25 = vld [vmem:[#allocation7 + $0x238] sm:$0xff]  }
 0x791   : > { %10149 = vmatmul.mubr.msk.bf16.gmra.mrb[28].mxu1 %vm15625_vm0, %v14289_v9  ;;  %v11423_v9 = vld [vmem:[%s11904_s16 + $0xb0] sm:$0xff]  ;;  %vm15653_vm0 = vnez %v15563_v49 }
 0x792   : > { %10152 = vmatprep.mubr.msk.bf16.mxu1 %vm15626_vm15, %v14291_v1  ;;  %10181 = vmatpush3.bf16.msra.mxu1 %v11126_v54  ;;  %v11424_v1 = vld [vmem:[%s11904_s16 + $0xb8] sm:$0xff]  ;;  %v15638_v54 = vld [vmem:[#allocation21_spill] sm:$0xff] }
 0x793   : > { %10182 = vmatprep.subr.bf16.mxu1 %v11127_v32  ;;  %10327 = vmatmul.mubr.f32.gmra.mrb[52].mxu0 %v11422_v61  ;;  %v15642_v61 = vld [vmem:[#allocation45_spill] sm:$0xff] }
 0x794   : > { %10329 = vmatprep.mubr.f32.mxu0 %v11423_v9  ;;  %v15644_v9 = vld [vmem:[#allocation69_spill] sm:$0xff] }
 0x796   : > { %10183 = vmatpush3.bf16.msra.mxu1 %v11127_v32  ;;  %v11132_v32 = vld [vmem:[#allocation7 + $0x220] sm:$0xff]  }
 0x797   : > { %10216 = vmatprep.subr.bf16.mxu1 %v11128_v12  ;;  %10330 = vmatmul.mubr.f32.gmra.mrb[54].mxu0 %v11424_v1  ;;  %v15645_v1 = vld [vmem:[#allocation40_spill] sm:$0xff] }
 0x798   : > { %10332 = vmatprep.mubr.f32.mxu0 %v11425_v11  ;;  %v15646_v11 = vmov 0.0|0.0  }
 0x799   : > { %10153 = vmatmul.mubr.msk.bf16.gmra.mrb[32].mxu1 %vm15585_vm9, %v14307_v44  ;;  %v11428_v44 = vld [vmem:[%s11904_s16 + $0xd8] sm:$0xff]  ;;  %vm15633_vm9 = vcmask 1040384  }
 0x79a   : > { %10156 = vmatprep.mubr.msk.bf16.mxu1 %vm15586_vm10, %v14309_v46  ;;  %v11429_v46 = vld [vmem:[%s11904_s16 + $0xe0] sm:$0xff]  ;;  %vm15635_vm10 = vnez %v15634_v16  ;;  %s11636_s16 = smov [#allocation10]  }
 0x79b   : > { %10333 = vmatmul.mubr.f32.gmra.mrb[56].mxu0 %v11426_v34  ;;  %s11551_s30 = sshll.u32 %s11636_s16, 4  ;;  %s11552_s30 = int_to_ptr.vmem [resolvable:$false] %s11551_s30 }
 0x79c   : > { %10335 = vmatprep.mubr.f32.mxu0 %v11427_v28  ;;  %p11554_p2 = scmp.lt.s32.totalorder %s14842_s26, %s11552_s30 }
 0x79f   : > { %10336 = vmatmul.mubr.f32.gmra.mrb[58].mxu0 %v11428_v44 }
 0x7a0   : > { %10338 = vmatprep.mubr.f32.mxu0 %v11429_v46 }
 0x7a1   : > { %10157 = vmatmul.mubr.msk.bf16.gmra.mrb[36].mxu1 %vm15587_vm14, %v14325_v4  ;;  %vm15651_vm14 = vnez %v15560_v30 }
 0x7a2   : > { %10160 = vmatprep.mubr.msk.bf16.mxu1 %vm15588_vm13, %v14327_v38  ;;  %v15631_v38 = vld [vmem:[#allocation17_spill] sm:$0xff] }
 0x7a3   : > { %10339 = vmatmul.mubr.f32.gmra.mrb[60].mxu0 %v11430_v51  ;;  %v15632_v5 = vrot.slane %v15631_v38, 7 }
 0x7a4   : > { %10341 = vmatprep.mubr.f32.mxu0 %v11431_v43  ;;  %v14707_v43 = vld [vmem:[%s15661_s24] ss:$0 sm:$0xff]  ;;  %s11553_s24 = scalar_lea.vmem %s11552_s30, 8192 }
 0x7a5   : > { %v6771_v23 = vsel %vm15633_vm9, %v15632_v5, %v15630_v45  ;;  %p11555_p1 = scmp.lt.s32.totalorder %s11553_s24, %s11547_s25 }
 0x7a6   : > { %v8845_v58 = vpack.c.bf16 %v15630_v45, %v6771_v23  ;;  %v14712_v45 = vld [vmem:[%s15662_s10] ss:$0 sm:$0xff] }
 0x7a7   : > { %10342 = vmatmul.mubr.f32.gmra.mrb[62].mxu0 %v11432_v57  ;;  %p11556_p4 = por %p11555_p1, %p11554_p2 }
 0x7a9   : > { %10161 = vmatmul.mubr.msk.bf16.gmra.mrb[40].mxu1 %vm15544_vm11, %v14344_v50  ;;  %v15636_v50 = vld [vmem:[#allocation41_spill] sm:$0xff]  ;;  %vm15652_vm11 = vnez %v15561_v60  ;;  %p11557_p9 = pnand %p11556_p4, %p11550_p12 }
 0x7aa   : > { %10164 = vmatprep.mubr.msk.bf16.mxu1 %vm15589_vm6, %v15628_v52  ;;  %vm15648_vm6 = vnez %v15556_v47 }
 0x7b1   : > { %10165 = vmatmul.mubr.msk.bf16.gmra.mrb[44].mxu1 %vm15635_vm10, %v8845_v58 }
 0x7b2   : > { %10184 = vmatprep.mubr.bf16.mxu1 %v15636_v50 }
 0x7b9   : > { %10185 = vmatmul.mubr.bf16.vlgmr.msra.gmra.mrb[16].mxu1 %v15637_v10 }
 0x7ba   : > { %10217 = vmatpush3.bf16.msra.mxu1 %v11128_v12  ;;  %10188 = vmatprep.mubr.bf16.mxu1 %v15638_v54  ;;  %v15641_v12 = vld [vmem:[#allocation31_spill] sm:$0xff] }
 0x7bb   : > { %10218 = vmatprep.subr.bf16.mxu1 %v11129_v19 }
 0x7be   : > { %10219 = vmatpush3.bf16.msra.mxu1 %v11129_v19 }
 0x7bf   : > { %10220 = vmatprep.subr.bf16.mxu1 %v11130_v6 }
 0x7c1   : > { %10189 = vmatmul.mubr.bf16.gmra.mrb[20].mxu1 %v15593_v26  ;;  %v15643_v26 = vld [vmem:[#allocation29_spill] sm:$0xff] }
 0x7c2   : > { %10192 = vmatprep.mubr.bf16.mxu1 %v15639_v40  ;;  %10221 = vmatpush3.bf16.msra.mxu1 %v11130_v6 }
 0x7c3   : > { %10222 = vmatprep.subr.bf16.mxu1 %v11131_v13 }
 0x7c6   : > { %10223 = vmatpush3.bf16.msra.mxu1 %v11131_v13 }
 0x7c7   : > { %10224 = vmatprep.subr.bf16.mxu1 %v11132_v32 }
 0x7c9   : > { %10193 = vmatmul.mubr.bf16.gmra.mrb[24].mxu1 %v15640_v17 }
 0x7ca   : > { %10196 = vmatprep.mubr.bf16.mxu1 %v15641_v12  ;;  %10225 = vmatpush3.bf16.msra.mxu1 %v11132_v32 }
 0x7cb   : > { %10226 = vmatprep.subr.bf16.mxu1 %v11133_v7 }
 0x7ce   : > { %10227 = vmatpush3.bf16.msra.mxu1 %v11133_v7 }
 0x7cf   : > { %10228 = vmatprep.subr.bf16.mxu1 %v11134_v0 }
 0x7d1   : > { %10197 = vmatmul.mubr.bf16.gmra.mrb[28].mxu1 %v15642_v61 }
 0x7d2   : > { %10200 = vmatprep.mubr.bf16.mxu1 %v15598_v31  ;;  %10229 = vmatpush3.bf16.msra.mxu1 %v11134_v0 }
 0x7d3   : > { %10230 = vmatprep.subr.bf16.mxu1 %v11135_v25 }
 0x7d6   : > { %10231 = vmatpush3.bf16.msra.mxu1 %v11135_v25 }
 0x7d9   : > { %10201 = vmatmul.mubr.bf16.gmra.mrb[32].mxu1 %v15643_v26 }
 0x7da   : > { %10204 = vmatprep.mubr.bf16.mxu1 %v15600_v36  ;;  %v15649_v36 = vld [vmem:[#allocation53_spill] sm:$0xff] }
 0x7db   : > { %vm15650_vm13 = vnez %v15649_v36 }
 0x7e1   : > { %10205 = vmatmul.mubr.bf16.gmra.mrb[36].mxu1 %v15601_v55 }
 0x7e2   : > { %10208 = vmatprep.mubr.bf16.mxu1 %v15602_v33 }
 0x7e9   : > { %10209 = vmatmul.mubr.bf16.gmra.mrb[40].mxu1 %v15644_v9 }
 0x7ea   : > { %10212 = vmatprep.mubr.bf16.mxu1 %v15645_v1 }
 0x7f1   : > { %10213 = vmatmul.mubr.bf16.gmra.mrb[44].mxu1 %v15646_v11 }
 0x7f2   : > { %10232 = vmatprep.mubr.msk.bf16.mxu1 %vm15555_vm5, %v14100_v41  ;;  %v15654_v41 = vld [vmem:[#allocation57_spill] sm:$0xff] }
 0x7f3   : > { %vm15655_vm5 = vnez %v15654_v41 }
 0x7f9   : > { %10233 = vmatmul.mubr.msk.bf16.vlgmr.msra.gmra.mrb[16].mxu1 %vm15648_vm6, %v14105_v37 }
 0x7fa   : > { %10236 = vmatprep.mubr.msk.bf16.mxu1 %vm15650_vm13, %v14110_v39 }
 0x801   : > { %10237 = vmatmul.mubr.msk.bf16.gmra.mrb[20].mxu1 %vm15651_vm14, %v14115_v14 }
 0x802   : > { %10240 = vmatprep.mubr.msk.bf16.mxu1 %vm15652_vm11, %v14126_v27 }
 0x809   : > { %10241 = vmatmul.mubr.msk.bf16.gmra.mrb[24].mxu1 %vm15653_vm0, %v14131_v20  ;;  %v15658_v20 = vld [vmem:[#allocation66_spill] sm:$0xff] }
 0x80a   : > { %10244 = vmatprep.mubr.msk.bf16.mxu1 %vm15655_vm5, %v14136_v24  ;;  %v15656_v24 = vld [vmem:[#allocation63_spill] sm:$0xff] }
 0x80b   : > { %vm15657_vm15 = vnez %v15656_v24 }
 0x811   : > { %10245 = vmatmul.mubr.msk.bf16.gmra.mrb[28].mxu1 %vm15608_vm3, %v14145_v2 }
 0x812   : > { %10248 = vmatprep.mubr.msk.bf16.mxu1 %vm15610_vm1, %v14150_v21  ;;  %vm15659_vm1 = vnez %v15658_v20 }
 0x819   : > { %10249 = vmatmul.mubr.msk.bf16.gmra.mrb[32].mxu1 %vm15612_vm2, %v14155_v56  ;;  %v15660_v56 = vld [vmem:[#allocation37_spill] sm:$0xff] }
 0x81a   : > { %10252 = vmatprep.mubr.msk.bf16.mxu1 %vm15570_vm7, %v14157_v29 }
 0x821   : > { %10253 = vmatmul.mubr.msk.bf16.gmra.mrb[36].mxu1 %vm15572_vm12, %v14171_v59 }
 0x822   : > { %10256 = vmatprep.mubr.msk.bf16.mxu1 %vm15657_vm15, %v14176_v62 }
 0x829   : > { %10257 = vmatmul.mubr.msk.bf16.gmra.mrb[40].mxu1 %vm15576_vm4, %v14185_v15 }
 0x82a   : > { %10260 = vmatprep.mubr.msk.bf16.mxu1 %vm15659_vm1, %v15615_v35 }
 0x831   : > { %10261 = vmatmul.mubr.msk.bf16.gmra.mrb[44].mxu1 %vm15580_vm8, %v15660_v56 }
 0x834   : > { %v10298_v29 = vpop.f32.mrb[32].mxu0 }
 0x835   : > { %v7763_v39 = vpop.f32.mrb[33].mxu0  ;;  %v7769_v13 = vadd.f32 %v10298_v29, %v14707_v43 }
 0x836   : > { %v7764_v16 = vadd.f32 %v14707_v43, %v7763_v39 }
 0x838   : > { %v10301_v37 = vpop.f32.mrb[34].mxu0 }
 0x839   : > { %v7773_v14 = vpop.f32.mrb[35].mxu0  ;;  %v7779_v23 = vadd.f32 %v10301_v37, %v14707_v43 }
 0x83a   : > { %v7774_v38 = vadd.f32 %v14707_v43, %v7773_v14 }
 0x83c   : > { %v10304_v27 = vpop.f32.mrb[36].mxu0 }
 0x83d   : > { %v7783_v2 = vpop.f32.mrb[37].mxu0  ;;  %v7789_v24 = vadd.f32 %v10304_v27, %v14707_v43 }
 0x83e   : > { %v7784_v9 = vadd.f32 %v14707_v43, %v7783_v2 }
 0x840   : > { %v10307_v21 = vpop.f32.mrb[38].mxu0 }
 0x841   : > { %v7793_v62 = vpop.f32.mrb[39].mxu0  ;;  %v7799_v25 = vadd.f32 %v10307_v21, %v14707_v43 }
 0x842   : > { %v7794_v12 = vadd.f32 %v14707_v43, %v7793_v62 }
 0x846   : > { %v14656_v59 = vpop.f32.mrb[40].mxu0 }
 0x847   : > { %v14658_v47 = vpop.f32.mrb[41].mxu0 }
 0x848   : > { %v7804_v62 = vadd.f32 %v14707_v43, %v14658_v47 }
 0x84f   : > { %v14660_v15 = vpop.f32.mrb[42].mxu0 }
 0x850   : > { %v14662_v30 = vpop.f32.mrb[43].mxu0  ;;  %v7819_v2 = vadd.f32 %v14660_v15, %v14707_v43 }
 0x851   : > { %v7814_v37 = vadd.f32 %v14707_v43, %v14662_v30 }
 0x856   : > { %v14664_v60 = vpop.f32.mrb[44].mxu0 }
 0x857   : > { %v14666_v49 = vpop.f32.mrb[45].mxu0 }
 0x85a   : > { %v14668_v18 = vpop.f32.mrb[46].mxu0 }
 0x85b   : > { %v14670_v35 = vpop.f32.mrb[47].mxu0 }
 0x85c   : > { %v7834_v47 = vadd.f32 %v14707_v43, %v14670_v35 }
 0x85e   : > { %v14672_v53 = vpop.f32.mrb[48].mxu0 }
 0x85f   : > { %v14674_v3 = vpop.f32.mrb[49].mxu0 }
 0x862   : > { %v14676_v31 = vpop.f32.mrb[50].mxu0 }
 0x863   : > { %v14678_v55 = vpop.f32.mrb[51].mxu0 }
 0x866   : > { %v14680_v33 = vpop.f32.mrb[52].mxu0 }
 0x867   : > { %v14682_v63 = vpop.f32.mrb[53].mxu0 }
 0x86a   : > { %v14684_v22 = vpop.f32.mrb[54].mxu0 }
 0x86b   : > { %v14686_v42 = vpop.f32.mrb[55].mxu0 }
 0x86e   : > { %v14688_v8 = vpop.f32.mrb[56].mxu0 }
 0x86f   : > { %v14690_v28 = vpop.f32.mrb[57].mxu0 }
 0x872   : > { %v14692_v44 = vpop.f32.mrb[58].mxu0 }
 0x873   : > { %v14694_v46 = vpop.f32.mrb[59].mxu0 }
 0x876   : > { %v14696_v48 = vpop.f32.mrb[60].mxu0 }
 0x877   : > { %v14698_v51 = vpop.f32.mrb[61].mxu0 }
 0x87a   : > { %v14700_v52 = vpop.f32.mrb[62].mxu0 }
 0x87b   : > { %v14702_v4 = vpop.f32.mrb[63].mxu0 }
 0x8cc   : > { %v10234_v5 = vpop.f32.mrb[16].mxu1 }
 0x8cd   : > { %v7644_v57 = vadd.f32 %v10234_v5, %v14712_v45  ;;  %v7477_v58 = vpop.f32.mrb[17].mxu1 }
 0x8ce   : > { %v7642_v50 = vadd.f32 %v14712_v45, %v7477_v58  ;;  %v10235_v19 = vpop.f32.mrb[18].mxu1  ;;  %v7809_v58 = vadd.f32 %v14656_v59, %v14707_v43 }
 0x8cf   : > { %v7924_v10 = vadd.f32 %v7774_v38, %v7644_v57  ;;  %v7645_v54 = vadd.f32 %v10235_v19, %v14712_v45  ;;  %v7480_v6 = vpop.f32.mrb[19].mxu1 }
 0x8d0   : > { %v7922_v40 = vadd.f32 %v7764_v16, %v7642_v50  ;;  %v7643_v32 = vadd.f32 %v14712_v45, %v7480_v6 }
 0x8d1   : > { %7956 = vst [vmem:[%s14724_s22 + $0x10] sm:$0xff] %v7924_v10  ;;  %v7925_v7 = vadd.f32 %v7779_v23, %v7645_v54  ;;  %v7839_v54 = vadd.f32 %v14668_v18, %v14707_v43 }
 0x8d2   : > { %7954 = vst [vmem:[%s14724_s22] sm:$0xff] %v7922_v40  ;;  %v7923_v17 = vadd.f32 %v7769_v13, %v7643_v32  ;;  %v7824_v13 = vadd.f32 %v14707_v43, %v14666_v49  ;;  %v7854_v49 = vadd.f32 %v14707_v43, %v14678_v55 }
 0x8d3   : > { %7957 = vst [vmem:[%s14724_s22 + $0x18] sm:$0xff] %v7925_v7 }
 0x8d4   : > { %7955 = vst [vmem:[%s14724_s22 + $0x8] sm:$0xff] %v7923_v17  ;;  %v10238_v0 = vpop.f32.mrb[20].mxu1 }
 0x8d5   : > { %v7648_v61 = vadd.f32 %v10238_v0, %v14712_v45  ;;  %v7493_v26 = vpop.f32.mrb[21].mxu1 }
 0x8d6   : > { %v7646_v1 = vadd.f32 %v14712_v45, %v7493_v26  ;;  %v10239_v11 = vpop.f32.mrb[22].mxu1 }
 0x8d7   : > { %v7928_v34 = vadd.f32 %v7794_v12, %v7648_v61  ;;  %v7649_v36 = vadd.f32 %v10239_v11, %v14712_v45  ;;  %v7496_v41 = vpop.f32.mrb[23].mxu1  ;;  %v7829_v12 = vadd.f32 %v14664_v60, %v14707_v43  ;;  %v7844_v11 = vadd.f32 %v14707_v43, %v14674_v3 }
 0x8d8   : > { %v7926_v20 = vadd.f32 %v7784_v9, %v7646_v1  ;;  %v7647_v56 = vadd.f32 %v14712_v45, %v7496_v41  ;;  %v7859_v9 = vadd.f32 %v14676_v31, %v14707_v43  ;;  %v7874_v3 = vadd.f32 %v14707_v43, %v14686_v42 }
 0x8d9   : > { %7960 = vst [vmem:[%s14724_s22 + $0x30] sm:$0xff] %v7928_v34  ;;  %v7929_v29 = vadd.f32 %v7799_v25, %v7649_v36 }
 0x8da   : > { %7958 = vst [vmem:[%s14724_s22 + $0x20] sm:$0xff] %v7926_v20  ;;  %v7927_v39 = vadd.f32 %v7789_v24, %v7647_v56  ;;  %v7849_v20 = vadd.f32 %v14672_v53, %v14707_v43 }
 0x8db   : > { %7961 = vst [vmem:[%s14724_s22 + $0x38] sm:$0xff] %v7929_v29 }
 0x8dc   : > { %7959 = vst [vmem:[%s14724_s22 + $0x28] sm:$0xff] %v7927_v39  ;;  %v10242_v14 = vpop.f32.mrb[24].mxu1 }
 0x8dd   : > { %v7652_v27 = vadd.f32 %v10242_v14, %v14712_v45  ;;  %v7509_v21 = vpop.f32.mrb[25].mxu1  ;;  %v7879_v14 = vadd.f32 %v14684_v22, %v14707_v43 }
 0x8de   : > { %v7650_v38 = vadd.f32 %v14712_v45, %v7509_v21  ;;  %v10243_v5 = vpop.f32.mrb[26].mxu1 }
 0x8df   : > { %v7932_v23 = vadd.f32 %v7814_v37, %v7652_v27  ;;  %v7653_v30 = vadd.f32 %v10243_v5, %v14712_v45  ;;  %v7512_v57 = vpop.f32.mrb[27].mxu1  ;;  %v7864_v27 = vadd.f32 %v14707_v43, %v14682_v63  ;;  %v7894_v63 = vadd.f32 %v14707_v43, %v14694_v46 }
 0x8e0   : > { %v7930_v16 = vadd.f32 %v7804_v62, %v7650_v38  ;;  %v7651_v15 = vadd.f32 %v14712_v45, %v7512_v57 }
 0x8e1   : > { %7964 = vst [vmem:[%s14724_s22 + $0x50] sm:$0xff] %v7932_v23  ;;  %v7933_v50 = vadd.f32 %v7819_v2, %v7653_v30  ;;  %v7869_v23 = vadd.f32 %v14680_v33, %v14707_v43 }
 0x8e2   : > { %7962 = vst [vmem:[%s14724_s22 + $0x40] sm:$0xff] %v7930_v16  ;;  %v7931_v19 = vadd.f32 %v7809_v58, %v7651_v15  ;;  %v7899_v15 = vadd.f32 %v14692_v44, %v14707_v43 }
 0x8e3   : > { %7965 = vst [vmem:[%s14724_s22 + $0x58] sm:$0xff] %v7933_v50 }
 0x8e4   : > { %7963 = vst [vmem:[%s14724_s22 + $0x48] sm:$0xff] %v7931_v19  ;;  %v10246_v10 = vpop.f32.mrb[28].mxu1  ;;  %v7884_v19 = vadd.f32 %v14707_v43, %v14690_v28  ;;  %v7914_v28 = vadd.f32 %v14707_v43, %v14702_v4 }
 0x8e5   : > { %v7656_v59 = vadd.f32 %v10246_v10, %v14712_v45  ;;  %v7525_v6 = vpop.f32.mrb[29].mxu1 }
 0x8e6   : > { %v7654_v40 = vadd.f32 %v14712_v45, %v7525_v6  ;;  %v10247_v32 = vpop.f32.mrb[30].mxu1  ;;  %v7889_v6 = vadd.f32 %v14688_v8, %v14707_v43 }
 0x8e7   : > { %v7936_v7 = vadd.f32 %v7834_v47, %v7656_v59  ;;  %v7657_v35 = vadd.f32 %v10247_v32, %v14712_v45  ;;  %v7528_v17 = vpop.f32.mrb[31].mxu1 }
 0x8e8   : > { %v7934_v0 = vadd.f32 %v7824_v13, %v7654_v40  ;;  %v7655_v18 = vadd.f32 %v14712_v45, %v7528_v17 }
 0x8e9   : > { %7968 = vst [vmem:[%s14724_s22 + $0x70] sm:$0xff] %v7936_v7  ;;  %v7937_v25 = vadd.f32 %v7839_v54, %v7657_v35  ;;  %v7919_v35 = vadd.f32 %v14700_v52, %v14707_v43 }
 0x8ea   : > { %7966 = vst [vmem:[%s14724_s22 + $0x60] sm:$0xff] %v7934_v0  ;;  %v7935_v61 = vadd.f32 %v7829_v12, %v7655_v18  ;;  %v7904_v12 = vadd.f32 %v14707_v43, %v14698_v51 }
 0x8eb   : > { %7969 = vst [vmem:[%s14724_s22 + $0x78] sm:$0xff] %v7937_v25 }
 0x8ec   : > { %7967 = vst [vmem:[%s14724_s22 + $0x68] sm:$0xff] %v7935_v61  ;;  %v10250_v26 = vpop.f32.mrb[32].mxu1  ;;  %v7909_v61 = vadd.f32 %v14696_v48, %v14707_v43 }
 0x8ed   : > { %v7660_v60 = vadd.f32 %v10250_v26, %v14712_v45  ;;  %v7541_v1 = vpop.f32.mrb[33].mxu1 }
 0x8ee   : > { %v7658_v34 = vadd.f32 %v14712_v45, %v7541_v1  ;;  %v10251_v36 = vpop.f32.mrb[34].mxu1 }
 0x8ef   : > { %v7940_v41 = vadd.f32 %v7854_v49, %v7660_v60  ;;  %v7661_v55 = vadd.f32 %v10251_v36, %v14712_v45  ;;  %v7544_v24 = vpop.f32.mrb[35].mxu1 }
 0x8f0   : > { %v7938_v56 = vadd.f32 %v7844_v11, %v7658_v34  ;;  %v7659_v31 = vadd.f32 %v14712_v45, %v7544_v24 }
 0x8f1   : > { %7972 = vst [vmem:[%s14724_s22 + $0x90] sm:$0xff] %v7940_v41  ;;  %v7941_v29 = vadd.f32 %v7859_v9, %v7661_v55 }
 0x8f2   : > { %7970 = vst [vmem:[%s14724_s22 + $0x80] sm:$0xff] %v7938_v56  ;;  %v7939_v39 = vadd.f32 %v7849_v20, %v7659_v31 }
 0x8f3   : > { %7973 = vst [vmem:[%s14724_s22 + $0x98] sm:$0xff] %v7941_v29 }
 0x8f4   : > { %7971 = vst [vmem:[%s14724_s22 + $0x88] sm:$0xff] %v7939_v39  ;;  %v10254_v37 = vpop.f32.mrb[36].mxu1 }
 0x8f5   : > { %v7664_v53 = vadd.f32 %v10254_v37, %v14712_v45  ;;  %v7557_v2 = vpop.f32.mrb[37].mxu1 }
 0x8f6   : > { %v7662_v21 = vadd.f32 %v14712_v45, %v7557_v2  ;;  %v10255_v62 = vpop.f32.mrb[38].mxu1 }
 0x8f7   : > { %v7944_v38 = vadd.f32 %v7874_v3, %v7664_v53  ;;  %v7665_v42 = vadd.f32 %v10255_v62, %v14712_v45  ;;  %v7560_v5 = vpop.f32.mrb[39].mxu1 }
 0x8f8   : > { %v7942_v30 = vadd.f32 %v7864_v27, %v7662_v21  ;;  %v7663_v22 = vadd.f32 %v14712_v45, %v7560_v5 }
 0x8f9   : > { %7976 = vst [vmem:[%s14724_s22 + $0xb0] sm:$0xff] %v7944_v38  ;;  %v7945_v57 = vadd.f32 %v7879_v14, %v7665_v42 }
 0x8fa   : > { %7974 = vst [vmem:[%s14724_s22 + $0xa0] sm:$0xff] %v7942_v30  ;;  %v7943_v58 = vadd.f32 %v7869_v23, %v7663_v22 }
 0x8fb   : > { %7977 = vst [vmem:[%s14724_s22 + $0xb8] sm:$0xff] %v7945_v57 }
 0x8fc   : > { %7975 = vst [vmem:[%s14724_s22 + $0xa8] sm:$0xff] %v7943_v58  ;;  %v10258_v16 = vpop.f32.mrb[40].mxu1 }
 0x8fd   : > { %v7668_v33 = vadd.f32 %v10258_v16, %v14712_v45  ;;  %v7573_v50 = vpop.f32.mrb[41].mxu1 }
 0x8fe   : > { %v7666_v47 = vadd.f32 %v14712_v45, %v7573_v50  ;;  %v10259_v10 = vpop.f32.mrb[42].mxu1 }
 0x8ff   : > { %v7948_v54 = vadd.f32 %v7894_v63, %v7668_v33  ;;  %v7669_v46 = vadd.f32 %v10259_v10, %v14712_v45  ;;  %v7576_v59 = vpop.f32.mrb[43].mxu1 }
 0x900   : > { %v7946_v13 = vadd.f32 %v7884_v19, %v7666_v47  ;;  %v7667_v44 = vadd.f32 %v14712_v45, %v7576_v59 }
 0x901   : > { %7980 = vst [vmem:[%s14724_s22 + $0xd0] sm:$0xff] %v7948_v54  ;;  %v7949_v40 = vadd.f32 %v7899_v15, %v7669_v46 }
 0x902   : > { %7978 = vst [vmem:[%s14724_s22 + $0xc0] sm:$0xff] %v7946_v13  ;;  %v7947_v32 = vadd.f32 %v7889_v6, %v7667_v44 }
 0x903   : > { %7981 = vst [vmem:[%s14724_s22 + $0xd8] sm:$0xff] %v7949_v40 }
 0x904   : > { %7979 = vst [vmem:[%s14724_s22 + $0xc8] sm:$0xff] %v7947_v32  ;;  %v10262_v7 = vpop.f32.mrb[44].mxu1 }
 0x905   : > { %v7672_v8 = vadd.f32 %v10262_v7, %v14712_v45  ;;  %v7589_v17 = vpop.f32.mrb[45].mxu1 }
 0x906   : > { %v7670_v0 = vadd.f32 %v14712_v45, %v7589_v17  ;;  %v10263_v18 = vpop.f32.mrb[46].mxu1 }
 0x907   : > { %v7952_v4 = vadd.f32 %v7914_v28, %v7672_v8  ;;  %v7673_v25 = vadd.f32 %v10263_v18, %v14712_v45  ;;  %v7592_v52 = vpop.f32.mrb[47].mxu1 }
 0x908   : > { %v7950_v49 = vadd.f32 %v7904_v12, %v7670_v0  ;;  %v7671_v26 = vadd.f32 %v14712_v45, %v7592_v52 }
 0x909   : > { %7984 = vst [vmem:[%s14724_s22 + $0xf0] sm:$0xff] %v7952_v4  ;;  %v7953_v51 = vadd.f32 %v7919_v35, %v7673_v25 }
 0x90a   : > { %7982 = vst [vmem:[%s14724_s22 + $0xe0] sm:$0xff] %v7950_v49  ;;  %v7951_v9 = vadd.f32 %v7909_v61, %v7671_v26 }
 0x90b   : > { %7985 = vst [vmem:[%s14724_s22 + $0xf8] sm:$0xff] %v7953_v51 }
 0x90c   : > { %7983 = vst [vmem:[%s14724_s22 + $0xe8] sm:$0xff] %v7951_v9 }
 0x90d   : > { %11560 = shalt.err (!%p11557_p9)
}
 0x90e   : > { %s11561_s14 = scalar_lea.hbm %s14840_s23, 4096  ;;  %s11565_s22 = scalar_lea.hbm %s15663_s27, 8192 }
 0x90f   : > { %p11562_p0 = scmp.ne.s32.totalorder %s14840_s23, %s11561_s14  ;;  %p11566_p13 = scmp.lt.u32.totalorder %s14840_s23, %s15663_s27 }
 0x910   : > { %p11567_p6 = scmp.lt.u32.totalorder %s11565_s22, %s11561_s14  ;;  %p11569_p3 = scmp.lt.u32.totalorder %s11561_s14, %s14840_s23 }
 0x911   : > { %p11563_p11 = pnand %p11562_p0, %p11847_p5 }
 0x912   : > { %p11568_p10 = por %p11567_p6, %p11566_p13 }
 0x913   : > { %p11564_p8 = pneg %p11563_p11 }
 0x914   : > { %p11570_p7 = por %p11569_p3, %p11568_p10 }
 0x916   : > { %p11571_p12 = pnand %p11570_p7, %p11564_p8 }
 0x918   : > { %11574 = shalt.err (!%p11571_p12)
}
 0x919   : > { %s11637_s12 = smov 128   ;;  %s11638_s25 = smov 8  }
 0x91a   : > { %10918 = dma.vmem_to_hbm [thread:$0]  (%p11847_p5), %s14842_s26, 4096, %s14840_s23, %s7987_s21, %s11637_s12, %s11637_s12, %s11638_s25  }
 0x91b PF: > { %s15664_s16 = sld [smem:[#allocation15_spill]]  ;;  %s15665_s30 = sld [smem:[#allocation16_spill]] }
 0x91c   : > { %p15667_p1 = scmp.ge.s32.totalorder %s11621_s20, 2 }
 0x921   : > { %s8015_s24 = sand.u32 1, %s15664_s16   ;;  %p15666_p2 = scmp.ne.s32.totalorder %s15665_s30, 0 }
 0x922   : > { %s8016_s14 = scalar_lea.sflag [#allocation4], %s8015_s24 }
 0x923   : > { %p10935_p4 = pnand %p15667_p1, %p15666_p2 }
 0x925   : > { %11604 = dma.done.wait (!%p10935_p4), %s8016_s14, 4096  }
 0x926   : > { %11606 = vsyncadd (!%p10935_p4), %s8016_s14, 4294963200  ;;  %s15668_s15 = smov %s11843_s17  ;;  %p26_p9 = scmp.ge.s32.totalorder %s11833_s8, 4  }
 0x927   : > { %s15669_s17 = smov %s11613_s18  ;;  %s15670_s18 = smov %s11617_s19 }
 0x928   : > { %s15671_s19 = smov %s15668_s15  ;;  %s15672_s20 = smov %s11833_s8 }
 0x929   :  { %28 = sbr.rel (!%p26_p9) target bundleno = 11 (0xb), region = 124 }
 0x930   :  { %8021 = vsyncpa [#allocation3], 1 }
 0x931   :  { %8023 = vsyncpa [#allocation3 + $0x1], 1 }
 0x932   :  { %8024 = vsyncpa [#allocation6], 1 }
 0x933   :  { %8025 = vsyncpa [#allocation9], 1 }
 0x934   :  { %8026 = vsyncpa [#allocation4], 1 }
 0x935   :  { %8028 = vsyncpa [#allocation4 + $0x1], 1 }

</bundles_post_ra>
